<compile_context>
chip_gen: v5e
topology: v5e:2x2
jax: 0.10.0
libtpu: 0.0.40
codegen_flags: <defaults>
</compile_context>

<pallas_src>
import jax
import jax.numpy as jnp
from jax.experimental import pallas as pl
from jax.experimental.pallas import tpu as pltpu  # noqa: F401  (TPU backend)

NJOINTS = 21
HIDDEN = [256, 512, 1024, 1024, 512, 256]
IN_NEURONS = 3 * NJOINTS          # 63
IN_PADDED = 64                    # zero-padded feature dim for lane alignment
OUT_NEURONS = 16 * 4              # 64
BN_EPS = 1e-5
QUAT_EPS = 1e-12                  # F.normalize / kornia default


def iknet_kernel(x_ref,
                 w0, b0, w1, b1, w2, b2, w3, b3, w4, b4, w5, b5, w6, b6,
                 g_ref, quat_ref):
    """Full MLP chain + quaternion normalization, single VMEM-resident tile."""
    h = x_ref[...]                                           # bf16 (B, 64)
    for w_r, b_r in ((w0, b0), (w1, b1), (w2, b2), (w3, b3), (w4, b4), (w5, b5)):
        acc = jnp.dot(h, w_r[...], preferred_element_type=jnp.float32)
        acc = acc + b_r[...]                                 # f32 bias (BN folded)
        h = jnp.maximum(acc, 0.0).astype(jnp.bfloat16)       # ReLU, back to bf16
    q = jnp.dot(h, w6[...], preferred_element_type=jnp.float32) + b6[...]  # (B, 64) f32

    # Per-quaternion squared norm, broadcast to all 4 lanes of each group via
    # a constant 0/1 block-diagonal matrix (segmented sum on the MXU).
    norm_sq = jnp.dot(q * q, g_ref[...], preferred_element_type=jnp.float32)
    # q / max(||q||, eps)  ==  q * rsqrt(max(||q||^2, eps^2))
    inv_norm = jax.lax.rsqrt(jnp.maximum(norm_sq, QUAT_EPS * QUAT_EPS))
    quat_ref[...] = q * inv_norm


def quaternion_to_angle_axis(quat):
    """kornia.quaternion_to_angle_axis, (w, x, y, z) convention.  JAX glue."""
    q1, q2, q3 = quat[..., 1], quat[..., 2], quat[..., 3]
    sin_sq = q1 * q1 + q2 * q2 + q3 * q3
    sin_t = jnp.sqrt(sin_sq)
    cos_t = quat[..., 0]
    two_theta = 2.0 * jnp.where(cos_t < 0.0,
                                jnp.arctan2(-sin_t, -cos_t),
                                jnp.arctan2(sin_t, cos_t))
    # NOTE: k_pos is inf/nan when sin_t == 0; masked by the where below
    # (matches kornia's forward); do not differentiate through this glue.
    k_pos = two_theta / sin_t
    k_neg = 2.0 * jnp.ones_like(sin_t)
    k = jnp.where(sin_sq > 0.0, k_pos, k_neg)
    return jnp.stack([q1 * k, q2 * k, q3 * k], axis=-1)


def init_params(key):
    """Deterministic synthetic parameters (PyTorch-style init, BN folded).

    Weights are stored in bf16 (MXU-native input dtype), biases in f32.
    """
    dims = [IN_NEURONS] + HIDDEN + [OUT_NEURONS]
    weights, biases = [], []
    for i, (fan_in, fan_out) in enumerate(zip(dims[:-1], dims[1:])):
        key, k1, k2, k3, k4, k5, k6 = jax.random.split(key, 7)
        bound = 1.0 / float(fan_in) ** 0.5
        w = jax.random.uniform(k1, (fan_in, fan_out), jnp.float32, -bound, bound)
        b = jax.random.uniform(k2, (fan_out,), jnp.float32, -bound, bound)
        if i < len(HIDDEN):  # layer is followed by BatchNorm1d (inference mode)
            gamma = 1.0 + 0.1 * jax.random.normal(k3, (fan_out,), jnp.float32)
            beta = 0.1 * jax.random.normal(k4, (fan_out,), jnp.float32)
            rmean = 0.1 * jax.random.normal(k5, (fan_out,), jnp.float32)
            rvar = 1.0 + 0.1 * jax.random.uniform(k6, (fan_out,), jnp.float32)
            scale = gamma / jnp.sqrt(rvar + BN_EPS)
            w = w * scale[None, :]
            b = (b - rmean) * scale + beta
        if i == 0:  # pad input features 63 -> 64 (zero rows do not change result)
            w = jnp.pad(w, ((0, IN_PADDED - IN_NEURONS), (0, 0)))
        weights.append(w.astype(jnp.bfloat16))
        biases.append(b.reshape(1, fan_out).astype(jnp.float32))
    return weights, biases


def iknet_forward(joints, weights, biases):
    B = joints.shape[0]
    x = joints.reshape(B, IN_NEURONS).astype(jnp.float32)
    x = jnp.pad(x, ((0, 0), (0, IN_PADDED - IN_NEURONS))).astype(jnp.bfloat16)

    # 0/1 group matrix: G[i, j] = 1 iff i//4 == j//4  (per-quaternion sum bcast)
    g = jnp.kron(jnp.eye(16, dtype=jnp.float32), jnp.ones((4, 4), jnp.float32))

    args = [x]
    for w, b in zip(weights, biases):
        args += [w, b]
    args.append(g)

    # No grid: every operand lives in VMEM once (single-buffered), no pipeline.
    quat_flat = pl.pallas_call(
        iknet_kernel,
        out_shape=jax.ShapeDtypeStruct((B, OUT_NEURONS), jnp.float32),
    )(*args)

    quat = quat_flat.reshape(B, 16, 4)                          # pred_mano_quat
    so3 = quaternion_to_angle_axis(quat).reshape(B, 1, 16 * 3)  # pred_mano_pose
    return {"pred_mano_pose": so3, "pred_mano_quat": quat}


if __name__ == "__main__":
    key = jax.random.PRNGKey(0)
    kp, kx = jax.random.split(key)
    weights, biases = init_params(kp)

    B = 8
    joints = jax.random.normal(kx, (B, NJOINTS, 3), jnp.float32)

    out = iknet_forward(joints, weights, biases)
    out = jax.block_until_ready(out)

    assert out["pred_mano_quat"].shape == (B, 16, 4)
    assert out["pred_mano_pose"].shape == (B, 1, 48)
    # quaternions are unit-norm after in-kernel normalization (f32)
    norms = jnp.linalg.norm(out["pred_mano_quat"], axis=-1)
    assert bool(jnp.all(jnp.abs(norms - 1.0) < 1e-4))
    print("KERNEL_OK")
</pallas_src>

<mosaic_0001>
module attributes {stable_mosaic.version = 11 : i64} {
  func.func @iknet_kernel(%arg0: memref<8x64xbf16, #tpu.memory_space<vmem>>, %arg1: memref<64x256xbf16, #tpu.memory_space<vmem>>, %arg2: memref<1x256xf32, #tpu.memory_space<vmem>>, %arg3: memref<256x512xbf16, #tpu.memory_space<vmem>>, %arg4: memref<1x512xf32, #tpu.memory_space<vmem>>, %arg5: memref<512x1024xbf16, #tpu.memory_space<vmem>>, %arg6: memref<1x1024xf32, #tpu.memory_space<vmem>>, %arg7: memref<1024x1024xbf16, #tpu.memory_space<vmem>>, %arg8: memref<1x1024xf32, #tpu.memory_space<vmem>>, %arg9: memref<1024x512xbf16, #tpu.memory_space<vmem>>, %arg10: memref<1x512xf32, #tpu.memory_space<vmem>>, %arg11: memref<512x256xbf16, #tpu.memory_space<vmem>>, %arg12: memref<1x256xf32, #tpu.memory_space<vmem>>, %arg13: memref<256x64xbf16, #tpu.memory_space<vmem>>, %arg14: memref<1x64xf32, #tpu.memory_space<vmem>>, %arg15: memref<64x64xf32, #tpu.memory_space<vmem>>, %arg16: memref<8x64xf32, #tpu.memory_space<vmem>>) attributes {dimension_semantics = [], scalar_prefetch = 0 : i64, scratch_operands = 0 : i64, tpu.core_type = #tpu.core_type<tc>} {
    %c0 = arith.constant 0 : index
    %c0_0 = arith.constant 0 : index
    %0 = vector.load %arg0[%c0, %c0_0] : memref<8x64xbf16, #tpu.memory_space<vmem>>, vector<8x64xbf16>
    %c0_1 = arith.constant 0 : index
    %c0_2 = arith.constant 0 : index
    %1 = vector.load %arg1[%c0_1, %c0_2] : memref<64x256xbf16, #tpu.memory_space<vmem>>, vector<64x256xbf16>
    %cst = arith.constant dense<0.000000e+00> : vector<8x256xf32>
    %2 = tpu.matmul %0, %1, %cst {dimension_numbers = #tpu.dot_dimension_numbers<[1], [0], [0], [1], [0, 0, 1, 1], [], []>} : vector<8x64xbf16>, vector<64x256xbf16>, vector<8x256xf32> -> vector<8x256xf32>
    %c0_3 = arith.constant 0 : index
    %c0_4 = arith.constant 0 : index
    %3 = vector.load %arg2[%c0_3, %c0_4] : memref<1x256xf32, #tpu.memory_space<vmem>>, vector<1x256xf32>
    %4 = vector.broadcast %3 : vector<1x256xf32> to vector<8x256xf32>
    %5 = arith.addf %2, %4 : vector<8x256xf32>
    %cst_5 = arith.constant 0.000000e+00 : f32
    %6 = vector.broadcast %cst_5 : f32 to vector<8x256xf32>
    %7 = arith.maximumf %5, %6 : vector<8x256xf32>
    %8 = arith.truncf %7 : vector<8x256xf32> to vector<8x256xbf16>
    %c0_6 = arith.constant 0 : index
    %c0_7 = arith.constant 0 : index
    %9 = vector.load %arg3[%c0_6, %c0_7] : memref<256x512xbf16, #tpu.memory_space<vmem>>, vector<256x512xbf16>
    %cst_8 = arith.constant dense<0.000000e+00> : vector<8x512xf32>
    %10 = tpu.matmul %8, %9, %cst_8 {dimension_numbers = #tpu.dot_dimension_numbers<[1], [0], [0], [1], [0, 0, 1, 1], [], []>} : vector<8x256xbf16>, vector<256x512xbf16>, vector<8x512xf32> -> vector<8x512xf32>
    %c0_9 = arith.constant 0 : index
    %c0_10 = arith.constant 0 : index
    %11 = vector.load %arg4[%c0_9, %c0_10] : memref<1x512xf32, #tpu.memory_space<vmem>>, vector<1x512xf32>
    %12 = vector.broadcast %11 : vector<1x512xf32> to vector<8x512xf32>
    %13 = arith.addf %10, %12 : vector<8x512xf32>
    %cst_11 = arith.constant 0.000000e+00 : f32
    %14 = vector.broadcast %cst_11 : f32 to vector<8x512xf32>
    %15 = arith.maximumf %13, %14 : vector<8x512xf32>
    %16 = arith.truncf %15 : vector<8x512xf32> to vector<8x512xbf16>
    %c0_12 = arith.constant 0 : index
    %c0_13 = arith.constant 0 : index
    %17 = vector.load %arg5[%c0_12, %c0_13] : memref<512x1024xbf16, #tpu.memory_space<vmem>>, vector<512x1024xbf16>
    %cst_14 = arith.constant dense<0.000000e+00> : vector<8x1024xf32>
    %18 = tpu.matmul %16, %17, %cst_14 {dimension_numbers = #tpu.dot_dimension_numbers<[1], [0], [0], [1], [0, 0, 1, 1], [], []>} : vector<8x512xbf16>, vector<512x1024xbf16>, vector<8x1024xf32> -> vector<8x1024xf32>
    %c0_15 = arith.constant 0 : index
    %c0_16 = arith.constant 0 : index
    %19 = vector.load %arg6[%c0_15, %c0_16] : memref<1x1024xf32, #tpu.memory_space<vmem>>, vector<1x1024xf32>
    %20 = vector.broadcast %19 : vector<1x1024xf32> to vector<8x1024xf32>
    %21 = arith.addf %18, %20 : vector<8x1024xf32>
    %cst_17 = arith.constant 0.000000e+00 : f32
    %22 = vector.broadcast %cst_17 : f32 to vector<8x1024xf32>
    %23 = arith.maximumf %21, %22 : vector<8x1024xf32>
    %24 = arith.truncf %23 : vector<8x1024xf32> to vector<8x1024xbf16>
    %c0_18 = arith.constant 0 : index
    %c0_19 = arith.constant 0 : index
    %25 = vector.load %arg7[%c0_18, %c0_19] : memref<1024x1024xbf16, #tpu.memory_space<vmem>>, vector<1024x1024xbf16>
    %cst_20 = arith.constant dense<0.000000e+00> : vector<8x1024xf32>
    %26 = tpu.matmul %24, %25, %cst_20 {dimension_numbers = #tpu.dot_dimension_numbers<[1], [0], [0], [1], [0, 0, 1, 1], [], []>} : vector<8x1024xbf16>, vector<1024x1024xbf16>, vector<8x1024xf32> -> vector<8x1024xf32>
    %c0_21 = arith.constant 0 : index
    %c0_22 = arith.constant 0 : index
    %27 = vector.load %arg8[%c0_21, %c0_22] : memref<1x1024xf32, #tpu.memory_space<vmem>>, vector<1x1024xf32>
    %28 = vector.broadcast %27 : vector<1x1024xf32> to vector<8x1024xf32>
    %29 = arith.addf %26, %28 : vector<8x1024xf32>
    %cst_23 = arith.constant 0.000000e+00 : f32
    %30 = vector.broadcast %cst_23 : f32 to vector<8x1024xf32>
    %31 = arith.maximumf %29, %30 : vector<8x1024xf32>
    %32 = arith.truncf %31 : vector<8x1024xf32> to vector<8x1024xbf16>
    %c0_24 = arith.constant 0 : index
    %c0_25 = arith.constant 0 : index
    %33 = vector.load %arg9[%c0_24, %c0_25] : memref<1024x512xbf16, #tpu.memory_space<vmem>>, vector<1024x512xbf16>
    %cst_26 = arith.constant dense<0.000000e+00> : vector<8x512xf32>
    %34 = tpu.matmul %32, %33, %cst_26 {dimension_numbers = #tpu.dot_dimension_numbers<[1], [0], [0], [1], [0, 0, 1, 1], [], []>} : vector<8x1024xbf16>, vector<1024x512xbf16>, vector<8x512xf32> -> vector<8x512xf32>
    %c0_27 = arith.constant 0 : index
    %c0_28 = arith.constant 0 : index
    %35 = vector.load %arg10[%c0_27, %c0_28] : memref<1x512xf32, #tpu.memory_space<vmem>>, vector<1x512xf32>
    %36 = vector.broadcast %35 : vector<1x512xf32> to vector<8x512xf32>
    %37 = arith.addf %34, %36 : vector<8x512xf32>
    %cst_29 = arith.constant 0.000000e+00 : f32
    %38 = vector.broadcast %cst_29 : f32 to vector<8x512xf32>
    %39 = arith.maximumf %37, %38 : vector<8x512xf32>
    %40 = arith.truncf %39 : vector<8x512xf32> to vector<8x512xbf16>
    %c0_30 = arith.constant 0 : index
    %c0_31 = arith.constant 0 : index
    %41 = vector.load %arg11[%c0_30, %c0_31] : memref<512x256xbf16, #tpu.memory_space<vmem>>, vector<512x256xbf16>
    %cst_32 = arith.constant dense<0.000000e+00> : vector<8x256xf32>
    %42 = tpu.matmul %40, %41, %cst_32 {dimension_numbers = #tpu.dot_dimension_numbers<[1], [0], [0], [1], [0, 0, 1, 1], [], []>} : vector<8x512xbf16>, vector<512x256xbf16>, vector<8x256xf32> -> vector<8x256xf32>
    %c0_33 = arith.constant 0 : index
    %c0_34 = arith.constant 0 : index
    %43 = vector.load %arg12[%c0_33, %c0_34] : memref<1x256xf32, #tpu.memory_space<vmem>>, vector<1x256xf32>
    %44 = vector.broadcast %43 : vector<1x256xf32> to vector<8x256xf32>
    %45 = arith.addf %42, %44 : vector<8x256xf32>
    %cst_35 = arith.constant 0.000000e+00 : f32
    %46 = vector.broadcast %cst_35 : f32 to vector<8x256xf32>
    %47 = arith.maximumf %45, %46 : vector<8x256xf32>
    %48 = arith.truncf %47 : vector<8x256xf32> to vector<8x256xbf16>
    %c0_36 = arith.constant 0 : index
    %c0_37 = arith.constant 0 : index
    %49 = vector.load %arg13[%c0_36, %c0_37] : memref<256x64xbf16, #tpu.memory_space<vmem>>, vector<256x64xbf16>
    %cst_38 = arith.constant dense<0.000000e+00> : vector<8x64xf32>
    %50 = tpu.matmul %48, %49, %cst_38 {dimension_numbers = #tpu.dot_dimension_numbers<[1], [0], [0], [1], [0, 0, 1, 1], [], []>} : vector<8x256xbf16>, vector<256x64xbf16>, vector<8x64xf32> -> vector<8x64xf32>
    %c0_39 = arith.constant 0 : index
    %c0_40 = arith.constant 0 : index
    %51 = vector.load %arg14[%c0_39, %c0_40] : memref<1x64xf32, #tpu.memory_space<vmem>>, vector<1x64xf32>
    %52 = vector.broadcast %51 : vector<1x64xf32> to vector<8x64xf32>
    %53 = arith.addf %50, %52 : vector<8x64xf32>
    %54 = arith.mulf %53, %53 : vector<8x64xf32>
    %c0_41 = arith.constant 0 : index
    %c0_42 = arith.constant 0 : index
    %55 = vector.load %arg15[%c0_41, %c0_42] : memref<64x64xf32, #tpu.memory_space<vmem>>, vector<64x64xf32>
    %cst_43 = arith.constant dense<0.000000e+00> : vector<8x64xf32>
    %56 = tpu.matmul %54, %55, %cst_43 {dimension_numbers = #tpu.dot_dimension_numbers<[1], [0], [0], [1], [0, 0, 1, 1], [], []>} : vector<8x64xf32>, vector<64x64xf32>, vector<8x64xf32> -> vector<8x64xf32>
    %cst_44 = arith.constant 1.000000e-24 : f32
    %57 = vector.broadcast %cst_44 : f32 to vector<8x64xf32>
    %58 = arith.maximumf %56, %57 : vector<8x64xf32>
    %59 = math.rsqrt %58 : vector<8x64xf32>
    %60 = arith.mulf %53, %59 : vector<8x64xf32>
    %c0_45 = arith.constant 0 : index
    %c0_46 = arith.constant 0 : index
    %61 = vector.load %arg16[%c0_45, %c0_46] : memref<8x64xf32, #tpu.memory_space<vmem>>, vector<8x64xf32>
    tpu.vector_store %arg16[%c0_45, %c0_46], %60 {strides = array<i32>} : memref<8x64xf32, #tpu.memory_space<vmem>>, vector<8x64xf32>,
    return
  }
}

</mosaic_0001>

<bundles_post_ra>
// kernel: tpu_custom_call.1
= control target key start
LH: loop header
LB: loop body
LE: loop exit
PB: predicated region body
PF: predicated region fallthrough
CT: control target
= control target key end

     0   :  { %s16485_s0 = inlined_call_operand.hbm [shape: bf16[8,64], index: 0, kind: input, shape index: {}]   ;;  %s16486_s1 = inlined_call_operand.hbm [shape: bf16[64,256], index: 1, kind: input, shape index: {}]   ;;  %s16487_s2 = inlined_call_operand.hbm [shape: f32[1,256], index: 2, kind: input, shape index: {}]   ;;  %s16488_s3 = inlined_call_operand.hbm [shape: bf16[256,512], index: 3, kind: input, shape index: {}]   ;;  %s16489_s4 = inlined_call_operand.hbm [shape: f32[1,512], index: 4, kind: input, shape index: {}]   ;;  %s16490_s5 = inlined_call_operand.hbm [shape: bf16[512,1024], index: 5, kind: input, shape index: {}]   ;;  %s16491_s6 = inlined_call_operand.hbm [shape: f32[1,1024], index: 6, kind: input, shape index: {}]   ;;  %s16492_s7 = inlined_call_operand.hbm [shape: bf16[1024,1024], index: 7, kind: input, shape index: {}]   ;;  %s16493_s8 = inlined_call_operand.hbm [shape: f32[1,1024], index: 8, kind: input, shape index: {}]   ;;  %s16494_s9 = inlined_call_operand.hbm [shape: bf16[1024,512], index: 9, kind: input, shape index: {}]   ;;  %s16495_s10 = inlined_call_operand.hbm [shape: f32[1,512], index: 10, kind: input, shape index: {}]   ;;  %s16496_s11 = inlined_call_operand.hbm [shape: bf16[512,256], index: 11, kind: input, shape index: {}]   ;;  %s16497_s12 = inlined_call_operand.hbm [shape: f32[1,256], index: 12, kind: input, shape index: {}]   ;;  %s16498_s13 = inlined_call_operand.vmem [shape: bf16[256,64], index: 13, kind: input, shape index: {}]   ;;  %s16499_s14 = inlined_call_operand.hbm [shape: f32[1,64], index: 14, kind: input, shape index: {}]   ;;  %s16500_s15 = inlined_call_operand.hbm [shape: f32[64,64], index: 15, kind: input, shape index: {}]   ;;  %s16501_s16 = inlined_call_operand.hbm [shape: f32[8,64], index: 16, kind: output, shape index: {}]  }
   0x1   :  { %16506 = sst [smem:[#allocation36_spill]] %s16485_s0 }
   0x2   :  { %21 = vsyncpa [#allocation3], 0 }
   0x3   :  { %22 = vsyncpa [#allocation6], 0 }
   0x4   :  { %23 = vsyncpa [#allocation9], 0 }
   0x5   :  { %24 = vsyncpa [#allocation12], 0 }
   0x6   :  { %25 = vsyncpa [#allocation15], 0 }
   0x7   :  { %26 = vsyncpa [#allocation18], 0 }
   0x8   :  { %27 = vsyncpa [#allocation21], 0 }
   0x9   :  { %28 = vsyncpa [#allocation24], 0  ;;  %s45_s23 = sshll.u32 %s16486_s1, 4  ;;  %s46_s23 = int_to_ptr.hbm [resolvable:$true] %s45_s23 }
   0xa   :  { %29 = vsyncpa [#allocation4], 0  ;;  %s15801_s24 = smov [#allocation5]   ;;  %s69_s28 = sshll.u32 %s16488_s3, 4  ;;  %s70_s28 = int_to_ptr.hbm [resolvable:$true] %s69_s28 }
   0xb   :  { %s47_s25 = sshll.u32 %s15801_s24, 4  ;;  %s16502_s29 = smov 128   ;;  %s48_s25 = int_to_ptr.vmem [resolvable:$true] %s47_s25 }
   0xc   :  { %s16504_s30 = smov 8   ;;  %s15804_s0 = smov [#allocation8]  }
   0xd   :  { %53 = dma.hbm_to_vmem [thread:$0]  %s46_s23, 1024, %s48_s25, [#allocation6], %s16502_s29, %s16502_s29, %s16504_s30  }
   0xe   :  { %s71_s17 = sshll.u32 %s15804_s0, 4  ;;  %s15805_s1 = smov 256   ;;  %s72_s17 = int_to_ptr.vmem [resolvable:$true] %s71_s17 }
   0xf   :  { %s15806_s18 = smov 16   ;;  %s93_s21 = sshll.u32 %s16490_s5, 4  ;;  %s94_s21 = int_to_ptr.hbm [resolvable:$true] %s93_s21 }
  0x10   :  { %77 = dma.hbm_to_vmem [thread:$0]  %s70_s28, 8192, %s72_s17, [#allocation9], %s15805_s1, %s15805_s1, %s15806_s18  }
  0x11   :  { %s15807_s22 = smov [#allocation11]   ;;  %s117_s27 = sshll.u32 %s16492_s7, 4  ;;  %s118_s27 = int_to_ptr.hbm [resolvable:$true] %s117_s27 }
  0x12   :  { %s95_s3 = sshll.u32 %s15807_s22, 4  ;;  %s15808_s23 = smov 512   ;;  %s96_s3 = int_to_ptr.vmem [resolvable:$true] %s95_s3 }
  0x13   :  { %s15809_s25 = smov 32   ;;  %s15810_s0 = smov [#allocation14]  }
  0x14   :  { %101 = dma.hbm_to_vmem [thread:$0]  %s94_s21, 32768, %s96_s3, [#allocation12], %s15808_s23, %s15808_s23, %s15809_s25  }
  0x15   :  { %s119_s29 = sshll.u32 %s15810_s0, 4  ;;  %s141_s17 = sshll.u32 %s16494_s9, 4  ;;  %s120_s29 = int_to_ptr.vmem [resolvable:$true] %s119_s29  ;;  %s142_s17 = int_to_ptr.hbm [resolvable:$true] %s141_s17 }
  0x16   :  { %125 = dma.hbm_to_vmem [thread:$0]  %s118_s27, 65536, %s120_s29, [#allocation15], %s15808_s23, %s15808_s23, %s15809_s25  }
  0x17   :  { %s165_s20 = sshll.u32 %s16496_s11, 4  ;;  %s15811_s22 = smov [#allocation17]   ;;  %s166_s20 = int_to_ptr.hbm [resolvable:$true] %s165_s20 }
  0x18   :  { %s143_s24 = sshll.u32 %s15811_s22, 4  ;;  %s15812_s7 = smov [#allocation20]   ;;  %s144_s24 = int_to_ptr.vmem [resolvable:$true] %s143_s24 }
  0x19   :  { %149 = dma.hbm_to_vmem [thread:$0]  %s142_s17, 32768, %s144_s24, [#allocation18], %s15805_s1, %s15805_s1, %s15806_s18  }
  0x1a   :  { %s167_s21 = sshll.u32 %s15812_s7, 4  ;;  %s192_s0 = sshll.u32 %s16499_s14, 4  ;;  %s168_s21 = int_to_ptr.vmem [resolvable:$true] %s167_s21  ;;  %s193_s0 = int_to_ptr.hbm [resolvable:$true] %s192_s0 }
  0x1b   :  { %s16507_s9 = smov 8   ;;  %s16508_s30 = smov 128  }
  0x1c   :  { %173 = dma.hbm_to_vmem [thread:$0]  %s166_s20, 8192, %s168_s21, [#allocation21], %s16508_s30, %s16508_s30, %s16507_s9  }
  0x1d   :  { %s16509_s11 = sld [smem:[#allocation36_spill]]  ;;  %s15813_s25 = smov [#allocation23]  }
  0x1e   :  { %s194_s28 = sshll.u32 %s15813_s25, 4  ;;  %s15814_s1 = smov [#allocation2]   ;;  %s195_s28 = int_to_ptr.vmem [resolvable:$true] %s194_s28 }
  0x1f   :  { %197 = dma.hbm_to_vmem [thread:$0]  %s193_s0, 16, %s195_s28, [#allocation24]  }
  0x20   :  { %s37_s18 = sshll.u32 %s15814_s1, 4  ;;  %s59_s14 = sshll.u32 %s16487_s2, 4  ;;  %s38_s18 = int_to_ptr.vmem [resolvable:$true] %s37_s18  ;;  %s60_s14 = int_to_ptr.hbm [resolvable:$true] %s59_s14 }
  0x21   :  { %s83_s22 = sshll.u32 %s16489_s4, 4  ;;  %s15815_s24 = smov [#allocation7]   ;;  %s84_s22 = int_to_ptr.hbm [resolvable:$true] %s83_s22 }
  0x22   :  { %s61_s7 = sshll.u32 %s15815_s24, 4  ;;  %s15816_s21 = smov [#allocation10]   ;;  %s62_s7 = int_to_ptr.vmem [resolvable:$true] %s61_s7 }
  0x23   :  { %s35_s23 = sshll.u32 %s16509_s11, 4  ;;  %s85_s3 = sshll.u32 %s15816_s21, 4  ;;  %s36_s23 = int_to_ptr.hbm [resolvable:$true] %s35_s23  ;;  %s86_s3 = int_to_ptr.vmem [resolvable:$true] %s85_s3 }
  0x24   :  { %40 = dma.hbm_to_vmem [thread:$0]  %s36_s23, 64, %s38_s18, [#allocation3]  }
  0x25   :  { %64 = dma.hbm_to_vmem [thread:$0]  %s60_s14, 32, %s62_s7, [#allocation6]  }
  0x26   :  { %s107_s29 = sshll.u32 %s16491_s6, 4  ;;  %s131_s11 = sshll.u32 %s16493_s8, 4  ;;  %s108_s29 = int_to_ptr.hbm [resolvable:$true] %s107_s29  ;;  %s132_s11 = int_to_ptr.hbm [resolvable:$true] %s131_s11 }
  0x27   :  { %88 = dma.hbm_to_vmem [thread:$0]  %s84_s22, 64, %s86_s3, [#allocation9]  }
  0x28   :  { %s15817_s23 = smov [#allocation13]   ;;  %s15818_s25 = smov [#allocation16]  }
  0x29   :  { %s109_s4 = sshll.u32 %s15817_s23, 4  ;;  %s133_s28 = sshll.u32 %s15818_s25, 4  ;;  %s110_s4 = int_to_ptr.vmem [resolvable:$true] %s109_s4  ;;  %s134_s28 = int_to_ptr.vmem [resolvable:$true] %s133_s28 }
  0x2a   :  { %112 = dma.hbm_to_vmem [thread:$0]  %s108_s29, 128, %s110_s4, [#allocation12]  }
  0x2b   :  { %s155_s17 = sshll.u32 %s16495_s10, 4  ;;  %s179_s14 = sshll.u32 %s16497_s12, 4  ;;  %s156_s17 = int_to_ptr.hbm [resolvable:$true] %s155_s17  ;;  %s180_s14 = int_to_ptr.hbm [resolvable:$true] %s179_s14 }
  0x2c   :  { %136 = dma.hbm_to_vmem [thread:$0]  %s132_s11, 128, %s134_s28, [#allocation15]  }
  0x2d   :  { %s15819_s19 = smov [#allocation19]   ;;  %s15820_s20 = smov [#allocation22]  }
  0x2e   :  { %s157_s8 = sshll.u32 %s15819_s19, 4  ;;  %s181_s22 = sshll.u32 %s15820_s20, 4  ;;  %s158_s8 = int_to_ptr.vmem [resolvable:$true] %s157_s8  ;;  %s182_s22 = int_to_ptr.vmem [resolvable:$true] %s181_s22 }
  0x2f   :  { %160 = dma.hbm_to_vmem [thread:$0]  %s156_s17, 64, %s158_s8, [#allocation18]  }
  0x30   :  { %s202_s21 = sshll.u32 %s16500_s15, 4  ;;  %s15821_s10 = smov [#allocation25]   ;;  %s203_s21 = int_to_ptr.hbm [resolvable:$true] %s202_s21 }
  0x31   :  { %184 = dma.hbm_to_vmem [thread:$0]  %s180_s14, 32, %s182_s22, [#allocation21]  }
  0x32   :  { %s204_s3 = sshll.u32 %s15821_s10, 4  ;;  %s205_s3 = int_to_ptr.vmem [resolvable:$true] %s204_s3 }
  0x33   :  { %210 = dma.hbm_to_vmem [thread:$0]  %s203_s21, 1024, %s205_s3, [#allocation24], %s16508_s30, %s16508_s30, %s16507_s9  }
  0x34   :  { %15783 = dma.done.wait [#allocation3], 64  }
  0x35   :  { %15784 = vsyncadd [#allocation3], 4294967232 }
  0x36   :  { %15785 = dma.done.wait [#allocation6], 1056  }
  0x37   :  { %15786 = vsyncadd [#allocation6], 4294966240 }
  0x38   :  { %15787 = dma.done.wait [#allocation9], 8256  }
  0x39   :  { %15788 = vsyncadd [#allocation9], 4294959040 }
  0x3a   :  { %15789 = dma.done.wait [#allocation12], 32896  }
  0x3b   :  { %15790 = vsyncadd [#allocation12], 4294934400 }
  0x3c   :  { %15791 = dma.done.wait [#allocation15], 65664  }
  0x3d   :  { %15792 = vsyncadd [#allocation15], 4294901632 }
  0x3e   :  { %15793 = dma.done.wait [#allocation18], 32832  }
  0x3f   :  { %15794 = vsyncadd [#allocation18], 4294934464 }
  0x40   :  { %15795 = dma.done.wait [#allocation21], 8224  }
  0x41   :  { %15796 = vsyncadd [#allocation21], 4294959072 }
  0x42   :  { %15797 = dma.done.wait [#allocation24], 1040  }
  0x43   :  { %15798 = vsyncadd [#allocation24], 4294966256  ;;  %v9512_v0 = vld [vmem:[#allocation5 + $0x30] sm:$0xf]  ;;  %v14200_v1 = vld [vmem:[#allocation5 + $0x34] sm:$0xf0] }
  0x44   :  { %v14199_v2 = vld [vmem:[#allocation5 + $0x34] sm:$0xf]  ;;  %v9513_v3 = vor.u32 %v14200_v1, %v9512_v0  ;;  %v9514_v4 = vld [vmem:[#allocation5 + $0x38] sm:$0xf0]  ;;  %v9504_v5 = vld [vmem:[#allocation5 + $0x20] sm:$0xf] }
  0x45   :  { %v14198_v6 = vld [vmem:[#allocation5 + $0x24] sm:$0xf0]  ;;  %v9517_v7 = vor.u32 %v14199_v2, %v9514_v4  ;;  %v14197_v8 = vld [vmem:[#allocation5 + $0x24] sm:$0xf]  ;;  %v9506_v9 = vld [vmem:[#allocation5 + $0x28] sm:$0xf0] }
  0x46   :  { %335 = vmatpush.bf16.msra.mxu0 %v9513_v3  ;;  %v9505_v10 = vor.u32 %v14198_v6, %v9504_v5  ;;  %v9509_v11 = vor.u32 %v14197_v8, %v9506_v9  ;;  %v9496_v12 = vld [vmem:[#allocation5 + $0x10] sm:$0xf]  ;;  %v14196_v13 = vld [vmem:[#allocation5 + $0x14] sm:$0xf0]  ;;  %v14195_v14 = vld [vmem:[#allocation5 + $0x14] sm:$0xf] }
  0x47   :  { %348 = vmatpush.bf16.msra.mxu1 %v9517_v7  ;;  %v9498_v15 = vld [vmem:[#allocation5 + $0x18] sm:$0xf0]  ;;  %v9634_v16 = vld [vmem:[#allocation8 + $0xe0] sm:$0xf]  ;;  %v14231_v18 = vld [vmem:[#allocation8 + $0xec] sm:$0xf0]  ;;  %v9497_v21 = vor.u32 %v14196_v13, %v9496_v12 }
  0x48   :  { %v9488_v17 = vld [vmem:[#allocation5] sm:$0xf]  ;;  %v14263_v20 = vld [vmem:[#allocation8 + $0x1ec] sm:$0xf0]  ;;  %v14194_v22 = vld [vmem:[#allocation5 + $0x4] sm:$0xf0]  ;;  %v9635_v25 = vor.u32 %v14231_v18, %v9634_v16  ;;  %v9501_v27 = vor.u32 %v14195_v14, %v9498_v15 }
  0x49   :  { %v9762_v19 = vld [vmem:[#allocation8 + $0x1e0] sm:$0xf]  ;;  %v9490_v24 = vld [vmem:[#allocation5 + $0x8] sm:$0xf0]  ;;  %v14229_v28 = vld [vmem:[#allocation8 + $0xe4] sm:$0xf]  ;;  %v9489_v38 = vor.u32 %v14194_v22, %v9488_v17 }
  0x4a   :  { %336 = vmatpush.bf16.msra.mxu0 %v9505_v10  ;;  %v14193_v23 = vld [vmem:[#allocation5 + $0x4] sm:$0xf]  ;;  %v9763_v26 = vor.u32 %v14263_v20, %v9762_v19  ;;  %v14227_v30 = vld [vmem:[#allocation8 + $0xcc] sm:$0xf0]  ;;  %755 = vmatpush.bf16.msra.mxu2 %v9635_v25  ;;  %v9636_v31 = vld [vmem:[#allocation8 + $0xf0] sm:$0xf0] }
  0x4b   :  { %349 = vmatpush.bf16.msra.mxu1 %v9509_v11  ;;  %v9618_v29 = vld [vmem:[#allocation8 + $0xc0] sm:$0xf]  ;;  %v14259_v34 = vld [vmem:[#allocation8 + $0x1cc] sm:$0xf0]  ;;  %v14261_v35 = vld [vmem:[#allocation8 + $0x1e4] sm:$0xf]  ;;  %v9493_v42 = vor.u32 %v14193_v23, %v9490_v24  ;;  %v9639_v43 = vor.u32 %v14229_v28, %v9636_v31 }
  0x4c   :  { %768 = vmatpush.bf16.msra.mxu3 %v9763_v26  ;;  %v9619_v32 = vor.u32 %v14227_v30, %v9618_v29  ;;  %v9746_v33 = vld [vmem:[#allocation8 + $0x1c0] sm:$0xf]  ;;  %v9764_v36 = vld [vmem:[#allocation8 + $0x1f0] sm:$0xf0]  ;;  %v14223_v40 = vld [vmem:[#allocation8 + $0xac] sm:$0xf0] }
  0x4d   :  { %v9747_v37 = vor.u32 %v14259_v34, %v9746_v33  ;;  %v9602_v39 = vld [vmem:[#allocation8 + $0xa0] sm:$0xf]  ;;  %vm327_vm0 = vcmask 523264   ;;  %v14255_v44 = vld [vmem:[#allocation8 + $0x1ac] sm:$0xf0]  ;;  %v9767_v45 = vor.u32 %v14261_v35, %v9764_v36  ;;  %s9469_s29 = sshll.u32 %s16501_s16, 4  ;;  %s9470_s29 = int_to_ptr.hbm [resolvable:$true] %s9469_s29 }
  0x4e   :  { %337 = vmatpush.bf16.msra.mxu0 %v9497_v21  ;;  %v9730_v41 = vld [vmem:[#allocation8 + $0x1a0] sm:$0xf]  ;;  %756 = vmatpush.bf16.msra.mxu2 %v9619_v32  ;;  %v14225_v46 = vld [vmem:[#allocation8 + $0xc4] sm:$0xf]  ;;  %v9620_v47 = vld [vmem:[#allocation8 + $0xd0] sm:$0xf0]  ;;  %v9603_v49 = vor.u32 %v14223_v40, %v9602_v39 }
  0x4f   :  { %350 = vmatpush.bf16.msra.mxu1 %v9501_v27  ;;  %v14257_v48 = vld [vmem:[#allocation8 + $0x1c4] sm:$0xf]  ;;  %v9748_v50 = vld [vmem:[#allocation8 + $0x1d0] sm:$0xf0]  ;;  %v9731_v51 = vor.u32 %v14255_v44, %v9730_v41  ;;  %v9586_v52 = vld [vmem:[#allocation8 + $0x80] sm:$0xf]  ;;  %v9623_v57 = vor.u32 %v14225_v46, %v9620_v47 }
  0x50   :  { %769 = vmatpush.bf16.msra.mxu3 %v9747_v37  ;;  %v14219_v53 = vld [vmem:[#allocation8 + $0x8c] sm:$0xf0]  ;;  %v272_v54 = vld [vmem:[#allocation2] sm:$0xf]  ;;  %v9714_v55 = vld [vmem:[#allocation8 + $0x180] sm:$0xf]  ;;  %v9751_v58 = vor.u32 %v14257_v48, %v9748_v50 }
  0x51   :  { %v14251_v56 = vld [vmem:[#allocation8 + $0x18c] sm:$0xf0]  ;;  %v14221_v59 = vld [vmem:[#allocation8 + $0xa4] sm:$0xf]  ;;  %v9604_v60 = vld [vmem:[#allocation8 + $0xb0] sm:$0xf0]  ;;  %v9587_v62 = vor.u32 %v14219_v53, %v9586_v52 }
  0x52   :  { %338 = vmatpush.bf16.msra.mxu0 %v9489_v38  ;;  %757 = vmatpush.bf16.msra.mxu2 %v9603_v49  ;;  %v14253_v61 = vld [vmem:[#allocation8 + $0x1a4] sm:$0xf]  ;;  %v9732_v63 = vld [vmem:[#allocation8 + $0x1b0] sm:$0xf0]  ;;  %v9715_v0 = vor.u32 %v14251_v56, %v9714_v55  ;;  %v9570_v1 = vld [vmem:[#allocation8 + $0x60] sm:$0xf]  ;;  %v9607_v5 = vor.u32 %v14221_v59, %v9604_v60 }
  0x53   :  { %351 = vmatpush.bf16.msra.mxu1 %v9493_v42  ;;  %v14215_v2 = vld [vmem:[#allocation8 + $0x6c] sm:$0xf0]  ;;  %v9698_v3 = vld [vmem:[#allocation8 + $0x160] sm:$0xf]  ;;  %v9735_v6 = vor.u32 %v14253_v61, %v9732_v63  ;;  %v14217_v7 = vld [vmem:[#allocation8 + $0x84] sm:$0xf] }
  0x54   :  { %770 = vmatpush.bf16.msra.mxu3 %v9731_v51  ;;  %v14247_v4 = vld [vmem:[#allocation8 + $0x16c] sm:$0xf0]  ;;  %v9588_v8 = vld [vmem:[#allocation8 + $0x90] sm:$0xf0]  ;;  %v14249_v9 = vld [vmem:[#allocation8 + $0x184] sm:$0xf]  ;;  %v9571_v10 = vor.u32 %v14215_v2, %v9570_v1 }
  0x55   :  { %9518 = vmatmul.msk.bf16.vlgmr.msra.gmra.mxu0 %vm327_vm0, %v272_v54  ;;  %v9716_v11 = vld [vmem:[#allocation8 + $0x190] sm:$0xf0]  ;;  %v9699_v12 = vor.u32 %v14247_v4, %v9698_v3  ;;  %v9554_v13 = vld [vmem:[#allocation8 + $0x40] sm:$0xf]  ;;  %v14211_v14 = vld [vmem:[#allocation8 + $0x4c] sm:$0xf0]  ;;  %v9591_v17 = vor.u32 %v14217_v7, %v9588_v8 }
  0x56   :  { %781 = vmatpush.bf16.msrb.mxu0 %v9639_v43  ;;  %9519 = vmatmul.msk.bf16.vlgmr.msra.gmra.mxu1 %vm327_vm0, %v272_v54  ;;  %v9682_v15 = vld [vmem:[#allocation8 + $0x140] sm:$0xf]  ;;  %v14243_v16 = vld [vmem:[#allocation8 + $0x14c] sm:$0xf0]  ;;  %v9719_v18 = vor.u32 %v14249_v9, %v9716_v11  ;;  %v14213_v19 = vld [vmem:[#allocation8 + $0x64] sm:$0xf]  ;;  %v9555_v22 = vor.u32 %v14211_v14, %v9554_v13 }
  0x57   :  { %794 = vmatpush.bf16.msrb.mxu1 %v9767_v45  ;;  %758 = vmatpush.bf16.msra.mxu2 %v9587_v62  ;;  %v9572_v20 = vld [vmem:[#allocation8 + $0x70] sm:$0xf0]  ;;  %v14245_v21 = vld [vmem:[#allocation8 + $0x164] sm:$0xf]  ;;  %v9683_v24 = vor.u32 %v14243_v16, %v9682_v15  ;;  %v9538_v25 = vld [vmem:[#allocation8 + $0x20] sm:$0xf] }
  0x58   :  { %771 = vmatpush.bf16.msra.mxu3 %v9715_v0  ;;  %v9700_v23 = vld [vmem:[#allocation8 + $0x170] sm:$0xf0]  ;;  %v14207_v26 = vld [vmem:[#allocation8 + $0x2c] sm:$0xf0]  ;;  %v9666_v27 = vld [vmem:[#allocation8 + $0x120] sm:$0xf]  ;;  %v9575_v29 = vor.u32 %v14213_v19, %v9572_v20 }
  0x59   :  { %v14239_v28 = vld [vmem:[#allocation8 + $0x12c] sm:$0xf0]  ;;  %v14209_v30 = vld [vmem:[#allocation8 + $0x44] sm:$0xf]  ;;  %v9703_v31 = vor.u32 %v14245_v21, %v9700_v23  ;;  %v9556_v32 = vld [vmem:[#allocation8 + $0x50] sm:$0xf0]  ;;  %v9539_v35 = vor.u32 %v14207_v26, %v9538_v25 }
  0x5a   :  { %782 = vmatpush.bf16.msrb.mxu0 %v9623_v57  ;;  %v14241_v33 = vld [vmem:[#allocation8 + $0x144] sm:$0xf]  ;;  %v9684_v34 = vld [vmem:[#allocation8 + $0x150] sm:$0xf0]  ;;  %v9667_v36 = vor.u32 %v14239_v28, %v9666_v27  ;;  %v9522_v37 = vld [vmem:[#allocation8] sm:$0xf]  ;;  %v9559_v43 = vor.u32 %v14209_v30, %v9556_v32 }
  0x5b   :  { %795 = vmatpush.bf16.msrb.mxu1 %v9751_v58  ;;  %759 = vmatpush.bf16.msra.mxu2 %v9571_v10  ;;  %v14203_v38 = vld [vmem:[#allocation8 + $0xc] sm:$0xf0]  ;;  %v9650_v39 = vld [vmem:[#allocation8 + $0x100] sm:$0xf]  ;;  %v9642_v41 = vld [vmem:[#allocation8 + $0xe8] sm:$0xf]  ;;  %v9687_v46 = vor.u32 %v14241_v33, %v9684_v34 }
  0x5c   :  { %772 = vmatpush.bf16.msra.mxu3 %v9699_v12  ;;  %v14235_v40 = vld [vmem:[#allocation8 + $0x10c] sm:$0xf0]  ;;  %v14232_v42 = vld [vmem:[#allocation8 + $0xf4] sm:$0xf0]  ;;  %v9770_v44 = vld [vmem:[#allocation8 + $0x1e8] sm:$0xf]  ;;  %v9523_v49 = vor.u32 %v14203_v38, %v9522_v37 }
  0x5d   :  { %v14264_v45 = vld [vmem:[#allocation8 + $0x1f4] sm:$0xf0]  ;;  %v14205_v47 = vld [vmem:[#allocation8 + $0x24] sm:$0xf]  ;;  %v9540_v48 = vld [vmem:[#allocation8 + $0x30] sm:$0xf0]  ;;  %v9651_v52 = vor.u32 %v14235_v40, %v9650_v39  ;;  %v9643_v53 = vor.u32 %v14232_v42, %v9642_v41 }
  0x5e   :  { %783 = vmatpush.bf16.msrb.mxu0 %v9607_v5  ;;  %v14237_v50 = vld [vmem:[#allocation8 + $0x124] sm:$0xf]  ;;  %v9668_v51 = vld [vmem:[#allocation8 + $0x130] sm:$0xf0]  ;;  %v9771_v54 = vor.u32 %v14264_v45, %v9770_v44  ;;  %v9626_v55 = vld [vmem:[#allocation8 + $0xc8] sm:$0xf]  ;;  %v9543_v57 = vor.u32 %v14205_v47, %v9540_v48 }
  0x5f   :  { %796 = vmatpush.bf16.msrb.mxu1 %v9735_v6  ;;  %760 = vmatpush.bf16.msra.mxu2 %v9555_v22  ;;  %v14228_v56 = vld [vmem:[#allocation8 + $0xd4] sm:$0xf0]  ;;  %v9754_v58 = vld [vmem:[#allocation8 + $0x1c8] sm:$0xf]  ;;  %v9671_v60 = vor.u32 %v14237_v50, %v9668_v51  ;;  %v14201_v61 = vld [vmem:[#allocation8 + $0x4] sm:$0xf] }
  0x60   :  { %773 = vmatpush.bf16.msra.mxu3 %v9683_v24  ;;  %v14260_v59 = vld [vmem:[#allocation8 + $0x1d4] sm:$0xf0]  ;;  %v9524_v62 = vld [vmem:[#allocation8 + $0x10] sm:$0xf0]  ;;  %v14233_v63 = vld [vmem:[#allocation8 + $0x104] sm:$0xf]  ;;  %v9627_v3 = vor.u32 %v14228_v56, %v9626_v55 }
  0x61   :  { %v9652_v0 = vld [vmem:[#allocation8 + $0x110] sm:$0xf0]  ;;  %v14230_v1 = vld [vmem:[#allocation8 + $0xec] sm:$0xf]  ;;  %v9644_v2 = vld [vmem:[#allocation8 + $0xf8] sm:$0xf0]  ;;  %v9755_v6 = vor.u32 %v14260_v59, %v9754_v58  ;;  %v9527_v7 = vor.u32 %v14201_v61, %v9524_v62 }
  0x62   :  { %784 = vmatpush.bf16.msrb.mxu0 %v9591_v17  ;;  %v14262_v4 = vld [vmem:[#allocation8 + $0x1ec] sm:$0xf]  ;;  %v9772_v5 = vld [vmem:[#allocation8 + $0x1f8] sm:$0xf0]  ;;  %v9655_v8 = vor.u32 %v14233_v63, %v9652_v0  ;;  %v9647_v9 = vor.u32 %v14230_v1, %v9644_v2  ;;  %v9610_v17 = vld [vmem:[#allocation8 + $0xa8] sm:$0xf] }
  0x63   :  { %797 = vmatpush.bf16.msrb.mxu1 %v9719_v18  ;;  %761 = vmatpush.bf16.msra.mxu2 %v9539_v35  ;;  %v9775_v10 = vor.u32 %v14262_v4, %v9772_v5  ;;  %v14226_v11 = vld [vmem:[#allocation8 + $0xcc] sm:$0xf]  ;;  %v9628_v12 = vld [vmem:[#allocation8 + $0xd8] sm:$0xf0]  ;;  %v14224_v18 = vld [vmem:[#allocation8 + $0xb4] sm:$0xf0] }
  0x64   :  { %774 = vmatpush.bf16.msra.mxu3 %v9667_v36  ;;  %v14258_v13 = vld [vmem:[#allocation8 + $0x1cc] sm:$0xf]  ;;  %v9756_v14 = vld [vmem:[#allocation8 + $0x1d8] sm:$0xf0]  ;;  %v9631_v15 = vor.u32 %v14226_v11, %v9628_v12  ;;  %v9738_v19 = vld [vmem:[#allocation8 + $0x1a8] sm:$0xf]  ;;  %v9611_v20 = vor.u32 %v14224_v18, %v9610_v17 }
  0x65   :  { %v9759_v16 = vor.u32 %v14258_v13, %v9756_v14  ;;  %v14256_v21 = vld [vmem:[#allocation8 + $0x1b4] sm:$0xf0]  ;;  %v14222_v22 = vld [vmem:[#allocation8 + $0xac] sm:$0xf]  ;;  %v9612_v23 = vld [vmem:[#allocation8 + $0xb8] sm:$0xf0] }
  0x66   :  { %785 = vmatpush.bf16.msrb.mxu0 %v9575_v29  ;;  %v9739_v24 = vor.u32 %v14256_v21, %v9738_v19  ;;  %v9615_v25 = vor.u32 %v14222_v22, %v9612_v23  ;;  %v14254_v26 = vld [vmem:[#allocation8 + $0x1ac] sm:$0xf]  ;;  %v9740_v27 = vld [vmem:[#allocation8 + $0x1b8] sm:$0xf0]  ;;  %v9594_v29 = vld [vmem:[#allocation8 + $0x88] sm:$0xf] }
  0x67   :  { %798 = vmatpush.bf16.msrb.mxu1 %v9703_v31  ;;  %762 = vmatpush.bf16.msra.mxu2 %v9523_v49  ;;  %v9743_v28 = vor.u32 %v14254_v26, %v9740_v27  ;;  %v14220_v30 = vld [vmem:[#allocation8 + $0x94] sm:$0xf0]  ;;  %v9722_v31 = vld [vmem:[#allocation8 + $0x188] sm:$0xf]  ;;  %v14218_v34 = vld [vmem:[#allocation8 + $0x8c] sm:$0xf] }
  0x68   :  { %775 = vmatpush.bf16.msra.mxu3 %v9651_v52  ;;  %v9595_v32 = vor.u32 %v14220_v30, %v9594_v29  ;;  %v14252_v33 = vld [vmem:[#allocation8 + $0x194] sm:$0xf0]  ;;  %v9596_v35 = vld [vmem:[#allocation8 + $0x98] sm:$0xf0]  ;;  %v14250_v38 = vld [vmem:[#allocation8 + $0x18c] sm:$0xf] }
  0x69   :  { %v9723_v36 = vor.u32 %v14252_v33, %v9722_v31  ;;  %v9599_v37 = vor.u32 %v14218_v34, %v9596_v35  ;;  %v9724_v39 = vld [vmem:[#allocation8 + $0x198] sm:$0xf0]  ;;  %v9578_v41 = vld [vmem:[#allocation8 + $0x68] sm:$0xf]  ;;  %v14216_v42 = vld [vmem:[#allocation8 + $0x74] sm:$0xf0] }
  0x6a   :  { %786 = vmatpush.bf16.msrb.mxu0 %v9559_v43  ;;  %v9727_v40 = vor.u32 %v14250_v38, %v9724_v39  ;;  %v9706_v43 = vld [vmem:[#allocation8 + $0x168] sm:$0xf]  ;;  %v9579_v44 = vor.u32 %v14216_v42, %v9578_v41  ;;  %v14248_v45 = vld [vmem:[#allocation8 + $0x174] sm:$0xf0]  ;;  %v9580_v47 = vld [vmem:[#allocation8 + $0x78] sm:$0xf0] }
  0x6b   :  { %799 = vmatpush.bf16.msrb.mxu1 %v9687_v46  ;;  %807 = vmatpush.bf16.msrb.mxu2 %v9643_v53  ;;  %v14214_v46 = vld [vmem:[#allocation8 + $0x6c] sm:$0xf]  ;;  %v9707_v48 = vor.u32 %v14248_v45, %v9706_v43  ;;  %v9708_v51 = vld [vmem:[#allocation8 + $0x178] sm:$0xf0]  ;;  %v9562_v53 = vld [vmem:[#allocation8 + $0x48] sm:$0xf] }
  0x6c   :  { %820 = vmatpush.bf16.msrb.mxu3 %v9771_v54  ;;  %v9583_v49 = vor.u32 %v14214_v46, %v9580_v47  ;;  %v14246_v50 = vld [vmem:[#allocation8 + $0x16c] sm:$0xf]  ;;  %v14212_v54 = vld [vmem:[#allocation8 + $0x54] sm:$0xf0]  ;;  %v9690_v55 = vld [vmem:[#allocation8 + $0x148] sm:$0xf] }
  0x6d   :  { %v9711_v52 = vor.u32 %v14246_v50, %v9708_v51  ;;  %v9563_v56 = vor.u32 %v14212_v54, %v9562_v53  ;;  %v14210_v58 = vld [vmem:[#allocation8 + $0x4c] sm:$0xf]  ;;  %v9564_v59 = vld [vmem:[#allocation8 + $0x58] sm:$0xf0]  ;;  %v9546_v0 = vld [vmem:[#allocation8 + $0x28] sm:$0xf] }
  0x6e   :  { %787 = vmatpush.bf16.msrb.mxu0 %v9543_v57  ;;  %v14244_v57 = vld [vmem:[#allocation8 + $0x154] sm:$0xf0]  ;;  %v9567_v61 = vor.u32 %v14210_v58, %v9564_v59  ;;  %v14242_v62 = vld [vmem:[#allocation8 + $0x14c] sm:$0xf]  ;;  %v9692_v63 = vld [vmem:[#allocation8 + $0x158] sm:$0xf0] }
  0x6f   :  { %800 = vmatpush.bf16.msrb.mxu1 %v9671_v60  ;;  %808 = vmatpush.bf16.msrb.mxu2 %v9627_v3  ;;  %v9691_v60 = vor.u32 %v14244_v57, %v9690_v55  ;;  %v9695_v1 = vor.u32 %v14242_v62, %v9692_v63  ;;  %v14208_v2 = vld [vmem:[#allocation8 + $0x34] sm:$0xf0]  ;;  %v9674_v3 = vld [vmem:[#allocation8 + $0x128] sm:$0xf]  ;;  %v9676_v11 = vld [vmem:[#allocation8 + $0x138] sm:$0xf0] }
  0x70   :  { %821 = vmatpush.bf16.msrb.mxu3 %v9755_v6  ;;  %v14240_v4 = vld [vmem:[#allocation8 + $0x134] sm:$0xf0]  ;;  %v9547_v5 = vor.u32 %v14208_v2, %v9546_v0  ;;  %v14206_v6 = vld [vmem:[#allocation8 + $0x2c] sm:$0xf]  ;;  %v9530_v12 = vld [vmem:[#allocation8 + $0x8] sm:$0xf] }
  0x71   :  { %v14204_v13 = vld [vmem:[#allocation8 + $0x14] sm:$0xf0]  ;;  %v14202_v17 = vld [vmem:[#allocation8 + $0xc] sm:$0xf]  ;;  %v9532_v18 = vld [vmem:[#allocation8 + $0x18] sm:$0xf0] }
  0x72   :  { %788 = vmatpush.bf16.msrb.mxu0 %v9527_v7  ;;  %v9548_v7 = vld [vmem:[#allocation8 + $0x38] sm:$0xf0]  ;;  %v14234_v19 = vld [vmem:[#allocation8 + $0x10c] sm:$0xf]  ;;  %v9531_v21 = vor.u32 %v14204_v13, %v9530_v12  ;;  %v9535_v23 = vor.u32 %v14202_v17, %v9532_v18  ;;  %v10258_v31 = vld [vmem:[#allocation11 + $0x3c0] sm:$0xf] }
  0x73   :  { %801 = vmatpush.bf16.msrb.mxu1 %v9655_v8  ;;  %809 = vmatpush.bf16.msrb.mxu2 %v9611_v20  ;;  %v14238_v8 = vld [vmem:[#allocation8 + $0x12c] sm:$0xf]  ;;  %v9660_v20 = vld [vmem:[#allocation8 + $0x118] sm:$0xf0]  ;;  %v10002_v33 = vld [vmem:[#allocation11 + $0x1c0] sm:$0xf] }
  0x74   :  { %822 = vmatpush.bf16.msrb.mxu3 %v9739_v24  ;;  %v9679_v14 = vor.u32 %v14238_v8, %v9676_v11  ;;  %v9663_v24 = vor.u32 %v14234_v19, %v9660_v20  ;;  %v14325_v35 = vld [vmem:[#allocation11 + $0x1dc] sm:$0xf0] }
  0x75   :  { %v10514_v39 = vld [vmem:[#allocation11 + $0x5c0] sm:$0xf]  ;;  %v10003_v46 = vor.u32 %v14325_v35, %v10002_v33 }
  0x76   :  { %833 = vmatpush.bf16.msra.mxu0 %v9647_v9  ;;  %v9675_v9 = vor.u32 %v14240_v4, %v9674_v3  ;;  %v14381_v45 = vld [vmem:[#allocation11 + $0x39c] sm:$0xf0] }
  0x77   :  { %846 = vmatpush.bf16.msra.mxu1 %v9775_v10  ;;  %810 = vmatpush.bf16.msrb.mxu2 %v9595_v32  ;;  %v9551_v10 = vor.u32 %v14206_v6, %v9548_v7  ;;  %v14389_v32 = vld [vmem:[#allocation11 + $0x3dc] sm:$0xf0] }
  0x78   :  { %823 = vmatpush.bf16.msrb.mxu3 %v9723_v36  ;;  %v10770_v36 = vld [vmem:[#allocation11 + $0x7c0] sm:$0xf]  ;;  %v10259_v43 = vor.u32 %v14389_v32, %v10258_v31 }
  0x79   :  { %v10738_v51 = vld [vmem:[#allocation11 + $0x780] sm:$0xf] }
  0x7a   :  { %834 = vmatpush.bf16.msra.mxu0 %v9631_v15  ;;  %v9658_v15 = vld [vmem:[#allocation8 + $0x108] sm:$0xf]  ;;  %v14509_v53 = vld [vmem:[#allocation11 + $0x79c] sm:$0xf0] }
  0x7b   :  { %847 = vmatpush.bf16.msra.mxu1 %v9759_v16  ;;  %811 = vmatpush.bf16.msrb.mxu2 %v9579_v44  ;;  %v14236_v16 = vld [vmem:[#allocation8 + $0x114] sm:$0xf0]  ;;  %v10226_v44 = vld [vmem:[#allocation11 + $0x380] sm:$0xf]  ;;  %v10739_v0 = vor.u32 %v14509_v53, %v10738_v51 }
  0x7c   :  { %824 = vmatpush.bf16.msrb.mxu3 %v9707_v48  ;;  %v9659_v22 = vor.u32 %v14236_v16, %v9658_v15  ;;  %v9970_v48 = vld [vmem:[#allocation11 + $0x180] sm:$0xf]  ;;  %v10227_v58 = vor.u32 %v14381_v45, %v10226_v44 }
  0x7d   :  { %v10482_v54 = vld [vmem:[#allocation11 + $0x580] sm:$0xf] }
  0x7e   :  { %835 = vmatpush.bf16.msra.mxu0 %v9615_v25  ;;  %v281_v25 = vld [vmem:[#allocation7] sm:$0x3]  ;;  %v14445_v55 = vld [vmem:[#allocation11 + $0x59c] sm:$0xf0] }
  0x7f   :  { %848 = vmatpush.bf16.msra.mxu1 %v9743_v28  ;;  %812 = vmatpush.bf16.msrb.mxu2 %v9563_v56  ;;  %v283_v26 = vperm.slane %v281_v25, 0  ;;  %v284_v27 = vperm.slane %v281_v25, 1  ;;  %v10194_v59 = vld [vmem:[#allocation11 + $0x340] sm:$0xf]  ;;  %v10483_v2 = vor.u32 %v14445_v55, %v10482_v54 }
  0x80   :  { %825 = vmatpush.bf16.msrb.mxu3 %v9691_v60  ;;  %v14373_v60 = vld [vmem:[#allocation11 + $0x35c] sm:$0xf0] }
  0x81   :  { %v9938_v62 = vld [vmem:[#allocation11 + $0x140] sm:$0xf]  ;;  %v10195_v6 = vor.u32 %v14373_v60, %v10194_v59 }
  0x82   :  { %836 = vmatpush.bf16.msra.mxu0 %v9599_v37  ;;  %v14517_v37 = vld [vmem:[#allocation11 + $0x7dc] sm:$0xf0] }
  0x83   :  { %849 = vmatpush.bf16.msra.mxu1 %v9727_v40  ;;  %813 = vmatpush.bf16.msrb.mxu2 %v9547_v5  ;;  %v14453_v40 = vld [vmem:[#allocation11 + $0x5dc] sm:$0xf0]  ;;  %v10771_v50 = vor.u32 %v14517_v37, %v10770_v36 }
  0x84   :  { %826 = vmatpush.bf16.msrb.mxu3 %v9675_v9  ;;  %v14309_v63 = vld [vmem:[#allocation11 + $0x15c] sm:$0xf0] }
  0x85   :  { %v14501_v3 = vld [vmem:[#allocation11 + $0x75c] sm:$0xf0]  ;;  %v9939_v9 = vor.u32 %v14309_v63, %v9938_v62  ;;  %v10260_v63 = vld [vmem:[#allocation11 + $0x3e0] sm:$0xf0] }
  0x86   :  { %837 = vmatpush.bf16.msra.mxu0 %v9583_v49  ;;  %v14317_v49 = vld [vmem:[#allocation11 + $0x19c] sm:$0xf0] }
  0x87   :  { %850 = vmatpush.bf16.msra.mxu1 %v9711_v52  ;;  %814 = vmatpush.bf16.msrb.mxu2 %v9531_v21  ;;  %v10515_v52 = vor.u32 %v14453_v40, %v10514_v39  ;;  %v10450_v4 = vld [vmem:[#allocation11 + $0x540] sm:$0xf] }
  0x88   :  { %827 = vmatpush.bf16.msrb.mxu3 %v9659_v22  ;;  %v14437_v5 = vld [vmem:[#allocation11 + $0x55c] sm:$0xf0] }
  0x89   :  { %v10162_v7 = vld [vmem:[#allocation11 + $0x300] sm:$0xf] }
  0x8a   :  { %838 = vmatpush.bf16.msra.mxu0 %v9567_v61  ;;  %v9971_v61 = vor.u32 %v14317_v49, %v9970_v48  ;;  %v14365_v8 = vld [vmem:[#allocation11 + $0x31c] sm:$0xf0] }
  0x8b   :  { %851 = vmatpush.bf16.msra.mxu1 %v9695_v1  ;;  %v10706_v1 = vld [vmem:[#allocation11 + $0x740] sm:$0xf]  ;;  %v10163_v18 = vor.u32 %v14365_v8, %v10162_v7  ;;  %v10772_v7 = vld [vmem:[#allocation11 + $0x7e0] sm:$0xf0] }
  0x8c   :  { %v14301_v11 = vld [vmem:[#allocation11 + $0x11c] sm:$0xf0]  ;;  %v10707_v12 = vor.u32 %v14501_v3, %v10706_v1  ;;  %v10004_v1 = vld [vmem:[#allocation11 + $0x1e0] sm:$0xf0] }
  0x8d   :  { %v10674_v13 = vld [vmem:[#allocation11 + $0x700] sm:$0xf] }
  0x8e   :  { %839 = vmatpush.bf16.msra.mxu0 %v9551_v10  ;;  %v9906_v10 = vld [vmem:[#allocation11 + $0x100] sm:$0xf] }
  0x8f   :  { %852 = vmatpush.bf16.msra.mxu1 %v9679_v14  ;;  %v10451_v14 = vor.u32 %v14437_v5, %v10450_v4  ;;  %v14493_v15 = vld [vmem:[#allocation11 + $0x71c] sm:$0xf0]  ;;  %v9907_v21 = vor.u32 %v14301_v11, %v9906_v10  ;;  %v10228_v11 = vld [vmem:[#allocation11 + $0x3a0] sm:$0xf0] }
  0x90   :  { %v10418_v16 = vld [vmem:[#allocation11 + $0x500] sm:$0xf] }
  0x91   :  { %v14429_v17 = vld [vmem:[#allocation11 + $0x51c] sm:$0xf0] }
  0x92   :  { %840 = vmatpush.bf16.msra.mxu0 %v9535_v23  ;;  %v10130_v19 = vld [vmem:[#allocation11 + $0x2c0] sm:$0xf] }
  0x93   :  { %853 = vmatpush.bf16.msra.mxu1 %v9663_v24  ;;  %v14357_v20 = vld [vmem:[#allocation11 + $0x2dc] sm:$0xf0]  ;;  %v10675_v24 = vor.u32 %v14493_v15, %v10674_v13  ;;  %v9972_v13 = vld [vmem:[#allocation11 + $0x1a0] sm:$0xf0] }
  0x94   :  { %v9874_v22 = vld [vmem:[#allocation11 + $0xc0] sm:$0xf] }
  0x95   :  { %v14293_v23 = vld [vmem:[#allocation11 + $0xdc] sm:$0xf0] }
  0x96   :  { %v10642_v25 = vld [vmem:[#allocation11 + $0x6c0] sm:$0xf]  ;;  %v9875_v33 = vor.u32 %v14293_v23, %v9874_v22  ;;  %v14361_v23 = vld [vmem:[#allocation11 + $0x304] sm:$0xf] }
  0x97   :  { %v10098_v31 = vld [vmem:[#allocation11 + $0x280] sm:$0xf] }
  0x98   :  { %v14349_v32 = vld [vmem:[#allocation11 + $0x29c] sm:$0xf0] }
  0x99   :  { %v14285_v35 = vld [vmem:[#allocation11 + $0x9c] sm:$0xf0] }
  0x9a   :  { %v10610_v37 = vld [vmem:[#allocation11 + $0x680] sm:$0xf] }
  0x9b   :  { %v14477_v39 = vld [vmem:[#allocation11 + $0x69c] sm:$0xf0] }
  0x9c   :  { %v10354_v40 = vld [vmem:[#allocation11 + $0x480] sm:$0xf] }
  0x9d   :  { %v10066_v44 = vld [vmem:[#allocation11 + $0x240] sm:$0xf] }
  0x9e   :  { %v14341_v45 = vld [vmem:[#allocation11 + $0x25c] sm:$0xf0] }
  0x9f   :  { %v9810_v48 = vld [vmem:[#allocation11 + $0x40] sm:$0xf]  ;;  %v10067_v55 = vor.u32 %v14341_v45, %v10066_v44  ;;  %v9876_v44 = vld [vmem:[#allocation11 + $0xe0] sm:$0xf0] }
  0xa0   :  { %v14277_v49 = vld [vmem:[#allocation11 + $0x5c] sm:$0xf0]  ;;  %v14449_v45 = vld [vmem:[#allocation11 + $0x5c4] sm:$0xf] }
  0xa1   :  { %v10578_v51 = vld [vmem:[#allocation11 + $0x640] sm:$0xf] }
  0xa2   :  { %v10322_v53 = vld [vmem:[#allocation11 + $0x440] sm:$0xf] }
  0xa3   :  { %v14405_v54 = vld [vmem:[#allocation11 + $0x45c] sm:$0xf0] }
  0xa4   :  { %v9778_v59 = vld [vmem:[#allocation11] sm:$0xf]  ;;  %v10323_v62 = vor.u32 %v14405_v54, %v10322_v53  ;;  %v10708_v53 = vld [vmem:[#allocation11 + $0x760] sm:$0xf0] }
  0xa5   :  { %v14269_v60 = vld [vmem:[#allocation11 + $0x1c] sm:$0xf0] }
  0xa6   :  { %v14461_v3 = vld [vmem:[#allocation11 + $0x61c] sm:$0xf0]  ;;  %v9779_v5 = vor.u32 %v14269_v60, %v9778_v59  ;;  %v14329_v60 = vld [vmem:[#allocation11 + $0x204] sm:$0xf] }
  0xd2   :  { %v340_v28 = vpop.f32.mrf.mxu0 }
  0xd3   :  { %v341_v29 = vadd.f32 %v340_v28, %v283_v26  ;;  %v353_v30 = vpop.f32.mrf.mxu1  ;;  %v10419_v26 = vor.u32 %v14429_v17, %v10418_v16  ;;  %v10386_v28 = vld [vmem:[#allocation11 + $0x4c0] sm:$0xf]  ;;  %v14369_v17 = vld [vmem:[#allocation11 + $0x344] sm:$0xf] }
  0xd4   :  { %v354_v34 = vadd.f32 %v353_v30, %v284_v27  ;;  %v14485_v27 = vld [vmem:[#allocation11 + $0x6dc] sm:$0xf0]  ;;  %v10131_v30 = vor.u32 %v14357_v20, %v10130_v19  ;;  %v10196_v19 = vld [vmem:[#allocation11 + $0x360] sm:$0xf0] }
  0xd5   :  { %v357_v38 = vmax.f32 %v341_v29, 0.0  ;;  %v14421_v29 = vld [vmem:[#allocation11 + $0x4dc] sm:$0xf0]  ;;  %v10643_v36 = vor.u32 %v14485_v27, %v10642_v25  ;;  %v14305_v20 = vld [vmem:[#allocation11 + $0x144] sm:$0xf]  ;;  %v10199_v22 = vor.u32 %v14369_v17, %v10196_v19 }
  0xd6   :  { %v358_v41 = vmax.f32 %v354_v34, 0.0  ;;  %v9842_v34 = vld [vmem:[#allocation11 + $0x80] sm:$0xf]  ;;  %v10164_v25 = vld [vmem:[#allocation11 + $0x320] sm:$0xf0] }
  0xd7   :  { %v15964_v42 = vpack.c.bf16 %v357_v38, %v357_v38  ;;  %v10387_v38 = vor.u32 %v14421_v29, %v10386_v28  ;;  %v9908_v27 = vld [vmem:[#allocation11 + $0x120] sm:$0xf0]  ;;  %v10167_v28 = vor.u32 %v14361_v23, %v10164_v25 }
  0xd8   :  { %v15966_v47 = vpack.c.bf16 %v358_v41, %v358_v41  ;;  %v14413_v41 = vld [vmem:[#allocation11 + $0x49c] sm:$0xf0]  ;;  %v14473_v17 = vld [vmem:[#allocation11 + $0x684] sm:$0xf] }
  0xd9   :  { %763 = vmatmul.bf16.vlgmr.msra.gmra.mxu2 %v15964_v42  ;;  %789 = vmatmul.bf16.vlgmr.msrb.gmra.mxu0 %v15964_v42  ;;  %v14465_v23 = vld [vmem:[#allocation11 + $0x644] sm:$0xf] }
  0xda   :  { %776 = vmatmul.bf16.vlgmr.msra.gmra.mxu3 %v15966_v47  ;;  %802 = vmatmul.bf16.vlgmr.msrb.gmra.mxu1 %v15966_v47  ;;  %v342_v56 = vpop.f32.mrf.mxu0 }
  0xdb   :  { %v355_v57 = vpop.f32.mrf.mxu1  ;;  %2434 = vmatpush.bf16.msra.mxu3 %v10259_v43  ;;  %2421 = vmatpush.bf16.msra.mxu2 %v10003_v46  ;;  %v10099_v43 = vor.u32 %v14349_v32, %v10098_v31  ;;  %v9843_v46 = vor.u32 %v14285_v35, %v9842_v34  ;;  %v14333_v56 = vld [vmem:[#allocation11 + $0x21c] sm:$0xf0]  ;;  %v10132_v31 = vld [vmem:[#allocation11 + $0x2e0] sm:$0xf0] }
  0xdc   :  { %2460 = vmatpush.bf16.msrb.mxu1 %v10771_v50  ;;  %2447 = vmatpush.bf16.msrb.mxu0 %v10515_v52  ;;  %v10611_v50 = vor.u32 %v14477_v39, %v10610_v37  ;;  %v14469_v52 = vld [vmem:[#allocation11 + $0x65c] sm:$0xf0]  ;;  %v9811_v57 = vor.u32 %v14277_v49, %v9810_v48  ;;  %v10100_v34 = vld [vmem:[#allocation11 + $0x2a0] sm:$0xf0] }
  0xdd   :  { %v14505_v35 = vld [vmem:[#allocation11 + $0x784] sm:$0xf]  ;;  %v14397_v39 = vld [vmem:[#allocation11 + $0x41c] sm:$0xf0] }
  0xde   :  { %v10740_v37 = vld [vmem:[#allocation11 + $0x7a0] sm:$0xf0] }
  0xdf   :  { %2435 = vmatpush.bf16.msra.mxu3 %v10227_v58  ;;  %2422 = vmatpush.bf16.msra.mxu2 %v9971_v61  ;;  %v14385_v58 = vld [vmem:[#allocation11 + $0x3c4] sm:$0xf]  ;;  %v10579_v61 = vor.u32 %v14469_v52, %v10578_v51 }
  0xe0   :  { %2461 = vmatpush.bf16.msrb.mxu1 %v10739_v0  ;;  %2448 = vmatpush.bf16.msrb.mxu0 %v10483_v2  ;;  %v14321_v0 = vld [vmem:[#allocation11 + $0x1c4] sm:$0xf]  ;;  %v10546_v2 = vld [vmem:[#allocation11 + $0x600] sm:$0xf]  ;;  %v10263_v8 = vor.u32 %v14385_v58, %v10260_v63 }
  0xe1   :  { %v10007_v10 = vor.u32 %v14321_v0, %v10004_v1  ;;  %v10516_v48 = vld [vmem:[#allocation11 + $0x5e0] sm:$0xf0] }
  0xe2   :  { %v10519_v49 = vor.u32 %v14449_v45, %v10516_v48  ;;  %v10068_v51 = vld [vmem:[#allocation11 + $0x260] sm:$0xf0]  ;;  %v14390_v48 = vld [vmem:[#allocation11 + $0x3e4] sm:$0xf0] }
  0xe3   :  { %2436 = vmatpush.bf16.msra.mxu3 %v10195_v6  ;;  %2423 = vmatpush.bf16.msra.mxu2 %v9939_v9  ;;  %v14513_v6 = vld [vmem:[#allocation11 + $0x7c4] sm:$0xf] }
  0xe4   :  { %2462 = vmatpush.bf16.msrb.mxu1 %v10707_v12  ;;  %2449 = vmatpush.bf16.msrb.mxu0 %v10451_v14  ;;  %v14377_v9 = vld [vmem:[#allocation11 + $0x384] sm:$0xf]  ;;  %v10547_v14 = vor.u32 %v14461_v3, %v10546_v2  ;;  %v10775_v15 = vor.u32 %v14513_v6, %v10772_v7 }
  0xe5   :  { %v14313_v12 = vld [vmem:[#allocation11 + $0x184] sm:$0xf]  ;;  %v10231_v16 = vor.u32 %v14377_v9, %v10228_v11 }
  0xe6   :  { %v10484_v58 = vld [vmem:[#allocation11 + $0x5a0] sm:$0xf0] }
  0xe7   :  { %2437 = vmatpush.bf16.msra.mxu3 %v10163_v18  ;;  %2424 = vmatpush.bf16.msra.mxu2 %v9907_v21  ;;  %v9975_v18 = vor.u32 %v14313_v12, %v9972_v13  ;;  %v9940_v21 = vld [vmem:[#allocation11 + $0x160] sm:$0xf0] }
  0xe8   :  { %2463 = vmatpush.bf16.msrb.mxu1 %v10675_v24  ;;  %2450 = vmatpush.bf16.msrb.mxu0 %v10419_v26  ;;  %v9943_v24 = vor.u32 %v14305_v20, %v9940_v21  ;;  %v14297_v26 = vld [vmem:[#allocation11 + $0x104] sm:$0xf] }
  0xe9   :  { %815 = vmatmul.bf16.vlgmr.msrb.gmra.mxu2 %v15964_v42  ;;  %841 = vmatmul.bf16.vlgmr.msra.gmra.mxu0 %v15964_v42  ;;  %v10355_v42 = vor.u32 %v14413_v41, %v10354_v40  ;;  %v9911_v29 = vor.u32 %v14297_v26, %v9908_v27  ;;  %v10743_v40 = vor.u32 %v14505_v35, %v10740_v37  ;;  %v14489_v63 = vld [vmem:[#allocation11 + $0x704] sm:$0xf]  ;;  %v15976_v35 = vld [vmem:[#allocation10] sm:$0xf] }
  0xea   :  { %828 = vmatmul.bf16.vlgmr.msrb.gmra.mxu3 %v15966_v47  ;;  %854 = vmatmul.bf16.vlgmr.msra.gmra.mxu1 %v15966_v47  ;;  %v10034_v47 = vld [vmem:[#allocation11 + $0x200] sm:$0xf]  ;;  %v10676_v0 = vld [vmem:[#allocation11 + $0x720] sm:$0xf0]  ;;  %v427_v45 = vperm.slane %v15976_v35, 0 }
  0xeb   :  { %2438 = vmatpush.bf16.msra.mxu3 %v10131_v30  ;;  %2425 = vmatpush.bf16.msra.mxu2 %v9875_v33  ;;  %v10035_v4 = vor.u32 %v14333_v56, %v10034_v47  ;;  %v14353_v30 = vld [vmem:[#allocation11 + $0x2c4] sm:$0xf]  ;;  %v10679_v1 = vor.u32 %v14489_v63, %v10676_v0  ;;  %v14374_v63 = vld [vmem:[#allocation11 + $0x364] sm:$0xf0] }
  0xec   :  { %2464 = vmatpush.bf16.msrb.mxu1 %v10643_v36  ;;  %2451 = vmatpush.bf16.msrb.mxu0 %v10387_v38  ;;  %v10135_v32 = vor.u32 %v14353_v30, %v10132_v31  ;;  %v14345_v33 = vld [vmem:[#allocation11 + $0x284] sm:$0xf]  ;;  %v10290_v38 = vld [vmem:[#allocation11 + $0x400] sm:$0xf] }
  0xed   :  { %v10103_v36 = vor.u32 %v14345_v33, %v10100_v34  ;;  %v10291_v41 = vor.u32 %v14397_v39, %v10290_v38  ;;  %v9844_v47 = vld [vmem:[#allocation11 + $0xa0] sm:$0xf0]  ;;  %v428_v38 = vperm.slane %v15976_v35, 1 }
  0xee   :  { %v14441_v56 = vld [vmem:[#allocation11 + $0x584] sm:$0xf] }
  0xef   :  { %2439 = vmatpush.bf16.msra.mxu3 %v10099_v43  ;;  %2426 = vmatpush.bf16.msra.mxu2 %v9843_v46  ;;  %v14289_v43 = vld [vmem:[#allocation11 + $0xc4] sm:$0xf]  ;;  %v10487_v59 = vor.u32 %v14441_v56, %v10484_v58  ;;  %v10010_v58 = vld [vmem:[#allocation11 + $0x1c8] sm:$0xf] }
  0xf0   :  { %2465 = vmatpush.bf16.msrb.mxu1 %v10611_v50  ;;  %2452 = vmatpush.bf16.msrb.mxu0 %v10355_v42  ;;  %v9879_v46 = vor.u32 %v14289_v43, %v9876_v44  ;;  %v14337_v50 = vld [vmem:[#allocation11 + $0x244] sm:$0xf] }
  0xf1   :  { %v14497_v42 = vld [vmem:[#allocation11 + $0x744] sm:$0xf]  ;;  %v10071_v52 = vor.u32 %v14337_v50, %v10068_v51 }
  0xf2   :  { %v10711_v54 = vor.u32 %v14497_v42, %v10708_v53  ;;  %v14273_v2 = vld [vmem:[#allocation11 + $0x44] sm:$0xf] }
  0xf3   :  { %2440 = vmatpush.bf16.msra.mxu3 %v10067_v55  ;;  %2427 = vmatpush.bf16.msra.mxu2 %v9811_v57  ;;  %v14281_v55 = vld [vmem:[#allocation11 + $0x84] sm:$0xf] }
  0xf4   :  { %2466 = vmatpush.bf16.msrb.mxu1 %v10579_v61  ;;  %2453 = vmatpush.bf16.msrb.mxu0 %v10323_v62  ;;  %v9847_v57 = vor.u32 %v14281_v55, %v9844_v47  ;;  %v10036_v61 = vld [vmem:[#allocation11 + $0x220] sm:$0xf0]  ;;  %v14382_v55 = vld [vmem:[#allocation11 + $0x3a4] sm:$0xf0] }
  0xf5   :  { %v10039_v62 = vor.u32 %v14329_v60, %v10036_v61  ;;  %v9812_v3 = vld [vmem:[#allocation11 + $0x60] sm:$0xf0] }
  0xf6   :  { %v10452_v6 = vld [vmem:[#allocation11 + $0x560] sm:$0xf0] }
  0xf7   :  { %2441 = vmatpush.bf16.msra.mxu3 %v10035_v4  ;;  %2428 = vmatpush.bf16.msra.mxu2 %v9779_v5  ;;  %v9815_v4 = vor.u32 %v14273_v2, %v9812_v3  ;;  %v14433_v5 = vld [vmem:[#allocation11 + $0x544] sm:$0xf]  ;;  %v430_v2 = vperm.slane %v15976_v35, 3  ;;  %v9978_v3 = vld [vmem:[#allocation11 + $0x188] sm:$0xf] }
  0xf8   :  { %2467 = vmatpush.bf16.msrb.mxu1 %v10547_v14  ;;  %2454 = vmatpush.bf16.msrb.mxu0 %v10291_v41  ;;  %v10455_v7 = vor.u32 %v14433_v5, %v10452_v6  ;;  %v10644_v9 = vld [vmem:[#allocation11 + $0x6e0] sm:$0xf0] }
  0xf9   :  { %v14265_v11 = vld [vmem:[#allocation11 + $0x4] sm:$0xf] }
  0xfa   :  { %v9780_v12 = vld [vmem:[#allocation11 + $0x20] sm:$0xf0] }
  0xfb   :  { %2486 = vmatpush.bf16.msrb.mxu3 %v10263_v8  ;;  %2473 = vmatpush.bf16.msrb.mxu2 %v10007_v10  ;;  %v14481_v8 = vld [vmem:[#allocation11 + $0x6c4] sm:$0xf]  ;;  %v9783_v14 = vor.u32 %v14265_v11, %v9780_v12 }
  0xfc   :  { %2512 = vmatpush.bf16.msra.mxu1 %v10775_v15  ;;  %2499 = vmatpush.bf16.msra.mxu0 %v10519_v49  ;;  %v10647_v10 = vor.u32 %v14481_v8, %v10644_v9  ;;  %v14425_v13 = vld [vmem:[#allocation11 + $0x504] sm:$0xf]  ;;  %v10170_v8 = vld [vmem:[#allocation11 + $0x308] sm:$0xf] }
  0xfd   :  { %v10420_v15 = vld [vmem:[#allocation11 + $0x520] sm:$0xf0]  ;;  %v14366_v9 = vld [vmem:[#allocation11 + $0x324] sm:$0xf0] }
  0xfe   :  { %v14417_v20 = vld [vmem:[#allocation11 + $0x4c4] sm:$0xf] }
  0xff   :  { %2487 = vmatpush.bf16.msrb.mxu3 %v10231_v16  ;;  %2474 = vmatpush.bf16.msrb.mxu2 %v9975_v18  ;;  %v10423_v16 = vor.u32 %v14425_v13, %v10420_v15  ;;  %v10612_v18 = vld [vmem:[#allocation11 + $0x6a0] sm:$0xf0]  ;;  %v14310_v15 = vld [vmem:[#allocation11 + $0x164] sm:$0xf0] }
 0x100   :  { %2513 = vmatpush.bf16.msra.mxu1 %v10743_v40  ;;  %2500 = vmatpush.bf16.msra.mxu0 %v10487_v59  ;;  %v10615_v19 = vor.u32 %v14473_v17, %v10612_v18  ;;  %v10388_v21 = vld [vmem:[#allocation11 + $0x4e0] sm:$0xf0]  ;;  %v14326_v59 = vld [vmem:[#allocation11 + $0x1e4] sm:$0xf0]  ;;  %v429_v17 = vperm.slane %v15976_v35, 2 }
 0x101   :  { %v14409_v26 = vld [vmem:[#allocation11 + $0x484] sm:$0xf]  ;;  %v10011_v0 = vor.u32 %v14326_v59, %v10010_v58  ;;  %v10138_v18 = vld [vmem:[#allocation11 + $0x2c8] sm:$0xf] }
 0x102   :  { %v10356_v27 = vld [vmem:[#allocation11 + $0x4a0] sm:$0xf0]  ;;  %v10746_v35 = vld [vmem:[#allocation11 + $0x788] sm:$0xf] }
 0x103   :  { %2488 = vmatpush.bf16.msrb.mxu3 %v10199_v22  ;;  %2475 = vmatpush.bf16.msrb.mxu2 %v9943_v24  ;;  %v10391_v22 = vor.u32 %v14417_v20, %v10388_v21  ;;  %v10580_v24 = vld [vmem:[#allocation11 + $0x660] sm:$0xf0]  ;;  %v14358_v20 = vld [vmem:[#allocation11 + $0x2e4] sm:$0xf0] }
 0x104   :  { %2514 = vmatpush.bf16.msra.mxu1 %v10711_v54  ;;  %2501 = vmatpush.bf16.msra.mxu0 %v10455_v7  ;;  %v10583_v25 = vor.u32 %v14465_v23, %v10580_v24  ;;  %v10548_v30 = vld [vmem:[#allocation11 + $0x620] sm:$0xf0]  ;;  %v10234_v54 = vld [vmem:[#allocation11 + $0x388] sm:$0xf] }
 0x105   :  { %v10324_v33 = vld [vmem:[#allocation11 + $0x460] sm:$0xf0]  ;;  %v10235_v60 = vor.u32 %v14382_v55, %v10234_v54  ;;  %v10778_v21 = vld [vmem:[#allocation11 + $0x7c8] sm:$0xf] }
 0x106   :  { %v10292_v37 = vld [vmem:[#allocation11 + $0x420] sm:$0xf0]  ;;  %v10490_v58 = vld [vmem:[#allocation11 + $0x588] sm:$0xf] }
 0x107   :  { %2489 = vmatpush.bf16.msrb.mxu3 %v10167_v28  ;;  %2476 = vmatpush.bf16.msrb.mxu2 %v9911_v29  ;;  %v10359_v28 = vor.u32 %v14409_v26, %v10356_v27  ;;  %v14457_v29 = vld [vmem:[#allocation11 + $0x604] sm:$0xf]  ;;  %v14302_v26 = vld [vmem:[#allocation11 + $0x124] sm:$0xf0] }
 0x108   :  { %2515 = vmatpush.bf16.msra.mxu1 %v10679_v1  ;;  %2502 = vmatpush.bf16.msra.mxu0 %v10423_v16  ;;  %v10551_v31 = vor.u32 %v14457_v29, %v10548_v30  ;;  %v10171_v16 = vor.u32 %v14366_v9, %v10170_v8  ;;  %v10106_v30 = vld [vmem:[#allocation11 + $0x288] sm:$0xf]  ;;  %v10268_v8 = vld [vmem:[#allocation11 + $0x3e8] sm:$0xf0] }
 0x109   :  { %v14446_v59 = vld [vmem:[#allocation11 + $0x5a4] sm:$0xf0] }
 0x10a   :  { %v9818_v9 = vld [vmem:[#allocation11 + $0x48] sm:$0xf] }
 0x10b   :  { %2490 = vmatpush.bf16.msrb.mxu3 %v10135_v32  ;;  %2477 = vmatpush.bf16.msrb.mxu2 %v9879_v46  ;;  %v14401_v32 = vld [vmem:[#allocation11 + $0x444] sm:$0xf]  ;;  %v10266_v46 = vld [vmem:[#allocation11 + $0x3c8] sm:$0xf] }
 0x10c   :  { %2516 = vmatpush.bf16.msra.mxu1 %v10647_v10  ;;  %2503 = vmatpush.bf16.msra.mxu0 %v10391_v22  ;;  %v10327_v34 = vor.u32 %v14401_v32, %v10324_v33  ;;  %v10267_v51 = vor.u32 %v14390_v48, %v10266_v46  ;;  %v14518_v22 = vld [vmem:[#allocation11 + $0x7e4] sm:$0xf0] }
 0x10d   :  { %v10779_v29 = vor.u32 %v14518_v22, %v10778_v21  ;;  %v10236_v21 = vld [vmem:[#allocation11 + $0x3a8] sm:$0xf0]  ;;  %v9786_v22 = vld [vmem:[#allocation11 + $0x8] sm:$0xf] }
 0x10f   :  { %2491 = vmatpush.bf16.msrb.mxu3 %v10103_v36  ;;  %2478 = vmatpush.bf16.msrb.mxu2 %v9847_v57  ;;  %v14393_v36 = vld [vmem:[#allocation11 + $0x404] sm:$0xf] }
 0x110   :  { %2517 = vmatpush.bf16.msra.mxu1 %v10615_v19  ;;  %2504 = vmatpush.bf16.msra.mxu0 %v10359_v28  ;;  %v10295_v39 = vor.u32 %v14393_v36, %v10292_v37  ;;  %v10139_v28 = vor.u32 %v14358_v20, %v10138_v18  ;;  %v14510_v36 = vld [vmem:[#allocation11 + $0x7a4] sm:$0xf0]  ;;  %v14378_v20 = vld [vmem:[#allocation11 + $0x38c] sm:$0xf] }
 0x111   :  { %v10747_v48 = vor.u32 %v14510_v36, %v10746_v35  ;;  %v14370_v35 = vld [vmem:[#allocation11 + $0x34c] sm:$0xf] }
 0x112   :  { %v10204_v36 = vld [vmem:[#allocation11 + $0x368] sm:$0xf0] }
 0x113   :  { %2492 = vmatpush.bf16.msrb.mxu3 %v10071_v52  ;;  %2479 = vmatpush.bf16.msrb.mxu2 %v9815_v4  ;;  %v14318_v4 = vld [vmem:[#allocation11 + $0x1a4] sm:$0xf0] }
 0x114   :  { %2518 = vmatpush.bf16.msra.mxu1 %v10583_v25  ;;  %2505 = vmatpush.bf16.msra.mxu0 %v10327_v34  ;;  %v9979_v11 = vor.u32 %v14318_v4, %v9978_v3  ;;  %v9914_v25 = vld [vmem:[#allocation11 + $0x108] sm:$0xf] }
 0x115   :  { %v14350_v34 = vld [vmem:[#allocation11 + $0x2a4] sm:$0xf0] }
 0x116   :  { %v10107_v46 = vor.u32 %v14350_v34, %v10106_v30  ;;  %v10682_v3 = vld [vmem:[#allocation11 + $0x708] sm:$0xf] }
 0x117   :  { %2493 = vmatpush.bf16.msrb.mxu3 %v10039_v62  ;;  %2480 = vmatpush.bf16.msrb.mxu2 %v9783_v14  ;;  %v10202_v62 = vld [vmem:[#allocation11 + $0x348] sm:$0xf] }
 0x118   :  { %2519 = vmatpush.bf16.msra.mxu1 %v10551_v31  ;;  %2506 = vmatpush.bf16.msra.mxu0 %v10295_v39  ;;  %v10203_v6 = vor.u32 %v14374_v63, %v10202_v62  ;;  %v9946_v14 = vld [vmem:[#allocation11 + $0x148] sm:$0xf] }
 0x119   :  { %v9947_v23 = vor.u32 %v14310_v15, %v9946_v14  ;;  %v9882_v39 = vld [vmem:[#allocation11 + $0xc8] sm:$0xf] }
 0x11a   :  { %v10042_v63 = vld [vmem:[#allocation11 + $0x208] sm:$0xf] }
 0x11b   :  { %v14494_v4 = vld [vmem:[#allocation11 + $0x724] sm:$0xf0] }
 0x11c   :  { %v10683_v14 = vor.u32 %v14494_v4, %v10682_v3  ;;  %v10618_v30 = vld [vmem:[#allocation11 + $0x688] sm:$0xf] }
 0x11d   :  { %v10330_v3 = vld [vmem:[#allocation11 + $0x448] sm:$0xf] }
 0x11e   :  { %v14406_v4 = vld [vmem:[#allocation11 + $0x464] sm:$0xf0] }
 0x156   :  { %v790_v40 = vpop.f32.mrf.mxu0 }
 0x157   :  { %v791_v41 = vadd.f32 %v790_v40, %v428_v38  ;;  %v803_v43 = vpop.f32.mrf.mxu1  ;;  %v9915_v38 = vor.u32 %v14302_v26, %v9914_v25  ;;  %v14430_v25 = vld [vmem:[#allocation11 + $0x524] sm:$0xf0] }
 0x159   :  { %v804_v44 = vadd.f32 %v803_v43, %v791_v41  ;;  %v14294_v43 = vld [vmem:[#allocation11 + $0xe4] sm:$0xf0] }
 0x15a   :  { %v9883_v54 = vor.u32 %v14294_v43, %v9882_v39  ;;  %v14422_v39 = vld [vmem:[#allocation11 + $0x4e4] sm:$0xf0]  ;;  %v9980_v43 = vld [vmem:[#allocation11 + $0x1a8] sm:$0xf0] }
 0x15b   :  { %v860_v49 = vmax.f32 %v804_v44, 0.0  ;;  %v10522_v44 = vld [vmem:[#allocation11 + $0x5c8] sm:$0xf] }
 0x15c   :  { %v764_v50 = vpop.f32.mrf.mxu2 }
 0x15d   :  { %v15980_v42 = vpack.c.bf16 %v860_v49, %v860_v49  ;;  %v765_v52 = vadd.f32 %v764_v50, %v427_v45  ;;  %v777_v53 = vpop.f32.mrf.mxu3  ;;  %v14454_v45 = vld [vmem:[#allocation11 + $0x5e4] sm:$0xf0] }
 0x15e   :  { %v792_v47 = vpop.f32.mrf.mxu0  ;;  %v10074_v49 = vld [vmem:[#allocation11 + $0x248] sm:$0xf]  ;;  %v10523_v55 = vor.u32 %v14454_v45, %v10522_v44  ;;  %v10207_v44 = vor.u32 %v14370_v35, %v10204_v36  ;;  %v10492_v35 = vld [vmem:[#allocation11 + $0x5a8] sm:$0xf0] }
 0x15f   :  { %v778_v56 = vadd.f32 %v777_v53, %v765_v52  ;;  %v805_v57 = vpop.f32.mrf.mxu1  ;;  %2442 = vmatmul.bf16.vlgmr.msra.gmra.mxu3 %v15980_v42  ;;  %v14342_v50 = vld [vmem:[#allocation11 + $0x264] sm:$0xf0] }
 0x160   :  { %2538 = vmatpush.bf16.msra.mxu3 %v10267_v51  ;;  %v10714_v52 = vld [vmem:[#allocation11 + $0x748] sm:$0xf] }
 0x161   :  { %v859_v61 = vmax.f32 %v778_v56, 0.0  ;;  %v14502_v53 = vld [vmem:[#allocation11 + $0x764] sm:$0xf0] }
 0x162   :  { %v9850_v47 = vld [vmem:[#allocation11 + $0x88] sm:$0xf]  ;;  %v10715_v62 = vor.u32 %v14502_v53, %v10714_v52 }
 0x163   :  { %v15983_v1 = vpack.c.bf16 %v859_v61, %v859_v61  ;;  %v14286_v57 = vld [vmem:[#allocation11 + $0xa4] sm:$0xf0]  ;;  %v10075_v61 = vor.u32 %v14342_v50, %v10074_v49  ;;  %v14362_v49 = vld [vmem:[#allocation11 + $0x30c] sm:$0xf] }
 0x164   :  { %2539 = vmatpush.bf16.msra.mxu3 %v10235_v60  ;;  %v766_v5 = vpop.f32.mrf.mxu2  ;;  %v10586_v45 = vld [vmem:[#allocation11 + $0x648] sm:$0xf]  ;;  %v10172_v50 = vld [vmem:[#allocation11 + $0x328] sm:$0xf0] }
 0x165   :  { %v779_v7 = vpop.f32.mrf.mxu3  ;;  %2429 = vmatmul.bf16.vlgmr.msra.gmra.mxu2 %v15983_v1  ;;  %v9851_v5 = vor.u32 %v14286_v57, %v9850_v47  ;;  %v10362_v52 = vld [vmem:[#allocation11 + $0x488] sm:$0xf]  ;;  %v9948_v47 = vld [vmem:[#allocation11 + $0x168] sm:$0xf0]  ;;  %v10175_v57 = vor.u32 %v14362_v49, %v10172_v50 }
 0x166   :  { %2525 = vmatpush.bf16.msra.mxu2 %v10011_v0  ;;  %v842_v10 = vpop.f32.mrf.mxu0  ;;  %v14386_v7 = vld [vmem:[#allocation11 + $0x3cc] sm:$0xf]  ;;  %v14414_v53 = vld [vmem:[#allocation11 + $0x4a4] sm:$0xf0] }
 0x167   :  { %v843_v12 = vadd.f32 %v842_v10, %v430_v2  ;;  %v855_v13 = vpop.f32.mrf.mxu1  ;;  %v14334_v2 = vld [vmem:[#allocation11 + $0x224] sm:$0xf0]  ;;  %v10271_v15 = vor.u32 %v14386_v7, %v10268_v8  ;;  %v9916_v7 = vld [vmem:[#allocation11 + $0x128] sm:$0xf0] }
 0x168   :  { %2540 = vmatpush.bf16.msra.mxu3 %v10203_v6  ;;  %v10491_v6 = vor.u32 %v14446_v59, %v10490_v58  ;;  %v14278_v10 = vld [vmem:[#allocation11 + $0x64] sm:$0xf0]  ;;  %v9820_v49 = vld [vmem:[#allocation11 + $0x68] sm:$0xf0] }
 0x169   :  { %v856_v19 = vadd.f32 %v855_v13, %v843_v12  ;;  %v14438_v12 = vld [vmem:[#allocation11 + $0x564] sm:$0xf0]  ;;  %v10043_v13 = vor.u32 %v14334_v2, %v10042_v63  ;;  %v9819_v18 = vor.u32 %v14278_v10, %v9818_v9  ;;  %v14514_v63 = vld [vmem:[#allocation11 + $0x7cc] sm:$0xf] }
 0x16a   :  { %2526 = vmatpush.bf16.msra.mxu2 %v9979_v11  ;;  %v10458_v11 = vld [vmem:[#allocation11 + $0x548] sm:$0xf]  ;;  %v14346_v10 = vld [vmem:[#allocation11 + $0x28c] sm:$0xf] }
 0x16b   :  { %v862_v24 = vmax.f32 %v856_v19, 0.0  ;;  %v10459_v19 = vor.u32 %v14438_v12, %v10458_v11  ;;  %v10554_v58 = vld [vmem:[#allocation11 + $0x608] sm:$0xf]  ;;  %v10331_v11 = vor.u32 %v14406_v4, %v10330_v3  ;;  %v10108_v12 = vld [vmem:[#allocation11 + $0x2a8] sm:$0xf0] }
 0x16c   :  { %2541 = vmatpush.bf16.msra.mxu3 %v10171_v16  ;;  %v816_v27 = vpop.f32.mrf.mxu2  ;;  %v10650_v16 = vld [vmem:[#allocation11 + $0x6c8] sm:$0xf]  ;;  %v14434_v50 = vld [vmem:[#allocation11 + $0x54c] sm:$0xf]  ;;  %v10018_v3 = vld [vmem:[#allocation11 + $0x1d0] sm:$0xf] }
 0x16d   :  { %v15988_v31 = vpack.c.bf16 %v862_v24, %v862_v24  ;;  %v817_v32 = vadd.f32 %v816_v27, %v429_v17  ;;  %v829_v33 = vpop.f32.mrf.mxu3  ;;  %v14486_v17 = vld [vmem:[#allocation11 + $0x6e4] sm:$0xf0]  ;;  %v14322_v27 = vld [vmem:[#allocation11 + $0x1cc] sm:$0xf]  ;;  %v14327_v4 = vld [vmem:[#allocation11 + $0x1ec] sm:$0xf0] }
 0x16e   :  { %2527 = vmatpush.bf16.msra.mxu2 %v9947_v23  ;;  %v844_v37 = vpop.f32.mrf.mxu0  ;;  %v14270_v23 = vld [vmem:[#allocation11 + $0x24] sm:$0xf0]  ;;  %v10651_v26 = vor.u32 %v14486_v17, %v10650_v16 }
 0x16f   :  { %v830_v40 = vadd.f32 %v829_v33, %v817_v32  ;;  %v857_v41 = vpop.f32.mrf.mxu1  ;;  %2468 = vmatmul.bf16.vlgmr.msrb.gmra.mxu1 %v15988_v31  ;;  %2494 = vmatmul.bf16.vlgmr.msrb.gmra.mxu3 %v15980_v42  ;;  %v10426_v24 = vld [vmem:[#allocation11 + $0x508] sm:$0xf]  ;;  %v9787_v33 = vor.u32 %v14270_v23, %v9786_v22  ;;  %v10111_v22 = vor.u32 %v14346_v10, %v10108_v12  ;;  %v10210_v10 = vld [vmem:[#allocation11 + $0x350] sm:$0xf] }
 0x170   :  { %2542 = vmatpush.bf16.msra.mxu3 %v10139_v28  ;;  %2564 = vmatpush.bf16.msrb.mxu1 %v10779_v29  ;;  %v10012_v28 = vld [vmem:[#allocation11 + $0x1e8] sm:$0xf0]  ;;  %v10239_v29 = vor.u32 %v14378_v20, %v10236_v21  ;;  %v14478_v32 = vld [vmem:[#allocation11 + $0x6a4] sm:$0xf0]  ;;  %v10427_v34 = vor.u32 %v14430_v25, %v10426_v24  ;;  %v10019_v12 = vor.u32 %v14327_v4, %v10018_v3 }
 0x171   :  { %v861_v51 = vmax.f32 %v830_v40, 0.0  ;;  %v10015_v37 = vor.u32 %v14322_v27, %v10012_v28  ;;  %v10619_v40 = vor.u32 %v14478_v32, %v10618_v30  ;;  %v14314_v41 = vld [vmem:[#allocation11 + $0x18c] sm:$0xf]  ;;  %v14462_v59 = vld [vmem:[#allocation11 + $0x624] sm:$0xf0] }
 0x172   :  { %2528 = vmatpush.bf16.msra.mxu2 %v9915_v38  ;;  %v10394_v38 = vld [vmem:[#allocation11 + $0x4c8] sm:$0xf]  ;;  %v14450_v20 = vld [vmem:[#allocation11 + $0x5cc] sm:$0xf] }
 0x173   :  { %v15992_v56 = vpack.c.bf16 %v861_v51, %v861_v51  ;;  %v9983_v51 = vor.u32 %v14314_v41, %v9980_v43  ;;  %v10298_v16 = vld [vmem:[#allocation11 + $0x408] sm:$0xf]  ;;  %v10524_v21 = vld [vmem:[#allocation11 + $0x5e8] sm:$0xf0] }
 0x174   :  { %2543 = vmatpush.bf16.msra.mxu3 %v10107_v46  ;;  %2565 = vmatpush.bf16.msrb.mxu1 %v10747_v48  ;;  %v818_v60 = vpop.f32.mrf.mxu2  ;;  %v14470_v46 = vld [vmem:[#allocation11 + $0x664] sm:$0xf0]  ;;  %v10395_v48 = vor.u32 %v14422_v39, %v10394_v38  ;;  %v14338_v24 = vld [vmem:[#allocation11 + $0x24c] sm:$0xf]  ;;  %v10527_v30 = vor.u32 %v14450_v20, %v10524_v21 }
 0x175   :  { %v831_v0 = vpop.f32.mrf.mxu3  ;;  %2455 = vmatmul.bf16.vlgmr.msrb.gmra.mxu0 %v15992_v56  ;;  %2481 = vmatmul.bf16.vlgmr.msrb.gmra.mxu2 %v15983_v1  ;;  %v14354_v60 = vld [vmem:[#allocation11 + $0x2cc] sm:$0xf]  ;;  %v14398_v17 = vld [vmem:[#allocation11 + $0x424] sm:$0xf0] }
 0x176   :  { %2529 = vmatpush.bf16.msra.mxu2 %v9883_v54  ;;  %2551 = vmatpush.bf16.msrb.mxu0 %v10523_v55  ;;  %v10587_v54 = vor.u32 %v14470_v46, %v10586_v45  ;;  %v14306_v55 = vld [vmem:[#allocation11 + $0x14c] sm:$0xf]  ;;  %v10299_v25 = vor.u32 %v14398_v17, %v10298_v16  ;;  %v10274_v45 = vld [vmem:[#allocation11 + $0x3d0] sm:$0xf] }
 0x177   :  { %v10780_v0 = vld [vmem:[#allocation11 + $0x7e8] sm:$0xf0]  ;;  %v9951_v2 = vor.u32 %v14306_v55, %v9948_v47  ;;  %v14391_v46 = vld [vmem:[#allocation11 + $0x3ec] sm:$0xf0] }
 0x178   :  { %2544 = vmatpush.bf16.msra.mxu3 %v10075_v61  ;;  %2566 = vmatpush.bf16.msrb.mxu1 %v10715_v62  ;;  %v10363_v61 = vor.u32 %v14414_v53, %v10362_v52  ;;  %v10140_v62 = vld [vmem:[#allocation11 + $0x2e8] sm:$0xf0]  ;;  %v10783_v9 = vor.u32 %v14514_v63, %v10780_v0  ;;  %v9986_v16 = vld [vmem:[#allocation11 + $0x190] sm:$0xf] }
 0x179   :  { %v10143_v8 = vor.u32 %v14354_v60, %v10140_v62  ;;  %v14498_v27 = vld [vmem:[#allocation11 + $0x74c] sm:$0xf]  ;;  %v14383_v60 = vld [vmem:[#allocation11 + $0x3ac] sm:$0xf0] }
 0x17a   :  { %2530 = vmatpush.bf16.msra.mxu2 %v9851_v5  ;;  %2552 = vmatpush.bf16.msrb.mxu0 %v10491_v6  ;;  %v10555_v5 = vor.u32 %v14462_v59, %v10554_v58  ;;  %v14298_v6 = vld [vmem:[#allocation11 + $0x10c] sm:$0xf]  ;;  %v10242_v59 = vld [vmem:[#allocation11 + $0x390] sm:$0xf] }
 0x17b   :  { %v10716_v28 = vld [vmem:[#allocation11 + $0x768] sm:$0xf0]  ;;  %v14319_v17 = vld [vmem:[#allocation11 + $0x1ac] sm:$0xf0] }
 0x17c   :  { %2545 = vmatpush.bf16.msra.mxu3 %v10043_v13  ;;  %2567 = vmatpush.bf16.msrb.mxu1 %v10683_v14  ;;  %v14506_v13 = vld [vmem:[#allocation11 + $0x78c] sm:$0xf] }
 0x17d   :  { %v10748_v14 = vld [vmem:[#allocation11 + $0x7a8] sm:$0xf0] }
 0x17e   :  { %2531 = vmatpush.bf16.msra.mxu2 %v9819_v18  ;;  %2553 = vmatpush.bf16.msrb.mxu0 %v10459_v19  ;;  %v14290_v18 = vld [vmem:[#allocation11 + $0xcc] sm:$0xf]  ;;  %v10751_v23 = vor.u32 %v14506_v13, %v10748_v14 }
 0x17f   :  { %2520 = vmatmul.bf16.vlgmr.msra.gmra.mxu1 %v15988_v31  ;;  %2546 = vmatmul.bf16.vlgmr.msra.gmra.mxu3 %v15980_v42  ;;  %v9884_v19 = vld [vmem:[#allocation11 + $0xe8] sm:$0xf0] }
 0x180   :  { %2590 = vmatpush.bf16.msrb.mxu3 %v10271_v15  ;;  %2568 = vmatpush.bf16.msrb.mxu1 %v10651_v26  ;;  %v9919_v15 = vor.u32 %v14298_v6, %v9916_v7  ;;  %v10076_v26 = vld [vmem:[#allocation11 + $0x268] sm:$0xf0] }
 0x181   :  { %v14282_v32 = vld [vmem:[#allocation11 + $0x8c] sm:$0xf]  ;;  %v10079_v36 = vor.u32 %v14338_v24, %v10076_v26  ;;  %v9987_v24 = vor.u32 %v14319_v17, %v9986_v16  ;;  %v14495_v16 = vld [vmem:[#allocation11 + $0x72c] sm:$0xf0] }
 0x182   :  { %2532 = vmatpush.bf16.msra.mxu2 %v9787_v33  ;;  %2554 = vmatpush.bf16.msrb.mxu0 %v10427_v34  ;;  %v9852_v33 = vld [vmem:[#allocation11 + $0xa8] sm:$0xf0] }
 0x183   :  { %v14442_v34 = vld [vmem:[#allocation11 + $0x58c] sm:$0xf]  ;;  %v9855_v43 = vor.u32 %v14282_v32, %v9852_v33 }
 0x184   :  { %2591 = vmatpush.bf16.msrb.mxu3 %v10239_v29  ;;  %2569 = vmatpush.bf16.msrb.mxu1 %v10619_v40  ;;  %v9887_v29 = vor.u32 %v14290_v18, %v9884_v19  ;;  %v14330_v38 = vld [vmem:[#allocation11 + $0x20c] sm:$0xf] }
 0x185   :  { %2507 = vmatmul.bf16.vlgmr.msra.gmra.mxu0 %v15992_v56  ;;  %2533 = vmatmul.bf16.vlgmr.msra.gmra.mxu2 %v15983_v1  ;;  %v10044_v39 = vld [vmem:[#allocation11 + $0x228] sm:$0xf0] }
 0x186   :  { %2577 = vmatpush.bf16.msrb.mxu2 %v10015_v37  ;;  %2555 = vmatpush.bf16.msrb.mxu0 %v10395_v48  ;;  %v10719_v37 = vor.u32 %v14498_v27, %v10716_v28  ;;  %v14490_v40 = vld [vmem:[#allocation11 + $0x70c] sm:$0xf]  ;;  %v10047_v52 = vor.u32 %v14330_v38, %v10044_v39  ;;  %v9954_v28 = vld [vmem:[#allocation11 + $0x150] sm:$0xf] }
 0x187   :  { %v10684_v41 = vld [vmem:[#allocation11 + $0x728] sm:$0xf0]  ;;  %v14519_v38 = vld [vmem:[#allocation11 + $0x7ec] sm:$0xf0] }
 0x188   :  { %2592 = vmatpush.bf16.msrb.mxu3 %v10207_v44  ;;  %2570 = vmatpush.bf16.msrb.mxu1 %v10587_v54  ;;  %v10495_v44 = vor.u32 %v14442_v34, %v10492_v35  ;;  %v14274_v48 = vld [vmem:[#allocation11 + $0x4c] sm:$0xf]  ;;  %v10687_v53 = vor.u32 %v14490_v40, %v10684_v41  ;;  %v10275_v54 = vor.u32 %v14391_v46, %v10274_v45  ;;  %v10146_v34 = vld [vmem:[#allocation11 + $0x2d0] sm:$0xf] }
 0x189   :  { %v14482_v55 = vld [vmem:[#allocation11 + $0x6cc] sm:$0xf]  ;;  %v14303_v45 = vld [vmem:[#allocation11 + $0x12c] sm:$0xf0] }
 0x18a   :  { %2578 = vmatpush.bf16.msrb.mxu2 %v9983_v51  ;;  %2556 = vmatpush.bf16.msrb.mxu0 %v10363_v61  ;;  %v10460_v51 = vld [vmem:[#allocation11 + $0x568] sm:$0xf0] }
 0x18b   :  { %v10652_v47 = vld [vmem:[#allocation11 + $0x6e8] sm:$0xf0]  ;;  %v10463_v58 = vor.u32 %v14434_v50, %v10460_v51  ;;  %v14351_v51 = vld [vmem:[#allocation11 + $0x2ac] sm:$0xf0] }
 0x18c   :  { %2593 = vmatpush.bf16.msrb.mxu3 %v10175_v57  ;;  %2571 = vmatpush.bf16.msrb.mxu1 %v10555_v5  ;;  %v9823_v57 = vor.u32 %v14274_v48, %v9820_v49  ;;  %v14266_v61 = vld [vmem:[#allocation11 + $0xc] sm:$0xf]  ;;  %v10243_v5 = vor.u32 %v14383_v60, %v10242_v59  ;;  %v10114_v49 = vld [vmem:[#allocation11 + $0x290] sm:$0xf] }
 0x18d   :  { %v9788_v62 = vld [vmem:[#allocation11 + $0x28] sm:$0xf0]  ;;  %v10530_v59 = vld [vmem:[#allocation11 + $0x5d0] sm:$0xf] }
 0x18e   :  { %2579 = vmatpush.bf16.msrb.mxu2 %v9951_v2  ;;  %2557 = vmatpush.bf16.msrb.mxu0 %v10331_v11  ;;  %v14426_v63 = vld [vmem:[#allocation11 + $0x50c] sm:$0xf]  ;;  %v10655_v2 = vor.u32 %v14482_v55, %v10652_v47  ;;  %v14375_v11 = vld [vmem:[#allocation11 + $0x36c] sm:$0xf0] }
 0x18f   :  { %2572 = vmatmul.bf16.vlgmr.msrb.gmra.mxu1 %v15988_v31  ;;  %v10428_v0 = vld [vmem:[#allocation11 + $0x528] sm:$0xf0]  ;;  %v10211_v18 = vor.u32 %v14375_v11, %v10210_v10  ;;  %v14455_v60 = vld [vmem:[#allocation11 + $0x5ec] sm:$0xf0] }
 0x190   :  { %2594 = vmatpush.bf16.msrb.mxu3 %v10143_v8  ;;  %2616 = vmatpush.bf16.msra.mxu1 %v10783_v9  ;;  %v14474_v6 = vld [vmem:[#allocation11 + $0x68c] sm:$0xf]  ;;  %v9791_v8 = vor.u32 %v14266_v61, %v9788_v62  ;;  %v10431_v9 = vor.u32 %v14426_v63, %v10428_v0  ;;  %v10115_v61 = vor.u32 %v14351_v51, %v10114_v49  ;;  %v10082_v0 = vld [vmem:[#allocation11 + $0x250] sm:$0xf]  ;;  %v14371_v49 = vld [vmem:[#allocation11 + $0x354] sm:$0xf] }
 0x191   :  { %v10620_v7 = vld [vmem:[#allocation11 + $0x6a8] sm:$0xf0]  ;;  %v10531_v4 = vor.u32 %v14455_v60, %v10530_v59  ;;  %v14447_v10 = vld [vmem:[#allocation11 + $0x5ac] sm:$0xf0]  ;;  %v10212_v51 = vld [vmem:[#allocation11 + $0x370] sm:$0xf0] }
 0x192   :  { %2580 = vmatpush.bf16.msrb.mxu2 %v9919_v15  ;;  %2558 = vmatpush.bf16.msrb.mxu0 %v10299_v25  ;;  %v14418_v13 = vld [vmem:[#allocation11 + $0x4cc] sm:$0xf]  ;;  %v10623_v15 = vor.u32 %v14474_v6, %v10620_v7  ;;  %v14503_v6 = vld [vmem:[#allocation11 + $0x76c] sm:$0xf0] }
 0x193   :  { %v10396_v14 = vld [vmem:[#allocation11 + $0x4e8] sm:$0xf0]  ;;  %v9858_v7 = vld [vmem:[#allocation11 + $0x90] sm:$0xf] }
 0x194   :  { %2595 = vmatpush.bf16.msrb.mxu3 %v10111_v22  ;;  %2617 = vmatpush.bf16.msra.mxu1 %v10751_v23  ;;  %v14466_v19 = vld [vmem:[#allocation11 + $0x64c] sm:$0xf]  ;;  %v10399_v21 = vor.u32 %v14418_v13, %v10396_v14  ;;  %v10178_v22 = vld [vmem:[#allocation11 + $0x310] sm:$0xf] }
 0x195   :  { %2559 = vmatmul.bf16.vlgmr.msrb.gmra.mxu0 %v15992_v56  ;;  %v10588_v20 = vld [vmem:[#allocation11 + $0x668] sm:$0xf0]  ;;  %v14367_v23 = vld [vmem:[#allocation11 + $0x32c] sm:$0xf0] }
 0x196   :  { %2581 = vmatpush.bf16.msrb.mxu2 %v9887_v29  ;;  %2603 = vmatpush.bf16.msra.mxu0 %v10527_v30  ;;  %v14410_v25 = vld [vmem:[#allocation11 + $0x48c] sm:$0xf]  ;;  %v10591_v27 = vor.u32 %v14466_v19, %v10588_v20  ;;  %v14311_v29 = vld [vmem:[#allocation11 + $0x16c] sm:$0xf0]  ;;  %v10179_v30 = vor.u32 %v14367_v23, %v10178_v22  ;;  %v14387_v19 = vld [vmem:[#allocation11 + $0x3d4] sm:$0xf] }
 0x197   :  { %v10364_v26 = vld [vmem:[#allocation11 + $0x4a8] sm:$0xf0]  ;;  %v9955_v39 = vor.u32 %v14311_v29, %v9954_v28  ;;  %v14335_v14 = vld [vmem:[#allocation11 + $0x22c] sm:$0xf0]  ;;  %v10276_v20 = vld [vmem:[#allocation11 + $0x3f0] sm:$0xf0] }
 0x198   :  { %2596 = vmatpush.bf16.msrb.mxu3 %v10079_v36  ;;  %2618 = vmatpush.bf16.msra.mxu1 %v10719_v37  ;;  %v14458_v32 = vld [vmem:[#allocation11 + $0x60c] sm:$0xf]  ;;  %v10367_v35 = vor.u32 %v14410_v25, %v10364_v26  ;;  %v14359_v36 = vld [vmem:[#allocation11 + $0x2ec] sm:$0xf0] }
 0x199   :  { %v10556_v33 = vld [vmem:[#allocation11 + $0x628] sm:$0xf0]  ;;  %v10786_v37 = vld [vmem:[#allocation11 + $0x7d0] sm:$0xf]  ;;  %v10147_v46 = vor.u32 %v14359_v36, %v10146_v34  ;;  %v10244_v34 = vld [vmem:[#allocation11 + $0x3b0] sm:$0xf0] }
 0x19a   :  { %2582 = vmatpush.bf16.msrb.mxu2 %v9855_v43  ;;  %2604 = vmatpush.bf16.msra.mxu0 %v10495_v44  ;;  %v14402_v40 = vld [vmem:[#allocation11 + $0x44c] sm:$0xf]  ;;  %v10559_v43 = vor.u32 %v14458_v32, %v10556_v33  ;;  %v9922_v44 = vld [vmem:[#allocation11 + $0x110] sm:$0xf]  ;;  %v10787_v48 = vor.u32 %v14519_v38, %v10786_v37  ;;  %v14379_v33 = vld [vmem:[#allocation11 + $0x394] sm:$0xf] }
 0x19b   :  { %v10332_v41 = vld [vmem:[#allocation11 + $0x468] sm:$0xf0]  ;;  %v14279_v22 = vld [vmem:[#allocation11 + $0x6c] sm:$0xf0] }
 0x19c   :  { %2597 = vmatpush.bf16.msrb.mxu3 %v10047_v52  ;;  %2619 = vmatpush.bf16.msra.mxu1 %v10687_v53  ;;  %v10335_v50 = vor.u32 %v14402_v40, %v10332_v41  ;;  %v10754_v52 = vld [vmem:[#allocation11 + $0x790] sm:$0xf]  ;;  %v14394_v55 = vld [vmem:[#allocation11 + $0x40c] sm:$0xf]  ;;  %v10020_v40 = vld [vmem:[#allocation11 + $0x1f0] sm:$0xf0] }
 0x19d   :  { %v14511_v53 = vld [vmem:[#allocation11 + $0x7ac] sm:$0xf0]  ;;  %v10300_v47 = vld [vmem:[#allocation11 + $0x428] sm:$0xf0] }
 0x19e   :  { %2583 = vmatpush.bf16.msrb.mxu2 %v9823_v57  ;;  %2605 = vmatpush.bf16.msra.mxu0 %v10463_v58  ;;  %v9890_v57 = vld [vmem:[#allocation11 + $0xd0] sm:$0xf]  ;;  %v10755_v62 = vor.u32 %v14511_v53, %v10754_v52  ;;  %v10303_v63 = vor.u32 %v14394_v55, %v10300_v47  ;;  %v9988_v55 = vld [vmem:[#allocation11 + $0x1b0] sm:$0xf0] }
 0x19f   :  { %2598 = vmatmul.bf16.vlgmr.msrb.gmra.mxu3 %v15980_v42  ;;  %v14295_v58 = vld [vmem:[#allocation11 + $0xec] sm:$0xf0] }
 0x1a0   :  { %2642 = vmatpush.bf16.msra.mxu3 %v10275_v54  ;;  %2620 = vmatpush.bf16.msra.mxu1 %v10655_v2  ;;  %v9923_v54 = vor.u32 %v14303_v45, %v9922_v44  ;;  %v14343_v2 = vld [vmem:[#allocation11 + $0x26c] sm:$0xf0]  ;;  %v9891_v3 = vor.u32 %v14295_v58, %v9890_v57  ;;  %v10215_v57 = vor.u32 %v14371_v49, %v10212_v51  ;;  %v10500_v49 = vld [vmem:[#allocation11 + $0x5b0] sm:$0xf0] }
 0x1a1   :  { %v10083_v11 = vor.u32 %v14343_v2, %v10082_v0  ;;  %v10466_v23 = vld [vmem:[#allocation11 + $0x550] sm:$0xf]  ;;  %v14331_v51 = vld [vmem:[#allocation11 + $0x214] sm:$0xf] }
 0x1a2   :  { %2584 = vmatpush.bf16.msrb.mxu2 %v9791_v8  ;;  %2606 = vmatpush.bf16.msra.mxu0 %v10431_v9  ;;  %v14287_v8 = vld [vmem:[#allocation11 + $0xac] sm:$0xf0] }
 0x1a3   :  { %v10498_v9 = vld [vmem:[#allocation11 + $0x590] sm:$0xf]  ;;  %v9859_v17 = vor.u32 %v14287_v8, %v9858_v7 }
 0x1a4   :  { %2643 = vmatpush.bf16.msra.mxu3 %v10243_v5  ;;  %2621 = vmatpush.bf16.msra.mxu1 %v10623_v15  ;;  %v10722_v5 = vld [vmem:[#allocation11 + $0x750] sm:$0xf] }
 0x1a5   :  { %2585 = vmatmul.bf16.vlgmr.msrb.gmra.mxu2 %v15983_v1  ;;  %v10723_v13 = vor.u32 %v14503_v6, %v10722_v5  ;;  %v10690_v15 = vld [vmem:[#allocation11 + $0x710] sm:$0xf] }
 0x1a6   :  { %2629 = vmatpush.bf16.msra.mxu2 %v10019_v12  ;;  %2607 = vmatpush.bf16.msra.mxu0 %v10399_v21  ;;  %v10050_v12 = vld [vmem:[#allocation11 + $0x210] sm:$0xf]  ;;  %v10691_v26 = vor.u32 %v14495_v16, %v10690_v15 }
 0x1a7   :  { %v9826_v21 = vld [vmem:[#allocation11 + $0x50] sm:$0xf]  ;;  %v10051_v25 = vor.u32 %v14335_v14, %v10050_v12  ;;  %v10788_v14 = vld [vmem:[#allocation11 + $0x7f0] sm:$0xf0] }
 0x1a8   :  { %2644 = vmatpush.bf16.msra.mxu3 %v10211_v18  ;;  %2622 = vmatpush.bf16.msra.mxu1 %v10591_v27  ;;  %v10499_v18 = vor.u32 %v14447_v10, %v10498_v9  ;;  %v10279_v27 = vor.u32 %v14387_v19, %v10276_v20  ;;  %v10658_v28 = vld [vmem:[#allocation11 + $0x6d0] sm:$0xf]  ;;  %v14355_v10 = vld [vmem:[#allocation11 + $0x2d4] sm:$0xf] }
 0x1a9   :  { %v14487_v29 = vld [vmem:[#allocation11 + $0x6ec] sm:$0xf0] }
 0x1aa   :  { %2630 = vmatpush.bf16.msra.mxu2 %v9987_v24  ;;  %2608 = vmatpush.bf16.msra.mxu0 %v10367_v35  ;;  %v14439_v24 = vld [vmem:[#allocation11 + $0x56c] sm:$0xf0]  ;;  %v10659_v41 = vor.u32 %v14487_v29, %v10658_v28 }
 0x1ab   :  { %v10467_v32 = vor.u32 %v14439_v24, %v10466_v23  ;;  %v9794_v35 = vld [vmem:[#allocation11 + $0x10] sm:$0xf]  ;;  %v10116_v23 = vld [vmem:[#allocation11 + $0x2b0] sm:$0xf0] }
 0x1ac   :  { %2645 = vmatpush.bf16.msra.mxu3 %v10179_v30  ;;  %2623 = vmatpush.bf16.msra.mxu1 %v10559_v43  ;;  %v9827_v30 = vor.u32 %v14279_v22, %v9826_v21  ;;  %v14271_v36 = vld [vmem:[#allocation11 + $0x2c] sm:$0xf0]  ;;  %v10247_v43 = vor.u32 %v14379_v33, %v10244_v34  ;;  %v14347_v22 = vld [vmem:[#allocation11 + $0x294] sm:$0xf] }
 0x1ad   :  { %v10434_v37 = vld [vmem:[#allocation11 + $0x510] sm:$0xf]  ;;  %v9795_v44 = vor.u32 %v14271_v36, %v9794_v35  ;;  %v14451_v33 = vld [vmem:[#allocation11 + $0x5d4] sm:$0xf]  ;;  %v10119_v35 = vor.u32 %v14347_v22, %v10116_v23  ;;  %v10218_v22 = vld [vmem:[#allocation11 + $0x358] sm:$0xf] }
 0x1ae   :  { %2631 = vmatpush.bf16.msra.mxu2 %v9955_v39  ;;  %2609 = vmatpush.bf16.msra.mxu0 %v10335_v50  ;;  %v14431_v38 = vld [vmem:[#allocation11 + $0x52c] sm:$0xf0]  ;;  %v14323_v39 = vld [vmem:[#allocation11 + $0x1d4] sm:$0xf] }
 0x1af   :  { %2624 = vmatmul.bf16.vlgmr.msra.gmra.mxu1 %v15988_v31  ;;  %v10435_v45 = vor.u32 %v14431_v38, %v10434_v37  ;;  %v10023_v50 = vor.u32 %v14323_v39, %v10020_v40  ;;  %v10402_v52 = vld [vmem:[#allocation11 + $0x4d0] sm:$0xf]  ;;  %v10532_v34 = vld [vmem:[#allocation11 + $0x5f0] sm:$0xf0] }
 0x1b0   :  { %2646 = vmatpush.bf16.msra.mxu3 %v10147_v46  ;;  %2668 = vmatpush.bf16.msrb.mxu1 %v10787_v48  ;;  %v10626_v46 = vld [vmem:[#allocation11 + $0x690] sm:$0xf]  ;;  %v14339_v39 = vld [vmem:[#allocation11 + $0x254] sm:$0xf] }
 0x1b1   :  { %v14479_v48 = vld [vmem:[#allocation11 + $0x6ac] sm:$0xf0]  ;;  %v10084_v40 = vld [vmem:[#allocation11 + $0x270] sm:$0xf0] }
 0x1b2   :  { %2632 = vmatpush.bf16.msra.mxu2 %v9923_v54  ;;  %2610 = vmatpush.bf16.msra.mxu0 %v10303_v63  ;;  %v14423_v53 = vld [vmem:[#allocation11 + $0x4ec] sm:$0xf0]  ;;  %v14315_v54 = vld [vmem:[#allocation11 + $0x194] sm:$0xf]  ;;  %v10627_v47 = vor.u32 %v14479_v48, %v10626_v46 }
 0x1b3   :  { %v10403_v58 = vor.u32 %v14423_v53, %v10402_v52  ;;  %v10594_v59 = vld [vmem:[#allocation11 + $0x650] sm:$0xf]  ;;  %v10180_v63 = vld [vmem:[#allocation11 + $0x330] sm:$0xf0] }
 0x1b4   :  { %2647 = vmatpush.bf16.msra.mxu3 %v10115_v61  ;;  %2669 = vmatpush.bf16.msrb.mxu1 %v10755_v62  ;;  %v14471_v60 = vld [vmem:[#allocation11 + $0x66c] sm:$0xf0]  ;;  %v14363_v61 = vld [vmem:[#allocation11 + $0x314] sm:$0xf]  ;;  %v9991_v62 = vor.u32 %v14315_v54, %v9988_v55 }
 0x1b5   :  { %2611 = vmatmul.bf16.vlgmr.msra.gmra.mxu0 %v15992_v56  ;;  %v10370_v0 = vld [vmem:[#allocation11 + $0x490] sm:$0xf]  ;;  %v10595_v5 = vor.u32 %v14471_v60, %v10594_v59  ;;  %v10183_v7 = vor.u32 %v14363_v61, %v10180_v63  ;;  %v9860_v46 = vld [vmem:[#allocation11 + $0xb0] sm:$0xf0]  ;;  %v14392_v59 = vld [vmem:[#allocation11 + $0x3f4] sm:$0xf0] }
 0x1b6   :  { %2633 = vmatpush.bf16.msra.mxu2 %v9891_v3  ;;  %2655 = vmatpush.bf16.msrb.mxu0 %v10531_v4  ;;  %v14415_v2 = vld [vmem:[#allocation11 + $0x4ac] sm:$0xf0]  ;;  %v14307_v3 = vld [vmem:[#allocation11 + $0x154] sm:$0xf] }
 0x1b7   :  { %v9956_v4 = vld [vmem:[#allocation11 + $0x170] sm:$0xf0]  ;;  %v10562_v6 = vld [vmem:[#allocation11 + $0x610] sm:$0xf]  ;;  %v10371_v8 = vor.u32 %v14415_v2, %v10370_v0 }
 0x1b8   :  { %2648 = vmatpush.bf16.msra.mxu3 %v10083_v11  ;;  %2670 = vmatpush.bf16.msrb.mxu1 %v10723_v13  ;;  %v14463_v9 = vld [vmem:[#allocation11 + $0x62c] sm:$0xf0]  ;;  %v10148_v11 = vld [vmem:[#allocation11 + $0x2f0] sm:$0xf0]  ;;  %v9959_v12 = vor.u32 %v14307_v3, %v9956_v4 }
 0x1b9   :  { %v14515_v13 = vld [vmem:[#allocation11 + $0x7d4] sm:$0xf]  ;;  %v10338_v15 = vld [vmem:[#allocation11 + $0x450] sm:$0xf]  ;;  %v10563_v19 = vor.u32 %v14463_v9, %v10562_v6  ;;  %v10151_v20 = vor.u32 %v14355_v10, %v10148_v11  ;;  %v14384_v9 = vld [vmem:[#allocation11 + $0x3b4] sm:$0xf0] }
 0x1ba   :  { %2634 = vmatpush.bf16.msra.mxu2 %v9859_v17  ;;  %2656 = vmatpush.bf16.msrb.mxu0 %v10499_v18  ;;  %v14407_v16 = vld [vmem:[#allocation11 + $0x46c] sm:$0xf0]  ;;  %v14299_v17 = vld [vmem:[#allocation11 + $0x114] sm:$0xf]  ;;  %v10791_v21 = vor.u32 %v14515_v13, %v10788_v14  ;;  %v10026_v14 = vld [vmem:[#allocation11 + $0x1d8] sm:$0xf] }
 0x1bb   :  { %v9924_v18 = vld [vmem:[#allocation11 + $0x130] sm:$0xf0]  ;;  %v10339_v24 = vor.u32 %v14407_v16, %v10338_v15  ;;  %v10306_v28 = vld [vmem:[#allocation11 + $0x410] sm:$0xf]  ;;  %v14328_v15 = vld [vmem:[#allocation11 + $0x1f4] sm:$0xf0] }
 0x1bc   :  { %2649 = vmatpush.bf16.msra.mxu3 %v10051_v25  ;;  %2671 = vmatpush.bf16.msrb.mxu1 %v10691_v26  ;;  %v9927_v25 = vor.u32 %v14299_v17, %v9924_v18  ;;  %v14507_v26 = vld [vmem:[#allocation11 + $0x794] sm:$0xf]  ;;  %v14399_v29 = vld [vmem:[#allocation11 + $0x42c] sm:$0xf0]  ;;  %v10027_v23 = vor.u32 %v14328_v15, %v10026_v14 }
 0x1bd   :  { %v10307_v37 = vor.u32 %v14399_v29, %v10306_v28  ;;  %v14443_v48 = vld [vmem:[#allocation11 + $0x594] sm:$0xf]  ;;  %v14320_v28 = vld [vmem:[#allocation11 + $0x1b4] sm:$0xf0] }
 0x1be   :  { %2635 = vmatpush.bf16.msra.mxu2 %v9827_v30  ;;  %2657 = vmatpush.bf16.msrb.mxu0 %v10467_v32  ;;  %v14291_v30 = vld [vmem:[#allocation11 + $0xd4] sm:$0xf] }
 0x1bf   :  { %2650 = vmatmul.bf16.vlgmr.msra.gmra.mxu3 %v15980_v42  ;;  %v9892_v32 = vld [vmem:[#allocation11 + $0xf0] sm:$0xf0] }
 0x1c0   :  { %2694 = vmatpush.bf16.msrb.mxu3 %v10279_v27  ;;  %2672 = vmatpush.bf16.msrb.mxu1 %v10659_v41  ;;  %v10756_v27 = vld [vmem:[#allocation11 + $0x7b0] sm:$0xf0]  ;;  %v9895_v38 = vor.u32 %v14291_v30, %v9892_v32 }
 0x1c1   :  { %v10759_v36 = vor.u32 %v14507_v26, %v10756_v27  ;;  %v14499_v41 = vld [vmem:[#allocation11 + $0x754] sm:$0xf]  ;;  %v9994_v27 = vld [vmem:[#allocation11 + $0x198] sm:$0xf] }
 0x1c2   :  { %2636 = vmatpush.bf16.msra.mxu2 %v9795_v44  ;;  %2658 = vmatpush.bf16.msrb.mxu0 %v10435_v45  ;;  %v10724_v44 = vld [vmem:[#allocation11 + $0x770] sm:$0xf0] }
 0x1c3   :  { %v14283_v45 = vld [vmem:[#allocation11 + $0x94] sm:$0xf]  ;;  %v10727_v52 = vor.u32 %v14499_v41, %v10724_v44  ;;  %v14312_v41 = vld [vmem:[#allocation11 + $0x174] sm:$0xf0] }
 0x1c4   :  { %2695 = vmatpush.bf16.msrb.mxu3 %v10247_v43  ;;  %2673 = vmatpush.bf16.msrb.mxu1 %v10627_v47  ;;  %v10535_v43 = vor.u32 %v14451_v33, %v10532_v34  ;;  %v9863_v53 = vor.u32 %v14283_v45, %v9860_v46  ;;  %v10052_v54 = vld [vmem:[#allocation11 + $0x230] sm:$0xf0] }
 0x1c5   :  { %2637 = vmatmul.bf16.vlgmr.msra.gmra.mxu2 %v15983_v1  ;;  %v14491_v55 = vld [vmem:[#allocation11 + $0x714] sm:$0xf]  ;;  %v10055_v0 = vor.u32 %v14331_v51, %v10052_v54 }
 0x1c6   :  { %2681 = vmatpush.bf16.msrb.mxu2 %v10023_v50  ;;  %2659 = vmatpush.bf16.msrb.mxu0 %v10403_v58  ;;  %v10087_v50 = vor.u32 %v14339_v39, %v10084_v40  ;;  %v10692_v47 = vld [vmem:[#allocation11 + $0x730] sm:$0xf0]  ;;  %v10282_v58 = vld [vmem:[#allocation11 + $0x3d8] sm:$0xf] }
 0x1c7   :  { %v14275_v60 = vld [vmem:[#allocation11 + $0x54] sm:$0xf]  ;;  %v10695_v2 = vor.u32 %v14491_v55, %v10692_v47  ;;  %v10283_v3 = vor.u32 %v14392_v59, %v10282_v58  ;;  %v9962_v40 = vld [vmem:[#allocation11 + $0x158] sm:$0xf] }
 0x1c8   :  { %2696 = vmatpush.bf16.msrb.mxu3 %v10215_v57  ;;  %2674 = vmatpush.bf16.msrb.mxu1 %v10595_v5  ;;  %v10503_v57 = vor.u32 %v14443_v48, %v10500_v49  ;;  %v9828_v61 = vld [vmem:[#allocation11 + $0x70] sm:$0xf0]  ;;  %v10154_v49 = vld [vmem:[#allocation11 + $0x2d8] sm:$0xf]  ;;  %v9963_v51 = vor.u32 %v14312_v41, %v9962_v40  ;;  %v14388_v40 = vld [vmem:[#allocation11 + $0x3dc] sm:$0xf] }
 0x1c9   :  { %v10468_v63 = vld [vmem:[#allocation11 + $0x570] sm:$0xf0]  ;;  %v9831_v6 = vor.u32 %v14275_v60, %v9828_v61  ;;  %v9930_v47 = vld [vmem:[#allocation11 + $0x118] sm:$0xf]  ;;  %v10284_v41 = vld [vmem:[#allocation11 + $0x3f8] sm:$0xf0] }
 0x1ca   :  { %2682 = vmatpush.bf16.msrb.mxu2 %v9991_v62  ;;  %2660 = vmatpush.bf16.msrb.mxu0 %v10371_v8  ;;  %v14435_v62 = vld [vmem:[#allocation11 + $0x554] sm:$0xf]  ;;  %v10250_v8 = vld [vmem:[#allocation11 + $0x398] sm:$0xf] }
 0x1cb   :  { %v14483_v4 = vld [vmem:[#allocation11 + $0x6d4] sm:$0xf]  ;;  %v10251_v17 = vor.u32 %v14384_v9, %v10250_v8  ;;  %v9898_v8 = vld [vmem:[#allocation11 + $0xd8] sm:$0xf] }
 0x1cc   :  { %2697 = vmatpush.bf16.msrb.mxu3 %v10183_v7  ;;  %2675 = vmatpush.bf16.msrb.mxu1 %v10563_v19  ;;  %v10660_v5 = vld [vmem:[#allocation11 + $0x6f0] sm:$0xf0]  ;;  %v10471_v7 = vor.u32 %v14435_v62, %v10468_v63  ;;  %v10122_v62 = vld [vmem:[#allocation11 + $0x298] sm:$0xf] }
 0x1cd   :  { %v14267_v10 = vld [vmem:[#allocation11 + $0x14] sm:$0xf]  ;;  %v10663_v16 = vor.u32 %v14483_v4, %v10660_v5  ;;  %v14352_v63 = vld [vmem:[#allocation11 + $0x2b4] sm:$0xf0] }
 0x1ce   :  { %2683 = vmatpush.bf16.msrb.mxu2 %v9959_v12  ;;  %2661 = vmatpush.bf16.msrb.mxu0 %v10339_v24  ;;  %v9796_v11 = vld [vmem:[#allocation11 + $0x30] sm:$0xf0]  ;;  %v14376_v24 = vld [vmem:[#allocation11 + $0x374] sm:$0xf0] }
 0x1cf   :  { %2676 = vmatmul.bf16.vlgmr.msrb.gmra.mxu1 %v15988_v31  ;;  %v14427_v12 = vld [vmem:[#allocation11 + $0x514] sm:$0xf]  ;;  %v9799_v18 = vor.u32 %v14267_v10, %v9796_v11  ;;  %v10219_v30 = vor.u32 %v14376_v24, %v10218_v22  ;;  %v10762_v4 = vld [vmem:[#allocation11 + $0x798] sm:$0xf] }
 0x1d0   :  { %2698 = vmatpush.bf16.msrb.mxu3 %v10151_v20  ;;  %2720 = vmatpush.bf16.msra.mxu1 %v10791_v21  ;;  %v10436_v13 = vld [vmem:[#allocation11 + $0x530] sm:$0xf0]  ;;  %v14512_v5 = vld [vmem:[#allocation11 + $0x7b4] sm:$0xf0] }
 0x1d1   :  { %v10439_v19 = vor.u32 %v14427_v12, %v10436_v13  ;;  %v14475_v20 = vld [vmem:[#allocation11 + $0x694] sm:$0xf]  ;;  %v14296_v9 = vld [vmem:[#allocation11 + $0xf4] sm:$0xf0]  ;;  %v10123_v13 = vor.u32 %v14352_v63, %v10122_v62  ;;  %v10763_v14 = vor.u32 %v14512_v5, %v10762_v4 }
 0x1d2   :  { %2684 = vmatpush.bf16.msrb.mxu2 %v9927_v25  ;;  %2662 = vmatpush.bf16.msrb.mxu0 %v10307_v37  ;;  %v10628_v21 = vld [vmem:[#allocation11 + $0x6b0] sm:$0xf0]  ;;  %v14368_v37 = vld [vmem:[#allocation11 + $0x334] sm:$0xf0] }
 0x1d3   :  { %v14419_v25 = vld [vmem:[#allocation11 + $0x4d4] sm:$0xf]  ;;  %v10631_v29 = vor.u32 %v14475_v20, %v10628_v21  ;;  %v10538_v11 = vld [vmem:[#allocation11 + $0x5d8] sm:$0xf] }
 0x1d4   :  { %2699 = vmatpush.bf16.msrb.mxu3 %v10119_v35  ;;  %2721 = vmatpush.bf16.msra.mxu1 %v10759_v36  ;;  %v10404_v26 = vld [vmem:[#allocation11 + $0x4f0] sm:$0xf0]  ;;  %v10186_v35 = vld [vmem:[#allocation11 + $0x318] sm:$0xf]  ;;  %v9995_v36 = vor.u32 %v14320_v28, %v9994_v27 }
 0x1d5   :  { %2663 = vmatmul.bf16.vlgmr.msrb.gmra.mxu0 %v15992_v56  ;;  %v10407_v32 = vor.u32 %v14419_v25, %v10404_v26  ;;  %v14467_v33 = vld [vmem:[#allocation11 + $0x654] sm:$0xf]  ;;  %v10187_v45 = vor.u32 %v14368_v37, %v10186_v35  ;;  %v14456_v12 = vld [vmem:[#allocation11 + $0x5f4] sm:$0xf0] }
 0x1d6   :  { %2685 = vmatpush.bf16.msrb.mxu2 %v9895_v38  ;;  %2707 = vmatpush.bf16.msra.mxu0 %v10535_v43  ;;  %v10596_v34 = vld [vmem:[#allocation11 + $0x670] sm:$0xf0]  ;;  %v10539_v21 = vor.u32 %v14456_v12, %v10538_v11  ;;  %v14504_v22 = vld [vmem:[#allocation11 + $0x774] sm:$0xf0]  ;;  %v14372_v12 = vld [vmem:[#allocation11 + $0x35c] sm:$0xf] }
 0x1d7   :  { %v14411_v38 = vld [vmem:[#allocation11 + $0x494] sm:$0xf]  ;;  %v10599_v43 = vor.u32 %v14467_v33, %v10596_v34  ;;  %v14288_v24 = vld [vmem:[#allocation11 + $0xb4] sm:$0xf0] }
 0x1d8   :  { %2700 = vmatpush.bf16.msrb.mxu3 %v10087_v50  ;;  %2722 = vmatpush.bf16.msra.mxu1 %v10727_v52  ;;  %v10372_v39 = vld [vmem:[#allocation11 + $0x4b0] sm:$0xf0]  ;;  %v14360_v50 = vld [vmem:[#allocation11 + $0x2f4] sm:$0xf0] }
 0x1d9   :  { %v14459_v44 = vld [vmem:[#allocation11 + $0x614] sm:$0xf]  ;;  %v10375_v46 = vor.u32 %v14411_v38, %v10372_v39  ;;  %v10794_v52 = vld [vmem:[#allocation11 + $0x7d8] sm:$0xf]  ;;  %v10155_v60 = vor.u32 %v14360_v50, %v10154_v49  ;;  %v10287_v50 = vor.u32 %v14388_v40, %v10284_v41 }
 0x1da   :  { %2686 = vmatpush.bf16.msrb.mxu2 %v9863_v53  ;;  %2708 = vmatpush.bf16.msra.mxu0 %v10503_v57  ;;  %v10564_v48 = vld [vmem:[#allocation11 + $0x630] sm:$0xf0]  ;;  %v14520_v53 = vld [vmem:[#allocation11 + $0x7f4] sm:$0xf0] }
 0x1db   :  { %v14403_v54 = vld [vmem:[#allocation11 + $0x454] sm:$0xf]  ;;  %v14304_v57 = vld [vmem:[#allocation11 + $0x134] sm:$0xf0]  ;;  %v10567_v58 = vor.u32 %v14459_v44, %v10564_v48  ;;  %v10795_v61 = vor.u32 %v14520_v53, %v10794_v52 }
 0x1dc   :  { %2701 = vmatpush.bf16.msrb.mxu3 %v10055_v0  ;;  %2723 = vmatpush.bf16.msra.mxu1 %v10695_v2  ;;  %v10340_v55 = vld [vmem:[#allocation11 + $0x470] sm:$0xf0]  ;;  %v16012_v0 = vld [vmem:[#allocation13] sm:$0xff]  ;;  %v10506_v26 = vld [vmem:[#allocation11 + $0x598] sm:$0xf] }
 0x1dd   :  { %v10343_v2 = vor.u32 %v14403_v54, %v10340_v55  ;;  %v1125_v10 = vperm.slane %v16012_v0, 0  ;;  %v14448_v27 = vld [vmem:[#allocation11 + $0x5b4] sm:$0xf0] }
 0x1de   :  { %2687 = vmatpush.bf16.msrb.mxu2 %v9831_v6  ;;  %2709 = vmatpush.bf16.msra.mxu0 %v10471_v7  ;;  %v14395_v6 = vld [vmem:[#allocation11 + $0x414] sm:$0xf]  ;;  %v14336_v34 = vld [vmem:[#allocation11 + $0x234] sm:$0xf0]  ;;  %v10507_v39 = vor.u32 %v14448_v27, %v10506_v26  ;;  %v14364_v26 = vld [vmem:[#allocation11 + $0x31c] sm:$0xf] }
 0x1df   :  { %2702 = vmatmul.bf16.vlgmr.msrb.gmra.mxu3 %v15980_v42  ;;  %v10308_v7 = vld [vmem:[#allocation11 + $0x430] sm:$0xf0]  ;;  %v10698_v35 = vld [vmem:[#allocation11 + $0x718] sm:$0xf] }
 0x1e0   :  { %2746 = vmatpush.bf16.msra.mxu3 %v10283_v3  ;;  %2724 = vmatpush.bf16.msra.mxu1 %v10663_v16  ;;  %v9931_v3 = vor.u32 %v14304_v57, %v9930_v47  ;;  %v10311_v15 = vor.u32 %v14395_v6, %v10308_v7  ;;  %v9899_v16 = vor.u32 %v14296_v9, %v9898_v8  ;;  %v14280_v44 = vld [vmem:[#allocation11 + $0x74] sm:$0xf0]  ;;  %v14380_v47 = vld [vmem:[#allocation11 + $0x39c] sm:$0xf] }
 0x1e1   :  { %v14488_v52 = vld [vmem:[#allocation11 + $0x6f4] sm:$0xf0]  ;;  %v10252_v57 = vld [vmem:[#allocation11 + $0x3b8] sm:$0xf0] }
 0x1e2   :  { %2688 = vmatpush.bf16.msrb.mxu2 %v9799_v18  ;;  %2710 = vmatpush.bf16.msra.mxu0 %v10439_v19  ;;  %v2443_v59 = vpop.f32.mrf.mxu3  ;;  %v14344_v18 = vld [vmem:[#allocation11 + $0x274] sm:$0xf0]  ;;  %v10255_v6 = vor.u32 %v14380_v47, %v10252_v57  ;;  %v14348_v57 = vld [vmem:[#allocation11 + $0x29c] sm:$0xf] }
 0x1e3   :  { %v10730_v19 = vld [vmem:[#allocation11 + $0x758] sm:$0xf] }
 0x1e4   :  { %2747 = vmatpush.bf16.msra.mxu3 %v10251_v17  ;;  %2725 = vmatpush.bf16.msra.mxu1 %v10631_v29  ;;  %v10090_v17 = vld [vmem:[#allocation11 + $0x258] sm:$0xf] }
 0x1e5   :  { %2689 = vmatmul.bf16.vlgmr.msrb.gmra.mxu2 %v15983_v1  ;;  %v10091_v29 = vor.u32 %v14344_v18, %v10090_v17  ;;  %v14480_v11 = vld [vmem:[#allocation11 + $0x6b4] sm:$0xf0]  ;;  %v14316_v18 = vld [vmem:[#allocation11 + $0x19c] sm:$0xf] }
 0x1e6   :  { %2733 = vmatpush.bf16.msra.mxu2 %v10027_v23  ;;  %2711 = vmatpush.bf16.msra.mxu0 %v10407_v32  ;;  %v9866_v23 = vld [vmem:[#allocation11 + $0x98] sm:$0xf]  ;;  %v10731_v32 = vor.u32 %v14504_v22, %v10730_v19  ;;  %v9996_v19 = vld [vmem:[#allocation11 + $0x1b8] sm:$0xf0] }
 0x1e7   :  { %v9867_v33 = vor.u32 %v14288_v24, %v9866_v23  ;;  %v14424_v17 = vld [vmem:[#allocation11 + $0x4f4] sm:$0xf0]  ;;  %v9999_v27 = vor.u32 %v14316_v18, %v9996_v19  ;;  %v14500_v18 = vld [vmem:[#allocation11 + $0x75c] sm:$0xf] }
 0x1e8   :  { %2748 = vmatpush.bf16.msra.mxu3 %v10219_v30  ;;  %2726 = vmatpush.bf16.msra.mxu1 %v10599_v43  ;;  %v2430_v20 = vpop.f32.mrf.mxu2  ;;  %v10058_v30 = vld [vmem:[#allocation11 + $0x218] sm:$0xf] }
 0x1e9   :  { %v2431_v25 = vadd.f32 %v2430_v20, %v1125_v10  ;;  %v9834_v43 = vld [vmem:[#allocation11 + $0x58] sm:$0xf]  ;;  %v10059_v48 = vor.u32 %v14336_v34, %v10058_v30  ;;  %v14308_v34 = vld [vmem:[#allocation11 + $0x15c] sm:$0xf] }
 0x1ea   :  { %2734 = vmatpush.bf16.msra.mxu2 %v9995_v36  ;;  %2712 = vmatpush.bf16.msra.mxu0 %v10375_v46  ;;  %v2445_v28 = vpop.f32.mrf.mxu3  ;;  %v14496_v36 = vld [vmem:[#allocation11 + $0x734] sm:$0xf0]  ;;  %v9835_v54 = vor.u32 %v14280_v44, %v9834_v43  ;;  %v14356_v43 = vld [vmem:[#allocation11 + $0x2dc] sm:$0xf] }
 0x1eb   :  { %v2444_v37 = vadd.f32 %v2443_v59, %v2431_v25  ;;  %v14440_v46 = vld [vmem:[#allocation11 + $0x574] sm:$0xf0]  ;;  %v10699_v49 = vor.u32 %v14496_v36, %v10698_v35  ;;  %v10188_v28 = vld [vmem:[#allocation11 + $0x338] sm:$0xf0] }
 0x1ec   :  { %2749 = vmatpush.bf16.msra.mxu3 %v10187_v45  ;;  %2727 = vmatpush.bf16.msra.mxu1 %v10567_v58  ;;  %v2469_v38 = vpop.f32.mrf.mxu1  ;;  %v10474_v45 = vld [vmem:[#allocation11 + $0x558] sm:$0xf]  ;;  %v9964_v35 = vld [vmem:[#allocation11 + $0x178] sm:$0xf0] }
 0x1ed   :  { %v10475_v55 = vor.u32 %v14440_v46, %v10474_v45  ;;  %v9802_v58 = vld [vmem:[#allocation11 + $0x18] sm:$0xf]  ;;  %v10156_v44 = vld [vmem:[#allocation11 + $0x2f8] sm:$0xf0]  ;;  %v9967_v45 = vor.u32 %v14308_v34, %v9964_v35 }
 0x1ee   :  { %2735 = vmatpush.bf16.msra.mxu2 %v9963_v51  ;;  %2713 = vmatpush.bf16.msra.mxu0 %v10343_v2  ;;  %v10666_v51 = vld [vmem:[#allocation11 + $0x6d8] sm:$0xf]  ;;  %v14324_v2 = vld [vmem:[#allocation11 + $0x1dc] sm:$0xf] }
 0x1ef   :  { %2728 = vmatmul.bf16.vlgmr.msra.gmra.mxu1 %v15988_v31  ;;  %v14272_v59 = vld [vmem:[#allocation11 + $0x34] sm:$0xf0]  ;;  %v10667_v5 = vor.u32 %v14488_v52, %v10666_v51  ;;  %v14516_v46 = vld [vmem:[#allocation11 + $0x7dc] sm:$0xf] }
 0x1f0   :  { %2750 = vmatpush.bf16.msra.mxu3 %v10155_v60  ;;  %2772 = vmatpush.bf16.msrb.mxu1 %v10795_v61  ;;  %v2432_v53 = vpop.f32.mrf.mxu2  ;;  %v10442_v60 = vld [vmem:[#allocation11 + $0x518] sm:$0xf]  ;;  %v9803_v8 = vor.u32 %v14272_v59, %v9802_v58  ;;  %v14300_v51 = vld [vmem:[#allocation11 + $0x11c] sm:$0xf] }
 0x1f1   :  { %v14432_v61 = vld [vmem:[#allocation11 + $0x534] sm:$0xf0]  ;;  %v9932_v52 = vld [vmem:[#allocation11 + $0x138] sm:$0xf0] }
 0x1f2   :  { %2736 = vmatpush.bf16.msra.mxu2 %v9931_v3  ;;  %2714 = vmatpush.bf16.msra.mxu0 %v10311_v15  ;;  %v2456_v62 = vpop.f32.mrf.mxu0  ;;  %v16017_v63 = vpop.f32.mrf.mxu3  ;;  %v10028_v3 = vld [vmem:[#allocation11 + $0x1f8] sm:$0xf0]  ;;  %v10443_v9 = vor.u32 %v14432_v61, %v10442_v60  ;;  %v10634_v10 = vld [vmem:[#allocation11 + $0x698] sm:$0xf]  ;;  %v9935_v60 = vor.u32 %v14300_v51, %v9932_v52 }
 0x1f3   :  { %v2457_v4 = vadd.f32 %v2456_v62, %v2444_v37  ;;  %v10220_v15 = vld [vmem:[#allocation11 + $0x378] sm:$0xf0]  ;;  %v10635_v20 = vor.u32 %v14480_v11, %v10634_v10  ;;  %v10602_v24 = vld [vmem:[#allocation11 + $0x658] sm:$0xf] }
 0x1f4   :  { %2751 = vmatpush.bf16.msra.mxu3 %v10123_v13  ;;  %2773 = vmatpush.bf16.msrb.mxu1 %v10763_v14  ;;  %v2471_v7 = vpop.f32.mrf.mxu1  ;;  %v10031_v14 = vor.u32 %v14324_v2, %v10028_v3  ;;  %v10223_v22 = vor.u32 %v14372_v12, %v10220_v15  ;;  %v14472_v25 = vld [vmem:[#allocation11 + $0x674] sm:$0xf0]  ;;  %v10124_v58 = vld [vmem:[#allocation11 + $0x2b8] sm:$0xf0] }
 0x1f5   :  { %2715 = vmatmul.bf16.vlgmr.msra.gmra.mxu0 %v15992_v56  ;;  %v16019_v13 = vadd.f32 %v2469_v38, %v2457_v4  ;;  %v14416_v30 = vld [vmem:[#allocation11 + $0x4b4] sm:$0xf0]  ;;  %v10603_v36 = vor.u32 %v14472_v25, %v10602_v24  ;;  %v14508_v61 = vld [vmem:[#allocation11 + $0x79c] sm:$0xf]  ;;  %v10127_v11 = vor.u32 %v14348_v57, %v10124_v58 }
 0x1f6   :  { %2737 = vmatpush.bf16.msra.mxu2 %v9899_v16  ;;  %2759 = vmatpush.bf16.msrb.mxu0 %v10539_v21  ;;  %v10410_v16 = vld [vmem:[#allocation11 + $0x4d8] sm:$0xf]  ;;  %v10764_v62 = vld [vmem:[#allocation11 + $0x7b8] sm:$0xf0] }
 0x1f7   :  { %v10411_v23 = vor.u32 %v14424_v17, %v10410_v16  ;;  %v10570_v37 = vld [vmem:[#allocation11 + $0x618] sm:$0xf]  ;;  %v9900_v7 = vld [vmem:[#allocation11 + $0xf8] sm:$0xf0]  ;;  %v10767_v12 = vor.u32 %v14508_v61, %v10764_v62  ;;  %v11026_v61 = vld [vmem:[#allocation14 + $0x1c0] sm:$0xf] }
 0x1f8   :  { %2752 = vmatpush.bf16.msra.mxu3 %v10091_v29  ;;  %2774 = vmatpush.bf16.msrb.mxu1 %v10731_v32  ;;  %v16022_v21 = vpop.f32.mrf.mxu2  ;;  %v10378_v29 = vld [vmem:[#allocation11 + $0x498] sm:$0xf]  ;;  %v14340_v16 = vld [vmem:[#allocation11 + $0x25c] sm:$0xf]  ;;  %v14581_v62 = vld [vmem:[#allocation14 + $0x1dc] sm:$0xf0] }
 0x1f9   :  { %v10379_v40 = vor.u32 %v14416_v30, %v10378_v29  ;;  %v14464_v41 = vld [vmem:[#allocation11 + $0x634] sm:$0xf0]  ;;  %v10092_v17 = vld [vmem:[#allocation11 + $0x278] sm:$0xf0] }
 0x1fa   :  { %2738 = vmatpush.bf16.msra.mxu2 %v9867_v33  ;;  %2760 = vmatpush.bf16.msrb.mxu0 %v10507_v39  ;;  %v2458_v32 = vpop.f32.mrf.mxu0  ;;  %v2497_v33 = vpop.f32.mrf.mxu3  ;;  %v10191_v39 = vor.u32 %v14364_v26, %v10188_v28  ;;  %v10571_v53 = vor.u32 %v14464_v41, %v10570_v37  ;;  %v10314_v2 = vld [vmem:[#allocation11 + $0x418] sm:$0xf]  ;;  %v14444_v24 = vld [vmem:[#allocation11 + $0x59c] sm:$0xf]  ;;  %v10095_v26 = vor.u32 %v14340_v16, %v10092_v17 }
 0x1fb   :  { %v10508_v25 = vld [vmem:[#allocation11 + $0x5b8] sm:$0xf0] }
 0x1fc   :  { %2753 = vmatpush.bf16.msra.mxu3 %v10059_v48  ;;  %2775 = vmatpush.bf16.msrb.mxu1 %v10699_v49  ;;  %v16025_v38 = vpop.f32.mrf.mxu1  ;;  %v10796_v48 = vld [vmem:[#allocation11 + $0x7f8] sm:$0xf0]  ;;  %v10346_v49 = vld [vmem:[#allocation11 + $0x458] sm:$0xf]  ;;  %v10511_v37 = vor.u32 %v14444_v24, %v10508_v25 }
 0x1fd   :  { %v10799_v47 = vor.u32 %v14516_v46, %v10796_v48  ;;  %v10060_v32 = vld [vmem:[#allocation11 + $0x238] sm:$0xf0] }
 0x1fe   :  { %2739 = vmatpush.bf16.msra.mxu2 %v9835_v54  ;;  %2761 = vmatpush.bf16.msrb.mxu0 %v10475_v55  ;;  %v10159_v55 = vor.u32 %v14356_v43, %v10156_v44  ;;  %v14492_v33 = vld [vmem:[#allocation11 + $0x71c] sm:$0xf] }
 0x1ff   :  { %2754 = vmatmul.bf16.vlgmr.msra.gmra.mxu3 %v15980_v42  ;;  %v10700_v34 = vld [vmem:[#allocation11 + $0x738] sm:$0xf0] }
 0x200   :  { %2798 = vmatpush.bf16.msrb.mxu3 %v10287_v50  ;;  %2776 = vmatpush.bf16.msrb.mxu1 %v10667_v5  ;;  %v14408_v50 = vld [vmem:[#allocation11 + $0x474] sm:$0xf0]  ;;  %v2484_v54 = vpop.f32.mrf.mxu2  ;;  %v14276_v41 = vld [vmem:[#allocation11 + $0x5c] sm:$0xf] }
 0x201   :  { %v10347_v59 = vor.u32 %v14408_v50, %v10346_v49  ;;  %v14400_v5 = vld [vmem:[#allocation11 + $0x434] sm:$0xf0]  ;;  %v9836_v43 = vld [vmem:[#allocation11 + $0x78] sm:$0xf0]  ;;  %v10703_v49 = vor.u32 %v14492_v33, %v10700_v34  ;;  %v10962_v33 = vld [vmem:[#allocation14 + $0x140] sm:$0xf] }
 0x202   :  { %2740 = vmatpush.bf16.msra.mxu2 %v9803_v8  ;;  %2762 = vmatpush.bf16.msrb.mxu0 %v10443_v9  ;;  %v16027_v3 = vpop.f32.mrf.mxu0  ;;  %v16029_v4 = vpop.f32.mrf.mxu3  ;;  %v14452_v8 = vld [vmem:[#allocation11 + $0x5dc] sm:$0xf]  ;;  %v14565_v34 = vld [vmem:[#allocation14 + $0x15c] sm:$0xf0] }
 0x203   :  { %v10540_v9 = vld [vmem:[#allocation11 + $0x5f8] sm:$0xf0] }
 0x204   :  { %2799 = vmatpush.bf16.msrb.mxu3 %v10255_v6  ;;  %2777 = vmatpush.bf16.msrb.mxu1 %v10635_v20  ;;  %v14292_v6 = vld [vmem:[#allocation11 + $0xdc] sm:$0xf]  ;;  %v2523_v10 = vpop.f32.mrf.mxu1  ;;  %v10543_v19 = vor.u32 %v14452_v8, %v10540_v9 }
 0x205   :  { %2741 = vmatmul.bf16.vlgmr.msra.gmra.mxu2 %v15983_v1  ;;  %v9903_v15 = vor.u32 %v14292_v6, %v9900_v7  ;;  %v10732_v20 = vld [vmem:[#allocation11 + $0x778] sm:$0xf0] }
 0x206   :  { %2785 = vmatpush.bf16.msrb.mxu2 %v10031_v14  ;;  %2763 = vmatpush.bf16.msrb.mxu0 %v10411_v23  ;;  %v10315_v14 = vor.u32 %v14400_v5, %v10314_v2  ;;  %v9868_v23 = vld [vmem:[#allocation11 + $0xb8] sm:$0xf0]  ;;  %v10735_v29 = vor.u32 %v14500_v18, %v10732_v20  ;;  %v14573_v20 = vld [vmem:[#allocation14 + $0x19c] sm:$0xf0] }
 0x207   :  { %v14436_v44 = vld [vmem:[#allocation11 + $0x55c] sm:$0xf] }
 0x208   :  { %2800 = vmatpush.bf16.msrb.mxu3 %v10223_v22  ;;  %2778 = vmatpush.bf16.msrb.mxu1 %v10603_v36  ;;  %v14284_v22 = vld [vmem:[#allocation11 + $0x9c] sm:$0xf]  ;;  %v16032_v28 = vpop.f32.mrf.mxu2 }
 0x209   :  { %v9871_v30 = vor.u32 %v14284_v22, %v9868_v23  ;;  %v14484_v51 = vld [vmem:[#allocation11 + $0x6dc] sm:$0xf] }
 0x20a   :  { %2786 = vmatpush.bf16.msrb.mxu2 %v9999_v27  ;;  %2764 = vmatpush.bf16.msrb.mxu0 %v10379_v40  ;;  %v14332_v27 = vld [vmem:[#allocation11 + $0x21c] sm:$0xf]  ;;  %v2510_v35 = vpop.f32.mrf.mxu0  ;;  %v2549_v36 = vpop.f32.mrf.mxu3  ;;  %v14645_v40 = vld [vmem:[#allocation14 + $0x3dc] sm:$0xf0] }
 0x20b   :  { %v10063_v48 = vor.u32 %v14332_v27, %v10060_v32  ;;  %v10668_v52 = vld [vmem:[#allocation11 + $0x6f8] sm:$0xf0]  ;;  %v11186_v27 = vld [vmem:[#allocation14 + $0x300] sm:$0xf]  ;;  %v1126_v35 = vperm.slane %v16012_v0, 1 }
 0x20c   :  { %2801 = vmatpush.bf16.msrb.mxu3 %v10191_v39  ;;  %2779 = vmatpush.bf16.msrb.mxu1 %v10571_v53  ;;  %v11282_v39 = vld [vmem:[#allocation14 + $0x3c0] sm:$0xf]  ;;  %v16035_v46 = vpop.f32.mrf.mxu1  ;;  %v9839_v53 = vor.u32 %v14276_v41, %v9836_v43  ;;  %v14268_v57 = vld [vmem:[#allocation11 + $0x1c] sm:$0xf]  ;;  %v10671_v5 = vor.u32 %v14484_v51, %v10668_v52 }
 0x20d   :  { %v11283_v50 = vor.u32 %v14645_v40, %v11282_v39  ;;  %v9804_v58 = vld [vmem:[#allocation11 + $0x38] sm:$0xf0]  ;;  %v11154_v43 = vld [vmem:[#allocation14 + $0x2c0] sm:$0xf] }
 0x20e   :  { %2787 = vmatpush.bf16.msrb.mxu2 %v9967_v45  ;;  %2765 = vmatpush.bf16.msrb.mxu0 %v10347_v59  ;;  %v10476_v45 = vld [vmem:[#allocation11 + $0x578] sm:$0xf0]  ;;  %v9807_v7 = vor.u32 %v14268_v57, %v9804_v58  ;;  %v11122_v58 = vld [vmem:[#allocation14 + $0x280] sm:$0xf] }
 0x20f   :  { %2780 = vmatmul.bf16.vlgmr.msrb.gmra.mxu1 %v15988_v31  ;;  %v10479_v54 = vor.u32 %v14436_v44, %v10476_v45  ;;  %v14428_v59 = vld [vmem:[#allocation11 + $0x51c] sm:$0xf]  ;;  %v14613_v44 = vld [vmem:[#allocation14 + $0x2dc] sm:$0xf0] }
 0x210   :  { %2802 = vmatpush.bf16.msrb.mxu3 %v10159_v55  ;;  %2824 = vmatpush.bf16.msra.mxu1 %v10799_v47  ;;  %v11250_v55 = vld [vmem:[#allocation14 + $0x380] sm:$0xf]  ;;  %v2536_v2 = vpop.f32.mrf.mxu2  ;;  %v14476_v9 = vld [vmem:[#allocation11 + $0x69c] sm:$0xf] }
 0x211   :  { %v14637_v47 = vld [vmem:[#allocation14 + $0x39c] sm:$0xf0]  ;;  %v10636_v10 = vld [vmem:[#allocation11 + $0x6b8] sm:$0xf0] }
 0x212   :  { %2788 = vmatpush.bf16.msrb.mxu2 %v9935_v60  ;;  %2766 = vmatpush.bf16.msrb.mxu0 %v10315_v14  ;;  %v10444_v60 = vld [vmem:[#allocation11 + $0x538] sm:$0xf0]  ;;  %v11251_v6 = vor.u32 %v14637_v47, %v11250_v55  ;;  %v11027_v14 = vor.u32 %v14581_v62, %v11026_v61  ;;  %v10639_v22 = vor.u32 %v14476_v9, %v10636_v10  ;;  %v11762_v2 = vld [vmem:[#allocation14 + $0x780] sm:$0xf] }
 0x213   :  { %v10447_v8 = vor.u32 %v14428_v59, %v10444_v60  ;;  %v14420_v16 = vld [vmem:[#allocation11 + $0x4dc] sm:$0xf]  ;;  %v11155_v47 = vor.u32 %v14613_v44, %v11154_v43  ;;  %v14605_v59 = vld [vmem:[#allocation14 + $0x29c] sm:$0xf0] }
 0x214   :  { %2803 = vmatpush.bf16.msrb.mxu3 %v10127_v11  ;;  %2825 = vmatpush.bf16.msra.mxu1 %v10767_v12  ;;  %v11218_v11 = vld [vmem:[#allocation14 + $0x340] sm:$0xf]  ;;  %v16038_v12 = vpop.f32.mrf.mxu0  ;;  %v10412_v17 = vld [vmem:[#allocation11 + $0x4f8] sm:$0xf0]  ;;  %v2575_v18 = vpop.f32.mrf.mxu1 }
 0x215   :  { %2767 = vmatmul.bf16.vlgmr.msrb.gmra.mxu0 %v15992_v56  ;;  %v10415_v24 = vor.u32 %v14420_v16, %v10412_v17  ;;  %v14468_v25 = vld [vmem:[#allocation11 + $0x65c] sm:$0xf]  ;;  %v14549_v9 = vld [vmem:[#allocation14 + $0xdc] sm:$0xf0] }
 0x216   :  { %2789 = vmatpush.bf16.msrb.mxu2 %v9903_v15  ;;  %2811 = vmatpush.bf16.msra.mxu0 %v10543_v19  ;;  %v14629_v15 = vld [vmem:[#allocation14 + $0x35c] sm:$0xf0]  ;;  %v10380_v32 = vld [vmem:[#allocation11 + $0x4b8] sm:$0xf0] }
 0x217   :  { %v10994_v19 = vld [vmem:[#allocation14 + $0x180] sm:$0xf]  ;;  %v11219_v23 = vor.u32 %v14629_v15, %v11218_v11  ;;  %v10572_v41 = vld [vmem:[#allocation11 + $0x638] sm:$0xf0] }
 0x218   :  { %2804 = vmatpush.bf16.msrb.mxu3 %v10095_v26  ;;  %2826 = vmatpush.bf16.msra.mxu1 %v10735_v29  ;;  %v10604_v26 = vld [vmem:[#allocation11 + $0x678] sm:$0xf0]  ;;  %v14621_v29 = vld [vmem:[#allocation14 + $0x31c] sm:$0xf0] }
 0x219   :  { %v10607_v36 = vor.u32 %v14468_v25, %v10604_v26  ;;  %v11187_v39 = vor.u32 %v14621_v29, %v11186_v27  ;;  %v14404_v51 = vld [vmem:[#allocation11 + $0x45c] sm:$0xf]  ;;  %v11538_v10 = vld [vmem:[#allocation14 + $0x5c0] sm:$0xf] }
 0x21a   :  { %2790 = vmatpush.bf16.msrb.mxu2 %v9871_v30  ;;  %2812 = vmatpush.bf16.msra.mxu0 %v10511_v37  ;;  %v14412_v30 = vld [vmem:[#allocation11 + $0x49c] sm:$0xf]  ;;  %v14709_v11 = vld [vmem:[#allocation14 + $0x5dc] sm:$0xf0] }
 0x21b   :  { %v14460_v37 = vld [vmem:[#allocation11 + $0x61c] sm:$0xf]  ;;  %v10383_v40 = vor.u32 %v14412_v30, %v10380_v32  ;;  %v14541_v25 = vld [vmem:[#allocation14 + $0x9c] sm:$0xf0] }
 0x21c   :  { %2805 = vmatpush.bf16.msrb.mxu3 %v10063_v48  ;;  %2827 = vmatpush.bf16.msra.mxu1 %v10703_v49  ;;  %v2562_v45 = vpop.f32.mrf.mxu0  ;;  %v10963_v48 = vor.u32 %v14565_v34, %v10962_v33  ;;  %v11794_v49 = vld [vmem:[#allocation14 + $0x7c0] sm:$0xf]  ;;  %v10348_v52 = vld [vmem:[#allocation11 + $0x478] sm:$0xf0]  ;;  %v10575_v55 = vor.u32 %v14460_v37, %v10572_v41 }
 0x21d   :  { %v10351_v61 = vor.u32 %v14404_v51, %v10348_v52  ;;  %v11506_v27 = vld [vmem:[#allocation14 + $0x580] sm:$0xf]  ;;  %v1127_v51 = vperm.slane %v16012_v0, 2 }
 0x21e   :  { %2791 = vmatpush.bf16.msrb.mxu2 %v9839_v53  ;;  %2813 = vmatpush.bf16.msra.mxu0 %v10479_v54  ;;  %v10930_v53 = vld [vmem:[#allocation14 + $0x100] sm:$0xf] }
 0x21f   :  { %2806 = vmatmul.bf16.vlgmr.msrb.gmra.mxu3 %v15980_v42  ;;  %v10995_v42 = vor.u32 %v14573_v20, %v10994_v19  ;;  %v14557_v54 = vld [vmem:[#allocation14 + $0x11c] sm:$0xf0] }
 0x220   :  { %5956 = vmatpush.bf16.msra.mxu3 %v11283_v50  ;;  %2828 = vmatpush.bf16.msra.mxu1 %v10671_v5  ;;  %v14773_v50 = vld [vmem:[#allocation14 + $0x7dc] sm:$0xf0]  ;;  %v10931_v62 = vor.u32 %v14557_v54, %v10930_v53 }
 0x221   :  { %v11795_v57 = vor.u32 %v14773_v50, %v11794_v49  ;;  %v14765_v5 = vld [vmem:[#allocation14 + $0x79c] sm:$0xf0] }
 0x222   :  { %2792 = vmatpush.bf16.msrb.mxu2 %v9807_v7  ;;  %2814 = vmatpush.bf16.msra.mxu0 %v10447_v8  ;;  %v16043_v60 = vpop.f32.mrf.mxu3  ;;  %v10316_v7 = vld [vmem:[#allocation11 + $0x438] sm:$0xf0]  ;;  %v10898_v8 = vld [vmem:[#allocation14 + $0xc0] sm:$0xf]  ;;  %v11763_v15 = vor.u32 %v14765_v5, %v11762_v2 }
 0x223   :  { %v10899_v18 = vor.u32 %v14549_v9, %v10898_v8  ;;  %v11090_v19 = vld [vmem:[#allocation14 + $0x240] sm:$0xf]  ;;  %v2837_v8 = vmax.f32 %v16019_v13, 0.0 }
 0x224   :  { %5957 = vmatpush.bf16.msra.mxu3 %v11251_v6  ;;  %2829 = vmatpush.bf16.msra.mxu1 %v10639_v22  ;;  %v14396_v6 = vld [vmem:[#allocation11 + $0x41c] sm:$0xf]  ;;  %v14597_v20 = vld [vmem:[#allocation14 + $0x25c] sm:$0xf0] }
 0x225   :  { %2793 = vmatmul.bf16.vlgmr.msrb.gmra.mxu2 %v15983_v1  ;;  %v2483_v1 = vadd.f32 %v16022_v21, %v1126_v35  ;;  %v10319_v17 = vor.u32 %v14396_v6, %v10316_v7  ;;  %v11730_v22 = vld [vmem:[#allocation14 + $0x740] sm:$0xf]  ;;  %v11091_v29 = vor.u32 %v14597_v20, %v11090_v19  ;;  %v2535_v19 = vadd.f32 %v16032_v28, %v1127_v51 }
 0x226   :  { %5943 = vmatpush.bf16.msra.mxu2 %v11027_v14  ;;  %2815 = vmatpush.bf16.msra.mxu0 %v10415_v24  ;;  %v11123_v14 = vor.u32 %v14605_v59, %v11122_v58  ;;  %v10866_v24 = vld [vmem:[#allocation14 + $0x80] sm:$0xf] }
 0x227   :  { %v2496_v21 = vadd.f32 %v16017_v63, %v2483_v1  ;;  %v14757_v63 = vld [vmem:[#allocation14 + $0x75c] sm:$0xf0]  ;;  %v10867_v34 = vor.u32 %v14541_v25, %v10866_v24 }
 0x228   :  { %5958 = vmatpush.bf16.msra.mxu3 %v11219_v23  ;;  %2830 = vmatpush.bf16.msra.mxu1 %v10607_v36  ;;  %v11539_v23 = vor.u32 %v14709_v11, %v11538_v10  ;;  %v2586_v26 = vpop.f32.mrf.mxu2  ;;  %v11731_v32 = vor.u32 %v14757_v63, %v11730_v22  ;;  %v14589_v35 = vld [vmem:[#allocation14 + $0x21c] sm:$0xf0] }
 0x229   :  { %v2509_v16 = vadd.f32 %v16027_v3, %v2496_v21  ;;  %v11058_v3 = vld [vmem:[#allocation14 + $0x200] sm:$0xf] }
 0x22a   :  { %5944 = vmatpush.bf16.msra.mxu2 %v10995_v42  ;;  %2816 = vmatpush.bf16.msra.mxu0 %v10383_v40  ;;  %v14701_v42 = vld [vmem:[#allocation14 + $0x59c] sm:$0xf0]  ;;  %v2601_v33 = vpop.f32.mrf.mxu3  ;;  %v11059_v49 = vor.u32 %v14589_v35, %v11058_v3 }
 0x22b   :  { %v2522_v30 = vadd.f32 %v16025_v38, %v2509_v16  ;;  %v14749_v36 = vld [vmem:[#allocation14 + $0x71c] sm:$0xf0]  ;;  %v11507_v37 = vor.u32 %v14701_v42, %v11506_v27  ;;  %v1128_v38 = vperm.slane %v16012_v0, 3  ;;  %v16060_v27 = vpack.c.bf16 %v2837_v8, %v2837_v8 }
 0x22c   :  { %5959 = vmatpush.bf16.msra.mxu3 %v11187_v39  ;;  %2831 = vmatpush.bf16.msra.mxu1 %v10575_v55  ;;  %v10834_v39 = vld [vmem:[#allocation14 + $0x40] sm:$0xf]  ;;  %v16049_v43 = vpop.f32.mrf.mxu1 }
 0x22d   :  { %v14533_v40 = vld [vmem:[#allocation14 + $0x5c] sm:$0xf0]  ;;  %v2838_v50 = vmax.f32 %v2522_v30, 0.0  ;;  %v2587_v5 = vadd.f32 %v2586_v26, %v1128_v38 }
 0x22e   :  { %5945 = vmatpush.bf16.msra.mxu2 %v10963_v48  ;;  %2817 = vmatpush.bf16.msra.mxu0 %v10351_v61  ;;  %v11474_v41 = vld [vmem:[#allocation14 + $0x540] sm:$0xf]  ;;  %v10835_v53 = vor.u32 %v14533_v40, %v10834_v39 }
 0x22f   :  { %2832 = vmatmul.bf16.vlgmr.msra.gmra.mxu1 %v15988_v31  ;;  %v11698_v31 = vld [vmem:[#allocation14 + $0x700] sm:$0xf]  ;;  %v16055_v9 = vpack.c.bf16 %v2838_v50, %v2838_v50  ;;  %v2600_v24 = vadd.f32 %v16043_v60, %v2587_v5 }
 0x230   :  { %5960 = vmatpush.bf16.msra.mxu3 %v11155_v47  ;;  %5982 = vmatpush.bf16.msrb.mxu1 %v11795_v57  ;;  %v14693_v44 = vld [vmem:[#allocation14 + $0x55c] sm:$0xf0]  ;;  %v11699_v52 = vor.u32 %v14749_v36, %v11698_v31  ;;  %v2588_v61 = vpop.f32.mrf.mxu2 }
 0x231   :  { %v12306_v45 = vld [vmem:[#allocation14 + $0xbc0] sm:$0xf]  ;;  %v11475_v55 = vor.u32 %v14693_v44, %v11474_v41 }
 0x232   :  { %5946 = vmatpush.bf16.msra.mxu2 %v10931_v62  ;;  %2818 = vmatpush.bf16.msra.mxu0 %v10319_v17  ;;  %v14901_v48 = vld [vmem:[#allocation14 + $0xbdc] sm:$0xf0]  ;;  %v2612_v10 = vpop.f32.mrf.mxu0 }
 0x233   :  { %v11666_v54 = vld [vmem:[#allocation14 + $0x6c0] sm:$0xf]  ;;  %v12307_v59 = vor.u32 %v14901_v48, %v12306_v45 }
 0x234   :  { %5961 = vmatpush.bf16.msra.mxu3 %v11123_v14  ;;  %5983 = vmatpush.bf16.msrb.mxu1 %v11763_v15  ;;  %v14741_v1 = vld [vmem:[#allocation14 + $0x6dc] sm:$0xf0]  ;;  %v2627_v20 = vpop.f32.mrf.mxu1 }
 0x235   :  { %2819 = vmatmul.bf16.vlgmr.msra.gmra.mxu0 %v15992_v56  ;;  %v10802_v47 = vld [vmem:[#allocation14] sm:$0xf]  ;;  %v11667_v21 = vor.u32 %v14741_v1, %v11666_v54 }
 0x236   :  { %5947 = vmatpush.bf16.msra.mxu2 %v10899_v18  ;;  %5969 = vmatpush.bf16.msrb.mxu0 %v11539_v23  ;;  %v14525_v57 = vld [vmem:[#allocation14 + $0x1c] sm:$0xf0] }
 0x237   :  { %v11442_v58 = vld [vmem:[#allocation14 + $0x500] sm:$0xf]  ;;  %v10803_v11 = vor.u32 %v14525_v57, %v10802_v47 }
 0x238   :  { %5962 = vmatpush.bf16.msra.mxu3 %v11091_v29  ;;  %5984 = vmatpush.bf16.msrb.mxu1 %v11731_v32  ;;  %v14685_v62 = vld [vmem:[#allocation14 + $0x51c] sm:$0xf0]  ;;  %v2613_v29 = vadd.f32 %v2612_v10, %v2600_v24 }
 0x239   :  { %v12050_v56 = vld [vmem:[#allocation14 + $0x9c0] sm:$0xf]  ;;  %v11443_v14 = vor.u32 %v14685_v62, %v11442_v58 }
 0x23a   :  { %5948 = vmatpush.bf16.msra.mxu2 %v10867_v34  ;;  %5970 = vmatpush.bf16.msrb.mxu0 %v11507_v37  ;;  %v14837_v2 = vld [vmem:[#allocation14 + $0x9dc] sm:$0xf0]  ;;  %v2548_v34 = vadd.f32 %v16029_v4, %v2535_v19  ;;  %v2614_v44 = vpop.f32.mrf.mxu0  ;;  %v2626_v45 = vadd.f32 %v16049_v43, %v2613_v29 }
 0x23b   :  { %v12274_v6 = vld [vmem:[#allocation14 + $0xb80] sm:$0xf]  ;;  %v12051_v15 = vor.u32 %v14837_v2, %v12050_v56 }
 0x23c   :  { %5963 = vmatpush.bf16.msra.mxu3 %v11059_v49  ;;  %v14893_v7 = vld [vmem:[#allocation14 + $0xb9c] sm:$0xf0]  ;;  %5985 = vmatpush.bf16.msrb.mxu1 %v11699_v52  ;;  %v2561_v40 = vadd.f32 %v16038_v12, %v2548_v34  ;;  %v2840_v57 = vmax.f32 %v2626_v45, 0.0 }
 0x23d   :  { %v11634_v16 = vld [vmem:[#allocation14 + $0x680] sm:$0xf]  ;;  %v12275_v63 = vor.u32 %v14893_v7, %v12274_v6 }
 0x23e   :  { %5949 = vmatpush.bf16.msra.mxu2 %v10835_v53  ;;  %5971 = vmatpush.bf16.msrb.mxu0 %v11475_v55  ;;  %v14733_v17 = vld [vmem:[#allocation14 + $0x69c] sm:$0xf0]  ;;  %v2574_v47 = vadd.f32 %v16035_v46, %v2561_v40  ;;  %v16069_v46 = vpack.c.bf16 %v2840_v57, %v2840_v57  ;;  %v14577_v40 = vld [vmem:[#allocation14 + $0x1c4] sm:$0xf] }
 0x23f   :  { %v11410_v18 = vld [vmem:[#allocation14 + $0x4c0] sm:$0xf]  ;;  %5964 = vmatmul.bf16.vlgmr.msra.gmra.mxu3 %v16055_v9  ;;  %v11635_v42 = vor.u32 %v14733_v17, %v11634_v16  ;;  %v10996_v57 = vld [vmem:[#allocation14 + $0x1a0] sm:$0xf0] }
 0x240   :  { %6008 = vmatpush.bf16.msrb.mxu3 %v12307_v59  ;;  %v14677_v13 = vld [vmem:[#allocation14 + $0x4dc] sm:$0xf0]  ;;  %5986 = vmatpush.bf16.msrb.mxu1 %v11667_v21  ;;  %v2839_v10 = vmax.f32 %v2574_v47, 0.0 }
 0x241   :  { %v12018_v22 = vld [vmem:[#allocation14 + $0x980] sm:$0xf]  ;;  %v11411_v28 = vor.u32 %v14677_v13, %v11410_v18 }
 0x242   :  { %v14829_v23 = vld [vmem:[#allocation14 + $0x99c] sm:$0xf0]  ;;  %5950 = vmatpush.bf16.msra.mxu2 %v10803_v11  ;;  %5972 = vmatpush.bf16.msrb.mxu0 %v11443_v14  ;;  %v16067_v43 = vpop.f32.mrf.mxu3 }
 0x243   :  { %v12242_v25 = vld [vmem:[#allocation14 + $0xb40] sm:$0xf]  ;;  %v12019_v3 = vor.u32 %v14829_v23, %v12018_v22 }
 0x244   :  { %v14885_v26 = vld [vmem:[#allocation14 + $0xb5c] sm:$0xf0]  ;;  %6009 = vmatpush.bf16.msrb.mxu3 %v12275_v63  ;;  %5987 = vmatpush.bf16.msrb.mxu1 %v11635_v42  ;;  %v1129_v63 = vperm.slane %v16012_v0, 4 }
 0x245   :  { %v11602_v30 = vld [vmem:[#allocation14 + $0x640] sm:$0xf]  ;;  %v12243_v36 = vor.u32 %v14885_v26, %v12242_v25  ;;  %5951 = vmatmul.bf16.vlgmr.msra.gmra.mxu2 %v16060_v27  ;;  %v16073_v26 = vpack.c.bf16 %v2839_v10, %v2839_v10 }
 0x246   :  { %5995 = vmatpush.bf16.msrb.mxu2 %v12051_v15  ;;  %v14725_v32 = vld [vmem:[#allocation14 + $0x65c] sm:$0xf0]  ;;  %5973 = vmatpush.bf16.msrb.mxu0 %v11411_v28 }
 0x247   :  { %v11378_v33 = vld [vmem:[#allocation14 + $0x480] sm:$0xf]  ;;  %v11603_v41 = vor.u32 %v14725_v32, %v11602_v30 }
 0x248   :  { %v14669_v35 = vld [vmem:[#allocation14 + $0x49c] sm:$0xf0]  ;;  %6010 = vmatpush.bf16.msrb.mxu3 %v12243_v36  ;;  %v2638_v20 = vpop.f32.mrf.mxu2 }
 0x249   :  { %v11986_v31 = vld [vmem:[#allocation14 + $0x940] sm:$0xf]  ;;  %v11379_v48 = vor.u32 %v14669_v35, %v11378_v33  ;;  %5988 = vmatpush.bf16.msrb.mxu1 %v11603_v41  ;;  %v2639_v0 = vadd.f32 %v2638_v20, %v1129_v63 }
 0x24a   :  { %v14821_v60 = vld [vmem:[#allocation14 + $0x95c] sm:$0xf0]  ;;  %5996 = vmatpush.bf16.msrb.mxu2 %v12019_v3  ;;  %v2653_v24 = vpop.f32.mrf.mxu3 }
 0x24b   :  { %v12210_v37 = vld [vmem:[#allocation14 + $0xb00] sm:$0xf]  ;;  %v11987_v4 = vor.u32 %v14821_v60, %v11986_v31  ;;  %5974 = vmatpush.bf16.msrb.mxu0 %v11379_v48  ;;  %v14641_v31 = vld [vmem:[#allocation14 + $0x3c4] sm:$0xf] }
 0x24c   :  { %v14877_v39 = vld [vmem:[#allocation14 + $0xb1c] sm:$0xf0]  ;;  %v2677_v35 = vpop.f32.mrf.mxu1  ;;  %v11284_v60 = vld [vmem:[#allocation14 + $0x3e0] sm:$0xf0] }
 0x24d   :  { %v11570_v38 = vld [vmem:[#allocation14 + $0x600] sm:$0xf]  ;;  %v12211_v54 = vor.u32 %v14877_v39, %v12210_v37  ;;  %v11028_v48 = vld [vmem:[#allocation14 + $0x1e0] sm:$0xf0] }
 0x24e   :  { %v14717_v49 = vld [vmem:[#allocation14 + $0x61c] sm:$0xf0]  ;;  %5997 = vmatpush.bf16.msrb.mxu2 %v11987_v4  ;;  %v11287_v4 = vor.u32 %v14641_v31, %v11284_v60  ;;  %v10932_v24 = vld [vmem:[#allocation14 + $0x120] sm:$0xf0] }
 0x24f   :  { %v11346_v50 = vld [vmem:[#allocation14 + $0x440] sm:$0xf]  ;;  %v11571_v12 = vor.u32 %v14717_v49, %v11570_v38  ;;  %6011 = vmatpush.bf16.msrb.mxu3 %v12211_v54  ;;  %v14601_v31 = vld [vmem:[#allocation14 + $0x284] sm:$0xf] }
 0x250   :  { %v14661_v51 = vld [vmem:[#allocation14 + $0x45c] sm:$0xf0]  ;;  %v2640_v45 = vpop.f32.mrf.mxu2  ;;  %v11124_v60 = vld [vmem:[#allocation14 + $0x2a0] sm:$0xf0] }
 0x251   :  { %v11954_v52 = vld [vmem:[#allocation14 + $0x900] sm:$0xf]  ;;  %v11347_v58 = vor.u32 %v14661_v51, %v11346_v50  ;;  %5989 = vmatpush.bf16.msrb.mxu1 %v11571_v12  ;;  %v14633_v50 = vld [vmem:[#allocation14 + $0x384] sm:$0xf] }
 0x252   :  { %v14813_v53 = vld [vmem:[#allocation14 + $0x91c] sm:$0xf0]  ;;  %v11252_v51 = vld [vmem:[#allocation14 + $0x3a0] sm:$0xf0]  ;;  %v2664_v54 = vpop.f32.mrf.mxu0 }
 0x253   :  { %v12178_v1 = vld [vmem:[#allocation14 + $0xac0] sm:$0xf]  ;;  %v11955_v59 = vor.u32 %v14813_v53, %v11954_v52  ;;  %5975 = vmatpush.bf16.msrb.mxu0 %v11347_v58  ;;  %v2652_v52 = vadd.f32 %v16067_v43, %v2639_v0  ;;  %v11255_v58 = vor.u32 %v14633_v50, %v11252_v51  ;;  %v14705_v45 = vld [vmem:[#allocation14 + $0x5c4] sm:$0xf] }
 0x254   :  { %v14869_v55 = vld [vmem:[#allocation14 + $0xadc] sm:$0xf0]  ;;  %5990 = vmatmul.bf16.vlgmr.msrb.gmra.mxu1 %v16069_v46  ;;  %v14537_v51 = vld [vmem:[#allocation14 + $0x84] sm:$0xf] }
 0x255   :  { %v11314_v61 = vld [vmem:[#allocation14 + $0x400] sm:$0xf]  ;;  %v12179_v5 = vor.u32 %v14869_v55, %v12178_v1  ;;  %5998 = vmatpush.bf16.msrb.mxu2 %v11955_v59  ;;  %v11031_v1 = vor.u32 %v14577_v40, %v11028_v48  ;;  %v14569_v55 = vld [vmem:[#allocation14 + $0x184] sm:$0xf]  ;;  %v2665_v47 = vadd.f32 %v2664_v54, %v2652_v52 }
 0x256   :  { %v14653_v62 = vld [vmem:[#allocation14 + $0x41c] sm:$0xf0]  ;;  %v10999_v43 = vor.u32 %v14569_v55, %v10996_v57  ;;  %v11540_v48 = vld [vmem:[#allocation14 + $0x5e0] sm:$0xf0] }
 0x257   :  { %v11922_v56 = vld [vmem:[#allocation14 + $0x8c0] sm:$0xf]  ;;  %v11315_v11 = vor.u32 %v14653_v62, %v11314_v61  ;;  %6012 = vmatpush.bf16.msrb.mxu3 %v12179_v5  ;;  %v2679_v62 = vpop.f32.mrf.mxu1  ;;  %v2678_v5 = vadd.f32 %v2677_v35, %v2665_v47  ;;  %v10900_v35 = vld [vmem:[#allocation14 + $0xe0] sm:$0xf0] }
 0x258   :  { %v14805_v2 = vld [vmem:[#allocation14 + $0x8dc] sm:$0xf0]  ;;  %v10868_v52 = vld [vmem:[#allocation14 + $0xa0] sm:$0xf0] }
 0x259   :  { %v12146_v6 = vld [vmem:[#allocation14 + $0xa80] sm:$0xf]  ;;  %v11923_v14 = vor.u32 %v14805_v2, %v11922_v56  ;;  %5976 = vmatpush.bf16.msrb.mxu0 %v11315_v11  ;;  %v14625_v56 = vld [vmem:[#allocation14 + $0x344] sm:$0xf] }
 0x25a   :  { %v14861_v7 = vld [vmem:[#allocation14 + $0xa9c] sm:$0xf0]  ;;  %v11220_v2 = vld [vmem:[#allocation14 + $0x360] sm:$0xf0]  ;;  %v2666_v20 = vpop.f32.mrf.mxu0 }
 0x25b   :  { %v12562_v8 = vld [vmem:[#allocation14 + $0xdc0] sm:$0xf]  ;;  %v12147_v17 = vor.u32 %v14861_v7, %v12146_v6  ;;  %5999 = vmatpush.bf16.msrb.mxu2 %v11923_v14  ;;  %v14561_v6 = vld [vmem:[#allocation14 + $0x144] sm:$0xf]  ;;  %v11223_v10 = vor.u32 %v14625_v56, %v11220_v2  ;;  %v10871_v56 = vor.u32 %v14537_v51, %v10868_v52 }
 0x25c   :  { %v14965_v21 = vld [vmem:[#allocation14 + $0xddc] sm:$0xf0]  ;;  %5977 = vmatmul.bf16.vlgmr.msrb.gmra.mxu0 %v16073_v26  ;;  %v10964_v7 = vld [vmem:[#allocation14 + $0x160] sm:$0xf0] }
 0x25d   :  { %v11890_v15 = vld [vmem:[#allocation14 + $0x880] sm:$0xf]  ;;  %v12563_v19 = vor.u32 %v14965_v21, %v12562_v8  ;;  %6013 = vmatpush.bf16.msrb.mxu3 %v12147_v17  ;;  %v2841_v21 = vmax.f32 %v2678_v5, 0.0  ;;  %v14593_v54 = vld [vmem:[#allocation14 + $0x244] sm:$0xf] }
 0x25e   :  { %v14797_v16 = vld [vmem:[#allocation14 + $0x89c] sm:$0xf0]  ;;  %v11092_v55 = vld [vmem:[#allocation14 + $0x260] sm:$0xf0] }
 0x25f   :  { %v12114_v18 = vld [vmem:[#allocation14 + $0xa40] sm:$0xf]  ;;  %v11891_v25 = vor.u32 %v14797_v16, %v11890_v15  ;;  %6021 = vmatpush.bf16.msra.mxu0 %v12563_v19  ;;  %v14617_v15 = vld [vmem:[#allocation14 + $0x304] sm:$0xf]  ;;  %v16077_v17 = vpack.c.bf16 %v2841_v21, %v2841_v21 }
 0x260   :  { %v14853_v13 = vld [vmem:[#allocation14 + $0xa5c] sm:$0xf0]  ;;  %v11188_v16 = vld [vmem:[#allocation14 + $0x320] sm:$0xf0] }
 0x261   :  { %v12530_v22 = vld [vmem:[#allocation14 + $0xd80] sm:$0xf]  ;;  %v12115_v28 = vor.u32 %v14853_v13, %v12114_v18  ;;  %6000 = vmatpush.bf16.msrb.mxu2 %v11891_v25  ;;  %v10967_v13 = vor.u32 %v14561_v6, %v10964_v7  ;;  %v11191_v25 = vor.u32 %v14617_v15, %v11188_v16  ;;  %v11508_v47 = vld [vmem:[#allocation14 + $0x5a0] sm:$0xf0]  ;;  %v11095_v7 = vor.u32 %v14593_v54, %v11092_v55 }
 0x262   :  { %v14957_v23 = vld [vmem:[#allocation14 + $0xd9c] sm:$0xf0]  ;;  %v14529_v2 = vld [vmem:[#allocation14 + $0x44] sm:$0xf] }
 0x263   :  { %v11858_v42 = vld [vmem:[#allocation14 + $0x840] sm:$0xf]  ;;  %v12531_v30 = vor.u32 %v14957_v23, %v12530_v22  ;;  %6014 = vmatpush.bf16.msrb.mxu3 %v12115_v28  ;;  %v14553_v22 = vld [vmem:[#allocation14 + $0x104] sm:$0xf] }
 0x264   :  { %v14789_v29 = vld [vmem:[#allocation14 + $0x85c] sm:$0xf0]  ;;  %v14609_v28 = vld [vmem:[#allocation14 + $0x2c4] sm:$0xf] }
 0x265   :  { %v12082_v3 = vld [vmem:[#allocation14 + $0xa00] sm:$0xf]  ;;  %v11859_v36 = vor.u32 %v14789_v29, %v11858_v42  ;;  %6022 = vmatpush.bf16.msra.mxu0 %v12531_v30  ;;  %v14545_v30 = vld [vmem:[#allocation14 + $0xc4] sm:$0xf] }
 0x266   :  { %v14845_v32 = vld [vmem:[#allocation14 + $0xa1c] sm:$0xf0]  ;;  %v10836_v5 = vld [vmem:[#allocation14 + $0x60] sm:$0xf0] }
 0x267   :  { %v12498_v33 = vld [vmem:[#allocation14 + $0xd40] sm:$0xf]  ;;  %v12083_v41 = vor.u32 %v14845_v32, %v12082_v3  ;;  %6001 = vmatpush.bf16.msrb.mxu2 %v11859_v36  ;;  %v11156_v3 = vld [vmem:[#allocation14 + $0x2e0] sm:$0xf0]  ;;  %v10839_v20 = vor.u32 %v14529_v2, %v10836_v5 }
 0x268   :  { %v14949_v34 = vld [vmem:[#allocation14 + $0xd5c] sm:$0xf0]  ;;  %v2690_v57 = vpop.f32.mrf.mxu2  ;;  %v11060_v21 = vld [vmem:[#allocation14 + $0x220] sm:$0xf0] }
 0x269   :  { %v11826_v37 = vld [vmem:[#allocation14 + $0x800] sm:$0xf]  ;;  %v12499_v44 = vor.u32 %v14949_v34, %v12498_v33  ;;  %6015 = vmatpush.bf16.msrb.mxu3 %v12083_v41  ;;  %v10935_v34 = vor.u32 %v14553_v22, %v10932_v24  ;;  %v14521_v22 = vld [vmem:[#allocation14 + $0x4] sm:$0xf] }
 0x26a   :  { %v14781_v39 = vld [vmem:[#allocation14 + $0x81c] sm:$0xf0]  ;;  %v12308_v51 = vld [vmem:[#allocation14 + $0xbe0] sm:$0xf0] }
 0x26b   :  { %v12466_v38 = vld [vmem:[#allocation14 + $0xd00] sm:$0xf]  ;;  %v11827_v53 = vor.u32 %v14781_v39, %v11826_v37  ;;  %6023 = vmatpush.bf16.msra.mxu0 %v12499_v44  ;;  %v16080_v37 = vpop.f32.mrf.mxu3  ;;  %v11159_v39 = vor.u32 %v14609_v28, %v11156_v3  ;;  %v11444_v28 = vld [vmem:[#allocation14 + $0x520] sm:$0xf0] }
 0x26c   :  { %v14941_v49 = vld [vmem:[#allocation14 + $0xd1c] sm:$0xf0]  ;;  %v14817_v52 = vld [vmem:[#allocation14 + $0x944] sm:$0xf] }
 0x26d   :  { %v12467_v12 = vor.u32 %v14941_v49, %v12466_v38  ;;  %6060 = vmatpush.bf16.msra.mxu3 %v11287_v4  ;;  %v12434_v59 = vld [vmem:[#allocation14 + $0xcc0] sm:$0xf]  ;;  %6002 = vmatpush.bf16.msrb.mxu2 %v11827_v53  ;;  %v10903_v49 = vor.u32 %v14545_v30, %v10900_v35  ;;  %v11127_v53 = vor.u32 %v14601_v31, %v11124_v60  ;;  %v14825_v60 = vld [vmem:[#allocation14 + $0x984] sm:$0xf] }
 0x26e   :  { %v14933_v61 = vld [vmem:[#allocation14 + $0xcdc] sm:$0xf0]  ;;  %v11988_v54 = vld [vmem:[#allocation14 + $0x960] sm:$0xf0] }
 0x26f   :  { %6024 = vmatpush.bf16.msra.mxu0 %v12467_v12  ;;  %v12435_v8 = vor.u32 %v14933_v61, %v12434_v59  ;;  %v12402_v11 = vld [vmem:[#allocation14 + $0xc80] sm:$0xf]  ;;  %v14697_v12 = vld [vmem:[#allocation14 + $0x584] sm:$0xf]  ;;  %v16082_v61 = vld [vmem:[#allocation13] sm:$0xff]  ;;  %v11991_v5 = vor.u32 %v14817_v52, %v11988_v54 }
 0x270   :  { %v14925_v14 = vld [vmem:[#allocation14 + $0xc9c] sm:$0xf0]  ;;  %6003 = vmatmul.bf16.vlgmr.msrb.gmra.mxu2 %v16077_v17  ;;  %v1130_v62 = vperm.slane %v16082_v61, 5  ;;  %v2692_v3 = vpop.f32.mrf.mxu2  ;;  %v11380_v55 = vld [vmem:[#allocation14 + $0x4a0] sm:$0xf0] }
 0x271   :  { %6047 = vmatpush.bf16.msra.mxu2 %v11031_v1  ;;  %6061 = vmatpush.bf16.msra.mxu3 %v11255_v58  ;;  %v12818_v18 = vld [vmem:[#allocation14 + $0xfc0] sm:$0xf]  ;;  %v12403_v23 = vor.u32 %v14925_v14, %v12402_v11  ;;  %v11543_v1 = vor.u32 %v14705_v45, %v11540_v48  ;;  %v14689_v11 = vld [vmem:[#allocation14 + $0x544] sm:$0xf] }
 0x272   :  { %v15029_v19 = vld [vmem:[#allocation14 + $0xfdc] sm:$0xf0]  ;;  %v11476_v14 = vld [vmem:[#allocation14 + $0x560] sm:$0xf0] }
 0x273   :  { %6025 = vmatpush.bf16.msra.mxu0 %v12435_v8  ;;  %v12819_v63 = vor.u32 %v15029_v19, %v12818_v18  ;;  %v12370_v42 = vld [vmem:[#allocation14 + $0xc40] sm:$0xf]  ;;  %v2705_v6 = vpop.f32.mrf.mxu3  ;;  %v14585_v8 = vld [vmem:[#allocation14 + $0x204] sm:$0xf]  ;;  %v2729_v19 = vpop.f32.mrf.mxu1 }
 0x274   :  { %v14917_v29 = vld [vmem:[#allocation14 + $0xc5c] sm:$0xf0]  ;;  %v11063_v24 = vor.u32 %v14585_v8, %v11060_v21  ;;  %v11796_v8 = vld [vmem:[#allocation14 + $0x7e0] sm:$0xf0] }
 0x275   :  { %6048 = vmatpush.bf16.msra.mxu2 %v10999_v43  ;;  %6062 = vmatpush.bf16.msra.mxu3 %v11223_v10  ;;  %v12786_v32 = vld [vmem:[#allocation14 + $0xf80] sm:$0xf]  ;;  %v12371_v0 = vor.u32 %v14917_v29, %v12370_v42  ;;  %v11511_v10 = vor.u32 %v14697_v12, %v11508_v47  ;;  %v12052_v42 = vld [vmem:[#allocation14 + $0x9e0] sm:$0xf0] }
 0x276   :  { %6034 = vmatpush.bf16.msra.mxu1 %v12819_v63  ;;  %v15021_v33 = vld [vmem:[#allocation14 + $0xf9c] sm:$0xf0]  ;;  %v14833_v63 = vld [vmem:[#allocation14 + $0x9c4] sm:$0xf] }
 0x277   :  { %6026 = vmatpush.bf16.msra.mxu0 %v12403_v23  ;;  %v12787_v36 = vor.u32 %v15021_v33, %v12786_v32  ;;  %v12338_v40 = vld [vmem:[#allocation14 + $0xc00] sm:$0xf]  ;;  %v10804_v23 = vld [vmem:[#allocation14 + $0x20] sm:$0xf0]  ;;  %v12055_v31 = vor.u32 %v14833_v63, %v12052_v42 }
 0x278   :  { %v14909_v41 = vld [vmem:[#allocation14 + $0xc1c] sm:$0xf0]  ;;  %v14681_v29 = vld [vmem:[#allocation14 + $0x504] sm:$0xf]  ;;  %v10807_v33 = vor.u32 %v14521_v22, %v10804_v23 }
 0x279   :  { %6049 = vmatpush.bf16.msra.mxu2 %v10967_v13  ;;  %6063 = vmatpush.bf16.msra.mxu3 %v11191_v25  ;;  %v12754_v44 = vld [vmem:[#allocation14 + $0xf40] sm:$0xf]  ;;  %v12339_v50 = vor.u32 %v14909_v41, %v12338_v40  ;;  %v2691_v13 = vadd.f32 %v2690_v57, %v1130_v62  ;;  %v11479_v25 = vor.u32 %v14689_v11, %v11476_v14  ;;  %v14673_v40 = vld [vmem:[#allocation14 + $0x4c4] sm:$0xf] }
 0x27a   :  { %6035 = vmatpush.bf16.msra.mxu1 %v12787_v36  ;;  %v15013_v4 = vld [vmem:[#allocation14 + $0xf5c] sm:$0xf0]  ;;  %v2716_v36 = vpop.f32.mrf.mxu0  ;;  %v11412_v41 = vld [vmem:[#allocation14 + $0x4e0] sm:$0xf0] }
 0x27b   :  { %v12755_v38 = vor.u32 %v15013_v4, %v12754_v44  ;;  %6027 = vmatpush.bf16.msra.mxu0 %v12371_v0  ;;  %v12722_v58 = vld [vmem:[#allocation14 + $0xf00] sm:$0xf]  ;;  %v2704_v35 = vadd.f32 %v16080_v37, %v2691_v13  ;;  %v11447_v0 = vor.u32 %v14681_v29, %v11444_v28  ;;  %v2731_v4 = vpop.f32.mrf.mxu1  ;;  %v14897_v37 = vld [vmem:[#allocation14 + $0xbc4] sm:$0xf] }
 0x27c   :  { %v15005_v59 = vld [vmem:[#allocation14 + $0xf1c] sm:$0xf0]  ;;  %v12276_v62 = vld [vmem:[#allocation14 + $0xba0] sm:$0xf0] }
 0x27d   :  { %6050 = vmatpush.bf16.msra.mxu2 %v10935_v34  ;;  %6064 = vmatpush.bf16.msra.mxu3 %v11159_v39  ;;  %v12723_v43 = vor.u32 %v15005_v59, %v12722_v58  ;;  %v12690_v15 = vld [vmem:[#allocation14 + $0xec0] sm:$0xf]  ;;  %v12020_v39 = vld [vmem:[#allocation14 + $0x9a0] sm:$0xf0]  ;;  %v2717_v44 = vadd.f32 %v2716_v36, %v2704_v35  ;;  %v12311_v58 = vor.u32 %v14897_v37, %v12308_v51  ;;  %v1131_v37 = vperm.slane %v16082_v61, 6 }
 0x27e   :  { %6036 = vmatpush.bf16.msra.mxu1 %v12755_v38  ;;  %v14997_v16 = vld [vmem:[#allocation14 + $0xedc] sm:$0xf0]  ;;  %v14889_v59 = vld [vmem:[#allocation14 + $0xb84] sm:$0xf] }
 0x27f   :  { %6028 = vmatpush.bf16.msra.mxu0 %v12339_v50  ;;  %v12691_v18 = vor.u32 %v14997_v16, %v12690_v15  ;;  %v12658_v30 = vld [vmem:[#allocation14 + $0xe80] sm:$0xf]  ;;  %v12023_v50 = vor.u32 %v14825_v60, %v12020_v39  ;;  %v14657_v11 = vld [vmem:[#allocation14 + $0x444] sm:$0xf]  ;;  %v12279_v16 = vor.u32 %v14889_v59, %v12276_v62 }
 0x280   :  { %v14989_v32 = vld [vmem:[#allocation14 + $0xe9c] sm:$0xf0]  ;;  %v11348_v14 = vld [vmem:[#allocation14 + $0x460] sm:$0xf0] }
 0x281   :  { %6051 = vmatpush.bf16.msra.mxu2 %v10903_v49  ;;  %6065 = vmatpush.bf16.msra.mxu3 %v11127_v53  ;;  %v12659_v34 = vor.u32 %v14989_v32, %v12658_v30  ;;  %v12626_v45 = vld [vmem:[#allocation14 + $0xe40] sm:$0xf]  ;;  %v2730_v49 = vadd.f32 %v2729_v19, %v2717_v44  ;;  %v11415_v53 = vor.u32 %v14673_v40, %v11412_v41  ;;  %v14761_v19 = vld [vmem:[#allocation14 + $0x784] sm:$0xf] }
 0x282   :  { %6037 = vmatpush.bf16.msra.mxu1 %v12723_v43  ;;  %v14981_v48 = vld [vmem:[#allocation14 + $0xe5c] sm:$0xf0]  ;;  %v14809_v43 = vld [vmem:[#allocation14 + $0x904] sm:$0xf]  ;;  %v2718_v21 = vpop.f32.mrf.mxu0  ;;  %v2755_v3 = vpop.f32.mrf.mxu3 }
 0x283   :  { %6073 = vmatpush.bf16.msrb.mxu0 %v11543_v1  ;;  %v12627_v38 = vor.u32 %v14981_v48, %v12626_v45  ;;  %v14665_v1 = vld [vmem:[#allocation14 + $0x484] sm:$0xf]  ;;  %v2842_v12 = vmax.f32 %v2730_v49, 0.0  ;;  %v12594_v47 = vld [vmem:[#allocation14 + $0xe00] sm:$0xf] }
 0x284   :  { %v14973_v57 = vld [vmem:[#allocation14 + $0xe1c] sm:$0xf0]  ;;  %v11383_v6 = vor.u32 %v14665_v1, %v11380_v55  ;;  %v12244_v22 = vld [vmem:[#allocation14 + $0xb60] sm:$0xf0] }
 0x285   :  { %6052 = vmatpush.bf16.msra.mxu2 %v10871_v56  ;;  %6066 = vmatpush.bf16.msra.mxu3 %v11095_v7  ;;  %v12595_v56 = vor.u32 %v14973_v57, %v12594_v47  ;;  %v16087_v2 = vpack.c.bf16 %v2842_v12, %v2842_v12  ;;  %v14769_v7 = vld [vmem:[#allocation14 + $0x7c4] sm:$0xf] }
 0x286   :  { %6038 = vmatpush.bf16.msra.mxu1 %v12691_v18  ;;  %v11799_v15 = vor.u32 %v14769_v7, %v11796_v8  ;;  %v14881_v18 = vld [vmem:[#allocation14 + $0xb44] sm:$0xf] }
 0x287   :  { %6074 = vmatpush.bf16.msrb.mxu0 %v11511_v10  ;;  %v11956_v10 = vld [vmem:[#allocation14 + $0x920] sm:$0xf0]  ;;  %6016 = vmatmul.bf16.vlgmr.msrb.gmra.mxu3 %v16087_v2  ;;  %v12247_v32 = vor.u32 %v14881_v18, %v12244_v22  ;;  %v11002_v18 = vld [vmem:[#allocation14 + $0x188] sm:$0xf] }
 0x288   :  { %v11959_v13 = vor.u32 %v14809_v43, %v11956_v10  ;;  %v14801_v23 = vld [vmem:[#allocation14 + $0x8c4] sm:$0xf]  ;;  %v2742_v44 = vpop.f32.mrf.mxu2 }
 0x289   :  { %6053 = vmatpush.bf16.msra.mxu2 %v10839_v20  ;;  %6067 = vmatpush.bf16.msra.mxu3 %v11063_v24  ;;  %v11764_v20 = vld [vmem:[#allocation14 + $0x7a0] sm:$0xf0]  ;;  %v11351_v24 = vor.u32 %v14657_v11, %v11348_v14  ;;  %v2743_v62 = vadd.f32 %v2742_v44, %v1131_v37  ;;  %v14558_v37 = vld [vmem:[#allocation14 + $0x124] sm:$0xf0] }
 0x28a   :  { %6039 = vmatpush.bf16.msra.mxu1 %v12659_v34  ;;  %v11924_v63 = vld [vmem:[#allocation14 + $0x8e0] sm:$0xf0]  ;;  %v2757_v51 = vpop.f32.mrf.mxu3 }
 0x28b   :  { %6075 = vmatpush.bf16.msrb.mxu0 %v11479_v25  ;;  %v11767_v25 = vor.u32 %v14761_v19, %v11764_v20  ;;  %v14649_v42 = vld [vmem:[#allocation14 + $0x404] sm:$0xf]  ;;  %v11927_v34 = vor.u32 %v14801_v23, %v11924_v63  ;;  %v14574_v19 = vld [vmem:[#allocation14 + $0x1a4] sm:$0xf0] }
 0x28c   :  { %v11316_v29 = vld [vmem:[#allocation14 + $0x420] sm:$0xf0]  ;;  %v2781_v57 = vpop.f32.mrf.mxu1 }
 0x28d   :  { %6054 = vmatpush.bf16.msra.mxu2 %v10807_v33  ;;  %6112 = vmatpush.bf16.msrb.mxu3 %v12311_v58  ;;  %v14753_v28 = vld [vmem:[#allocation14 + $0x744] sm:$0xf]  ;;  %v11319_v60 = vor.u32 %v14649_v42, %v11316_v29 }
 0x28e   :  { %6040 = vmatpush.bf16.msra.mxu1 %v12627_v38  ;;  %v11732_v30 = vld [vmem:[#allocation14 + $0x760] sm:$0xf0] }
 0x28f   :  { %6076 = vmatpush.bf16.msrb.mxu0 %v11447_v0  ;;  %v11735_v33 = vor.u32 %v14753_v28, %v11732_v30  ;;  %v14873_v35 = vld [vmem:[#allocation14 + $0xb04] sm:$0xf]  ;;  %v11003_v28 = vor.u32 %v14574_v19, %v11002_v18  ;;  %v11162_v19 = vld [vmem:[#allocation14 + $0x2c8] sm:$0xf] }
 0x290   :  { %6055 = vmatmul.bf16.vlgmr.msra.gmra.mxu2 %v16060_v27  ;;  %v14793_v0 = vld [vmem:[#allocation14 + $0x884] sm:$0xf]  ;;  %v2744_v8 = vpop.f32.mrf.mxu2 }
 0x291   :  { %6099 = vmatpush.bf16.msrb.mxu2 %v12055_v31  ;;  %6113 = vmatpush.bf16.msrb.mxu3 %v12279_v16  ;;  %v12212_v31 = vld [vmem:[#allocation14 + $0xb20] sm:$0xf0]  ;;  %v2756_v16 = vadd.f32 %v2755_v3, %v2743_v62  ;;  %v14622_v8 = vld [vmem:[#allocation14 + $0x324] sm:$0xf0] }
 0x292   :  { %6041 = vmatpush.bf16.msra.mxu1 %v12595_v56  ;;  %v11892_v36 = vld [vmem:[#allocation14 + $0x8a0] sm:$0xf0]  ;;  %v12215_v39 = vor.u32 %v14873_v35, %v12212_v31  ;;  %v11034_v56 = vld [vmem:[#allocation14 + $0x1c8] sm:$0xf]  ;;  %v2768_v20 = vpop.f32.mrf.mxu0 }
 0x293   :  { %6077 = vmatpush.bf16.msrb.mxu0 %v11415_v53  ;;  %v14745_v40 = vld [vmem:[#allocation14 + $0x704] sm:$0xf]  ;;  %v11895_v45 = vor.u32 %v14793_v0, %v11892_v36  ;;  %v2769_v63 = vadd.f32 %v2768_v20, %v2756_v16  ;;  %v10970_v35 = vld [vmem:[#allocation14 + $0x148] sm:$0xf] }
 0x294   :  { %v11700_v41 = vld [vmem:[#allocation14 + $0x720] sm:$0xf0]  ;;  %v2783_v29 = vpop.f32.mrf.mxu1  ;;  %v14566_v31 = vld [vmem:[#allocation14 + $0x164] sm:$0xf0] }
 0x295   :  { %6100 = vmatpush.bf16.msrb.mxu2 %v12023_v50  ;;  %6114 = vmatpush.bf16.msrb.mxu3 %v12247_v32  ;;  %v14865_v48 = vld [vmem:[#allocation14 + $0xac4] sm:$0xf]  ;;  %v11703_v38 = vor.u32 %v14745_v40, %v11700_v41  ;;  %v11290_v32 = vld [vmem:[#allocation14 + $0x3c8] sm:$0xf]  ;;  %v2782_v3 = vadd.f32 %v2781_v57, %v2769_v63  ;;  %v10971_v44 = vor.u32 %v14566_v31, %v10970_v35 }
 0x296   :  { %6086 = vmatpush.bf16.msrb.mxu1 %v11799_v15  ;;  %v12180_v4 = vld [vmem:[#allocation14 + $0xae0] sm:$0xf0]  ;;  %v14614_v20 = vld [vmem:[#allocation14 + $0x2e4] sm:$0xf0] }
 0x297   :  { %6078 = vmatpush.bf16.msrb.mxu0 %v11383_v6  ;;  %v14785_v49 = vld [vmem:[#allocation14 + $0x844] sm:$0xf]  ;;  %v12183_v52 = vor.u32 %v14865_v48, %v12180_v4  ;;  %6068 = vmatmul.bf16.vlgmr.msra.gmra.mxu3 %v16055_v9  ;;  %v11258_v48 = vld [vmem:[#allocation14 + $0x388] sm:$0xf] }
 0x298   :  { %v11860_v50 = vld [vmem:[#allocation14 + $0x860] sm:$0xf0]  ;;  %v14638_v4 = vld [vmem:[#allocation14 + $0x3a4] sm:$0xf0] }
 0x299   :  { %6101 = vmatpush.bf16.msrb.mxu2 %v11991_v5  ;;  %6115 = vmatpush.bf16.msrb.mxu3 %v12215_v39  ;;  %v14737_v53 = vld [vmem:[#allocation14 + $0x6c4] sm:$0xf]  ;;  %v11863_v1 = vor.u32 %v14785_v49, %v11860_v50  ;;  %v14582_v5 = vld [vmem:[#allocation14 + $0x1e4] sm:$0xf0]  ;;  %v2843_v39 = vmax.f32 %v2782_v3, 0.0 }
 0x29a   :  { %6087 = vmatpush.bf16.msrb.mxu1 %v11767_v25  ;;  %v11668_v54 = vld [vmem:[#allocation14 + $0x6e0] sm:$0xf0]  ;;  %v11035_v15 = vor.u32 %v14582_v5, %v11034_v56  ;;  %v10938_v50 = vld [vmem:[#allocation14 + $0x108] sm:$0xf] }
 0x29b   :  { %6079 = vmatpush.bf16.msrb.mxu0 %v11351_v24  ;;  %v14857_v55 = vld [vmem:[#allocation14 + $0xa84] sm:$0xf]  ;;  %v11671_v47 = vor.u32 %v14737_v53, %v11668_v54  ;;  %v11259_v53 = vor.u32 %v14638_v4, %v11258_v48  ;;  %v14534_v63 = vld [vmem:[#allocation14 + $0x64] sm:$0xf0] }
 0x29c   :  { %v12148_v12 = vld [vmem:[#allocation14 + $0xaa0] sm:$0xf0]  ;;  %v14526_v35 = vld [vmem:[#allocation14 + $0x24] sm:$0xf0] }
 0x29d   :  { %6102 = vmatpush.bf16.msrb.mxu2 %v11959_v13  ;;  %v14777_v58 = vld [vmem:[#allocation14 + $0x804] sm:$0xf]  ;;  %6116 = vmatpush.bf16.msrb.mxu3 %v12183_v52  ;;  %v12151_v43 = vor.u32 %v14857_v55, %v12148_v12  ;;  %v2770_v52 = vpop.f32.mrf.mxu0  ;;  %v11226_v12 = vld [vmem:[#allocation14 + $0x348] sm:$0xf] }
 0x29e   :  { %6088 = vmatpush.bf16.msrb.mxu1 %v11735_v33  ;;  %v11828_v59 = vld [vmem:[#allocation14 + $0x820] sm:$0xf0]  ;;  %v14646_v33 = vld [vmem:[#allocation14 + $0x3e4] sm:$0xf0] }
 0x29f   :  { %6080 = vmatpush.bf16.msrb.mxu0 %v11319_v60  ;;  %v14729_v6 = vld [vmem:[#allocation14 + $0x684] sm:$0xf]  ;;  %v11831_v21 = vor.u32 %v14777_v58, %v11828_v59  ;;  %v11291_v40 = vor.u32 %v14646_v33, %v11290_v32  ;;  %v10906_v58 = vld [vmem:[#allocation14 + $0xc8] sm:$0xf] }
 0x2a0   :  { %v11636_v7 = vld [vmem:[#allocation14 + $0x6a0] sm:$0xf0]  ;;  %v14550_v59 = vld [vmem:[#allocation14 + $0xe4] sm:$0xf0] }
 0x2a1   :  { %6103 = vmatpush.bf16.msrb.mxu2 %v11927_v34  ;;  %v14849_v10 = vld [vmem:[#allocation14 + $0xa44] sm:$0xf]  ;;  %v11639_v14 = vor.u32 %v14729_v6, %v11636_v7  ;;  %6117 = vmatpush.bf16.msrb.mxu3 %v12151_v43  ;;  %v10907_v43 = vor.u32 %v14550_v59, %v10906_v58  ;;  %v11194_v7 = vld [vmem:[#allocation14 + $0x308] sm:$0xf] }
 0x2a2   :  { %6089 = vmatpush.bf16.msrb.mxu1 %v11703_v38  ;;  %v12116_v11 = vld [vmem:[#allocation14 + $0xa60] sm:$0xf0]  ;;  %v16093_v38 = vpack.c.bf16 %v2843_v39, %v2843_v39  ;;  %v2807_v62 = vpop.f32.mrf.mxu3  ;;  %v11130_v32 = vld [vmem:[#allocation14 + $0x288] sm:$0xf] }
 0x2a3   :  { %v12119_v13 = vor.u32 %v14849_v10, %v12116_v11  ;;  %v14721_v22 = vld [vmem:[#allocation14 + $0x644] sm:$0xf]  ;;  %v10874_v10 = vld [vmem:[#allocation14 + $0x88] sm:$0xf] }
 0x2a4   :  { %v11604_v23 = vld [vmem:[#allocation14 + $0x660] sm:$0xf0]  ;;  %6029 = vmatmul.bf16.vlgmr.msra.gmra.mxu0 %v16093_v38  ;;  %v14542_v11 = vld [vmem:[#allocation14 + $0xa4] sm:$0xf0] }
 0x2a5   :  { %6104 = vmatpush.bf16.msrb.mxu2 %v11895_v45  ;;  %v14841_v24 = vld [vmem:[#allocation14 + $0xa04] sm:$0xf]  ;;  %v11607_v42 = vor.u32 %v14721_v22, %v11604_v23  ;;  %6118 = vmatpush.bf16.msrb.mxu3 %v12119_v13  ;;  %v10875_v16 = vor.u32 %v14542_v11, %v10874_v10  ;;  %v10842_v23 = vld [vmem:[#allocation14 + $0x48] sm:$0xf] }
 0x2a6   :  { %6090 = vmatpush.bf16.msrb.mxu1 %v11671_v47  ;;  %v12084_v25 = vld [vmem:[#allocation14 + $0xa20] sm:$0xf0]  ;;  %v14630_v47 = vld [vmem:[#allocation14 + $0x364] sm:$0xf0] }
 0x2a7   :  { %v14961_v30 = vld [vmem:[#allocation14 + $0xdc4] sm:$0xf]  ;;  %v12087_v60 = vor.u32 %v14841_v24, %v12084_v25  ;;  %v11227_v56 = vor.u32 %v14630_v47, %v11226_v12  ;;  %v1132_v24 = vperm.slane %v16082_v61, 7  ;;  %v14606_v33 = vld [vmem:[#allocation14 + $0x2a4] sm:$0xf0] }
 0x2a8   :  { %v12564_v34 = vld [vmem:[#allocation14 + $0xde0] sm:$0xf0]  ;;  %v2794_v13 = vpop.f32.mrf.mxu2  ;;  %v11131_v61 = vor.u32 %v14606_v33, %v11130_v32  ;;  %v14590_v12 = vld [vmem:[#allocation14 + $0x224] sm:$0xf0] }
 0x2a9   :  { %6105 = vmatpush.bf16.msrb.mxu2 %v11863_v1  ;;  %v14713_v0 = vld [vmem:[#allocation14 + $0x604] sm:$0xf]  ;;  %v12567_v41 = vor.u32 %v14961_v30, %v12564_v34  ;;  %6119 = vmatpush.bf16.msrb.mxu3 %v12087_v60  ;;  %v10939_v1 = vor.u32 %v14558_v37, %v10938_v50  ;;  %v10810_v34 = vld [vmem:[#allocation14 + $0x8] sm:$0xf] }
 0x2aa   :  { %6091 = vmatpush.bf16.msrb.mxu1 %v11639_v14  ;;  %v11572_v36 = vld [vmem:[#allocation14 + $0x620] sm:$0xf0]  ;;  %v11195_v14 = vor.u32 %v14622_v8, %v11194_v7  ;;  %v2809_v25 = vpop.f32.mrf.mxu3  ;;  %v12058_v60 = vld [vmem:[#allocation14 + $0x9c8] sm:$0xf] }
 0x2ab   :  { %v14953_v45 = vld [vmem:[#allocation14 + $0xd84] sm:$0xf]  ;;  %v11575_v51 = vor.u32 %v14713_v0, %v11572_v36  ;;  %6125 = vmatpush.bf16.msra.mxu0 %v12567_v41  ;;  %v14838_v0 = vld [vmem:[#allocation14 + $0x9e4] sm:$0xf0]  ;;  %v2795_v36 = vadd.f32 %v2794_v13, %v1132_v24 }
 0x2ac   :  { %v12532_v49 = vld [vmem:[#allocation14 + $0xda0] sm:$0xf0]  ;;  %6120 = vmatmul.bf16.vlgmr.msrb.gmra.mxu3 %v16087_v2  ;;  %v2833_v31 = vpop.f32.mrf.mxu1  ;;  %v11098_v41 = vld [vmem:[#allocation14 + $0x248] sm:$0xf]  ;;  %v12059_v48 = vor.u32 %v14838_v0, %v12058_v60 }
 0x2ad   :  { %6106 = vmatpush.bf16.msrb.mxu2 %v11831_v21  ;;  %6164 = vmatpush.bf16.msra.mxu3 %v11291_v40  ;;  %v12535_v54 = vor.u32 %v14953_v45, %v12532_v49  ;;  %v14945_v55 = vld [vmem:[#allocation14 + $0xd44] sm:$0xf]  ;;  %v10811_v40 = vor.u32 %v14526_v35, %v10810_v34  ;;  %v12026_v50 = vld [vmem:[#allocation14 + $0x988] sm:$0xf] }
 0x2ae   :  { %6092 = vmatpush.bf16.msrb.mxu1 %v11607_v42  ;;  %v12500_v57 = vld [vmem:[#allocation14 + $0xd60] sm:$0xf0]  ;;  %v11163_v42 = vor.u32 %v14614_v20, %v11162_v19  ;;  %v14830_v37 = vld [vmem:[#allocation14 + $0x9a4] sm:$0xf0] }
 0x2af   :  { %6126 = vmatpush.bf16.msra.mxu0 %v12535_v54  ;;  %v12503_v5 = vor.u32 %v14945_v55, %v12500_v57  ;;  %v14937_v6 = vld [vmem:[#allocation14 + $0xd04] sm:$0xf]  ;;  %v11066_v55 = vld [vmem:[#allocation14 + $0x208] sm:$0xf]  ;;  %v12027_v57 = vor.u32 %v14830_v37, %v12026_v50 }
 0x2b0   :  { %6107 = vmatmul.bf16.vlgmr.msrb.gmra.mxu2 %v16077_v17  ;;  %v12468_v21 = vld [vmem:[#allocation14 + $0xd20] sm:$0xf0]  ;;  %v2796_v45 = vpop.f32.mrf.mxu2  ;;  %v12314_v59 = vld [vmem:[#allocation14 + $0xbc8] sm:$0xf]  ;;  %v11067_v8 = vor.u32 %v14590_v12, %v11066_v55 }
 0x2b1   :  { %6151 = vmatpush.bf16.msra.mxu2 %v11035_v15  ;;  %6165 = vmatpush.bf16.msra.mxu3 %v11259_v53  ;;  %v12471_v15 = vor.u32 %v14937_v6, %v12468_v21  ;;  %v14929_v18 = vld [vmem:[#allocation14 + $0xcc4] sm:$0xf]  ;;  %v11546_v6 = vld [vmem:[#allocation14 + $0x5c8] sm:$0xf] }
 0x2b2   :  { %6093 = vmatpush.bf16.msrb.mxu1 %v11575_v51  ;;  %v12436_v22 = vld [vmem:[#allocation14 + $0xce0] sm:$0xf0]  ;;  %v2808_v51 = vadd.f32 %v2807_v62, %v2795_v36  ;;  %v2820_v53 = vpop.f32.mrf.mxu0  ;;  %v14710_v7 = vld [vmem:[#allocation14 + $0x5e4] sm:$0xf0] }
 0x2b3   :  { %6127 = vmatpush.bf16.msra.mxu0 %v12503_v5  ;;  %v12439_v29 = vor.u32 %v14929_v18, %v12436_v22  ;;  %v14921_v30 = vld [vmem:[#allocation14 + $0xc84] sm:$0xf]  ;;  %v11994_v10 = vld [vmem:[#allocation14 + $0x948] sm:$0xf]  ;;  %v11547_v18 = vor.u32 %v14710_v7, %v11546_v6 }
 0x2b4   :  { %v12404_v3 = vld [vmem:[#allocation14 + $0xca0] sm:$0xf0]  ;;  %6081 = vmatmul.bf16.vlgmr.msrb.gmra.mxu0 %v16073_v26  ;;  %v2821_v47 = vadd.f32 %v2820_v53, %v2808_v51  ;;  %v2835_v5 = vpop.f32.mrf.mxu1  ;;  %v14822_v11 = vld [vmem:[#allocation14 + $0x964] sm:$0xf0] }
 0x2b5   :  { %6152 = vmatpush.bf16.msra.mxu2 %v11003_v28  ;;  %6166 = vmatpush.bf16.msra.mxu3 %v11227_v56  ;;  %v10843_v28 = vor.u32 %v14534_v63, %v10842_v23  ;;  %v12407_v39 = vor.u32 %v14921_v30, %v12404_v3  ;;  %v14913_v4 = vld [vmem:[#allocation14 + $0xc44] sm:$0xf]  ;;  %v14902_v56 = vld [vmem:[#allocation14 + $0xbe4] sm:$0xf0]  ;;  %v11995_v22 = vor.u32 %v14822_v11, %v11994_v10 }
 0x2b6   :  { %v12372_v49 = vld [vmem:[#allocation14 + $0xc60] sm:$0xf0]  ;;  %v2834_v62 = vadd.f32 %v2833_v31, %v2821_v47  ;;  %v12282_v19 = vld [vmem:[#allocation14 + $0xb88] sm:$0xf] }
 0x2b7   :  { %6128 = vmatpush.bf16.msra.mxu0 %v12471_v15  ;;  %v12375_v54 = vor.u32 %v14913_v4, %v12372_v49  ;;  %v12340_v58 = vld [vmem:[#allocation14 + $0xc20] sm:$0xf0]  ;;  %v12315_v15 = vor.u32 %v14902_v56, %v12314_v59  ;;  %v14894_v20 = vld [vmem:[#allocation14 + $0xba4] sm:$0xf0] }
 0x2b8   :  { %v12820_v21 = vld [vmem:[#allocation14 + $0xfe0] sm:$0xf0]  ;;  %v11514_v63 = vld [vmem:[#allocation14 + $0x588] sm:$0xf]  ;;  %v12283_v32 = vor.u32 %v14894_v20, %v12282_v19 }
 0x2b9   :  { %6153 = vmatpush.bf16.msra.mxu2 %v10971_v44  ;;  %6167 = vmatpush.bf16.msra.mxu3 %v11195_v14  ;;  %v14598_v44 = vld [vmem:[#allocation14 + $0x264] sm:$0xf0]  ;;  %v15017_v23 = vld [vmem:[#allocation14 + $0xf84] sm:$0xf] }
 0x2ba   :  { %v11099_v52 = vor.u32 %v14598_v44, %v11098_v41  ;;  %v14702_v24 = vld [vmem:[#allocation14 + $0x5a4] sm:$0xf0]  ;;  %v2822_v30 = vpop.f32.mrf.mxu0  ;;  %v15009_v3 = vld [vmem:[#allocation14 + $0xf44] sm:$0xf] }
 0x2bb   :  { %6129 = vmatpush.bf16.msra.mxu0 %v12439_v29  ;;  %v11962_v29 = vld [vmem:[#allocation14 + $0x908] sm:$0xf]  ;;  %v11515_v33 = vor.u32 %v14702_v24, %v11514_v63  ;;  %v14993_v6 = vld [vmem:[#allocation14 + $0xec4] sm:$0xf] }
 0x2bc   :  { %v12250_v34 = vld [vmem:[#allocation14 + $0xb48] sm:$0xf] }
 0x2bd   :  { %6154 = vmatpush.bf16.msra.mxu2 %v10939_v1  ;;  %6168 = vmatpush.bf16.msra.mxu3 %v11163_v42  ;;  %v14905_v1 = vld [vmem:[#allocation14 + $0xc04] sm:$0xf]  ;;  %v14886_v35 = vld [vmem:[#allocation14 + $0xb64] sm:$0xf0] }
 0x2be   :  { %v12343_v14 = vor.u32 %v14905_v1, %v12340_v58  ;;  %v12788_v42 = vld [vmem:[#allocation14 + $0xfa0] sm:$0xf0]  ;;  %v11482_v0 = vld [vmem:[#allocation14 + $0x548] sm:$0xf]  ;;  %v12251_v44 = vor.u32 %v14886_v35, %v12250_v34 }
 0x2bf   :  { %6130 = vmatpush.bf16.msra.mxu0 %v12407_v39  ;;  %v12791_v31 = vor.u32 %v15017_v23, %v12788_v42  ;;  %v14694_v36 = vld [vmem:[#allocation14 + $0x564] sm:$0xf0]  ;;  %v12756_v39 = vld [vmem:[#allocation14 + $0xf60] sm:$0xf0] }
 0x2c0   :  { %v14806_v41 = vld [vmem:[#allocation14 + $0x8e4] sm:$0xf0]  ;;  %v12759_v37 = vor.u32 %v15009_v3, %v12756_v39  ;;  %v12724_v1 = vld [vmem:[#allocation14 + $0xf20] sm:$0xf0]  ;;  %v11036_v3 = vld [vmem:[#allocation14 + $0x1e8] sm:$0xf0] }
 0x2c1   :  { %6155 = vmatpush.bf16.msra.mxu2 %v10907_v43  ;;  %6169 = vmatpush.bf16.msra.mxu3 %v11131_v61  ;;  %v15025_v43 = vld [vmem:[#allocation14 + $0xfc4] sm:$0xf]  ;;  %v12218_v49 = vld [vmem:[#allocation14 + $0xb08] sm:$0xf] }
 0x2c2   :  { %v12823_v13 = vor.u32 %v15025_v43, %v12820_v21  ;;  %v16103_v61 = vld [vmem:[#allocation16] sm:$0xff]  ;;  %v5965_v45 = vpop.f32.mrf.mxu3  ;;  %v14878_v50 = vld [vmem:[#allocation14 + $0xb24] sm:$0xf0] }
 0x2c3   :  { %6131 = vmatpush.bf16.msra.mxu0 %v12375_v54  ;;  %v3367_v4 = vperm.slane %v16103_v61, 0  ;;  %v11450_v53 = vld [vmem:[#allocation14 + $0x508] sm:$0xf]  ;;  %v12219_v47 = vor.u32 %v14878_v50, %v12218_v49  ;;  %v12692_v21 = vld [vmem:[#allocation14 + $0xee0] sm:$0xf0] }
 0x2c4   :  { %v14686_v54 = vld [vmem:[#allocation14 + $0x524] sm:$0xf0]  ;;  %v14985_v23 = vld [vmem:[#allocation14 + $0xe84] sm:$0xf]  ;;  %v11004_v49 = vld [vmem:[#allocation14 + $0x1a8] sm:$0xf0] }
 0x2c5   :  { %6156 = vmatpush.bf16.msra.mxu2 %v10875_v16  ;;  %6170 = vmatpush.bf16.msra.mxu3 %v11099_v52  ;;  %v2844_v16 = vmax.f32 %v2834_v62, 0.0  ;;  %v15001_v52 = vld [vmem:[#allocation14 + $0xf04] sm:$0xf]  ;;  %v11898_v55 = vld [vmem:[#allocation14 + $0x888] sm:$0xf] }
 0x2c6   :  { %v14798_v12 = vld [vmem:[#allocation14 + $0x8a4] sm:$0xf0]  ;;  %v12727_v5 = vor.u32 %v15001_v52, %v12724_v1  ;;  %v12660_v42 = vld [vmem:[#allocation14 + $0xea0] sm:$0xf0] }
 0x2c7   :  { %v16100_v25 = vpack.c.bf16 %v2844_v16, %v2844_v16  ;;  %6132 = vmatpush.bf16.msra.mxu0 %v12343_v14  ;;  %v12186_v58 = vld [vmem:[#allocation14 + $0xac8] sm:$0xf]  ;;  %v11899_v43 = vor.u32 %v14798_v12, %v11898_v55  ;;  %v12596_v52 = vld [vmem:[#allocation14 + $0xe20] sm:$0xf0] }
 0x2c8   :  { %v14870_v59 = vld [vmem:[#allocation14 + $0xae4] sm:$0xf0]  ;;  %v5952_v56 = vpop.f32.mrf.mxu2 }
 0x2c9   :  { %6157 = vmatpush.bf16.msra.mxu2 %v10843_v28  ;;  %6171 = vmatpush.bf16.msra.mxu3 %v11067_v8  ;;  %v14814_v28 = vld [vmem:[#allocation14 + $0x924] sm:$0xf0]  ;;  %v5953_v8 = vadd.f32 %v5952_v56, %v3367_v4  ;;  %v12187_v14 = vor.u32 %v14870_v59, %v12186_v58  ;;  %v14570_v4 = vld [vmem:[#allocation14 + $0x18c] sm:$0xf] }
 0x2ca   :  { %6042 = vmatmul.bf16.vlgmr.msra.gmra.mxu1 %v16100_v25  ;;  %v11963_v60 = vor.u32 %v14814_v28, %v11962_v29  ;;  %6133 = vmatmul.bf16.vlgmr.msra.gmra.mxu0 %v16093_v38  ;;  %v11418_v7 = vld [vmem:[#allocation14 + $0x4c8] sm:$0xf]  ;;  %v11292_v58 = vld [vmem:[#allocation14 + $0x3e8] sm:$0xf0]  ;;  %v11007_v59 = vor.u32 %v14570_v4, %v11004_v49 }
 0x2cb   :  { %6177 = vmatpush.bf16.msrb.mxu0 %v11547_v18  ;;  %6138 = vmatpush.bf16.msra.mxu1 %v12823_v13  ;;  %v14678_v62 = vld [vmem:[#allocation14 + $0x4e4] sm:$0xf0]  ;;  %v5966_v18 = vadd.f32 %v5965_v45, %v5953_v8  ;;  %v12695_v13 = vor.u32 %v14993_v6, %v12692_v21  ;;  %v12628_v45 = vld [vmem:[#allocation14 + $0xe60] sm:$0xf0]  ;;  %v14562_v8 = vld [vmem:[#allocation14 + $0x14c] sm:$0xf] }
 0x2cc   :  { %6172 = vmatmul.bf16.vlgmr.msra.gmra.mxu3 %v16055_v9  ;;  %v11866_v10 = vld [vmem:[#allocation14 + $0x848] sm:$0xf]  ;;  %v11419_v16 = vor.u32 %v14678_v62, %v11418_v7  ;;  %v10972_v21 = vld [vmem:[#allocation14 + $0x168] sm:$0xf0] }
 0x2cd   :  { %6158 = vmatpush.bf16.msra.mxu2 %v10811_v40  ;;  %6216 = vmatpush.bf16.msrb.mxu3 %v12315_v15  ;;  %v11930_v40 = vld [vmem:[#allocation14 + $0x8c8] sm:$0xf]  ;;  %v5967_v15 = vpop.f32.mrf.mxu3 }
 0x2ce   :  { %v11931_v51 = vor.u32 %v14806_v41, %v11930_v40  ;;  %v14790_v11 = vld [vmem:[#allocation14 + $0x864] sm:$0xf0] }
 0x2cf   :  { %6178 = vmatpush.bf16.msrb.mxu0 %v11515_v33  ;;  %6139 = vmatpush.bf16.msra.mxu1 %v12791_v31  ;;  %v12154_v19 = vld [vmem:[#allocation14 + $0xa88] sm:$0xf]  ;;  %v14578_v33 = vld [vmem:[#allocation14 + $0x1cc] sm:$0xf] }
 0x2d0   :  { %6159 = vmatmul.bf16.vlgmr.msra.gmra.mxu2 %v16060_v27  ;;  %v14862_v20 = vld [vmem:[#allocation14 + $0xaa4] sm:$0xf0]  ;;  %v11039_v41 = vor.u32 %v14578_v33, %v11036_v3  ;;  %v14626_v33 = vld [vmem:[#allocation14 + $0x34c] sm:$0xf] }
 0x2d1   :  { %6203 = vmatpush.bf16.msrb.mxu2 %v12059_v48  ;;  %6217 = vmatpush.bf16.msrb.mxu3 %v12283_v32  ;;  %v11483_v48 = vor.u32 %v14694_v36, %v11482_v0  ;;  %v11386_v63 = vld [vmem:[#allocation14 + $0x488] sm:$0xf]  ;;  %v5991_v30 = vpop.f32.mrf.mxu1  ;;  %v12155_v32 = vor.u32 %v14862_v20, %v12154_v19  ;;  %v12663_v0 = vor.u32 %v14985_v23, %v12660_v42  ;;  %v11260_v19 = vld [vmem:[#allocation14 + $0x3a8] sm:$0xf0] }
 0x2d2   :  { %v14670_v24 = vld [vmem:[#allocation14 + $0x4a4] sm:$0xf0]  ;;  %v14554_v42 = vld [vmem:[#allocation14 + $0x10c] sm:$0xf] }
 0x2d3   :  { %6179 = vmatpush.bf16.msrb.mxu0 %v11483_v48  ;;  %6140 = vmatpush.bf16.msra.mxu1 %v12759_v37  ;;  %v11834_v29 = vld [vmem:[#allocation14 + $0x808] sm:$0xf]  ;;  %v11387_v34 = vor.u32 %v14670_v24, %v11386_v63  ;;  %v11228_v3 = vld [vmem:[#allocation14 + $0x368] sm:$0xf0] }
 0x2d4   :  { %v14782_v28 = vld [vmem:[#allocation14 + $0x824] sm:$0xf0] }
 0x2d5   :  { %6204 = vmatpush.bf16.msrb.mxu2 %v12027_v57  ;;  %6218 = vmatpush.bf16.msrb.mxu3 %v12251_v44  ;;  %v11451_v57 = vor.u32 %v14686_v54, %v11450_v53  ;;  %v12122_v35 = vld [vmem:[#allocation14 + $0xa48] sm:$0xf]  ;;  %v11835_v36 = vor.u32 %v14782_v28, %v11834_v29  ;;  %v14977_v44 = vld [vmem:[#allocation14 + $0xe44] sm:$0xf]  ;;  %v10940_v29 = vld [vmem:[#allocation14 + $0x128] sm:$0xf0] }
 0x2d6   :  { %v14854_v31 = vld [vmem:[#allocation14 + $0xa64] sm:$0xf0]  ;;  %v12631_v12 = vor.u32 %v14977_v44, %v12628_v45  ;;  %v14618_v45 = vld [vmem:[#allocation14 + $0x30c] sm:$0xf] }
 0x2d7   :  { %6180 = vmatpush.bf16.msrb.mxu0 %v11451_v57  ;;  %6141 = vmatpush.bf16.msra.mxu1 %v12727_v5  ;;  %v11354_v39 = vld [vmem:[#allocation14 + $0x448] sm:$0xf]  ;;  %v12123_v48 = vor.u32 %v14854_v31, %v12122_v35  ;;  %v14642_v57 = vld [vmem:[#allocation14 + $0x3cc] sm:$0xf]  ;;  %v10943_v35 = vor.u32 %v14554_v42, %v10940_v29 }
 0x2d8   :  { %v14662_v40 = vld [vmem:[#allocation14 + $0x464] sm:$0xf0]  ;;  %v14834_v42 = vld [vmem:[#allocation14 + $0x9cc] sm:$0xf] }
 0x2d9   :  { %6205 = vmatpush.bf16.msrb.mxu2 %v11995_v22  ;;  %6219 = vmatpush.bf16.msrb.mxu3 %v12219_v47  ;;  %v11867_v22 = vor.u32 %v14790_v11, %v11866_v10  ;;  %v5978_v50 = vpop.f32.mrf.mxu0  ;;  %v11355_v37 = vor.u32 %v14662_v40, %v11354_v39  ;;  %v11322_v53 = vld [vmem:[#allocation14 + $0x408] sm:$0xf]  ;;  %v5993_v6 = vpop.f32.mrf.mxu1  ;;  %v14546_v39 = vld [vmem:[#allocation14 + $0xcc] sm:$0xf] }
 0x2da   :  { %6094 = vmatmul.bf16.vlgmr.msrb.gmra.mxu1 %v16069_v46  ;;  %v12090_v54 = vld [vmem:[#allocation14 + $0xa08] sm:$0xf]  ;;  %v5979_v55 = vadd.f32 %v5978_v50, %v5966_v18  ;;  %v14634_v18 = vld [vmem:[#allocation14 + $0x38c] sm:$0xf] }
 0x2db   :  { %6181 = vmatpush.bf16.msrb.mxu0 %v11419_v16  ;;  %6142 = vmatpush.bf16.msra.mxu1 %v12695_v13  ;;  %v14846_v1 = vld [vmem:[#allocation14 + $0xa24] sm:$0xf0]  ;;  %v10975_v13 = vor.u32 %v14562_v8, %v10972_v21  ;;  %v10908_v40 = vld [vmem:[#allocation14 + $0xe8] sm:$0xf0] }
 0x2dc   :  { %v14654_v47 = vld [vmem:[#allocation14 + $0x424] sm:$0xf0]  ;;  %v12091_v7 = vor.u32 %v14846_v1, %v12090_v54  ;;  %v16109_v10 = vadd.f32 %v5991_v30, %v5979_v55  ;;  %v11263_v30 = vor.u32 %v14634_v18, %v11260_v19  ;;  %v10911_v49 = vor.u32 %v14546_v39, %v10908_v40  ;;  %v10876_v54 = vld [vmem:[#allocation14 + $0xa8] sm:$0xf0] }
 0x2dd   :  { %6206 = vmatpush.bf16.msrb.mxu2 %v11963_v60  ;;  %6220 = vmatpush.bf16.msrb.mxu3 %v12187_v14  ;;  %v5954_v60 = vpop.f32.mrf.mxu2  ;;  %v11802_v56 = vld [vmem:[#allocation14 + $0x7c8] sm:$0xf]  ;;  %v11323_v11 = vor.u32 %v14654_v47, %v11322_v53  ;;  %v11295_v14 = vor.u32 %v14642_v57, %v11292_v58  ;;  %v14538_v53 = vld [vmem:[#allocation14 + $0x8c] sm:$0xf] }
 0x2de   :  { %v12570_v5 = vld [vmem:[#allocation14 + $0xdc8] sm:$0xf]  ;;  %v11164_v47 = vld [vmem:[#allocation14 + $0x2e8] sm:$0xf0]  ;;  %v10879_v58 = vor.u32 %v14538_v53, %v10876_v54 }
 0x2df   :  { %6182 = vmatpush.bf16.msrb.mxu0 %v11387_v34  ;;  %6143 = vmatpush.bf16.msra.mxu1 %v12663_v0  ;;  %v14774_v62 = vld [vmem:[#allocation14 + $0x7e4] sm:$0xf0]  ;;  %v14530_v6 = vld [vmem:[#allocation14 + $0x4c] sm:$0xf] }
 0x2e0   :  { %v11803_v20 = vor.u32 %v14774_v62, %v11802_v56  ;;  %v12538_v23 = vld [vmem:[#allocation14 + $0xd88] sm:$0xf]  ;;  %v12060_v29 = vld [vmem:[#allocation14 + $0x9e8] sm:$0xf0] }
 0x2e1   :  { %6207 = vmatpush.bf16.msrb.mxu2 %v11931_v51  ;;  %6221 = vmatpush.bf16.msrb.mxu3 %v12155_v32  ;;  %v14969_v51 = vld [vmem:[#allocation14 + $0xe04] sm:$0xf]  ;;  %v14958_v63 = vld [vmem:[#allocation14 + $0xda4] sm:$0xf0]  ;;  %v5980_v28 = vpop.f32.mrf.mxu0  ;;  %v12028_v39 = vld [vmem:[#allocation14 + $0x9a8] sm:$0xf0] }
 0x2e2   :  { %v12599_v15 = vor.u32 %v14969_v51, %v12596_v52  ;;  %v14766_v24 = vld [vmem:[#allocation14 + $0x7a4] sm:$0xf0]  ;;  %v12539_v32 = vor.u32 %v14958_v63, %v12538_v23  ;;  %v14522_v23 = vld [vmem:[#allocation14 + $0xc] sm:$0xf] }
 0x2e3   :  { %6183 = vmatpush.bf16.msrb.mxu0 %v11355_v37  ;;  %6144 = vmatpush.bf16.msra.mxu1 %v12631_v12  ;;  %v11738_v31 = vld [vmem:[#allocation14 + $0x748] sm:$0xf]  ;;  %v14610_v12 = vld [vmem:[#allocation14 + $0x2cc] sm:$0xf] }
 0x2e4   :  { %v12506_v60 = vld [vmem:[#allocation14 + $0xd48] sm:$0xf]  ;;  %v11167_v62 = vor.u32 %v14610_v12, %v11164_v47  ;;  %v10812_v63 = vld [vmem:[#allocation14 + $0x28] sm:$0xf0] }
 0x2e5   :  { %6208 = vmatpush.bf16.msrb.mxu2 %v11899_v43  ;;  %v14966_v43 = vld [vmem:[#allocation14 + $0xde4] sm:$0xf0]  ;;  %6222 = vmatpush.bf16.msrb.mxu3 %v12123_v48  ;;  %v11196_v48 = vld [vmem:[#allocation14 + $0x328] sm:$0xf0] }
 0x2e6   :  { %v12571_v16 = vor.u32 %v14966_v43, %v12570_v5  ;;  %v14950_v0 = vld [vmem:[#allocation14 + $0xd64] sm:$0xf0]  ;;  %v11199_v1 = vor.u32 %v14618_v45, %v11196_v48 }
 0x2e7   :  { %6184 = vmatpush.bf16.msrb.mxu0 %v11323_v11  ;;  %6145 = vmatpush.bf16.msra.mxu1 %v12599_v15  ;;  %v12507_v44 = vor.u32 %v14950_v0, %v12506_v60  ;;  %v11706_v50 = vld [vmem:[#allocation14 + $0x708] sm:$0xf]  ;;  %v14602_v11 = vld [vmem:[#allocation14 + $0x28c] sm:$0xf] }
 0x2e8   :  { %v12474_v37 = vld [vmem:[#allocation14 + $0xd08] sm:$0xf] }
 0x2e9   :  { %6209 = vmatpush.bf16.msrb.mxu2 %v11867_v22  ;;  %v11770_v22 = vld [vmem:[#allocation14 + $0x788] sm:$0xf]  ;;  %6223 = vmatpush.bf16.msrb.mxu3 %v12091_v7  ;;  %v10844_v7 = vld [vmem:[#allocation14 + $0x68] sm:$0xf0] }
 0x2ea   :  { %v11771_v34 = vor.u32 %v14766_v24, %v11770_v22  ;;  %6185 = vmatmul.bf16.vlgmr.msrb.gmra.mxu0 %v16073_v26  ;;  %6146 = vmatmul.bf16.vlgmr.msra.gmra.mxu1 %v16100_v25  ;;  %v14942_v51 = vld [vmem:[#allocation14 + $0xd24] sm:$0xf0]  ;;  %v10847_v18 = vor.u32 %v14530_v6, %v10844_v7  ;;  %v14890_v6 = vld [vmem:[#allocation14 + $0xb8c] sm:$0xf] }
 0x2eb   :  { %6229 = vmatpush.bf16.msra.mxu0 %v12571_v16  ;;  %6190 = vmatpush.bf16.msrb.mxu1 %v11803_v20  ;;  %v14750_v52 = vld [vmem:[#allocation14 + $0x724] sm:$0xf0]  ;;  %v12475_v55 = vor.u32 %v14942_v51, %v12474_v37  ;;  %v14898_v51 = vld [vmem:[#allocation14 + $0xbcc] sm:$0xf] }
 0x2ec   :  { %6224 = vmatmul.bf16.vlgmr.msrb.gmra.mxu3 %v16087_v2  ;;  %v11707_v57 = vor.u32 %v14750_v52, %v11706_v50  ;;  %v12442_v56 = vld [vmem:[#allocation14 + $0xcc8] sm:$0xf]  ;;  %v12316_v52 = vld [vmem:[#allocation14 + $0xbe8] sm:$0xf0] }
 0x2ed   :  { %6210 = vmatpush.bf16.msrb.mxu2 %v11835_v36  ;;  %6268 = vmatpush.bf16.msra.mxu3 %v11295_v14  ;;  %v14758_v36 = vld [vmem:[#allocation14 + $0x764] sm:$0xf0]  ;;  %v11132_v14 = vld [vmem:[#allocation14 + $0x2a8] sm:$0xf0] }
 0x2ee   :  { %v11739_v4 = vor.u32 %v14758_v36, %v11738_v31  ;;  %v14934_v5 = vld [vmem:[#allocation14 + $0xce4] sm:$0xf0]  ;;  %v11135_v24 = vor.u32 %v14602_v11, %v11132_v14  ;;  %v14826_v36 = vld [vmem:[#allocation14 + $0x98c] sm:$0xf] }
 0x2ef   :  { %6230 = vmatpush.bf16.msra.mxu0 %v12539_v32  ;;  %6191 = vmatpush.bf16.msrb.mxu1 %v11771_v34  ;;  %v14742_v43 = vld [vmem:[#allocation14 + $0x6e4] sm:$0xf0]  ;;  %v12443_v21 = vor.u32 %v14934_v5, %v12442_v56  ;;  %v11100_v32 = vld [vmem:[#allocation14 + $0x268] sm:$0xf0]  ;;  %v12031_v53 = vor.u32 %v14826_v36, %v12028_v39  ;;  %v12319_v56 = vor.u32 %v14898_v51, %v12316_v52 }
 0x2f0   :  { %6211 = vmatmul.bf16.vlgmr.msrb.gmra.mxu2 %v16077_v17  ;;  %v11642_v19 = vld [vmem:[#allocation14 + $0x688] sm:$0xf]  ;;  %v12284_v7 = vld [vmem:[#allocation14 + $0xba8] sm:$0xf0] }
 0x2f1   :  { %6255 = vmatpush.bf16.msra.mxu2 %v11039_v41  ;;  %6269 = vmatpush.bf16.msra.mxu3 %v11263_v30  ;;  %v11231_v41 = vor.u32 %v14626_v33, %v11228_v3  ;;  %v12410_v20 = vld [vmem:[#allocation14 + $0xc88] sm:$0xf]  ;;  %v14594_v30 = vld [vmem:[#allocation14 + $0x24c] sm:$0xf]  ;;  %v10815_v33 = vor.u32 %v14522_v23, %v10812_v63 }
 0x2f2   :  { %v14734_v22 = vld [vmem:[#allocation14 + $0x6a4] sm:$0xf0]  ;;  %v11103_v0 = vor.u32 %v14594_v30, %v11100_v32  ;;  %v14698_v11 = vld [vmem:[#allocation14 + $0x58c] sm:$0xf] }
 0x2f3   :  { %6231 = vmatpush.bf16.msra.mxu0 %v12507_v44  ;;  %6192 = vmatpush.bf16.msrb.mxu1 %v11739_v4  ;;  %v6004_v8 = vpop.f32.mrf.mxu2  ;;  %v12378_v3 = vld [vmem:[#allocation14 + $0xc48] sm:$0xf]  ;;  %v14586_v4 = vld [vmem:[#allocation14 + $0x20c] sm:$0xf] }
 0x2f4   :  { %v16116_v15 = vadd.f32 %v6004_v8, %v16109_v10  ;;  %v11643_v10 = vor.u32 %v14734_v22, %v11642_v19  ;;  %v14918_v34 = vld [vmem:[#allocation14 + $0xc64] sm:$0xf0]  ;;  %v11516_v14 = vld [vmem:[#allocation14 + $0x5a8] sm:$0xf0] }
 0x2f5   :  { %6256 = vmatpush.bf16.msra.mxu2 %v11007_v59  ;;  %6270 = vmatpush.bf16.msra.mxu3 %v11231_v41  ;;  %v11674_v59 = vld [vmem:[#allocation14 + $0x6c8] sm:$0xf]  ;;  %v12379_v41 = vor.u32 %v14918_v34, %v12378_v3  ;;  %v11964_v19 = vld [vmem:[#allocation14 + $0x928] sm:$0xf0] }
 0x2f6   :  { %v11675_v16 = vor.u32 %v14742_v43, %v11674_v59  ;;  %v11610_v31 = vld [vmem:[#allocation14 + $0x648] sm:$0xf]  ;;  %v14882_v22 = vld [vmem:[#allocation14 + $0xb4c] sm:$0xf] }
 0x2f7   :  { %6232 = vmatpush.bf16.msra.mxu0 %v12475_v55  ;;  %6193 = vmatpush.bf16.msrb.mxu1 %v11707_v57  ;;  %v14726_v60 = vld [vmem:[#allocation14 + $0x664] sm:$0xf0]  ;;  %v11548_v55 = vld [vmem:[#allocation14 + $0x5e8] sm:$0xf0] }
 0x2f8   :  { %v11578_v44 = vld [vmem:[#allocation14 + $0x608] sm:$0xf]  ;;  %v11611_v50 = vor.u32 %v14726_v60, %v11610_v31  ;;  %v14818_v57 = vld [vmem:[#allocation14 + $0x94c] sm:$0xf] }
 0x2f9   :  { %6257 = vmatpush.bf16.msra.mxu2 %v10975_v13  ;;  %6271 = vmatpush.bf16.msra.mxu3 %v11199_v1  ;;  %v14926_v13 = vld [vmem:[#allocation14 + $0xca4] sm:$0xf0]  ;;  %v14706_v1 = vld [vmem:[#allocation14 + $0x5cc] sm:$0xf] }
 0x2fa   :  { %v12411_v28 = vor.u32 %v14926_v13, %v12410_v20  ;;  %v14718_v45 = vld [vmem:[#allocation14 + $0x624] sm:$0xf0]  ;;  %v11551_v43 = vor.u32 %v14706_v1, %v11548_v55  ;;  %v12287_v20 = vor.u32 %v14890_v6, %v12284_v7  ;;  %v11519_v13 = vor.u32 %v14698_v11, %v11516_v14  ;;  %v12252_v23 = vld [vmem:[#allocation14 + $0xb68] sm:$0xf0] }
 0x2fb   :  { %6233 = vmatpush.bf16.msra.mxu0 %v12443_v21  ;;  %6194 = vmatpush.bf16.msrb.mxu1 %v11675_v16  ;;  %v6006_v40 = vpop.f32.mrf.mxu2  ;;  %v12346_v48 = vld [vmem:[#allocation14 + $0xc08] sm:$0xf]  ;;  %v11579_v5 = vor.u32 %v14718_v45, %v11578_v44  ;;  %v14802_v32 = vld [vmem:[#allocation14 + $0x8cc] sm:$0xf] }
 0x2fc   :  { %v14910_v37 = vld [vmem:[#allocation14 + $0xc24] sm:$0xf0]  ;;  %v14874_v34 = vld [vmem:[#allocation14 + $0xb0c] sm:$0xf] }
 0x2fd   :  { %6258 = vmatpush.bf16.msra.mxu2 %v10943_v35  ;;  %6272 = vmatpush.bf16.msra.mxu3 %v11167_v62  ;;  %v12063_v35 = vor.u32 %v14834_v42, %v12060_v29  ;;  %v12826_v54 = vld [vmem:[#allocation14 + $0xfc8] sm:$0xf]  ;;  %v12347_v59 = vor.u32 %v14910_v37, %v12346_v48  ;;  %v14690_v29 = vld [vmem:[#allocation14 + $0x54c] sm:$0xf] }
 0x2fe   :  { %v15030_v47 = vld [vmem:[#allocation14 + $0xfe4] sm:$0xf0]  ;;  %v14682_v36 = vld [vmem:[#allocation14 + $0x50c] sm:$0xf] }
 0x2ff   :  { %6234 = vmatpush.bf16.msra.mxu0 %v12411_v28  ;;  %6195 = vmatpush.bf16.msrb.mxu1 %v11643_v10  ;;  %v12827_v62 = vor.u32 %v15030_v47, %v12826_v54  ;;  %v12794_v21 = vld [vmem:[#allocation14 + $0xf88] sm:$0xf]  ;;  %v11484_v28 = vld [vmem:[#allocation14 + $0x568] sm:$0xf0] }
 0x300   :  { %v15022_v16 = vld [vmem:[#allocation14 + $0xfa4] sm:$0xf0]  ;;  %v11932_v10 = vld [vmem:[#allocation14 + $0x8e8] sm:$0xf0]  ;;  %v11487_v3 = vor.u32 %v14690_v29, %v11484_v28 }
 0x301   :  { %6259 = vmatpush.bf16.msra.mxu2 %v10911_v49  ;;  %6273 = vmatpush.bf16.msra.mxu3 %v11135_v24  ;;  %v11068_v49 = vld [vmem:[#allocation14 + $0x228] sm:$0xf0]  ;;  %v12795_v63 = vor.u32 %v15022_v16, %v12794_v21  ;;  %v12762_v42 = vld [vmem:[#allocation14 + $0xf48] sm:$0xf]  ;;  %v11935_v60 = vor.u32 %v14802_v32, %v11932_v10  ;;  %v11010_v10 = vld [vmem:[#allocation14 + $0x190] sm:$0xf] }
 0x302   :  { %v11071_v12 = vor.u32 %v14586_v4, %v11068_v49  ;;  %v15014_v30 = vld [vmem:[#allocation14 + $0xf64] sm:$0xf0]  ;;  %v11452_v39 = vld [vmem:[#allocation14 + $0x528] sm:$0xf0] }
 0x303   :  { %6235 = vmatpush.bf16.msra.mxu0 %v12379_v41  ;;  %6196 = vmatpush.bf16.msrb.mxu1 %v11611_v50  ;;  %v12763_v31 = vor.u32 %v15014_v30, %v12762_v42  ;;  %v15006_v40 = vld [vmem:[#allocation14 + $0xf24] sm:$0xf0]  ;;  %v14794_v41 = vld [vmem:[#allocation14 + $0x88c] sm:$0xf]  ;;  %v11455_v48 = vor.u32 %v14682_v36, %v11452_v39 }
 0x304   :  { %v11900_v44 = vld [vmem:[#allocation14 + $0x8a8] sm:$0xf0]  ;;  %v12698_v52 = vld [vmem:[#allocation14 + $0xec8] sm:$0xf] }
 0x305   :  { %6260 = vmatpush.bf16.msra.mxu2 %v10879_v58  ;;  %6274 = vmatpush.bf16.msra.mxu3 %v11103_v0  ;;  %v11996_v58 = vld [vmem:[#allocation14 + $0x968] sm:$0xf0]  ;;  %v12730_v0 = vld [vmem:[#allocation14 + $0xf08] sm:$0xf]  ;;  %v11903_v51 = vor.u32 %v14794_v41, %v11900_v44  ;;  %v11298_v41 = vld [vmem:[#allocation14 + $0x3d0] sm:$0xf] }
 0x306   :  { %v11999_v8 = vor.u32 %v14818_v57, %v11996_v58  ;;  %v14866_v4 = vld [vmem:[#allocation14 + $0xacc] sm:$0xf]  ;;  %v12731_v37 = vor.u32 %v15006_v40, %v12730_v0  ;;  %v14998_v1 = vld [vmem:[#allocation14 + $0xee4] sm:$0xf0]  ;;  %v14647_v44 = vld [vmem:[#allocation14 + $0x3ec] sm:$0xf0] }
 0x307   :  { %6236 = vmatpush.bf16.msra.mxu0 %v12347_v59  ;;  %6197 = vmatpush.bf16.msrb.mxu1 %v11579_v5  ;;  %v12188_v49 = vld [vmem:[#allocation14 + $0xae8] sm:$0xf0]  ;;  %v12699_v5 = vor.u32 %v14998_v1, %v12698_v52  ;;  %v12666_v6 = vld [vmem:[#allocation14 + $0xe88] sm:$0xf]  ;;  %v10978_v52 = vld [vmem:[#allocation14 + $0x150] sm:$0xf] }
 0x308   :  { %v11420_v54 = vld [vmem:[#allocation14 + $0x4e8] sm:$0xf0]  ;;  %v12191_v47 = vor.u32 %v14866_v4, %v12188_v49  ;;  %v14990_v21 = vld [vmem:[#allocation14 + $0xea4] sm:$0xf0] }
 0x309   :  { %6261 = vmatpush.bf16.msra.mxu2 %v10847_v18  ;;  %6275 = vmatpush.bf16.msra.mxu3 %v11071_v12  ;;  %v14810_v18 = vld [vmem:[#allocation14 + $0x90c] sm:$0xf]  ;;  %v12634_v28 = vld [vmem:[#allocation14 + $0xe48] sm:$0xf] }
 0x30a   :  { %v11967_v24 = vor.u32 %v14810_v18, %v11964_v19  ;;  %6237 = vmatmul.bf16.vlgmr.msra.gmra.mxu0 %v16093_v38  ;;  %6198 = vmatmul.bf16.vlgmr.msrb.gmra.mxu1 %v16069_v46  ;;  %v14786_v55 = vld [vmem:[#allocation14 + $0x84c] sm:$0xf]  ;;  %v11042_v18 = vld [vmem:[#allocation14 + $0x1d0] sm:$0xf]  ;;  %v14982_v30 = vld [vmem:[#allocation14 + $0xe64] sm:$0xf0] }
 0x30b   :  { %6281 = vmatpush.bf16.msrb.mxu0 %v11551_v43  ;;  %6242 = vmatpush.bf16.msra.mxu1 %v12827_v62  ;;  %v11868_v12 = vld [vmem:[#allocation14 + $0x868] sm:$0xf0]  ;;  %v14583_v19 = vld [vmem:[#allocation14 + $0x1ec] sm:$0xf0]  ;;  %v12635_v39 = vor.u32 %v14982_v30, %v12634_v28 }
 0x30c   :  { %6276 = vmatmul.bf16.vlgmr.msra.gmra.mxu3 %v16055_v9  ;;  %v14858_v58 = vld [vmem:[#allocation14 + $0xa8c] sm:$0xf]  ;;  %v11871_v43 = vor.u32 %v14786_v55, %v11868_v12  ;;  %v11299_v55 = vor.u32 %v14647_v44, %v11298_v41  ;;  %v11202_v30 = vld [vmem:[#allocation14 + $0x310] sm:$0xf] }
 0x30d   :  { %6262 = vmatpush.bf16.msra.mxu2 %v10815_v33  ;;  %6320 = vmatpush.bf16.msrb.mxu3 %v12319_v56  ;;  %v12255_v33 = vor.u32 %v14882_v22, %v12252_v23  ;;  %v12156_v59 = vld [vmem:[#allocation14 + $0xaa8] sm:$0xf0]  ;;  %v6017_v56 = vpop.f32.mrf.mxu3  ;;  %v11170_v44 = vld [vmem:[#allocation14 + $0x2d0] sm:$0xf] }
 0x30e   :  { %v14666_v7 = vld [vmem:[#allocation14 + $0x48c] sm:$0xf]  ;;  %v12159_v16 = vor.u32 %v14858_v58, %v12156_v59  ;;  %v14639_v58 = vld [vmem:[#allocation14 + $0x3ac] sm:$0xf0] }
 0x30f   :  { %6282 = vmatpush.bf16.msrb.mxu0 %v11519_v13  ;;  %6243 = vmatpush.bf16.msra.mxu1 %v12795_v63  ;;  %v11388_v62 = vld [vmem:[#allocation14 + $0x4a8] sm:$0xf0]  ;;  %v12667_v63 = vor.u32 %v14990_v21, %v12666_v6 }
 0x310   :  { %6263 = vmatmul.bf16.vlgmr.msra.gmra.mxu2 %v16060_v27  ;;  %v14778_v11 = vld [vmem:[#allocation14 + $0x80c] sm:$0xf] }
 0x311   :  { %6307 = vmatpush.bf16.msrb.mxu2 %v12063_v35  ;;  %6321 = vmatpush.bf16.msrb.mxu3 %v12287_v20  ;;  %v12220_v35 = vld [vmem:[#allocation14 + $0xb28] sm:$0xf0]  ;;  %v11391_v20 = vor.u32 %v14666_v7, %v11388_v62  ;;  %v10946_v62 = vld [vmem:[#allocation14 + $0x110] sm:$0xf] }
 0x312   :  { %v12223_v45 = vor.u32 %v14874_v34, %v12220_v35  ;;  %v11836_v14 = vld [vmem:[#allocation14 + $0x828] sm:$0xf0]  ;;  %v12602_v34 = vld [vmem:[#allocation14 + $0xe08] sm:$0xf] }
 0x313   :  { %6283 = vmatpush.bf16.msrb.mxu0 %v11487_v3  ;;  %6244 = vmatpush.bf16.msra.mxu1 %v12763_v31  ;;  %v16122_v50 = vpop.f32.mrf.mxu2  ;;  %v14850_v13 = vld [vmem:[#allocation14 + $0xa4c] sm:$0xf]  ;;  %v14974_v35 = vld [vmem:[#allocation14 + $0xe24] sm:$0xf0] }
 0x314   :  { %v12124_v22 = vld [vmem:[#allocation14 + $0xa68] sm:$0xf0]  ;;  %v12603_v12 = vor.u32 %v14974_v35, %v12602_v34 }
 0x315   :  { %6308 = vmatpush.bf16.msrb.mxu2 %v12031_v53  ;;  %6322 = vmatpush.bf16.msrb.mxu3 %v12255_v33  ;;  %v14674_v53 = vld [vmem:[#allocation14 + $0x4cc] sm:$0xf]  ;;  %v12127_v32 = vor.u32 %v14850_v13, %v12124_v22  ;;  %v14575_v33 = vld [vmem:[#allocation14 + $0x1ac] sm:$0xf0]  ;;  %v6019_v36 = vpop.f32.mrf.mxu3 }
 0x316   :  { %v11423_v57 = vor.u32 %v14674_v53, %v11420_v54  ;;  %v14658_v42 = vld [vmem:[#allocation14 + $0x44c] sm:$0xf]  ;;  %v14567_v53 = vld [vmem:[#allocation14 + $0x16c] sm:$0xf0]  ;;  %v3368_v54 = vperm.slane %v16103_v61, 1 }
 0x317   :  { %6284 = vmatpush.bf16.msrb.mxu0 %v11455_v48  ;;  %6245 = vmatpush.bf16.msra.mxu1 %v12731_v37  ;;  %v11356_v29 = vld [vmem:[#allocation14 + $0x468] sm:$0xf0]  ;;  %v14559_v61 = vld [vmem:[#allocation14 + $0x12c] sm:$0xf0] }
 0x318   :  { %v11359_v3 = vor.u32 %v14658_v42, %v11356_v29  ;;  %v14650_v31 = vld [vmem:[#allocation14 + $0x40c] sm:$0xf]  ;;  %v6057_v21 = vadd.f32 %v16122_v50, %v3368_v54  ;;  %v10947_v22 = vor.u32 %v14559_v61, %v10946_v62  ;;  %v10914_v42 = vld [vmem:[#allocation14 + $0xd0] sm:$0xf] }
 0x319   :  { %6309 = vmatpush.bf16.msrb.mxu2 %v11999_v8  ;;  %6323 = vmatpush.bf16.msrb.mxu3 %v12223_v45  ;;  %v16125_v8 = vadd.f32 %v6017_v56, %v16116_v15  ;;  %v11043_v15 = vor.u32 %v14583_v19, %v11042_v18  ;;  %v12092_v0 = vld [vmem:[#allocation14 + $0xa28] sm:$0xf0]  ;;  %v11011_v45 = vor.u32 %v14575_v33, %v11010_v10  ;;  %v11234_v18 = vld [vmem:[#allocation14 + $0x350] sm:$0xf] }
 0x31a   :  { %v11324_v40 = vld [vmem:[#allocation14 + $0x428] sm:$0xf0]  ;;  %v10979_v56 = vor.u32 %v14567_v53, %v10978_v52  ;;  %v14631_v19 = vld [vmem:[#allocation14 + $0x36c] sm:$0xf0] }
 0x31b   :  { %6285 = vmatpush.bf16.msrb.mxu0 %v11423_v57  ;;  %6246 = vmatpush.bf16.msra.mxu1 %v12699_v5  ;;  %v6058_v23 = vpop.f32.mrf.mxu2  ;;  %v14770_v48 = vld [vmem:[#allocation14 + $0x7cc] sm:$0xf]  ;;  %v11327_v1 = vor.u32 %v14650_v31, %v11324_v40  ;;  %v11266_v57 = vld [vmem:[#allocation14 + $0x390] sm:$0xf] }
 0x31c   :  { %v14962_v4 = vld [vmem:[#allocation14 + $0xdcc] sm:$0xf]  ;;  %v14551_v29 = vld [vmem:[#allocation14 + $0xec] sm:$0xf0] }
 0x31d   :  { %6310 = vmatpush.bf16.msrb.mxu2 %v11967_v24  ;;  %6324 = vmatpush.bf16.msrb.mxu3 %v12191_v47  ;;  %v11839_v24 = vor.u32 %v14778_v11, %v11836_v14  ;;  %v12572_v49 = vld [vmem:[#allocation14 + $0xde8] sm:$0xf0]  ;;  %v11267_v11 = vor.u32 %v14639_v58, %v11266_v57  ;;  %v6069_v14 = vpop.f32.mrf.mxu3  ;;  %v10915_v33 = vor.u32 %v14551_v29, %v10914_v42  ;;  %v11138_v57 = vld [vmem:[#allocation14 + $0x290] sm:$0xf] }
 0x31e   :  { %v12575_v47 = vor.u32 %v14962_v4, %v12572_v49  ;;  %v14762_v5 = vld [vmem:[#allocation14 + $0x78c] sm:$0xf]  ;;  %v14607_v58 = vld [vmem:[#allocation14 + $0x2ac] sm:$0xf0] }
 0x31f   :  { %6286 = vmatpush.bf16.msrb.mxu0 %v11391_v20  ;;  %6247 = vmatpush.bf16.msra.mxu1 %v12667_v63  ;;  %v12540_v6 = vld [vmem:[#allocation14 + $0xda8] sm:$0xf0]  ;;  %v16130_v20 = vadd.f32 %v6069_v14, %v6057_v21  ;;  %v14527_v62 = vld [vmem:[#allocation14 + $0x2c] sm:$0xf0]  ;;  %v11139_v61 = vor.u32 %v14607_v58, %v11138_v57 }
 0x320   :  { %v11772_v7 = vld [vmem:[#allocation14 + $0x7a8] sm:$0xf0]  ;;  %v12066_v21 = vld [vmem:[#allocation14 + $0x9d0] sm:$0xf] }
 0x321   :  { %6311 = vmatpush.bf16.msrb.mxu2 %v11935_v60  ;;  %6325 = vmatpush.bf16.msrb.mxu3 %v12159_v16  ;;  %v14842_v60 = vld [vmem:[#allocation14 + $0xa0c] sm:$0xf]  ;;  %v11775_v13 = vor.u32 %v14762_v5, %v11772_v7  ;;  %v10818_v7 = vld [vmem:[#allocation14 + $0x10] sm:$0xf] }
 0x322   :  { %v12095_v37 = vor.u32 %v14842_v60, %v12092_v0  ;;  %v14754_v23 = vld [vmem:[#allocation14 + $0x74c] sm:$0xf]  ;;  %v10882_v60 = vld [vmem:[#allocation14 + $0x90] sm:$0xf] }
 0x323   :  { %6287 = vmatpush.bf16.msrb.mxu0 %v11359_v3  ;;  %6248 = vmatpush.bf16.msra.mxu1 %v12635_v39  ;;  %v14946_v63 = vld [vmem:[#allocation14 + $0xd4c] sm:$0xf]  ;;  %v14543_v0 = vld [vmem:[#allocation14 + $0xac] sm:$0xf0]  ;;  %v6030_v39 = vpop.f32.mrf.mxu0 }
 0x324   :  { %v11740_v50 = vld [vmem:[#allocation14 + $0x768] sm:$0xf0]  ;;  %v12290_v58 = vld [vmem:[#allocation14 + $0xb90] sm:$0xf] }
 0x325   :  { %6312 = vmatpush.bf16.msrb.mxu2 %v11903_v51  ;;  %6326 = vmatpush.bf16.msrb.mxu3 %v12127_v32  ;;  %v11804_v51 = vld [vmem:[#allocation14 + $0x7e8] sm:$0xf0]  ;;  %v14623_v32 = vld [vmem:[#allocation14 + $0x32c] sm:$0xf0]  ;;  %v11743_v10 = vor.u32 %v14754_v23, %v11740_v50  ;;  %v6071_v40 = vpop.f32.mrf.mxu3 }
 0x326   :  { %v11807_v59 = vor.u32 %v14770_v48, %v11804_v51  ;;  %v14746_v3 = vld [vmem:[#allocation14 + $0x70c] sm:$0xf]  ;;  %v11203_v36 = vor.u32 %v14623_v32, %v11202_v30  ;;  %v16136_v48 = vadd.f32 %v6030_v39, %v16125_v8  ;;  %v12034_v30 = vld [vmem:[#allocation14 + $0x990] sm:$0xf] }
 0x327   :  { %6288 = vmatpush.bf16.msrb.mxu0 %v11327_v1  ;;  %6249 = vmatpush.bf16.msra.mxu1 %v12603_v12  ;;  %v14938_v34 = vld [vmem:[#allocation14 + $0xd0c] sm:$0xf]  ;;  %v10850_v1 = vld [vmem:[#allocation14 + $0x50] sm:$0xf] }
 0x328   :  { %v12476_v35 = vld [vmem:[#allocation14 + $0xd28] sm:$0xf0]  ;;  %v14831_v32 = vld [vmem:[#allocation14 + $0x9ac] sm:$0xf0] }
 0x329   :  { %6313 = vmatpush.bf16.msrb.mxu2 %v11871_v43  ;;  %v14954_v43 = vld [vmem:[#allocation14 + $0xd8c] sm:$0xf]  ;;  %6327 = vmatpush.bf16.msrb.mxu3 %v12095_v37  ;;  %v12479_v41 = vor.u32 %v14938_v34, %v12476_v35  ;;  %v10883_v37 = vor.u32 %v14543_v0, %v10882_v60  ;;  %v11074_v35 = vld [vmem:[#allocation14 + $0x210] sm:$0xf]  ;;  %v12035_v40 = vor.u32 %v14831_v32, %v12034_v30 }
 0x32a   :  { %v12543_v16 = vor.u32 %v14954_v43, %v12540_v6  ;;  %6289 = vmatmul.bf16.vlgmr.msrb.gmra.mxu0 %v16073_v26  ;;  %6250 = vmatmul.bf16.vlgmr.msra.gmra.mxu1 %v16100_v25  ;;  %v11708_v31 = vld [vmem:[#allocation14 + $0x728] sm:$0xf0]  ;;  %v14903_v39 = vld [vmem:[#allocation14 + $0xbec] sm:$0xf0] }
 0x32b   :  { %6333 = vmatpush.bf16.msra.mxu0 %v12575_v47  ;;  %6294 = vmatpush.bf16.msrb.mxu1 %v11807_v59  ;;  %v11711_v49 = vor.u32 %v14746_v3, %v11708_v31  ;;  %v14738_v51 = vld [vmem:[#allocation14 + $0x6cc] sm:$0xf]  ;;  %v6032_v14 = vpop.f32.mrf.mxu0  ;;  %v14591_v31 = vld [vmem:[#allocation14 + $0x22c] sm:$0xf0] }
 0x32c   :  { %6328 = vmatmul.bf16.vlgmr.msrb.gmra.mxu3 %v16087_v2  ;;  %v14930_v52 = vld [vmem:[#allocation14 + $0xccc] sm:$0xf]  ;;  %v14887_v14 = vld [vmem:[#allocation14 + $0xb6c] sm:$0xf0] }
 0x32d   :  { %6314 = vmatpush.bf16.msrb.mxu2 %v11839_v24  ;;  %6372 = vmatpush.bf16.msra.mxu3 %v11299_v55  ;;  %v12508_v24 = vld [vmem:[#allocation14 + $0xd68] sm:$0xf0]  ;;  %v14535_v55 = vld [vmem:[#allocation14 + $0x6c] sm:$0xf0] }
 0x32e   :  { %v12511_v28 = vor.u32 %v14946_v63, %v12508_v24  ;;  %v12444_v53 = vld [vmem:[#allocation14 + $0xce8] sm:$0xf0]  ;;  %v10851_v59 = vor.u32 %v14535_v55, %v10850_v1  ;;  %v10819_v63 = vor.u32 %v14527_v62, %v10818_v7  ;;  %v11970_v62 = vld [vmem:[#allocation14 + $0x910] sm:$0xf] }
 0x32f   :  { %6334 = vmatpush.bf16.msra.mxu0 %v12543_v16  ;;  %6295 = vmatpush.bf16.msrb.mxu1 %v11775_v13  ;;  %v11676_v54 = vld [vmem:[#allocation14 + $0x6e8] sm:$0xf0]  ;;  %v12447_v47 = vor.u32 %v14930_v52, %v12444_v53  ;;  %v16140_v16 = vpop.f32.mrf.mxu3  ;;  %v14599_v13 = vld [vmem:[#allocation14 + $0x26c] sm:$0xf0] }
 0x330   :  { %6315 = vmatmul.bf16.vlgmr.msrb.gmra.mxu2 %v16077_v17  ;;  %v11679_v8 = vor.u32 %v14738_v51, %v11676_v54  ;;  %v14922_v5 = vld [vmem:[#allocation14 + $0xc8c] sm:$0xf]  ;;  %v12002_v51 = vld [vmem:[#allocation14 + $0x950] sm:$0xf] }
 0x331   :  { %6359 = vmatpush.bf16.msra.mxu2 %v11043_v15  ;;  %6373 = vmatpush.bf16.msra.mxu3 %v11267_v11  ;;  %v11235_v15 = vor.u32 %v14631_v19, %v11234_v18  ;;  %v12412_v43 = vld [vmem:[#allocation14 + $0xca8] sm:$0xf0]  ;;  %v14839_v11 = vld [vmem:[#allocation14 + $0x9ec] sm:$0xf0] }
 0x332   :  { %v11644_v6 = vld [vmem:[#allocation14 + $0x6a8] sm:$0xf0]  ;;  %v12415_v18 = vor.u32 %v14922_v5, %v12412_v43  ;;  %v11106_v19 = vld [vmem:[#allocation14 + $0x250] sm:$0xf]  ;;  %v12067_v42 = vor.u32 %v14839_v11, %v12066_v21 }
 0x333   :  { %6335 = vmatpush.bf16.msra.mxu0 %v12511_v28  ;;  %6296 = vmatpush.bf16.msrb.mxu1 %v11743_v10  ;;  %v16138_v4 = vpop.f32.mrf.mxu2  ;;  %v14914_v24 = vld [vmem:[#allocation14 + $0xc4c] sm:$0xf]  ;;  %v11107_v28 = vor.u32 %v14599_v13, %v11106_v19  ;;  %v14823_v52 = vld [vmem:[#allocation14 + $0x96c] sm:$0xf0]  ;;  %v6082_v53 = vpop.f32.mrf.mxu0 }
 0x334   :  { %v12380_v50 = vld [vmem:[#allocation14 + $0xc68] sm:$0xf0]  ;;  %v11522_v43 = vld [vmem:[#allocation14 + $0x590] sm:$0xf] }
 0x335   :  { %6360 = vmatpush.bf16.msra.mxu2 %v11011_v45  ;;  %6374 = vmatpush.bf16.msra.mxu3 %v11235_v15  ;;  %v14615_v45 = vld [vmem:[#allocation14 + $0x2ec] sm:$0xf0]  ;;  %v14722_v29 = vld [vmem:[#allocation14 + $0x64c] sm:$0xf]  ;;  %v12383_v10 = vor.u32 %v14914_v24, %v12380_v50 }
 0x336   :  { %v11171_v12 = vor.u32 %v14615_v45, %v11170_v44  ;;  %v11612_v15 = vld [vmem:[#allocation14 + $0x668] sm:$0xf0]  ;;  %v11554_v44 = vld [vmem:[#allocation14 + $0x5d0] sm:$0xf] }
 0x337   :  { %6336 = vmatpush.bf16.msra.mxu0 %v12479_v41  ;;  %6297 = vmatpush.bf16.msrb.mxu1 %v11711_v49  ;;  %v11580_v3 = vld [vmem:[#allocation14 + $0x628] sm:$0xf0]  ;;  %v11615_v60 = vor.u32 %v14722_v29, %v11612_v15  ;;  %v14711_v45 = vld [vmem:[#allocation14 + $0x5ec] sm:$0xf0]  ;;  %v11075_v49 = vor.u32 %v14591_v31, %v11074_v35  ;;  %v6123_v54 = vpop.f32.mrf.mxu3 }
 0x338   :  { %v14906_v34 = vld [vmem:[#allocation14 + $0xc0c] sm:$0xf]  ;;  %v11555_v57 = vor.u32 %v14711_v45, %v11554_v44  ;;  %v12258_v11 = vld [vmem:[#allocation14 + $0xb50] sm:$0xf] }
 0x339   :  { %6361 = vmatpush.bf16.msra.mxu2 %v10979_v56  ;;  %6375 = vmatpush.bf16.msra.mxu3 %v11203_v36  ;;  %v14730_v56 = vld [vmem:[#allocation14 + $0x68c] sm:$0xf]  ;;  %v12322_v36 = vld [vmem:[#allocation14 + $0xbd0] sm:$0xf]  ;;  %v12259_v29 = vor.u32 %v14887_v14, %v12258_v11  ;;  %v14579_v14 = vld [vmem:[#allocation14 + $0x1d4] sm:$0xf] }
 0x33a   :  { %v11647_v23 = vor.u32 %v14730_v56, %v11644_v6  ;;  %v12348_v0 = vld [vmem:[#allocation14 + $0xc28] sm:$0xf0]  ;;  %v12323_v55 = vor.u32 %v14903_v39, %v12322_v36  ;;  %v12003_v56 = vor.u32 %v14823_v52, %v12002_v51  ;;  %v14703_v6 = vld [vmem:[#allocation14 + $0x5ac] sm:$0xf0] }
 0x33b   :  { %6337 = vmatpush.bf16.msra.mxu0 %v12447_v47  ;;  %6298 = vmatpush.bf16.msrb.mxu1 %v11679_v8  ;;  %v15026_v41 = vld [vmem:[#allocation14 + $0xfcc] sm:$0xf]  ;;  %v12351_v1 = vor.u32 %v14906_v34, %v12348_v0  ;;  %v14895_v8 = vld [vmem:[#allocation14 + $0xbac] sm:$0xf0] }
 0x33c   :  { %v15018_v5 = vld [vmem:[#allocation14 + $0xf8c] sm:$0xf]  ;;  %v12291_v21 = vor.u32 %v14895_v8, %v12290_v58  ;;  %v11938_v24 = vld [vmem:[#allocation14 + $0x8d0] sm:$0xf]  ;;  %v16154_v58 = vld [vmem:[#allocation16] sm:$0xff] }
 0x33d   :  { %6362 = vmatpush.bf16.msra.mxu2 %v10947_v22  ;;  %6376 = vmatpush.bf16.msra.mxu3 %v11171_v12  ;;  %v6110_v22 = vpop.f32.mrf.mxu2  ;;  %v16144_v12 = vadd.f32 %v6082_v53, %v16130_v20  ;;  %v12796_v7 = vld [vmem:[#allocation14 + $0xfa8] sm:$0xf0]  ;;  %v11523_v20 = vor.u32 %v14703_v6, %v11522_v43  ;;  %v14807_v50 = vld [vmem:[#allocation14 + $0x8ec] sm:$0xf0]  ;;  %v3369_v8 = vperm.slane %v16154_v58, 2 }
 0x33e   :  { %v15010_v13 = vld [vmem:[#allocation14 + $0xf4c] sm:$0xf]  ;;  %v11490_v22 = vld [vmem:[#allocation14 + $0x550] sm:$0xf] }
 0x33f   :  { %6338 = vmatpush.bf16.msra.mxu0 %v12415_v18  ;;  %6299 = vmatpush.bf16.msrb.mxu1 %v11647_v23  ;;  %v12799_v18 = vor.u32 %v15018_v5, %v12796_v7  ;;  %v14695_v23 = vld [vmem:[#allocation14 + $0x56c] sm:$0xf0]  ;;  %v12732_v35 = vld [vmem:[#allocation14 + $0xf28] sm:$0xf0] }
 0x340   :  { %v11491_v15 = vor.u32 %v14695_v23, %v11490_v22  ;;  %v14879_v30 = vld [vmem:[#allocation14 + $0xb2c] sm:$0xf0]  ;;  %v12700_v54 = vld [vmem:[#allocation14 + $0xee8] sm:$0xf0] }
 0x341   :  { %6363 = vmatpush.bf16.msra.mxu2 %v10915_v33  ;;  %6377 = vmatpush.bf16.msra.mxu3 %v11139_v61  ;;  %v14714_v33 = vld [vmem:[#allocation14 + $0x60c] sm:$0xf]  ;;  %v14815_v61 = vld [vmem:[#allocation14 + $0x92c] sm:$0xf0] }
 0x342   :  { %v11583_v47 = vor.u32 %v14714_v33, %v11580_v3  ;;  %v11971_v19 = vor.u32 %v14815_v61, %v11970_v62  ;;  %v15002_v33 = vld [vmem:[#allocation14 + $0xf0c] sm:$0xf]  ;;  %v11458_v3 = vld [vmem:[#allocation14 + $0x510] sm:$0xf] }
 0x343   :  { %6339 = vmatpush.bf16.msra.mxu0 %v12383_v10  ;;  %6300 = vmatpush.bf16.msrb.mxu1 %v11615_v60  ;;  %v11939_v10 = vor.u32 %v14807_v50, %v11938_v24  ;;  %v14687_v34 = vld [vmem:[#allocation14 + $0x52c] sm:$0xf0]  ;;  %v12735_v45 = vor.u32 %v15002_v33, %v12732_v35  ;;  %v14986_v6 = vld [vmem:[#allocation14 + $0xe8c] sm:$0xf]  ;;  %v14571_v35 = vld [vmem:[#allocation14 + $0x194] sm:$0xf] }
 0x344   :  { %v11906_v31 = vld [vmem:[#allocation14 + $0x890] sm:$0xf]  ;;  %v11459_v36 = vor.u32 %v14687_v34, %v11458_v3  ;;  %v12668_v61 = vld [vmem:[#allocation14 + $0xea8] sm:$0xf0] }
 0x345   :  { %6364 = vmatpush.bf16.msra.mxu2 %v10883_v37  ;;  %6378 = vmatpush.bf16.msra.mxu3 %v11107_v28  ;;  %v12828_v37 = vld [vmem:[#allocation14 + $0xfe8] sm:$0xf0]  ;;  %v12226_v28 = vld [vmem:[#allocation14 + $0xb10] sm:$0xf]  ;;  %v12671_v50 = vor.u32 %v14986_v6, %v12668_v61  ;;  %v11268_v61 = vld [vmem:[#allocation14 + $0x3b0] sm:$0xf0] }
 0x346   :  { %v14799_v60 = vld [vmem:[#allocation14 + $0x8ac] sm:$0xf0]  ;;  %v12227_v0 = vor.u32 %v14879_v30, %v12226_v28  ;;  %v12636_v33 = vld [vmem:[#allocation14 + $0xe68] sm:$0xf0] }
 0x347   :  { %6340 = vmatpush.bf16.msra.mxu0 %v12351_v1  ;;  %6301 = vmatpush.bf16.msrb.mxu1 %v11583_v47  ;;  %v12194_v39 = vld [vmem:[#allocation14 + $0xad0] sm:$0xf] }
 0x348   :  { %v11426_v51 = vld [vmem:[#allocation14 + $0x4d0] sm:$0xf] }
 0x349   :  { %6365 = vmatpush.bf16.msra.mxu2 %v10851_v59  ;;  %v12831_v59 = vor.u32 %v15026_v41, %v12828_v37  ;;  %6379 = vmatpush.bf16.msra.mxu3 %v11075_v49  ;;  %v6043_v41 = vpop.f32.mrf.mxu1  ;;  %v11907_v49 = vor.u32 %v14799_v60, %v11906_v31  ;;  %v14994_v37 = vld [vmem:[#allocation14 + $0xecc] sm:$0xf]  ;;  %v14679_v52 = vld [vmem:[#allocation14 + $0x4ec] sm:$0xf0]  ;;  %v11012_v31 = vld [vmem:[#allocation14 + $0x1b0] sm:$0xf0] }
 0x34a   :  { %6341 = vmatmul.bf16.vlgmr.msra.gmra.mxu0 %v16093_v38  ;;  %6302 = vmatmul.bf16.vlgmr.msrb.gmra.mxu1 %v16069_v46  ;;  %v16150_v53 = vadd.f32 %v6043_v41, %v16136_v48  ;;  %v11874_v1 = vld [vmem:[#allocation14 + $0x850] sm:$0xf]  ;;  %v12703_v43 = vor.u32 %v14994_v37, %v12700_v54  ;;  %v11300_v37 = vld [vmem:[#allocation14 + $0x3f0] sm:$0xf0] }
 0x34b   :  { %6385 = vmatpush.bf16.msrb.mxu0 %v11555_v57  ;;  %6346 = vmatpush.bf16.msra.mxu1 %v12831_v59  ;;  %v11427_v59 = vor.u32 %v14679_v52, %v11426_v51  ;;  %v14863_v5 = vld [vmem:[#allocation14 + $0xaac] sm:$0xf0]  ;;  %v11015_v51 = vor.u32 %v14571_v35, %v11012_v31 }
 0x34c   :  { %6380 = vmatmul.bf16.vlgmr.msra.gmra.mxu3 %v16055_v9  ;;  %v11394_v7 = vld [vmem:[#allocation14 + $0x490] sm:$0xf] }
 0x34d   :  { %6366 = vmatpush.bf16.msra.mxu2 %v10819_v63  ;;  %6424 = vmatpush.bf16.msrb.mxu3 %v12323_v55  ;;  %v12764_v63 = vld [vmem:[#allocation14 + $0xf68] sm:$0xf0]  ;;  %v14791_v55 = vld [vmem:[#allocation14 + $0x86c] sm:$0xf0] }
 0x34e   :  { %v12767_v32 = vor.u32 %v15010_v13, %v12764_v63  ;;  %v11875_v48 = vor.u32 %v14791_v55, %v11874_v1  ;;  %v14671_v62 = vld [vmem:[#allocation14 + $0x4ac] sm:$0xf0] }
 0x34f   :  { %6386 = vmatpush.bf16.msrb.mxu0 %v11523_v20  ;;  %6347 = vmatpush.bf16.msra.mxu1 %v12799_v18  ;;  %v14783_v20 = vld [vmem:[#allocation14 + $0x82c] sm:$0xf0]  ;;  %v11044_v18 = vld [vmem:[#allocation14 + $0x1f0] sm:$0xf0]  ;;  %v11395_v13 = vor.u32 %v14671_v62, %v11394_v7  ;;  %v6173_v24 = vpop.f32.mrf.mxu3 }
 0x350   :  { %6367 = vmatmul.bf16.vlgmr.msra.gmra.mxu2 %v16060_v27  ;;  %v12130_v22 = vld [vmem:[#allocation14 + $0xa50] sm:$0xf]  ;;  %v14635_v62 = vld [vmem:[#allocation14 + $0x394] sm:$0xf] }
 0x351   :  { %6411 = vmatpush.bf16.msrb.mxu2 %v12067_v42  ;;  %v6084_v42 = vpop.f32.mrf.mxu0  ;;  %6425 = vmatpush.bf16.msrb.mxu3 %v12291_v21  ;;  %v11842_v21 = vld [vmem:[#allocation14 + $0x810] sm:$0xf]  ;;  %v6045_v63 = vpop.f32.mrf.mxu1 }
 0x352   :  { %v14855_v23 = vld [vmem:[#allocation14 + $0xa6c] sm:$0xf0]  ;;  %v11843_v42 = vor.u32 %v14783_v20, %v11842_v21 }
 0x353   :  { %6387 = vmatpush.bf16.msrb.mxu0 %v11491_v15  ;;  %6348 = vmatpush.bf16.msra.mxu1 %v12767_v32  ;;  %v6160_v44 = vpop.f32.mrf.mxu2  ;;  %v14663_v15 = vld [vmem:[#allocation14 + $0x46c] sm:$0xf0]  ;;  %v11047_v32 = vor.u32 %v14579_v14, %v11044_v18  ;;  %v12131_v34 = vor.u32 %v14855_v23, %v12130_v22  ;;  %v14555_v22 = vld [vmem:[#allocation14 + $0x114] sm:$0xf] }
 0x354   :  { %v14847_v41 = vld [vmem:[#allocation14 + $0xa2c] sm:$0xf0]  ;;  %v10948_v23 = vld [vmem:[#allocation14 + $0x130] sm:$0xf0] }
 0x355   :  { %6412 = vmatpush.bf16.msrb.mxu2 %v12035_v40  ;;  %6426 = vmatpush.bf16.msrb.mxu3 %v12259_v29  ;;  %v14871_v40 = vld [vmem:[#allocation14 + $0xaec] sm:$0xf0] }
 0x356   :  { %v12195_v57 = vor.u32 %v14871_v40, %v12194_v39  ;;  %v11362_v29 = vld [vmem:[#allocation14 + $0x450] sm:$0xf] }
 0x357   :  { %6388 = vmatpush.bf16.msrb.mxu0 %v11459_v36  ;;  %6349 = vmatpush.bf16.msra.mxu1 %v12735_v45  ;;  %v11363_v60 = vor.u32 %v14663_v15, %v11362_v29  ;;  %v12604_v36 = vld [vmem:[#allocation14 + $0xe28] sm:$0xf0]  ;;  %v11330_v39 = vld [vmem:[#allocation14 + $0x410] sm:$0xf]  ;;  %v10951_v15 = vor.u32 %v14555_v22, %v10948_v23 }
 0x358   :  { %v12098_v40 = vld [vmem:[#allocation14 + $0xa10] sm:$0xf] }
 0x359   :  { %6413 = vmatpush.bf16.msrb.mxu2 %v12003_v56  ;;  %v16152_v47 = vpop.f32.mrf.mxu0  ;;  %6427 = vmatpush.bf16.msrb.mxu3 %v12227_v0  ;;  %v12162_v56 = vld [vmem:[#allocation14 + $0xa90] sm:$0xf]  ;;  %v14970_v0 = vld [vmem:[#allocation14 + $0xe0c] sm:$0xf]  ;;  %v12099_v55 = vor.u32 %v14847_v41, %v12098_v40 }
 0x35a   :  { %v12163_v11 = vor.u32 %v14863_v5, %v12162_v56  ;;  %v14655_v45 = vld [vmem:[#allocation14 + $0x42c] sm:$0xf0]  ;;  %v12607_v6 = vor.u32 %v14970_v0, %v12604_v36  ;;  %v14619_v36 = vld [vmem:[#allocation14 + $0x314] sm:$0xf] }
 0x35b   :  { %6389 = vmatpush.bf16.msrb.mxu0 %v11427_v59  ;;  %6350 = vmatpush.bf16.msra.mxu1 %v12703_v43  ;;  %v6162_v30 = vpop.f32.mrf.mxu2  ;;  %v11810_v52 = vld [vmem:[#allocation14 + $0x7d0] sm:$0xf]  ;;  %v10980_v59 = vld [vmem:[#allocation14 + $0x170] sm:$0xf0]  ;;  %v11331_v56 = vor.u32 %v14655_v45, %v11330_v39  ;;  %v6095_v43 = vpop.f32.mrf.mxu1 }
 0x35c   :  { %v12578_v54 = vld [vmem:[#allocation14 + $0xdd0] sm:$0xf]  ;;  %v6096_v21 = vadd.f32 %v6095_v43, %v16144_v12  ;;  %v11236_v12 = vld [vmem:[#allocation14 + $0x370] sm:$0xf0] }
 0x35d   :  { %6414 = vmatpush.bf16.msrb.mxu2 %v11971_v19  ;;  %6428 = vmatpush.bf16.msrb.mxu3 %v12195_v57  ;;  %v6161_v19 = vadd.f32 %v6160_v44, %v3369_v8  ;;  %v14967_v1 = vld [vmem:[#allocation14 + $0xdec] sm:$0xf0]  ;;  %v14563_v8 = vld [vmem:[#allocation14 + $0x154] sm:$0xf] }
 0x35e   :  { %v14775_v57 = vld [vmem:[#allocation14 + $0x7ec] sm:$0xf0]  ;;  %v12579_v7 = vor.u32 %v14967_v1, %v12578_v54  ;;  %v6109_v63 = vadd.f32 %v16138_v4, %v6096_v21  ;;  %v11204_v39 = vld [vmem:[#allocation14 + $0x330] sm:$0xf0] }
 0x35f   :  { %v16157_v28 = vadd.f32 %v6173_v24, %v6161_v19  ;;  %6390 = vmatpush.bf16.msrb.mxu0 %v11395_v13  ;;  %6351 = vmatpush.bf16.msra.mxu1 %v12671_v50  ;;  %v11811_v20 = vor.u32 %v14775_v57, %v11810_v52  ;;  %v11778_v14 = vld [vmem:[#allocation14 + $0x790] sm:$0xf]  ;;  %v11271_v24 = vor.u32 %v14635_v62, %v11268_v61  ;;  %v11172_v1 = vld [vmem:[#allocation14 + $0x2f0] sm:$0xf0] }
 0x360   :  { %v12546_v18 = vld [vmem:[#allocation14 + $0xd90] sm:$0xf]  ;;  %v11207_v52 = vor.u32 %v14619_v36, %v11204_v39 }
 0x361   :  { %6415 = vmatpush.bf16.msrb.mxu2 %v11939_v10  ;;  %v14978_v10 = vld [vmem:[#allocation14 + $0xe4c] sm:$0xf]  ;;  %v6136_v3 = vpop.f32.mrf.mxu0  ;;  %6429 = vmatpush.bf16.msrb.mxu3 %v12163_v11  ;;  %v10983_v11 = vor.u32 %v14563_v8, %v10980_v59  ;;  %v14959_v19 = vld [vmem:[#allocation14 + $0xdac] sm:$0xf0] }
 0x362   :  { %v12639_v44 = vor.u32 %v14978_v10, %v12636_v33  ;;  %v14767_v13 = vld [vmem:[#allocation14 + $0x7ac] sm:$0xf0]  ;;  %v12547_v50 = vor.u32 %v14959_v19, %v12546_v18  ;;  %v6122_v33 = vadd.f32 %v16140_v16, %v6109_v63  ;;  %v14547_v3 = vld [vmem:[#allocation14 + $0xd4] sm:$0xf] }
 0x363   :  { %6391 = vmatpush.bf16.msrb.mxu0 %v11363_v60  ;;  %v11779_v29 = vor.u32 %v14767_v13, %v11778_v14  ;;  %v11746_v30 = vld [vmem:[#allocation14 + $0x750] sm:$0xf]  ;;  %v6097_v60 = vpop.f32.mrf.mxu1  ;;  %v11140_v14 = vld [vmem:[#allocation14 + $0x2b0] sm:$0xf0] }
 0x364   :  { %6352 = vmatpush.bf16.msra.mxu1 %v12639_v44  ;;  %v14951_v10 = vld [vmem:[#allocation14 + $0xd6c] sm:$0xf0]  ;;  %v6135_v31 = vadd.f32 %v16152_v47, %v6122_v33  ;;  %v14611_v47 = vld [vmem:[#allocation14 + $0x2d4] sm:$0xf] }
 0x365   :  { %6416 = vmatpush.bf16.msrb.mxu2 %v11907_v49  ;;  %v14643_v49 = vld [vmem:[#allocation14 + $0x3d4] sm:$0xf]  ;;  %6430 = vmatpush.bf16.msrb.mxu3 %v12131_v34  ;;  %v14759_v4 = vld [vmem:[#allocation14 + $0x76c] sm:$0xf0]  ;;  %v11175_v62 = vor.u32 %v14611_v47, %v11172_v1 }
 0x366   :  { %v11303_v5 = vor.u32 %v14643_v49, %v11300_v37  ;;  %v10916_v34 = vld [vmem:[#allocation14 + $0xf0] sm:$0xf0]  ;;  %v11747_v16 = vor.u32 %v14759_v4, %v11746_v30  ;;  %v11714_v41 = vld [vmem:[#allocation14 + $0x710] sm:$0xf] }
 0x367   :  { %6392 = vmatpush.bf16.msrb.mxu0 %v11331_v56  ;;  %v10919_v40 = vor.u32 %v14547_v3, %v10916_v34  ;;  %v12482_v44 = vld [vmem:[#allocation14 + $0xd10] sm:$0xf]  ;;  %v14539_v37 = vld [vmem:[#allocation14 + $0x94] sm:$0xf] }
 0x368   :  { %6353 = vmatpush.bf16.msra.mxu1 %v12607_v6  ;;  %v14943_v45 = vld [vmem:[#allocation14 + $0xd2c] sm:$0xf0]  ;;  %v10852_v6 = vld [vmem:[#allocation14 + $0x70] sm:$0xf0] }
 0x369   :  { %6417 = vmatpush.bf16.msrb.mxu2 %v11875_v48  ;;  %v6175_v48 = vpop.f32.mrf.mxu3  ;;  %6431 = vmatpush.bf16.msrb.mxu3 %v12099_v55  ;;  %v14751_v49 = vld [vmem:[#allocation14 + $0x72c] sm:$0xf0]  ;;  %v12483_v54 = vor.u32 %v14943_v45, %v12482_v44  ;;  %v14595_v30 = vld [vmem:[#allocation14 + $0x254] sm:$0xf] }
 0x36a   :  { %6393 = vmatmul.bf16.vlgmr.msrb.gmra.mxu0 %v16073_v26  ;;  %v11715_v55 = vor.u32 %v14751_v49, %v11714_v41  ;;  %v11682_v8 = vld [vmem:[#allocation14 + $0x6d0] sm:$0xf]  ;;  %v14531_v48 = vld [vmem:[#allocation14 + $0x54] sm:$0xf] }
 0x36b   :  { %6437 = vmatpush.bf16.msra.mxu0 %v12579_v7  ;;  %6354 = vmatmul.bf16.vlgmr.msra.gmra.mxu1 %v16100_v25  ;;  %v12450_v59 = vld [vmem:[#allocation14 + $0xcd0] sm:$0xf]  ;;  %v6186_v7 = vpop.f32.mrf.mxu0  ;;  %v6147_v21 = vpop.f32.mrf.mxu1  ;;  %v10855_v13 = vor.u32 %v14531_v48, %v10852_v6  ;;  %v14899_v1 = vld [vmem:[#allocation14 + $0xbd4] sm:$0xf] }
 0x36c   :  { %6398 = vmatpush.bf16.msrb.mxu1 %v11811_v20  ;;  %6432 = vmatmul.bf16.vlgmr.msrb.gmra.mxu3 %v16087_v2  ;;  %v14935_v56 = vld [vmem:[#allocation14 + $0xcec] sm:$0xf0]  ;;  %v16170_v61 = vadd.f32 %v6186_v7, %v16157_v28  ;;  %v16172_v18 = vadd.f32 %v6147_v21, %v6135_v31  ;;  %v14819_v6 = vld [vmem:[#allocation14 + $0x954] sm:$0xf] }
 0x36d   :  { %6418 = vmatpush.bf16.msrb.mxu2 %v11843_v42  ;;  %6476 = vmatpush.bf16.msra.mxu3 %v11303_v5  ;;  %v14627_v42 = vld [vmem:[#allocation14 + $0x354] sm:$0xf]  ;;  %v14743_v43 = vld [vmem:[#allocation14 + $0x6ec] sm:$0xf0]  ;;  %v12451_v20 = vor.u32 %v14935_v56, %v12450_v59 }
 0x36e   :  { %v11239_v35 = vor.u32 %v14627_v42, %v11236_v12  ;;  %v11683_v19 = vor.u32 %v14743_v43, %v11682_v8  ;;  %v11650_v22 = vld [vmem:[#allocation14 + $0x690] sm:$0xf]  ;;  %v10820_v42 = vld [vmem:[#allocation14 + $0x30] sm:$0xf0] }
 0x36f   :  { %6438 = vmatpush.bf16.msra.mxu0 %v12547_v50  ;;  %v12418_v23 = vld [vmem:[#allocation14 + $0xc90] sm:$0xf]  ;;  %v14523_v50 = vld [vmem:[#allocation14 + $0x14] sm:$0xf] }
 0x370   :  { %6419 = vmatmul.bf16.vlgmr.msrb.gmra.mxu2 %v16077_v17  ;;  %6399 = vmatpush.bf16.msrb.mxu1 %v11779_v29  ;;  %v14927_v63 = vld [vmem:[#allocation14 + $0xcac] sm:$0xf0]  ;;  %v14835_v12 = vld [vmem:[#allocation14 + $0x9d4] sm:$0xf]  ;;  %v10823_v4 = vor.u32 %v14523_v50, %v10820_v42 }
 0x371   :  { %6463 = vmatpush.bf16.msra.mxu2 %v11047_v32  ;;  %v12514_v32 = vld [vmem:[#allocation14 + $0xd50] sm:$0xf]  ;;  %6477 = vmatpush.bf16.msra.mxu3 %v11271_v24  ;;  %v12068_v29 = vld [vmem:[#allocation14 + $0x9f0] sm:$0xf0] }
 0x372   :  { %v12515_v0 = vor.u32 %v14951_v10, %v12514_v32  ;;  %v14735_v24 = vld [vmem:[#allocation14 + $0x6ac] sm:$0xf0]  ;;  %v11108_v32 = vld [vmem:[#allocation14 + $0x270] sm:$0xf0]  ;;  %v16174_v10 = vpop.f32.mrf.mxu3  ;;  %v12071_v31 = vor.u32 %v14835_v12, %v12068_v29 }
 0x373   :  { %v16167_v5 = vpop.f32.mrf.mxu2  ;;  %v11651_v33 = vor.u32 %v14735_v24, %v11650_v22  ;;  %v12386_v3 = vld [vmem:[#allocation14 + $0xc50] sm:$0xf]  ;;  %v6188_v36 = vpop.f32.mrf.mxu0  ;;  %v11111_v39 = vor.u32 %v14595_v30, %v11108_v32  ;;  %v14707_v59 = vld [vmem:[#allocation14 + $0x5d4] sm:$0xf] }
 0x374   :  { %6439 = vmatpush.bf16.msra.mxu0 %v12515_v0  ;;  %6400 = vmatpush.bf16.msrb.mxu1 %v11747_v16  ;;  %v14919_v34 = vld [vmem:[#allocation14 + $0xc6c] sm:$0xf0]  ;;  %v14827_v16 = vld [vmem:[#allocation14 + $0x994] sm:$0xf]  ;;  %v6149_v41 = vpop.f32.mrf.mxu1 }
 0x375   :  { %6464 = vmatpush.bf16.msra.mxu2 %v11015_v51  ;;  %v10884_v51 = vld [vmem:[#allocation14 + $0xb0] sm:$0xf0]  ;;  %6478 = vmatpush.bf16.msra.mxu3 %v11239_v35  ;;  %v11618_v60 = vld [vmem:[#allocation14 + $0x650] sm:$0xf]  ;;  %v12387_v44 = vor.u32 %v14919_v34, %v12386_v3 }
 0x376   :  { %v10887_v57 = vor.u32 %v14539_v37, %v10884_v51  ;;  %v14727_v0 = vld [vmem:[#allocation14 + $0x66c] sm:$0xf0]  ;;  %v14587_v51 = vld [vmem:[#allocation14 + $0x214] sm:$0xf] }
 0x377   :  { %v11586_v45 = vld [vmem:[#allocation14 + $0x610] sm:$0xf]  ;;  %v11556_v56 = vld [vmem:[#allocation14 + $0x5f0] sm:$0xf0] }
 0x378   :  { %6440 = vmatpush.bf16.msra.mxu0 %v12483_v54  ;;  %6401 = vmatpush.bf16.msrb.mxu1 %v11715_v55  ;;  %v14719_v49 = vld [vmem:[#allocation14 + $0x62c] sm:$0xf0]  ;;  %v11619_v54 = vor.u32 %v14727_v0, %v11618_v60  ;;  %v12324_v55 = vld [vmem:[#allocation14 + $0xbf0] sm:$0xf0] }
 0x379   :  { %6465 = vmatpush.bf16.msra.mxu2 %v10983_v11  ;;  %6479 = vmatpush.bf16.msra.mxu3 %v11207_v52  ;;  %v14603_v11 = vld [vmem:[#allocation14 + $0x294] sm:$0xf]  ;;  %v12354_v37 = vld [vmem:[#allocation14 + $0xc10] sm:$0xf]  ;;  %v12327_v21 = vor.u32 %v14899_v1, %v12324_v55 }
 0x37a   :  { %v11143_v28 = vor.u32 %v14603_v11, %v11140_v14  ;;  %v11076_v52 = vld [vmem:[#allocation14 + $0x230] sm:$0xf0]  ;;  %v14911_v47 = vld [vmem:[#allocation14 + $0xc2c] sm:$0xf0]  ;;  %v11587_v11 = vor.u32 %v14719_v49, %v11586_v45  ;;  %v11559_v14 = vor.u32 %v14707_v59, %v11556_v56 }
 0x37b   :  { %v6214_v35 = vpop.f32.mrf.mxu2  ;;  %v12834_v8 = vld [vmem:[#allocation14 + $0xfd0] sm:$0xf]  ;;  %v11079_v43 = vor.u32 %v14587_v51, %v11076_v52  ;;  %v12004_v7 = vld [vmem:[#allocation14 + $0x970] sm:$0xf0] }
 0x37c   :  { %6441 = vmatpush.bf16.msra.mxu0 %v12451_v20  ;;  %6402 = vmatpush.bf16.msrb.mxu1 %v11683_v19  ;;  %v15031_v48 = vld [vmem:[#allocation14 + $0xfec] sm:$0xf0]  ;;  %v6227_v20 = vpop.f32.mrf.mxu3  ;;  %v14891_v19 = vld [vmem:[#allocation14 + $0xb94] sm:$0xf] }
 0x37d   :  { %6466 = vmatpush.bf16.msra.mxu2 %v10951_v15  ;;  %6480 = vmatpush.bf16.msra.mxu3 %v11175_v62  ;;  %v12419_v15 = vor.u32 %v14927_v63, %v12418_v23  ;;  %v12355_v62 = vor.u32 %v14911_v47, %v12354_v37  ;;  %v12835_v22 = vor.u32 %v15031_v48, %v12834_v8  ;;  %v12802_v63 = vld [vmem:[#allocation14 + $0xf90] sm:$0xf]  ;;  %v14699_v24 = vld [vmem:[#allocation14 + $0x594] sm:$0xf] }
 0x37e   :  { %v12007_v23 = vor.u32 %v14819_v6, %v12004_v7  ;;  %v11524_v50 = vld [vmem:[#allocation14 + $0x5b0] sm:$0xf0]  ;;  %v15023_v42 = vld [vmem:[#allocation14 + $0xfac] sm:$0xf0] }
 0x37f   :  { %v11972_v12 = vld [vmem:[#allocation14 + $0x930] sm:$0xf0]  ;;  %v12770_v3 = vld [vmem:[#allocation14 + $0xf50] sm:$0xf] }
 0x380   :  { %6442 = vmatpush.bf16.msra.mxu0 %v12419_v15  ;;  %6403 = vmatpush.bf16.msrb.mxu1 %v11651_v33  ;;  %v11527_v15 = vor.u32 %v14699_v24, %v11524_v50  ;;  %v14883_v30 = vld [vmem:[#allocation14 + $0xb54] sm:$0xf]  ;;  %v12803_v33 = vor.u32 %v15023_v42, %v12802_v63  ;;  %v12738_v45 = vld [vmem:[#allocation14 + $0xf10] sm:$0xf] }
 0x381   :  { %6467 = vmatpush.bf16.msra.mxu2 %v10919_v40  ;;  %6481 = vmatpush.bf16.msra.mxu3 %v11143_v28  ;;  %v12036_v40 = vld [vmem:[#allocation14 + $0x9b0] sm:$0xf0]  ;;  %v15007_v51 = vld [vmem:[#allocation14 + $0xf2c] sm:$0xf0] }
 0x382   :  { %v14811_v28 = vld [vmem:[#allocation14 + $0x914] sm:$0xf]  ;;  %v12739_v8 = vor.u32 %v15007_v51, %v12738_v45  ;;  %v12706_v56 = vld [vmem:[#allocation14 + $0xed0] sm:$0xf] }
 0x383   :  { %v12260_v32 = vld [vmem:[#allocation14 + $0xb70] sm:$0xf0]  ;;  %v14999_v7 = vld [vmem:[#allocation14 + $0xeec] sm:$0xf0] }
 0x384   :  { %6443 = vmatpush.bf16.msra.mxu0 %v12387_v44  ;;  %6404 = vmatpush.bf16.msrb.mxu1 %v11619_v54  ;;  %v14691_v34 = vld [vmem:[#allocation14 + $0x554] sm:$0xf]  ;;  %v12263_v36 = vor.u32 %v14883_v30, %v12260_v32  ;;  %v12707_v24 = vor.u32 %v14999_v7, %v12706_v56  ;;  %v12674_v42 = vld [vmem:[#allocation14 + $0xe90] sm:$0xf] }
 0x385   :  { %6468 = vmatpush.bf16.msra.mxu2 %v10887_v57  ;;  %v12039_v57 = vor.u32 %v14827_v16, %v12036_v40  ;;  %6482 = vmatpush.bf16.msra.mxu3 %v11111_v39  ;;  %v11492_v35 = vld [vmem:[#allocation14 + $0x570] sm:$0xf0]  ;;  %v14983_v45 = vld [vmem:[#allocation14 + $0xe6c] sm:$0xf0] }
 0x386   :  { %v14803_v60 = vld [vmem:[#allocation14 + $0x8d4] sm:$0xf]  ;;  %v11495_v39 = vor.u32 %v14691_v34, %v11492_v35 }
 0x387   :  { %v11940_v0 = vld [vmem:[#allocation14 + $0x8f0] sm:$0xf0]  ;;  %v6238_v20 = vpop.f32.mrf.mxu0 }
 0x388   :  { %6444 = vmatpush.bf16.msra.mxu0 %v12355_v62  ;;  %6405 = vmatpush.bf16.msrb.mxu1 %v11587_v11  ;;  %v14875_v16 = vld [vmem:[#allocation14 + $0xb14] sm:$0xf]  ;;  %v11943_v44 = vor.u32 %v14803_v60, %v11940_v0 }
 0x389   :  { %6469 = vmatpush.bf16.msra.mxu2 %v10855_v13  ;;  %v12292_v13 = vld [vmem:[#allocation14 + $0xbb0] sm:$0xf0]  ;;  %6483 = vmatpush.bf16.msra.mxu3 %v11079_v43 }
 0x38a   :  { %v12295_v29 = vor.u32 %v14891_v19, %v12292_v13  ;;  %v12228_v40 = vld [vmem:[#allocation14 + $0xb30] sm:$0xf0]  ;;  %v6199_v19 = vpop.f32.mrf.mxu1 }
 0x38b   :  { %6445 = vmatmul.bf16.vlgmr.msra.gmra.mxu0 %v16093_v38  ;;  %6406 = vmatmul.bf16.vlgmr.msrb.gmra.mxu1 %v16069_v46  ;;  %v14683_v49 = vld [vmem:[#allocation14 + $0x514] sm:$0xf]  ;;  %v12231_v47 = vor.u32 %v14875_v16, %v12228_v40  ;;  %v6200_v63 = vadd.f32 %v6199_v19, %v16170_v61  ;;  %v10986_v19 = vld [vmem:[#allocation14 + $0x158] sm:$0xf] }
 0x38c   :  { %6489 = vmatpush.bf16.msrb.mxu0 %v11559_v14  ;;  %6450 = vmatpush.bf16.msra.mxu1 %v12835_v22  ;;  %v11460_v37 = vld [vmem:[#allocation14 + $0x530] sm:$0xf0]  ;;  %v3370_v14 = vperm.slane %v16154_v58, 3 }
 0x38d   :  { %6470 = vmatpush.bf16.msra.mxu2 %v10823_v4  ;;  %6528 = vmatpush.bf16.msrb.mxu3 %v12327_v21  ;;  %v11975_v4 = vor.u32 %v14811_v28, %v11972_v12  ;;  %v14795_v52 = vld [vmem:[#allocation14 + $0x894] sm:$0xf]  ;;  %v11463_v1 = vor.u32 %v14683_v49, %v11460_v37  ;;  %v6213_v32 = vadd.f32 %v16167_v5, %v6200_v63 }
 0x38e   :  { %6484 = vmatmul.bf16.vlgmr.msra.gmra.mxu3 %v16055_v9  ;;  %v11908_v54 = vld [vmem:[#allocation14 + $0x8b0] sm:$0xf0] }
 0x38f   :  { %v14867_v55 = vld [vmem:[#allocation14 + $0xad4] sm:$0xf]  ;;  %v11911_v59 = vor.u32 %v14795_v52, %v11908_v54  ;;  %v6277_v60 = vpop.f32.mrf.mxu3  ;;  %v6240_v37 = vpop.f32.mrf.mxu0  ;;  %v11018_v52 = vld [vmem:[#allocation14 + $0x198] sm:$0xf] }
 0x390   :  { %6471 = vmatmul.bf16.vlgmr.msra.gmra.mxu2 %v16060_v27  ;;  %6490 = vmatpush.bf16.msrb.mxu0 %v11527_v15  ;;  %v14675_v43 = vld [vmem:[#allocation14 + $0x4d4] sm:$0xf]  ;;  %v11210_v37 = vld [vmem:[#allocation14 + $0x318] sm:$0xf] }
 0x391   :  { %6515 = vmatpush.bf16.msrb.mxu2 %v12071_v31  ;;  %v15015_v31 = vld [vmem:[#allocation14 + $0xf6c] sm:$0xf0]  ;;  %6529 = vmatpush.bf16.msrb.mxu3 %v12295_v29  ;;  %v11428_v48 = vld [vmem:[#allocation14 + $0x4f0] sm:$0xf0] }
 0x392   :  { %6451 = vmatpush.bf16.msra.mxu1 %v12803_v33  ;;  %v12771_v41 = vor.u32 %v15015_v31, %v12770_v3  ;;  %v14787_v62 = vld [vmem:[#allocation14 + $0x854] sm:$0xf]  ;;  %v11431_v13 = vor.u32 %v14675_v43, %v11428_v48  ;;  %v14991_v29 = vld [vmem:[#allocation14 + $0xeac] sm:$0xf0]  ;;  %v11050_v33 = vld [vmem:[#allocation14 + $0x1d8] sm:$0xf]  ;;  %v6226_v31 = vadd.f32 %v16174_v10, %v6213_v32  ;;  %v6201_v54 = vpop.f32.mrf.mxu1 }
 0x393   :  { %v6264_v6 = vpop.f32.mrf.mxu2  ;;  %v11876_v21 = vld [vmem:[#allocation14 + $0x870] sm:$0xf0]  ;;  %v12675_v0 = vor.u32 %v14991_v29, %v12674_v42  ;;  %v14576_v10 = vld [vmem:[#allocation14 + $0x1b4] sm:$0xf0] }
 0x394   :  { %6491 = vmatpush.bf16.msrb.mxu0 %v11495_v39  ;;  %v14859_v22 = vld [vmem:[#allocation14 + $0xa94] sm:$0xf]  ;;  %v11879_v50 = vor.u32 %v14787_v62, %v11876_v21  ;;  %v6265_v3 = vadd.f32 %v6264_v6, %v3370_v14  ;;  %v16186_v49 = vadd.f32 %v6238_v20, %v6226_v31  ;;  %v11306_v48 = vld [vmem:[#allocation14 + $0x3d8] sm:$0xf]  ;;  %v11019_v7 = vor.u32 %v14576_v10, %v11018_v52 }
 0x395   :  { %6516 = vmatpush.bf16.msrb.mxu2 %v12039_v57  ;;  %6530 = vmatpush.bf16.msrb.mxu3 %v12263_v36  ;;  %v12196_v57 = vld [vmem:[#allocation14 + $0xaf0] sm:$0xf0]  ;;  %v14648_v6 = vld [vmem:[#allocation14 + $0x3f4] sm:$0xf0] }
 0x396   :  { %6452 = vmatpush.bf16.msra.mxu1 %v12771_v41  ;;  %v12199_v11 = vor.u32 %v14867_v55, %v12196_v57  ;;  %v14667_v28 = vld [vmem:[#allocation14 + $0x494] sm:$0xf]  ;;  %v16184_v40 = vadd.f32 %v6277_v60, %v6265_v3  ;;  %v14975_v55 = vld [vmem:[#allocation14 + $0xe2c] sm:$0xf0]  ;;  %v11274_v42 = vld [vmem:[#allocation14 + $0x398] sm:$0xf] }
 0x397   :  { %v11396_v12 = vld [vmem:[#allocation14 + $0x4b0] sm:$0xf0]  ;;  %v6279_v63 = vpop.f32.mrf.mxu3 }
 0x398   :  { %6492 = vmatpush.bf16.msrb.mxu0 %v11463_v1  ;;  %v14779_v15 = vld [vmem:[#allocation14 + $0x814] sm:$0xf]  ;;  %v11399_v34 = vor.u32 %v14667_v28, %v11396_v12  ;;  %v12610_v1 = vld [vmem:[#allocation14 + $0xe10] sm:$0xf]  ;;  %v14640_v28 = vld [vmem:[#allocation14 + $0x3b4] sm:$0xf0] }
 0x399   :  { %6517 = vmatpush.bf16.msrb.mxu2 %v12007_v23  ;;  %6531 = vmatpush.bf16.msrb.mxu3 %v12231_v47  ;;  %v12164_v23 = vld [vmem:[#allocation14 + $0xab0] sm:$0xf0]  ;;  %v11275_v3 = vor.u32 %v14640_v28, %v11274_v42  ;;  %v11146_v42 = vld [vmem:[#allocation14 + $0x298] sm:$0xf] }
 0x39a   :  { %6453 = vmatpush.bf16.msra.mxu1 %v12739_v8  ;;  %v11844_v30 = vld [vmem:[#allocation14 + $0x830] sm:$0xf0]  ;;  %v12167_v58 = vor.u32 %v14859_v22, %v12164_v23  ;;  %v11307_v23 = vor.u32 %v14648_v6, %v11306_v48  ;;  %v14616_v48 = vld [vmem:[#allocation14 + $0x2f4] sm:$0xf0] }
 0x39b   :  { %v14851_v61 = vld [vmem:[#allocation14 + $0xa54] sm:$0xf]  ;;  %v11847_v36 = vor.u32 %v14779_v15, %v11844_v30  ;;  %v6266_v5 = vpop.f32.mrf.mxu2  ;;  %v14608_v28 = vld [vmem:[#allocation14 + $0x2b4] sm:$0xf0] }
 0x39c   :  { %6493 = vmatpush.bf16.msrb.mxu0 %v11431_v13  ;;  %v12132_v35 = vld [vmem:[#allocation14 + $0xa70] sm:$0xf0]  ;;  %v14568_v13 = vld [vmem:[#allocation14 + $0x174] sm:$0xf0] }
 0x39d   :  { %6518 = vmatpush.bf16.msrb.mxu2 %v11975_v4  ;;  %6532 = vmatpush.bf16.msrb.mxu3 %v12199_v11  ;;  %v14584_v4 = vld [vmem:[#allocation14 + $0x1f4] sm:$0xf0]  ;;  %v14659_v39 = vld [vmem:[#allocation14 + $0x454] sm:$0xf]  ;;  %v12135_v51 = vor.u32 %v14851_v61, %v12132_v35  ;;  %v10987_v29 = vor.u32 %v14568_v13, %v10986_v19 }
 0x39e   :  { %6454 = vmatpush.bf16.msra.mxu1 %v12707_v24  ;;  %v11364_v16 = vld [vmem:[#allocation14 + $0x470] sm:$0xf0]  ;;  %v11051_v41 = vor.u32 %v14584_v4, %v11050_v33  ;;  %v12611_v24 = vor.u32 %v14975_v55, %v12610_v1  ;;  %v10954_v33 = vld [vmem:[#allocation14 + $0x118] sm:$0xf] }
 0x39f   :  { %v11367_v47 = vor.u32 %v14659_v39, %v11364_v16  ;;  %v14651_v57 = vld [vmem:[#allocation14 + $0x414] sm:$0xf]  ;;  %v14560_v4 = vld [vmem:[#allocation14 + $0x134] sm:$0xf0] }
 0x3a0   :  { %6494 = vmatpush.bf16.msrb.mxu0 %v11399_v34  ;;  %v14843_v8 = vld [vmem:[#allocation14 + $0xa14] sm:$0xf]  ;;  %v11242_v61 = vld [vmem:[#allocation14 + $0x358] sm:$0xf]  ;;  %v10955_v60 = vor.u32 %v14560_v4, %v10954_v33 }
 0x3a1   :  { %6519 = vmatpush.bf16.msrb.mxu2 %v11943_v44  ;;  %v12642_v44 = vld [vmem:[#allocation14 + $0xe50] sm:$0xf]  ;;  %6533 = vmatpush.bf16.msrb.mxu3 %v12167_v58  ;;  %v11332_v43 = vld [vmem:[#allocation14 + $0x430] sm:$0xf0]  ;;  %v14632_v35 = vld [vmem:[#allocation14 + $0x374] sm:$0xf0] }
 0x3a2   :  { %6455 = vmatpush.bf16.msra.mxu1 %v12675_v0  ;;  %v12643_v56 = vor.u32 %v14983_v45, %v12642_v44  ;;  %v14771_v62 = vld [vmem:[#allocation14 + $0x7d4] sm:$0xf]  ;;  %v11335_v22 = vor.u32 %v14651_v57, %v11332_v43  ;;  %v10922_v5 = vld [vmem:[#allocation14 + $0xd8] sm:$0xf]  ;;  %v11243_v44 = vor.u32 %v14632_v35, %v11242_v61 }
 0x3a3   :  { %v14963_v21 = vld [vmem:[#allocation14 + $0xdd4] sm:$0xf]  ;;  %v10890_v57 = vld [vmem:[#allocation14 + $0x98] sm:$0xf] }
 0x3a4   :  { %v12580_v20 = vld [vmem:[#allocation14 + $0xdf0] sm:$0xf0]  ;;  %6495 = vmatpush.bf16.msrb.mxu0 %v11367_v47  ;;  %v11178_v43 = vld [vmem:[#allocation14 + $0x2d8] sm:$0xf] }
 0x3a5   :  { %6520 = vmatpush.bf16.msrb.mxu2 %v11911_v59  ;;  %v12100_v59 = vld [vmem:[#allocation14 + $0xa30] sm:$0xf0]  ;;  %6534 = vmatpush.bf16.msrb.mxu3 %v12135_v51  ;;  %v14624_v51 = vld [vmem:[#allocation14 + $0x334] sm:$0xf0] }
 0x3a6   :  { %v12103_v11 = vor.u32 %v14843_v8, %v12100_v59  ;;  %v11812_v14 = vld [vmem:[#allocation14 + $0x7f0] sm:$0xf0]  ;;  %6456 = vmatpush.bf16.msra.mxu1 %v12643_v56  ;;  %v14544_v8 = vld [vmem:[#allocation14 + $0xb4] sm:$0xf0]  ;;  %v11211_v59 = vor.u32 %v14624_v51, %v11210_v37 }
 0x3a7   :  { %v11815_v12 = vor.u32 %v14771_v62, %v11812_v14  ;;  %v14763_v15 = vld [vmem:[#allocation14 + $0x794] sm:$0xf]  ;;  %v10858_v19 = vld [vmem:[#allocation14 + $0x58] sm:$0xf]  ;;  %v6251_v63 = vpop.f32.mrf.mxu1 }
 0x3a8   :  { %v14955_v30 = vld [vmem:[#allocation14 + $0xd94] sm:$0xf]  ;;  %6496 = vmatpush.bf16.msrb.mxu0 %v11335_v22  ;;  %v14536_v13 = vld [vmem:[#allocation14 + $0x74] sm:$0xf0]  ;;  %v6290_v22 = vpop.f32.mrf.mxu0 }
 0x3a9   :  { %6521 = vmatpush.bf16.msrb.mxu2 %v11879_v50  ;;  %v12583_v50 = vor.u32 %v14963_v21, %v12580_v20  ;;  %v12548_v32 = vld [vmem:[#allocation14 + $0xdb0] sm:$0xf0]  ;;  %6535 = vmatpush.bf16.msrb.mxu3 %v12103_v11  ;;  %v10826_v4 = vld [vmem:[#allocation14 + $0x18] sm:$0xf] }
 0x3aa   :  { %v11780_v58 = vld [vmem:[#allocation14 + $0x7b0] sm:$0xf0]  ;;  %6457 = vmatpush.bf16.msra.mxu1 %v12611_v24  ;;  %v12551_v34 = vor.u32 %v14955_v30, %v12548_v32  ;;  %v16195_v24 = vadd.f32 %v6290_v22, %v16184_v40  ;;  %v11147_v40 = vor.u32 %v14608_v28, %v11146_v42  ;;  %v14840_v61 = vld [vmem:[#allocation14 + $0x9f4] sm:$0xf0] }
 0x3ab   :  { %v11783_v31 = vor.u32 %v14763_v15, %v11780_v58  ;;  %v14755_v0 = vld [vmem:[#allocation14 + $0x754] sm:$0xf]  ;;  %6497 = vmatmul.bf16.vlgmr.msrb.gmra.mxu0 %v16073_v26  ;;  %v10859_v15 = vor.u32 %v14536_v13, %v10858_v19  ;;  %v12010_v13 = vld [vmem:[#allocation14 + $0x958] sm:$0xf] }
 0x3ac   :  { %6541 = vmatpush.bf16.msra.mxu0 %v12583_v50  ;;  %v12516_v39 = vld [vmem:[#allocation14 + $0xd70] sm:$0xf0]  ;;  %6536 = vmatmul.bf16.vlgmr.msrb.gmra.mxu3 %v16087_v2  ;;  %v14824_v22 = vld [vmem:[#allocation14 + $0x974] sm:$0xf0] }
 0x3ad   :  { %6522 = vmatpush.bf16.msrb.mxu2 %v11847_v36  ;;  %6580 = vmatpush.bf16.msra.mxu3 %v11307_v23  ;;  %v14947_v36 = vld [vmem:[#allocation14 + $0xd54] sm:$0xf]  ;;  %v11179_v23 = vor.u32 %v14616_v48, %v11178_v43  ;;  %v12330_v48 = vld [vmem:[#allocation14 + $0xbd8] sm:$0xf] }
 0x3ae   :  { %6502 = vmatpush.bf16.msrb.mxu1 %v11815_v12  ;;  %v11748_v16 = vld [vmem:[#allocation14 + $0x770] sm:$0xf0]  ;;  %v12519_v45 = vor.u32 %v14947_v36, %v12516_v39  ;;  %v16198_v12 = vadd.f32 %v6251_v63, %v16186_v49 }
 0x3af   :  { %6458 = vmatmul.bf16.vlgmr.msra.gmra.mxu1 %v16100_v25  ;;  %v11751_v52 = vor.u32 %v14755_v0, %v11748_v16  ;;  %v14747_v54 = vld [vmem:[#allocation14 + $0x714] sm:$0xf]  ;;  %v16200_v49 = vpop.f32.mrf.mxu3 }
 0x3b0   :  { %6523 = vmatmul.bf16.vlgmr.msrb.gmra.mxu2 %v16077_v17  ;;  %6542 = vmatpush.bf16.msra.mxu0 %v12551_v34  ;;  %v14939_v47 = vld [vmem:[#allocation14 + $0xd14] sm:$0xf]  ;;  %v12074_v34 = vld [vmem:[#allocation14 + $0x9d8] sm:$0xf]  ;;  %v6292_v37 = vpop.f32.mrf.mxu0 }
 0x3b1   :  { %6567 = vmatpush.bf16.msra.mxu2 %v11051_v41  ;;  %v14552_v41 = vld [vmem:[#allocation14 + $0xf4] sm:$0xf0]  ;;  %6581 = vmatpush.bf16.msra.mxu3 %v11275_v3  ;;  %v12484_v1 = vld [vmem:[#allocation14 + $0xd30] sm:$0xf0] }
 0x3b2   :  { %6503 = vmatpush.bf16.msrb.mxu1 %v11783_v31  ;;  %v10923_v10 = vor.u32 %v14552_v41, %v10922_v5  ;;  %v11716_v55 = vld [vmem:[#allocation14 + $0x730] sm:$0xf0]  ;;  %v12487_v56 = vor.u32 %v14939_v47, %v12484_v1  ;;  %v14528_v3 = vld [vmem:[#allocation14 + $0x34] sm:$0xf0]  ;;  %v12075_v41 = vor.u32 %v14840_v61, %v12074_v34 }
 0x3b3   :  { %v11719_v6 = vor.u32 %v14747_v54, %v11716_v55  ;;  %v14739_v62 = vld [vmem:[#allocation14 + $0x6d4] sm:$0xf]  ;;  %v16192_v11 = vpop.f32.mrf.mxu2  ;;  %v11114_v31 = vld [vmem:[#allocation14 + $0x258] sm:$0xf]  ;;  %v10827_v36 = vor.u32 %v14528_v3, %v10826_v4  ;;  %v6253_v54 = vpop.f32.mrf.mxu1 }
 0x3b4   :  { %6543 = vmatpush.bf16.msra.mxu0 %v12519_v45  ;;  %v14931_v21 = vld [vmem:[#allocation14 + $0xcd4] sm:$0xf]  ;;  %v14704_v4 = vld [vmem:[#allocation14 + $0x5b4] sm:$0xf0] }
 0x3b5   :  { %6568 = vmatpush.bf16.msra.mxu2 %v11019_v7  ;;  %6582 = vmatpush.bf16.msra.mxu3 %v11243_v44  ;;  %v10891_v7 = vor.u32 %v14544_v8, %v10890_v57  ;;  %v12452_v20 = vld [vmem:[#allocation14 + $0xcf0] sm:$0xf0]  ;;  %v11082_v8 = vld [vmem:[#allocation14 + $0x218] sm:$0xf] }
 0x3b6   :  { %6504 = vmatpush.bf16.msrb.mxu1 %v11751_v52  ;;  %v11684_v14 = vld [vmem:[#allocation14 + $0x6f0] sm:$0xf0]  ;;  %v12455_v50 = vor.u32 %v14931_v21, %v12452_v20  ;;  %v12042_v52 = vld [vmem:[#allocation14 + $0x998] sm:$0xf] }
 0x3b7   :  { %v14731_v30 = vld [vmem:[#allocation14 + $0x694] sm:$0xf]  ;;  %v11562_v21 = vld [vmem:[#allocation14 + $0x5d8] sm:$0xf] }
 0x3b8   :  { %6544 = vmatpush.bf16.msra.mxu0 %v12487_v56  ;;  %v14923_v32 = vld [vmem:[#allocation14 + $0xc94] sm:$0xf]  ;;  %v14712_v20 = vld [vmem:[#allocation14 + $0x5f4] sm:$0xf0] }
 0x3b9   :  { %6569 = vmatpush.bf16.msra.mxu2 %v10987_v29  ;;  %6583 = vmatpush.bf16.msra.mxu3 %v11211_v59  ;;  %v11687_v29 = vor.u32 %v14739_v62, %v11684_v14  ;;  %v12420_v58 = vld [vmem:[#allocation14 + $0xcb0] sm:$0xf0]  ;;  %v14592_v59 = vld [vmem:[#allocation14 + $0x234] sm:$0xf0]  ;;  %v11563_v28 = vor.u32 %v14712_v20, %v11562_v21 }
 0x3ba   :  { %6505 = vmatpush.bf16.msrb.mxu1 %v11719_v6  ;;  %v11652_v33 = vld [vmem:[#allocation14 + $0x6b0] sm:$0xf0]  ;;  %v12423_v35 = vor.u32 %v14923_v32, %v12420_v58  ;;  %v14904_v6 = vld [vmem:[#allocation14 + $0xbf4] sm:$0xf0]  ;;  %v11083_v14 = vor.u32 %v14592_v59, %v11082_v8  ;;  %v12011_v32 = vor.u32 %v14824_v22, %v12010_v13 }
 0x3bb   :  { %v11655_v0 = vor.u32 %v14731_v30, %v11652_v33  ;;  %v14915_v39 = vld [vmem:[#allocation14 + $0xc54] sm:$0xf]  ;;  %v6318_v5 = vpop.f32.mrf.mxu2  ;;  %v12331_v63 = vor.u32 %v14904_v6, %v12330_v48  ;;  %v11530_v33 = vld [vmem:[#allocation14 + $0x598] sm:$0xf] }
 0x3bc   :  { %6545 = vmatpush.bf16.msra.mxu0 %v12455_v50  ;;  %v12388_v16 = vld [vmem:[#allocation14 + $0xc70] sm:$0xf0]  ;;  %v6331_v50 = vpop.f32.mrf.mxu3  ;;  %v14816_v34 = vld [vmem:[#allocation14 + $0x934] sm:$0xf0] }
 0x3bd   :  { %6570 = vmatpush.bf16.msra.mxu2 %v10955_v60  ;;  %6584 = vmatpush.bf16.msra.mxu3 %v11179_v23  ;;  %v14600_v60 = vld [vmem:[#allocation14 + $0x274] sm:$0xf0]  ;;  %v14723_v44 = vld [vmem:[#allocation14 + $0x654] sm:$0xf]  ;;  %v12391_v47 = vor.u32 %v14915_v39, %v12388_v16 }
 0x3be   :  { %6506 = vmatpush.bf16.msrb.mxu1 %v11687_v29  ;;  %v11620_v45 = vld [vmem:[#allocation14 + $0x670] sm:$0xf0]  ;;  %v11115_v51 = vor.u32 %v14600_v60, %v11114_v31  ;;  %v12298_v29 = vld [vmem:[#allocation14 + $0xb98] sm:$0xf] }
 0x3bf   :  { %v14715_v1 = vld [vmem:[#allocation14 + $0x614] sm:$0xf]  ;;  %v11623_v56 = vor.u32 %v14723_v44, %v11620_v45  ;;  %v12266_v31 = vld [vmem:[#allocation14 + $0xb58] sm:$0xf] }
 0x3c0   :  { %6546 = vmatpush.bf16.msra.mxu0 %v12423_v35  ;;  %v11588_v55 = vld [vmem:[#allocation14 + $0x630] sm:$0xf0]  ;;  %v11531_v35 = vor.u32 %v14704_v4, %v11530_v33  ;;  %v14888_v60 = vld [vmem:[#allocation14 + $0xb74] sm:$0xf0] }
 0x3c1   :  { %6571 = vmatpush.bf16.msra.mxu2 %v10923_v10  ;;  %6585 = vmatpush.bf16.msra.mxu3 %v11147_v40  ;;  %v14832_v10 = vld [vmem:[#allocation14 + $0x9b4] sm:$0xf0]  ;;  %v14907_v57 = vld [vmem:[#allocation14 + $0xc14] sm:$0xf]  ;;  %v11591_v42 = vor.u32 %v14715_v1, %v11588_v55  ;;  %v12267_v37 = vor.u32 %v14888_v60, %v12266_v31 }
 0x3c2   :  { %6507 = vmatpush.bf16.msrb.mxu1 %v11655_v0  ;;  %v12356_v43 = vld [vmem:[#allocation14 + $0xc30] sm:$0xf0]  ;;  %v11978_v40 = vld [vmem:[#allocation14 + $0x918] sm:$0xf] }
 0x3c3   :  { %v15027_v62 = vld [vmem:[#allocation14 + $0xfd4] sm:$0xf]  ;;  %v12359_v23 = vor.u32 %v14907_v57, %v12356_v43  ;;  %v11498_v16 = vld [vmem:[#allocation14 + $0x558] sm:$0xf] }
 0x3c4   :  { %v12836_v19 = vld [vmem:[#allocation14 + $0xff0] sm:$0xf0]  ;;  %6547 = vmatpush.bf16.msra.mxu0 %v12391_v47  ;;  %v14696_v5 = vld [vmem:[#allocation14 + $0x574] sm:$0xf0] }
 0x3c5   :  { %6572 = vmatpush.bf16.msra.mxu2 %v10891_v7  ;;  %v12043_v7 = vor.u32 %v14832_v10, %v12042_v52  ;;  %6586 = vmatpush.bf16.msra.mxu3 %v11115_v51  ;;  %v12839_v30 = vor.u32 %v15027_v62, %v12836_v19  ;;  %v15019_v58 = vld [vmem:[#allocation14 + $0xf94] sm:$0xf]  ;;  %v11946_v44 = vld [vmem:[#allocation14 + $0x8d8] sm:$0xf]  ;;  %v11499_v51 = vor.u32 %v14696_v5, %v11498_v16  ;;  %v11052_v16 = vld [vmem:[#allocation14 + $0x1f8] sm:$0xf0] }
 0x3c6   :  { %6508 = vmatpush.bf16.msrb.mxu1 %v11623_v56  ;;  %v12804_v3 = vld [vmem:[#allocation14 + $0xfb0] sm:$0xf0]  ;;  %v14808_v45 = vld [vmem:[#allocation14 + $0x8f4] sm:$0xf0] }
 0x3c7   :  { %v12807_v0 = vor.u32 %v15019_v58, %v12804_v3  ;;  %v15011_v39 = vld [vmem:[#allocation14 + $0xf54] sm:$0xf]  ;;  %v12234_v52 = vld [vmem:[#allocation14 + $0xb18] sm:$0xf]  ;;  %v11947_v47 = vor.u32 %v14808_v45, %v11946_v44  ;;  %v6342_v50 = vpop.f32.mrf.mxu0 }
 0x3c8   :  { %6548 = vmatpush.bf16.msra.mxu0 %v12359_v23  ;;  %v14880_v10 = vld [vmem:[#allocation14 + $0xb34] sm:$0xf0]  ;;  %v15003_v1 = vld [vmem:[#allocation14 + $0xf14] sm:$0xf] }
 0x3c9   :  { %6573 = vmatpush.bf16.msra.mxu2 %v10859_v15  ;;  %v14896_v15 = vld [vmem:[#allocation14 + $0xbb4] sm:$0xf0]  ;;  %6587 = vmatpush.bf16.msra.mxu3 %v11083_v14  ;;  %v12740_v8 = vld [vmem:[#allocation14 + $0xf30] sm:$0xf0]  ;;  %v12235_v43 = vor.u32 %v14880_v10, %v12234_v52 }
 0x3ca   :  { %v12299_v61 = vor.u32 %v14896_v15, %v12298_v29  ;;  %6509 = vmatpush.bf16.msrb.mxu1 %v11591_v42  ;;  %v11466_v55 = vld [vmem:[#allocation14 + $0x518] sm:$0xf]  ;;  %v12743_v62 = vor.u32 %v15003_v1, %v12740_v8  ;;  %v14995_v20 = vld [vmem:[#allocation14 + $0xed4] sm:$0xf]  ;;  %v6303_v15 = vpop.f32.mrf.mxu1 }
 0x3cb   :  { %6549 = vmatmul.bf16.vlgmr.msra.gmra.mxu0 %v16093_v38  ;;  %v14688_v57 = vld [vmem:[#allocation14 + $0x534] sm:$0xf0]  ;;  %v12708_v22 = vld [vmem:[#allocation14 + $0xef0] sm:$0xf0]  ;;  %v6304_v33 = vadd.f32 %v6303_v15, %v16195_v24 }
 0x3cc   :  { %6593 = vmatpush.bf16.msrb.mxu0 %v11563_v28  ;;  %6588 = vmatmul.bf16.vlgmr.msra.gmra.mxu3 %v16055_v9  ;;  %v11914_v59 = vld [vmem:[#allocation14 + $0x898] sm:$0xf]  ;;  %v11467_v48 = vor.u32 %v14688_v57, %v11466_v55  ;;  %v16206_v28 = vld [vmem:[#allocation16] sm:$0xff]  ;;  %v12711_v4 = vor.u32 %v14995_v20, %v12708_v22  ;;  %v14979_v55 = vld [vmem:[#allocation14 + $0xe54] sm:$0xf] }
 0x3cd   :  { %6574 = vmatpush.bf16.msra.mxu2 %v10827_v36  ;;  %6632 = vmatpush.bf16.msrb.mxu3 %v12331_v63  ;;  %v11979_v36 = vor.u32 %v14816_v34, %v11978_v40  ;;  %v14800_v56 = vld [vmem:[#allocation14 + $0x8b4] sm:$0xf0]  ;;  %v3371_v29 = vperm.slane %v16206_v28, 4  ;;  %v14987_v40 = vld [vmem:[#allocation14 + $0xe94] sm:$0xf] }
 0x3ce   :  { %6554 = vmatpush.bf16.msra.mxu1 %v12839_v30  ;;  %v12202_v6 = vld [vmem:[#allocation14 + $0xad8] sm:$0xf]  ;;  %v11915_v21 = vor.u32 %v14800_v56, %v11914_v59  ;;  %v12644_v57 = vld [vmem:[#allocation14 + $0xe70] sm:$0xf0]  ;;  %v14644_v22 = vld [vmem:[#allocation14 + $0x3dc] sm:$0xf] }
 0x3cf   :  { %6510 = vmatmul.bf16.vlgmr.msrb.gmra.mxu1 %v16069_v46  ;;  %v11434_v14 = vld [vmem:[#allocation14 + $0x4d8] sm:$0xf]  ;;  %v6344_v59 = vpop.f32.mrf.mxu0 }
 0x3d0   :  { %6575 = vmatmul.bf16.vlgmr.msra.gmra.mxu2 %v16060_v27  ;;  %6594 = vmatpush.bf16.msrb.mxu0 %v11531_v35  ;;  %v14680_v19 = vld [vmem:[#allocation14 + $0x4f4] sm:$0xf0]  ;;  %v12676_v35 = vld [vmem:[#allocation14 + $0xeb0] sm:$0xf0] }
 0x3d1   :  { %6619 = vmatpush.bf16.msrb.mxu2 %v12075_v41  ;;  %v12772_v41 = vld [vmem:[#allocation14 + $0xf70] sm:$0xf0]  ;;  %6633 = vmatpush.bf16.msrb.mxu3 %v12299_v61  ;;  %v11882_v23 = vld [vmem:[#allocation14 + $0x858] sm:$0xf]  ;;  %v11435_v30 = vor.u32 %v14680_v19, %v11434_v14  ;;  %v12647_v19 = vor.u32 %v14979_v55, %v12644_v57  ;;  %v14548_v55 = vld [vmem:[#allocation14 + $0xdc] sm:$0xf] }
 0x3d2   :  { %6555 = vmatpush.bf16.msra.mxu1 %v12807_v0  ;;  %v12775_v54 = vor.u32 %v15011_v39, %v12772_v41  ;;  %v14792_v63 = vld [vmem:[#allocation14 + $0x874] sm:$0xf0]  ;;  %v6317_v0 = vadd.f32 %v16192_v11, %v6304_v33  ;;  %v14580_v39 = vld [vmem:[#allocation14 + $0x1dc] sm:$0xf] }
 0x3d3   :  { %v6368_v13 = vpop.f32.mrf.mxu2  ;;  %v14864_v58 = vld [vmem:[#allocation14 + $0xab4] sm:$0xf0]  ;;  %v11883_v3 = vor.u32 %v14792_v63, %v11882_v23  ;;  %v11055_v1 = vor.u32 %v14580_v39, %v11052_v16  ;;  %v11308_v23 = vld [vmem:[#allocation14 + $0x3f8] sm:$0xf0] }
 0x3d4   :  { %6595 = vmatpush.bf16.msrb.mxu0 %v11499_v51  ;;  %v11402_v34 = vld [vmem:[#allocation14 + $0x498] sm:$0xf]  ;;  %v6369_v5 = vadd.f32 %v6368_v13, %v3371_v29  ;;  %v6330_v45 = vadd.f32 %v16200_v49, %v6317_v0  ;;  %v12679_v51 = vor.u32 %v14987_v40, %v12676_v35  ;;  %v11020_v49 = vld [vmem:[#allocation14 + $0x1b8] sm:$0xf0] }
 0x3d5   :  { %6620 = vmatpush.bf16.msrb.mxu2 %v12043_v7  ;;  %6634 = vmatpush.bf16.msrb.mxu3 %v12267_v37  ;;  %v14872_v7 = vld [vmem:[#allocation14 + $0xaf4] sm:$0xf0]  ;;  %v6381_v37 = vpop.f32.mrf.mxu3  ;;  %v11276_v35 = vld [vmem:[#allocation14 + $0x3b8] sm:$0xf0] }
 0x3d6   :  { %6556 = vmatpush.bf16.msra.mxu1 %v12775_v54  ;;  %v12203_v42 = vor.u32 %v14872_v7, %v12202_v6  ;;  %v14672_v61 = vld [vmem:[#allocation14 + $0x4b4] sm:$0xf0]  ;;  %v16214_v8 = vadd.f32 %v6342_v50, %v6330_v45  ;;  %v14971_v7 = vld [vmem:[#allocation14 + $0xe14] sm:$0xf]  ;;  %v14628_v45 = vld [vmem:[#allocation14 + $0x35c] sm:$0xf] }
 0x3d7   :  { %v11850_v31 = vld [vmem:[#allocation14 + $0x818] sm:$0xf]  ;;  %v11403_v41 = vor.u32 %v14672_v61, %v11402_v34  ;;  %v14636_v61 = vld [vmem:[#allocation14 + $0x39c] sm:$0xf] }
 0x3d8   :  { %6596 = vmatpush.bf16.msrb.mxu0 %v11467_v48  ;;  %v14784_v60 = vld [vmem:[#allocation14 + $0x834] sm:$0xf0]  ;;  %v6305_v48 = vpop.f32.mrf.mxu1  ;;  %v10924_v57 = vld [vmem:[#allocation14 + $0xf8] sm:$0xf0] }
 0x3d9   :  { %6621 = vmatpush.bf16.msrb.mxu2 %v12011_v32  ;;  %6635 = vmatpush.bf16.msrb.mxu3 %v12235_v43  ;;  %v12170_v32 = vld [vmem:[#allocation14 + $0xa98] sm:$0xf]  ;;  %v11851_v52 = vor.u32 %v14784_v60, %v11850_v31  ;;  %v14572_v43 = vld [vmem:[#allocation14 + $0x19c] sm:$0xf] }
 0x3da   :  { %6557 = vmatpush.bf16.msra.mxu1 %v12743_v62  ;;  %v12138_v24 = vld [vmem:[#allocation14 + $0xa58] sm:$0xf]  ;;  %v12612_v62 = vld [vmem:[#allocation14 + $0xe30] sm:$0xf0]  ;;  %v11023_v63 = vor.u32 %v14572_v43, %v11020_v49  ;;  %v14620_v43 = vld [vmem:[#allocation14 + $0x31c] sm:$0xf] }
 0x3db   :  { %v14856_v44 = vld [vmem:[#allocation14 + $0xa74] sm:$0xf0]  ;;  %v6370_v11 = vpop.f32.mrf.mxu2  ;;  %v12615_v40 = vor.u32 %v14971_v7, %v12612_v62  ;;  %v11212_v49 = vld [vmem:[#allocation14 + $0x338] sm:$0xf0] }
 0x3dc   :  { %6597 = vmatpush.bf16.msrb.mxu0 %v11435_v30  ;;  %v11370_v10 = vld [vmem:[#allocation14 + $0x458] sm:$0xf]  ;;  %v12139_v56 = vor.u32 %v14856_v44, %v12138_v24  ;;  %v11279_v24 = vor.u32 %v14636_v61, %v11276_v35 }
 0x3dd   :  { %6622 = vmatpush.bf16.msrb.mxu2 %v11979_v36  ;;  %6636 = vmatpush.bf16.msrb.mxu3 %v12203_v42  ;;  %v12171_v36 = vor.u32 %v14864_v58, %v12170_v32  ;;  %v14664_v54 = vld [vmem:[#allocation14 + $0x474] sm:$0xf0]  ;;  %v14564_v32 = vld [vmem:[#allocation14 + $0x15c] sm:$0xf] }
 0x3de   :  { %6558 = vmatpush.bf16.msra.mxu1 %v12711_v4  ;;  %v11371_v6 = vor.u32 %v14664_v54, %v11370_v10  ;;  %v12106_v20 = vld [vmem:[#allocation14 + $0xa18] sm:$0xf]  ;;  %v10988_v58 = vld [vmem:[#allocation14 + $0x178] sm:$0xf0]  ;;  %v11311_v4 = vor.u32 %v14644_v22, %v11308_v23 }
 0x3df   :  { %v14848_v14 = vld [vmem:[#allocation14 + $0xa34] sm:$0xf0]  ;;  %v10991_v60 = vor.u32 %v14564_v32, %v10988_v58  ;;  %v14612_v23 = vld [vmem:[#allocation14 + $0x2dc] sm:$0xf] }
 0x3e0   :  { %6598 = vmatpush.bf16.msrb.mxu0 %v11403_v41  ;;  %v14656_v13 = vld [vmem:[#allocation14 + $0x434] sm:$0xf0]  ;;  %v12107_v15 = vor.u32 %v14848_v14, %v12106_v20  ;;  %v10956_v41 = vld [vmem:[#allocation14 + $0x138] sm:$0xf0] }
 0x3e1   :  { %6623 = vmatpush.bf16.msrb.mxu2 %v11947_v47  ;;  %v16212_v47 = vadd.f32 %v6381_v37, %v6369_v5  ;;  %6637 = vmatpush.bf16.msrb.mxu3 %v12171_v36  ;;  %v11818_v50 = vld [vmem:[#allocation14 + $0x7d8] sm:$0xf]  ;;  %v14556_v5 = vld [vmem:[#allocation14 + $0x11c] sm:$0xf] }
 0x3e2   :  { %6559 = vmatpush.bf16.msra.mxu1 %v12679_v51  ;;  %v12586_v42 = vld [vmem:[#allocation14 + $0xdd8] sm:$0xf]  ;;  %v11244_v37 = vld [vmem:[#allocation14 + $0x378] sm:$0xf0] }
 0x3e3   :  { %v14968_v29 = vld [vmem:[#allocation14 + $0xdf4] sm:$0xf0]  ;;  %v11247_v59 = vor.u32 %v14628_v45, %v11244_v37  ;;  %v14540_v14 = vld [vmem:[#allocation14 + $0x9c] sm:$0xf] }
 0x3e4   :  { %v14776_v30 = vld [vmem:[#allocation14 + $0x7f4] sm:$0xf0]  ;;  %6599 = vmatpush.bf16.msrb.mxu0 %v11371_v6  ;;  %v12587_v34 = vor.u32 %v14968_v29, %v12586_v42  ;;  %v10927_v6 = vor.u32 %v14548_v55, %v10924_v57  ;;  %v10828_v45 = vld [vmem:[#allocation14 + $0x38] sm:$0xf0] }
 0x3e5   :  { %6624 = vmatpush.bf16.msrb.mxu2 %v11915_v21  ;;  %v11338_v21 = vld [vmem:[#allocation14 + $0x418] sm:$0xf]  ;;  %6638 = vmatpush.bf16.msrb.mxu3 %v12139_v56  ;;  %v11819_v31 = vor.u32 %v14776_v30, %v11818_v50  ;;  %v14836_v37 = vld [vmem:[#allocation14 + $0x9dc] sm:$0xf] }
 0x3e6   :  { %v11339_v33 = vor.u32 %v14656_v13, %v11338_v21  ;;  %6560 = vmatpush.bf16.msra.mxu1 %v12647_v19  ;;  %v11786_v0 = vld [vmem:[#allocation14 + $0x798] sm:$0xf]  ;;  %v10892_v19 = vld [vmem:[#allocation14 + $0xb8] sm:$0xf0]  ;;  %v11215_v13 = vor.u32 %v14620_v43, %v11212_v49 }
 0x3e7   :  { %v12554_v36 = vld [vmem:[#allocation14 + $0xd98] sm:$0xf]  ;;  %v10895_v42 = vor.u32 %v14540_v14, %v10892_v19 }
 0x3e8   :  { %v14960_v39 = vld [vmem:[#allocation14 + $0xdb4] sm:$0xf0]  ;;  %6600 = vmatpush.bf16.msrb.mxu0 %v11339_v33  ;;  %v14532_v33 = vld [vmem:[#allocation14 + $0x5c] sm:$0xf] }
 0x3e9   :  { %6625 = vmatpush.bf16.msrb.mxu2 %v11883_v3  ;;  %v6383_v3 = vpop.f32.mrf.mxu3  ;;  %6639 = vmatpush.bf16.msrb.mxu3 %v12107_v15  ;;  %v14768_v16 = vld [vmem:[#allocation14 + $0x7b4] sm:$0xf0]  ;;  %v12555_v44 = vor.u32 %v14960_v39, %v12554_v36 }
 0x3ea   :  { %6561 = vmatpush.bf16.msra.mxu1 %v12615_v40  ;;  %v11787_v51 = vor.u32 %v14768_v16, %v11786_v0  ;;  %v11754_v10 = vld [vmem:[#allocation14 + $0x758] sm:$0xf]  ;;  %v6394_v3 = vpop.f32.mrf.mxu0 }
 0x3eb   :  { %v12522_v54 = vld [vmem:[#allocation14 + $0xd58] sm:$0xf]  ;;  %6601 = vmatmul.bf16.vlgmr.msrb.gmra.mxu0 %v16073_v26  ;;  %v16223_v61 = vadd.f32 %v6394_v3, %v16212_v47 }
 0x3ec   :  { %6645 = vmatpush.bf16.msra.mxu0 %v12587_v34  ;;  %v14952_v11 = vld [vmem:[#allocation14 + $0xd74] sm:$0xf0]  ;;  %6640 = vmatmul.bf16.vlgmr.msrb.gmra.mxu3 %v16087_v2  ;;  %v6355_v34 = vpop.f32.mrf.mxu1 }
 0x3ed   :  { %6626 = vmatpush.bf16.msrb.mxu2 %v11851_v52  ;;  %6684 = vmatpush.bf16.msra.mxu3 %v11311_v4  ;;  %v10959_v52 = vor.u32 %v14556_v5, %v10956_v41  ;;  %v12523_v56 = vor.u32 %v14952_v11, %v12522_v54  ;;  %v11722_v7 = vld [vmem:[#allocation14 + $0x718] sm:$0xf]  ;;  %v10860_v4 = vld [vmem:[#allocation14 + $0x78] sm:$0xf0]  ;;  %v16226_v0 = vadd.f32 %v6355_v34, %v16214_v8 }
 0x3ee   :  { %6606 = vmatpush.bf16.msrb.mxu1 %v11819_v31  ;;  %v12490_v62 = vld [vmem:[#allocation14 + $0xd18] sm:$0xf]  ;;  %v14604_v31 = vld [vmem:[#allocation14 + $0x29c] sm:$0xf]  ;;  %v10863_v39 = vor.u32 %v14532_v33, %v10860_v4 }
 0x3ef   :  { %6562 = vmatmul.bf16.vlgmr.msra.gmra.mxu1 %v16100_v25  ;;  %v14944_v21 = vld [vmem:[#allocation14 + $0xd34] sm:$0xf0]  ;;  %v11116_v54 = vld [vmem:[#allocation14 + $0x278] sm:$0xf0] }
 0x3f0   :  { %6627 = vmatmul.bf16.vlgmr.msrb.gmra.mxu2 %v16077_v17  ;;  %6646 = vmatpush.bf16.msra.mxu0 %v12555_v44  ;;  %v14752_v20 = vld [vmem:[#allocation14 + $0x734] sm:$0xf0]  ;;  %v12491_v22 = vor.u32 %v14944_v21, %v12490_v62  ;;  %v14524_v44 = vld [vmem:[#allocation14 + $0x1c] sm:$0xf] }
 0x3f1   :  { %6671 = vmatpush.bf16.msra.mxu2 %v11055_v1  ;;  %v14760_v1 = vld [vmem:[#allocation14 + $0x774] sm:$0xf0]  ;;  %6685 = vmatpush.bf16.msra.mxu3 %v11279_v24  ;;  %v11723_v50 = vor.u32 %v14752_v20, %v11722_v7  ;;  %v16228_v8 = vpop.f32.mrf.mxu3  ;;  %v14828_v7 = vld [vmem:[#allocation14 + $0x99c] sm:$0xf] }
 0x3f2   :  { %6607 = vmatpush.bf16.msrb.mxu1 %v11787_v51  ;;  %v11755_v48 = vor.u32 %v14760_v1, %v11754_v10  ;;  %v11690_v29 = vld [vmem:[#allocation14 + $0x6d8] sm:$0xf]  ;;  %v12076_v51 = vld [vmem:[#allocation14 + $0x9f8] sm:$0xf0]  ;;  %v10831_v1 = vor.u32 %v14524_v44, %v10828_v45 }
 0x3f3   :  { %v12458_v15 = vld [vmem:[#allocation14 + $0xcd8] sm:$0xf]  ;;  %v16220_v32 = vpop.f32.mrf.mxu2  ;;  %v14596_v10 = vld [vmem:[#allocation14 + $0x25c] sm:$0xf] }
 0x3f4   :  { %6647 = vmatpush.bf16.msra.mxu0 %v12523_v56  ;;  %v14936_v30 = vld [vmem:[#allocation14 + $0xcf4] sm:$0xf0]  ;;  %v12079_v56 = vor.u32 %v14836_v37, %v12076_v51  ;;  %v12044_v62 = vld [vmem:[#allocation14 + $0x9b8] sm:$0xf0]  ;;  %v6357_v21 = vpop.f32.mrf.mxu1 }
 0x3f5   :  { %6672 = vmatpush.bf16.msra.mxu2 %v11023_v63  ;;  %6686 = vmatpush.bf16.msra.mxu3 %v11247_v59  ;;  %v11180_v63 = vld [vmem:[#allocation14 + $0x2f8] sm:$0xf0]  ;;  %v14744_v58 = vld [vmem:[#allocation14 + $0x6f4] sm:$0xf0]  ;;  %v12459_v35 = vor.u32 %v14936_v30, %v12458_v15  ;;  %v12047_v15 = vor.u32 %v14828_v7, %v12044_v62 }
 0x3f6   :  { %6608 = vmatpush.bf16.msrb.mxu1 %v11755_v48  ;;  %v11183_v40 = vor.u32 %v14612_v23, %v11180_v63  ;;  %v11691_v36 = vor.u32 %v14744_v58, %v11690_v29  ;;  %v11658_v16 = vld [vmem:[#allocation14 + $0x698] sm:$0xf]  ;;  %v6396_v48 = vpop.f32.mrf.mxu0  ;;  %v11084_v23 = vld [vmem:[#allocation14 + $0x238] sm:$0xf0] }
 0x3f7   :  { %v12426_v5 = vld [vmem:[#allocation14 + $0xc98] sm:$0xf]  ;;  %v12332_v29 = vld [vmem:[#allocation14 + $0xbf8] sm:$0xf0] }
 0x3f8   :  { %6648 = vmatpush.bf16.msra.mxu0 %v12491_v22  ;;  %v14928_v41 = vld [vmem:[#allocation14 + $0xcb4] sm:$0xf0]  ;;  %v14588_v22 = vld [vmem:[#allocation14 + $0x21c] sm:$0xf] }
 0x3f9   :  { %6673 = vmatpush.bf16.msra.mxu2 %v10991_v60  ;;  %6687 = vmatpush.bf16.msra.mxu3 %v11215_v13  ;;  %v11148_v60 = vld [vmem:[#allocation14 + $0x2b8] sm:$0xf0]  ;;  %v14736_v24 = vld [vmem:[#allocation14 + $0x6b4] sm:$0xf0]  ;;  %v11087_v4 = vor.u32 %v14588_v22, %v11084_v23 }
 0x3fa   :  { %6609 = vmatpush.bf16.msrb.mxu1 %v11723_v50  ;;  %v11151_v47 = vor.u32 %v14604_v31, %v11148_v60  ;;  %v11659_v11 = vor.u32 %v14736_v24, %v11658_v16  ;;  %v12394_v55 = vld [vmem:[#allocation14 + $0xc58] sm:$0xf]  ;;  %v14708_v58 = vld [vmem:[#allocation14 + $0x5dc] sm:$0xf]  ;;  %v6435_v60 = vpop.f32.mrf.mxu3 }
 0x3fb   :  { %v14920_v57 = vld [vmem:[#allocation14 + $0xc74] sm:$0xf0]  ;;  %v6422_v59 = vpop.f32.mrf.mxu2  ;;  %v11564_v33 = vld [vmem:[#allocation14 + $0x5f8] sm:$0xf0] }
 0x3fc   :  { %6649 = vmatpush.bf16.msra.mxu0 %v12459_v35  ;;  %v11626_v43 = vld [vmem:[#allocation14 + $0x658] sm:$0xf]  ;;  %v12395_v20 = vor.u32 %v14920_v57, %v12394_v55  ;;  %v12012_v34 = vld [vmem:[#allocation14 + $0x978] sm:$0xf0] }
 0x3fd   :  { %6674 = vmatpush.bf16.msra.mxu2 %v10959_v52  ;;  %6688 = vmatpush.bf16.msra.mxu3 %v11183_v40  ;;  %v12427_v52 = vor.u32 %v14928_v41, %v12426_v5  ;;  %v14728_v49 = vld [vmem:[#allocation14 + $0x674] sm:$0xf0]  ;;  %v14820_v40 = vld [vmem:[#allocation14 + $0x95c] sm:$0xf] }
 0x3fe   :  { %6610 = vmatpush.bf16.msrb.mxu1 %v11691_v36  ;;  %v11594_v14 = vld [vmem:[#allocation14 + $0x618] sm:$0xf]  ;;  %v11627_v63 = vor.u32 %v14728_v49, %v11626_v43  ;;  %v14892_v16 = vld [vmem:[#allocation14 + $0xb9c] sm:$0xf]  ;;  %v12015_v24 = vor.u32 %v14820_v40, %v12012_v34 }
 0x3ff   :  { %v14720_v19 = vld [vmem:[#allocation14 + $0x634] sm:$0xf0]  ;;  %v12300_v5 = vld [vmem:[#allocation14 + $0xbb8] sm:$0xf0] }
 0x400   :  { %6650 = vmatpush.bf16.msra.mxu0 %v12427_v52  ;;  %v12362_v13 = vld [vmem:[#allocation14 + $0xc18] sm:$0xf]  ;;  %v11595_v36 = vor.u32 %v14720_v19, %v11594_v14  ;;  %v14700_v45 = vld [vmem:[#allocation14 + $0x59c] sm:$0xf] }
 0x401   :  { %6675 = vmatpush.bf16.msra.mxu2 %v10927_v6  ;;  %6689 = vmatpush.bf16.msra.mxu3 %v11151_v47  ;;  %v11119_v6 = vor.u32 %v14596_v10, %v11116_v54  ;;  %v14912_v50 = vld [vmem:[#allocation14 + $0xc34] sm:$0xf0]  ;;  %v11532_v47 = vld [vmem:[#allocation14 + $0x5b8] sm:$0xf0] }
 0x402   :  { %6611 = vmatpush.bf16.msrb.mxu1 %v11659_v11  ;;  %v12842_v30 = vld [vmem:[#allocation14 + $0xfd8] sm:$0xf]  ;;  %v12363_v35 = vor.u32 %v14912_v50, %v12362_v13  ;;  %v14812_v51 = vld [vmem:[#allocation14 + $0x91c] sm:$0xf]  ;;  %v11535_v10 = vor.u32 %v14700_v45, %v11532_v47 }
 0x403   :  { %v15032_v3 = vld [vmem:[#allocation14 + $0xff4] sm:$0xf0]  ;;  %v11980_v52 = vld [vmem:[#allocation14 + $0x938] sm:$0xf0] }
 0x404   :  { %6651 = vmatpush.bf16.msra.mxu0 %v12395_v20  ;;  %v12843_v41 = vor.u32 %v15032_v3, %v12842_v30  ;;  %v12810_v44 = vld [vmem:[#allocation14 + $0xf98] sm:$0xf]  ;;  %v14884_v54 = vld [vmem:[#allocation14 + $0xb5c] sm:$0xf]  ;;  %v11983_v55 = vor.u32 %v14812_v51, %v11980_v52 }
 0x405   :  { %6676 = vmatpush.bf16.msra.mxu2 %v10895_v42  ;;  %v14900_v42 = vld [vmem:[#allocation14 + $0xbdc] sm:$0xf]  ;;  %6690 = vmatpush.bf16.msra.mxu3 %v11119_v6  ;;  %v15024_v37 = vld [vmem:[#allocation14 + $0xfb4] sm:$0xf0] }
 0x406   :  { %v12335_v31 = vor.u32 %v14900_v42, %v12332_v29  ;;  %6612 = vmatpush.bf16.msrb.mxu1 %v11627_v63  ;;  %v12268_v11 = vld [vmem:[#allocation14 + $0xb78] sm:$0xf0]  ;;  %v12778_v57 = vld [vmem:[#allocation14 + $0xf58] sm:$0xf] }
 0x407   :  { %v14692_v59 = vld [vmem:[#allocation14 + $0x55c] sm:$0xf]  ;;  %v15016_v43 = vld [vmem:[#allocation14 + $0xf74] sm:$0xf0]  ;;  %v12271_v6 = vor.u32 %v14884_v54, %v12268_v11 }
 0x408   :  { %6652 = vmatpush.bf16.msra.mxu0 %v12363_v35  ;;  %v14804_v49 = vld [vmem:[#allocation14 + $0x8dc] sm:$0xf]  ;;  %v12779_v20 = vor.u32 %v15016_v43, %v12778_v57  ;;  %v12746_v19 = vld [vmem:[#allocation14 + $0xf18] sm:$0xf]  ;;  %v16234_v60 = vpop.f32.mrf.mxu0 }
 0x409   :  { %6677 = vmatpush.bf16.msra.mxu2 %v10863_v39  ;;  %v11567_v39 = vor.u32 %v14708_v58, %v11564_v33  ;;  %6691 = vmatpush.bf16.msra.mxu3 %v11087_v4  ;;  %v11948_v48 = vld [vmem:[#allocation14 + $0x8f8] sm:$0xf0]  ;;  %v15008_v23 = vld [vmem:[#allocation14 + $0xf34] sm:$0xf0] }
 0x40a   :  { %6613 = vmatpush.bf16.msrb.mxu1 %v11595_v36  ;;  %v14876_v62 = vld [vmem:[#allocation14 + $0xb1c] sm:$0xf]  ;;  %v11951_v14 = vor.u32 %v14804_v49, %v11948_v48  ;;  %v12747_v30 = vor.u32 %v15008_v23, %v12746_v19  ;;  %v12714_v33 = vld [vmem:[#allocation14 + $0xed8] sm:$0xf]  ;;  %v12946_v23 = vld [vmem:[#allocation17 + $0xc0] sm:$0xf] }
 0x40b   :  { %6653 = vmatmul.bf16.vlgmr.msra.gmra.mxu0 %v16093_v38  ;;  %v12236_v21 = vld [vmem:[#allocation14 + $0xb38] sm:$0xf0]  ;;  %v15000_v34 = vld [vmem:[#allocation14 + $0xef4] sm:$0xf0] }
 0x40c   :  { %6697 = vmatpush.bf16.msrb.mxu0 %v11567_v39  ;;  %6692 = vmatmul.bf16.vlgmr.msra.gmra.mxu3 %v16055_v9  ;;  %v14684_v13 = vld [vmem:[#allocation14 + $0x51c] sm:$0xf]  ;;  %v12239_v50 = vor.u32 %v14876_v62, %v12236_v21  ;;  %v3372_v39 = vperm.slane %v16206_v28, 5  ;;  %v12715_v45 = vor.u32 %v15000_v34, %v12714_v33  ;;  %v14984_v19 = vld [vmem:[#allocation14 + $0xe74] sm:$0xf0] }
 0x40d   :  { %6678 = vmatpush.bf16.msra.mxu2 %v10831_v1  ;;  %6736 = vmatpush.bf16.msrb.mxu3 %v12335_v31  ;;  %v12811_v1 = vor.u32 %v15024_v37, %v12810_v44  ;;  %v11468_v22 = vld [vmem:[#allocation14 + $0x538] sm:$0xf0]  ;;  %v12682_v37 = vld [vmem:[#allocation14 + $0xe98] sm:$0xf] }
 0x40e   :  { %6658 = vmatpush.bf16.msra.mxu1 %v12843_v41  ;;  %v14796_v9 = vld [vmem:[#allocation14 + $0x89c] sm:$0xf]  ;;  %v11471_v42 = vor.u32 %v14684_v13, %v11468_v22 }
 0x40f   :  { %6614 = vmatmul.bf16.vlgmr.msrb.gmra.mxu1 %v16069_v46  ;;  %v11916_v63 = vld [vmem:[#allocation14 + $0x8b8] sm:$0xf0] }
 0x410   :  { %6679 = vmatmul.bf16.vlgmr.msra.gmra.mxu2 %v16060_v27  ;;  %v12303_v27 = vor.u32 %v14892_v16, %v12300_v5  ;;  %6698 = vmatpush.bf16.msrb.mxu0 %v11535_v10  ;;  %v14868_v29 = vld [vmem:[#allocation14 + $0xadc] sm:$0xf]  ;;  %v11919_v58 = vor.u32 %v14796_v9, %v11916_v63  ;;  %v6407_v16 = vpop.f32.mrf.mxu1  ;;  %v6448_v13 = vpop.f32.mrf.mxu0  ;;  %v15059_v9 = vld [vmem:[#allocation17 + $0xcc] sm:$0xf0] }
 0x411   :  { %6723 = vmatpush.bf16.msrb.mxu2 %v12079_v56  ;;  %v11500_v56 = vld [vmem:[#allocation14 + $0x578] sm:$0xf0]  ;;  %v6408_v44 = vadd.f32 %v6407_v16, %v16223_v61  ;;  %v6485_v49 = vpop.f32.mrf.mxu3  ;;  %v12930_v16 = vld [vmem:[#allocation17 + $0xa0] sm:$0xf] }
 0x412   :  { %6737 = vmatpush.bf16.msrb.mxu3 %v12303_v27  ;;  %v11503_v7 = vor.u32 %v14692_v59, %v11500_v56  ;;  %6659 = vmatpush.bf16.msra.mxu1 %v12811_v1  ;;  %v14676_v4 = vld [vmem:[#allocation14 + $0x4dc] sm:$0xf]  ;;  %v14992_v27 = vld [vmem:[#allocation14 + $0xeb4] sm:$0xf0]  ;;  %v12962_v1 = vld [vmem:[#allocation17 + $0xe0] sm:$0xf] }
 0x413   :  { %v11436_v3 = vld [vmem:[#allocation14 + $0x4f8] sm:$0xf0]  ;;  %v6472_v40 = vpop.f32.mrf.mxu2  ;;  %v6421_v11 = vadd.f32 %v16220_v32, %v6408_v44  ;;  %v12683_v48 = vor.u32 %v14992_v27, %v12682_v37  ;;  %v13074_v37 = vld [vmem:[#allocation17 + $0x1c0] sm:$0xf] }
 0x414   :  { %6699 = vmatpush.bf16.msrb.mxu0 %v11503_v7  ;;  %v14788_v35 = vld [vmem:[#allocation14 + $0x85c] sm:$0xf]  ;;  %v11439_v5 = vor.u32 %v14676_v4, %v11436_v3  ;;  %v6473_v57 = vadd.f32 %v6472_v40, %v3372_v39  ;;  %v13090_v4 = vld [vmem:[#allocation17 + $0x1e0] sm:$0xf]  ;;  %v15095_v3 = vld [vmem:[#allocation17 + $0x1ec] sm:$0xf0]  ;;  %v12947_v40 = vor.u32 %v15059_v9, %v12946_v23 }
 0x415   :  { %6724 = vmatpush.bf16.msrb.mxu2 %v12047_v15  ;;  %v12204_v15 = vld [vmem:[#allocation14 + $0xaf8] sm:$0xf0]  ;;  %v16240_v43 = vadd.f32 %v16228_v8, %v6421_v11  ;;  %v13042_v13 = vld [vmem:[#allocation17 + $0x180] sm:$0xf] }
 0x416   :  { %6738 = vmatpush.bf16.msrb.mxu3 %v12271_v6  ;;  %6660 = vmatpush.bf16.msra.mxu1 %v12779_v20  ;;  %v11884_v31 = vld [vmem:[#allocation14 + $0x878] sm:$0xf0]  ;;  %v12207_v36 = vor.u32 %v14868_v29, %v12204_v15  ;;  %v16242_v32 = vadd.f32 %v6485_v49, %v6473_v57 }
 0x417   :  { %v14860_v41 = vld [vmem:[#allocation14 + $0xa9c] sm:$0xf]  ;;  %v11887_v47 = vor.u32 %v14788_v35, %v11884_v31 }
 0x418   :  { %6700 = vmatpush.bf16.msrb.mxu0 %v11471_v42  ;;  %v14668_v51 = vld [vmem:[#allocation14 + $0x49c] sm:$0xf]  ;;  %v6409_v8 = vpop.f32.mrf.mxu1  ;;  %v14976_v42 = vld [vmem:[#allocation14 + $0xe34] sm:$0xf0] }
 0x419   :  { %6725 = vmatpush.bf16.msrb.mxu2 %v12015_v24  ;;  %v12172_v24 = vld [vmem:[#allocation14 + $0xab8] sm:$0xf0]  ;;  %v6487_v44 = vpop.f32.mrf.mxu3 }
 0x41a   :  { %6739 = vmatpush.bf16.msrb.mxu3 %v12239_v50  ;;  %6661 = vmatpush.bf16.msra.mxu1 %v12747_v30  ;;  %v11404_v52 = vld [vmem:[#allocation14 + $0x4b8] sm:$0xf0]  ;;  %v12175_v28 = vor.u32 %v14860_v41, %v12172_v24  ;;  %v12618_v50 = vld [vmem:[#allocation14 + $0xe18] sm:$0xf]  ;;  %v13091_v24 = vor.u32 %v15095_v3, %v13090_v4  ;;  %v13010_v44 = vld [vmem:[#allocation17 + $0x140] sm:$0xf] }
 0x41b   :  { %v14780_v10 = vld [vmem:[#allocation14 + $0x81c] sm:$0xf]  ;;  %v11407_v59 = vor.u32 %v14668_v51, %v11404_v52  ;;  %v6474_v21 = vpop.f32.mrf.mxu2  ;;  %v15091_v51 = vld [vmem:[#allocation17 + $0x1cc] sm:$0xf0] }
 0x41c   :  { %v11852_v54 = vld [vmem:[#allocation14 + $0x838] sm:$0xf0]  ;;  %6701 = vmatpush.bf16.msrb.mxu0 %v11439_v5  ;;  %v15055_v5 = vld [vmem:[#allocation17 + $0xac] sm:$0xf0]  ;;  %v12898_v21 = vld [vmem:[#allocation17 + $0x60] sm:$0xf] }
 0x41d   :  { %6726 = vmatpush.bf16.msrb.mxu2 %v11983_v55  ;;  %v15063_v55 = vld [vmem:[#allocation17 + $0xec] sm:$0xf0]  ;;  %v14852_v61 = vld [vmem:[#allocation14 + $0xa5c] sm:$0xf]  ;;  %v11855_v6 = vor.u32 %v14780_v10, %v11852_v54  ;;  %v12931_v27 = vor.u32 %v15055_v5, %v12930_v16 }
 0x41e   :  { %6740 = vmatpush.bf16.msrb.mxu3 %v12207_v36  ;;  %v12140_v56 = vld [vmem:[#allocation14 + $0xa78] sm:$0xf0]  ;;  %6662 = vmatpush.bf16.msra.mxu1 %v12715_v45  ;;  %v12963_v20 = vor.u32 %v15063_v55, %v12962_v1  ;;  %v12619_v45 = vor.u32 %v14976_v42, %v12618_v50  ;;  %v12914_v1 = vld [vmem:[#allocation17 + $0x80] sm:$0xf]  ;;  %v15051_v55 = vld [vmem:[#allocation17 + $0x8c] sm:$0xf0] }
 0x41f   :  { %v14660_v7 = vld [vmem:[#allocation14 + $0x45c] sm:$0xf]  ;;  %v12143_v22 = vor.u32 %v14852_v61, %v12140_v56  ;;  %v15087_v61 = vld [vmem:[#allocation17 + $0x1ac] sm:$0xf0]  ;;  %v12915_v49 = vor.u32 %v15051_v55, %v12914_v1  ;;  %v13474_v1 = vld [vmem:[#allocation17 + $0x4e0] sm:$0xf] }
 0x420   :  { %v11372_v62 = vld [vmem:[#allocation14 + $0x478] sm:$0xf0]  ;;  %6702 = vmatpush.bf16.msrb.mxu0 %v11407_v59  ;;  %v13058_v59 = vld [vmem:[#allocation17 + $0x1a0] sm:$0xf]  ;;  %v15043_v42 = vld [vmem:[#allocation17 + $0x4c] sm:$0xf0] }
 0x421   :  { %6727 = vmatpush.bf16.msrb.mxu2 %v11951_v14  ;;  %v12650_v14 = vld [vmem:[#allocation14 + $0xe58] sm:$0xf]  ;;  %v11375_v63 = vor.u32 %v14660_v7, %v11372_v62  ;;  %v14652_v29 = vld [vmem:[#allocation14 + $0x41c] sm:$0xf] }
 0x422   :  { %6741 = vmatpush.bf16.msrb.mxu3 %v12175_v28  ;;  %v14844_v15 = vld [vmem:[#allocation14 + $0xa1c] sm:$0xf]  ;;  %6663 = vmatpush.bf16.msra.mxu1 %v12683_v48  ;;  %v15191_v55 = vld [vmem:[#allocation17 + $0x4ec] sm:$0xf0] }
 0x423   :  { %v12108_v30 = vld [vmem:[#allocation14 + $0xa38] sm:$0xf0] }
 0x424   :  { %v11340_v33 = vld [vmem:[#allocation14 + $0x438] sm:$0xf0]  ;;  %v12111_v36 = vor.u32 %v14844_v15, %v12108_v30  ;;  %6703 = vmatpush.bf16.msrb.mxu0 %v11375_v63  ;;  %v13026_v30 = vld [vmem:[#allocation17 + $0x160] sm:$0xf] }
 0x425   :  { %6728 = vmatpush.bf16.msrb.mxu2 %v11919_v58  ;;  %v12651_v58 = vor.u32 %v14984_v19, %v12650_v14  ;;  %v14772_v34 = vld [vmem:[#allocation14 + $0x7dc] sm:$0xf]  ;;  %v11343_v41 = vor.u32 %v14652_v29, %v11340_v33  ;;  %v13059_v14 = vor.u32 %v15087_v61, %v13058_v59  ;;  %v15071_v59 = vld [vmem:[#allocation17 + $0x12c] sm:$0xf0] }
 0x426   :  { %v14964_v35 = vld [vmem:[#allocation14 + $0xddc] sm:$0xf]  ;;  %6742 = vmatpush.bf16.msrb.mxu3 %v12143_v22  ;;  %v15083_v22 = vld [vmem:[#allocation17 + $0x18c] sm:$0xf0] }
 0x427   :  { %v12588_v31 = vld [vmem:[#allocation14 + $0xdf8] sm:$0xf0]  ;;  %6664 = vmatpush.bf16.msra.mxu1 %v12651_v58  ;;  %v13043_v29 = vor.u32 %v15083_v22, %v13042_v13  ;;  %v15079_v58 = vld [vmem:[#allocation17 + $0x16c] sm:$0xf0]  ;;  %v13458_v22 = vld [vmem:[#allocation17 + $0x4c0] sm:$0xf] }
 0x428   :  { %v11820_v39 = vld [vmem:[#allocation14 + $0x7f8] sm:$0xf0]  ;;  %6704 = vmatpush.bf16.msrb.mxu0 %v11343_v41  ;;  %v16250_v16 = vpop.f32.mrf.mxu0  ;;  %v13027_v5 = vor.u32 %v15079_v58, %v13026_v30  ;;  %v15223_v30 = vld [vmem:[#allocation17 + $0x5ec] sm:$0xf0] }
 0x429   :  { %6729 = vmatpush.bf16.msrb.mxu2 %v11887_v47  ;;  %v12591_v47 = vor.u32 %v14964_v35, %v12588_v31  ;;  %v11823_v52 = vor.u32 %v14772_v34, %v11820_v39  ;;  %v14764_v10 = vld [vmem:[#allocation14 + $0x79c] sm:$0xf]  ;;  %v15039_v39 = vld [vmem:[#allocation17 + $0x2c] sm:$0xf0] }
 0x42a   :  { %v14956_v54 = vld [vmem:[#allocation14 + $0xd9c] sm:$0xf]  ;;  %6743 = vmatpush.bf16.msrb.mxu3 %v12111_v36  ;;  %v12866_v36 = vld [vmem:[#allocation17 + $0x20] sm:$0xf] }
 0x42b   :  { %v12556_v11 = vld [vmem:[#allocation14 + $0xdb8] sm:$0xf0]  ;;  %6665 = vmatpush.bf16.msra.mxu1 %v12619_v45  ;;  %6705 = vmatmul.bf16.vlgmr.msrb.gmra.mxu0 %v16073_v26  ;;  %v15075_v45 = vld [vmem:[#allocation17 + $0x14c] sm:$0xf0] }
 0x42c   :  { %v11788_v28 = vld [vmem:[#allocation14 + $0x7b8] sm:$0xf0]  ;;  %6749 = vmatpush.bf16.msra.mxu0 %v12591_v47  ;;  %v12559_v57 = vor.u32 %v14956_v54, %v12556_v11  ;;  %v16252_v41 = vpop.f32.mrf.mxu1  ;;  %v12850_v54 = vld [vmem:[#allocation17] sm:$0xf]  ;;  %v15035_v11 = vld [vmem:[#allocation17 + $0xc] sm:$0xf0] }
 0x42d   :  { %6730 = vmatpush.bf16.msrb.mxu2 %v11855_v6  ;;  %v11791_v56 = vor.u32 %v14764_v10, %v11788_v28  ;;  %v14756_v48 = vld [vmem:[#allocation14 + $0x75c] sm:$0xf]  ;;  %6744 = vmatmul.bf16.vlgmr.msrb.gmra.mxu3 %v16087_v2  ;;  %v12882_v2 = vld [vmem:[#allocation17 + $0x40] sm:$0xf]  ;;  %v13011_v28 = vor.u32 %v15075_v45, %v13010_v44  ;;  %v6776_v44 = vmax.f32 %v16172_v18, 0.0 }
 0x42e   :  { %8350 = vmatpush.bf16.msra.mxu3 %v13091_v24  ;;  %v14948_v6 = vld [vmem:[#allocation14 + $0xd5c] sm:$0xf]  ;;  %6666 = vmatmul.bf16.vlgmr.msra.gmra.mxu1 %v16100_v25  ;;  %v12883_v4 = vor.u32 %v15043_v42, %v12882_v2  ;;  %v12978_v2 = vld [vmem:[#allocation17 + $0x100] sm:$0xf]  ;;  %v15067_v42 = vld [vmem:[#allocation17 + $0x10c] sm:$0xf0] }
 0x42f   :  { %6710 = vmatpush.bf16.msrb.mxu1 %v11823_v52  ;;  %v12524_v7 = vld [vmem:[#allocation14 + $0xd78] sm:$0xf0]  ;;  %v16254_v61 = vpop.f32.mrf.mxu3  ;;  %v16261_v18 = vpack.c.bf16 %v6776_v44, %v6776_v44 }
 0x430   :  { %6731 = vmatmul.bf16.vlgmr.msrb.gmra.mxu2 %v16077_v17  ;;  %v13075_v17 = vor.u32 %v15091_v51, %v13074_v37  ;;  %v11756_v62 = vld [vmem:[#allocation14 + $0x778] sm:$0xf0]  ;;  %6750 = vmatpush.bf16.msra.mxu0 %v12559_v57  ;;  %v12527_v19 = vor.u32 %v14948_v6, %v12524_v7  ;;  %v12867_v37 = vor.u32 %v15039_v39, %v12866_v36  ;;  %v12994_v57 = vld [vmem:[#allocation17 + $0x120] sm:$0xf]  ;;  %v6775_v7 = vmax.f32 %v16150_v53, 0.0 }
 0x431   :  { %8337 = vmatpush.bf16.msra.mxu2 %v12963_v20  ;;  %v15047_v20 = vld [vmem:[#allocation17 + $0x6c] sm:$0xf0]  ;;  %v11759_v23 = vor.u32 %v14756_v48, %v11756_v62  ;;  %v14748_v8 = vld [vmem:[#allocation14 + $0x71c] sm:$0xf]  ;;  %v12995_v13 = vor.u32 %v15071_v59, %v12994_v57  ;;  %v13442_v36 = vld [vmem:[#allocation17 + $0x4a0] sm:$0xf] }
 0x432   :  { %8351 = vmatpush.bf16.msra.mxu3 %v13075_v17  ;;  %v12899_v9 = vor.u32 %v15047_v20, %v12898_v21  ;;  %v14940_v63 = vld [vmem:[#allocation14 + $0xd1c] sm:$0xf]  ;;  %v13475_v21 = vor.u32 %v15191_v55, %v13474_v1  ;;  %v16257_v58 = vpack.c.bf16 %v6775_v7, %v6775_v7  ;;  %v15183_v39 = vld [vmem:[#allocation17 + $0x4ac] sm:$0xf0]  ;;  %v13426_v55 = vld [vmem:[#allocation17 + $0x480] sm:$0xf] }
 0x433   :  { %6711 = vmatpush.bf16.msrb.mxu1 %v11791_v56  ;;  %v12492_v26 = vld [vmem:[#allocation14 + $0xd38] sm:$0xf0]  ;;  %v16248_v35 = vpop.f32.mrf.mxu2 }
 0x434   :  { %v11724_v50 = vld [vmem:[#allocation14 + $0x738] sm:$0xf0]  ;;  %6751 = vmatpush.bf16.msra.mxu0 %v12527_v19  ;;  %v12495_v15 = vor.u32 %v14940_v63, %v12492_v26  ;;  %v6500_v19 = vpop.f32.mrf.mxu0 }
 0x435   :  { %8338 = vmatpush.bf16.msra.mxu2 %v12947_v40  ;;  %v11727_v33 = vor.u32 %v14748_v8, %v11724_v50  ;;  %v14740_v3 = vld [vmem:[#allocation14 + $0x6dc] sm:$0xf]  ;;  %v15175_v19 = vld [vmem:[#allocation17 + $0x46c] sm:$0xf0] }
 0x436   :  { %8352 = vmatpush.bf16.msra.mxu3 %v13059_v14  ;;  %v14932_v40 = vld [vmem:[#allocation14 + $0xcdc] sm:$0xf] }
 0x437   :  { %6712 = vmatpush.bf16.msrb.mxu1 %v11759_v23  ;;  %v12460_v34 = vld [vmem:[#allocation14 + $0xcf8] sm:$0xf0]  ;;  %v15187_v23 = vld [vmem:[#allocation17 + $0x4cc] sm:$0xf0]  ;;  %v6539_v45 = vpop.f32.mrf.mxu3 }
 0x438   :  { %v11692_v31 = vld [vmem:[#allocation14 + $0x6f8] sm:$0xf0]  ;;  %6752 = vmatpush.bf16.msra.mxu0 %v12495_v15  ;;  %v12463_v24 = vor.u32 %v14932_v40, %v12460_v34  ;;  %v13602_v15 = vld [vmem:[#allocation17 + $0x5e0] sm:$0xf]  ;;  %v15127_v40 = vld [vmem:[#allocation17 + $0x2ec] sm:$0xf0]  ;;  %v12979_v34 = vor.u32 %v15067_v42, %v12978_v2  ;;  %v6447_v45 = vadd.f32 %v16234_v60, %v16240_v43 }
 0x439   :  { %8339 = vmatpush.bf16.msra.mxu2 %v12931_v27  ;;  %v11695_v47 = vor.u32 %v14740_v3, %v11692_v31  ;;  %v14732_v51 = vld [vmem:[#allocation14 + $0x69c] sm:$0xf]  ;;  %v13218_v3 = vld [vmem:[#allocation17 + $0x2e0] sm:$0xf] }
 0x43a   :  { %8353 = vmatpush.bf16.msra.mxu3 %v13043_v29  ;;  %v14924_v52 = vld [vmem:[#allocation14 + $0xc9c] sm:$0xf]  ;;  %v13394_v42 = vld [vmem:[#allocation17 + $0x440] sm:$0xf] }
 0x43b   :  { %6713 = vmatpush.bf16.msrb.mxu1 %v11727_v33  ;;  %v12428_v27 = vld [vmem:[#allocation14 + $0xcb8] sm:$0xf0]  ;;  %v6526_v62 = vpop.f32.mrf.mxu2  ;;  %v13459_v33 = vor.u32 %v15187_v23, %v13458_v22  ;;  %v13554_v23 = vld [vmem:[#allocation17 + $0x580] sm:$0xf] }
 0x43c   :  { %v11660_v10 = vld [vmem:[#allocation14 + $0x6b8] sm:$0xf0]  ;;  %6753 = vmatpush.bf16.msra.mxu0 %v12463_v24  ;;  %v12431_v17 = vor.u32 %v14924_v52, %v12428_v27  ;;  %v13603_v24 = vor.u32 %v15223_v30, %v13602_v15  ;;  %v15219_v52 = vld [vmem:[#allocation17 + $0x5cc] sm:$0xf0]  ;;  %v13186_v62 = vld [vmem:[#allocation17 + $0x2a0] sm:$0xf] }
 0x43d   :  { %8340 = vmatpush.bf16.msra.mxu2 %v12915_v49  ;;  %v11663_v56 = vor.u32 %v14732_v51, %v11660_v10  ;;  %v12851_v49 = vor.u32 %v15035_v11, %v12850_v54  ;;  %v14916_v48 = vld [vmem:[#allocation14 + $0xc5c] sm:$0xf]  ;;  %v13586_v51 = vld [vmem:[#allocation17 + $0x5c0] sm:$0xf]  ;;  %v13443_v10 = vor.u32 %v15183_v39, %v13442_v36  ;;  %v15207_v30 = vld [vmem:[#allocation17 + $0x56c] sm:$0xf0] }
 0x43e   :  { %8354 = vmatpush.bf16.msra.mxu3 %v13027_v5  ;;  %v12396_v6 = vld [vmem:[#allocation14 + $0xc78] sm:$0xf0]  ;;  %v13202_v11 = vld [vmem:[#allocation17 + $0x2c0] sm:$0xf]  ;;  %v13587_v57 = vor.u32 %v15219_v52, %v13586_v51 }
 0x43f   :  { %6714 = vmatpush.bf16.msrb.mxu1 %v11695_v47  ;;  %v14724_v20 = vld [vmem:[#allocation14 + $0x65c] sm:$0xf]  ;;  %v12399_v8 = vor.u32 %v14916_v48, %v12396_v6  ;;  %v13538_v15 = vld [vmem:[#allocation17 + $0x560] sm:$0xf] }
 0x440   :  { %v11628_v14 = vld [vmem:[#allocation14 + $0x678] sm:$0xf0]  ;;  %6754 = vmatpush.bf16.msra.mxu0 %v12431_v17  ;;  %v15179_v17 = vld [vmem:[#allocation17 + $0x48c] sm:$0xf0]  ;;  %v13378_v39 = vld [vmem:[#allocation17 + $0x420] sm:$0xf]  ;;  %v13539_v44 = vor.u32 %v15207_v30, %v13538_v15 }
 0x441   :  { %8341 = vmatpush.bf16.msra.mxu2 %v12899_v9  ;;  %v6461_v9 = vpop.f32.mrf.mxu1  ;;  %v14716_v63 = vld [vmem:[#allocation14 + $0x61c] sm:$0xf]  ;;  %v11631_v53 = vor.u32 %v14724_v20, %v11628_v14  ;;  %v13427_v6 = vor.u32 %v15179_v17, %v13426_v55  ;;  %v13410_v14 = vld [vmem:[#allocation17 + $0x460] sm:$0xf]  ;;  %v15107_v55 = vld [vmem:[#allocation17 + $0x24c] sm:$0xf0]  ;;  %v6460_v17 = vadd.f32 %v16252_v41, %v6447_v45 }
 0x442   :  { %8355 = vmatpush.bf16.msra.mxu3 %v13011_v28  ;;  %v11596_v26 = vld [vmem:[#allocation14 + $0x638] sm:$0xf0]  ;;  %v15123_v28 = vld [vmem:[#allocation17 + $0x2cc] sm:$0xf0]  ;;  %v13362_v43 = vld [vmem:[#allocation17 + $0x400] sm:$0xf] }
 0x443   :  { %v14908_v50 = vld [vmem:[#allocation14 + $0xc1c] sm:$0xf]  ;;  %6715 = vmatpush.bf16.msrb.mxu1 %v11663_v56  ;;  %v11599_v47 = vor.u32 %v14716_v63, %v11596_v26  ;;  %v13203_v59 = vor.u32 %v15123_v28, %v13202_v11  ;;  %v13570_v56 = vld [vmem:[#allocation17 + $0x5a0] sm:$0xf]  ;;  %v15211_v9 = vld [vmem:[#allocation17 + $0x58c] sm:$0xf0]  ;;  %v13411_v63 = vor.u32 %v15175_v19, %v13410_v14 }
 0x444   :  { %v12364_v29 = vld [vmem:[#allocation14 + $0xc38] sm:$0xf0]  ;;  %6755 = vmatpush.bf16.msra.mxu0 %v12399_v8  ;;  %v13122_v19 = vld [vmem:[#allocation17 + $0x220] sm:$0xf]  ;;  %v6779_v41 = vmax.f32 %v6460_v17, 0.0 }
 0x445   :  { %8342 = vmatpush.bf16.msra.mxu2 %v12883_v4  ;;  %v15028_v4 = vld [vmem:[#allocation14 + $0xfdc] sm:$0xf]  ;;  %v12367_v5 = vor.u32 %v14908_v50, %v12364_v29  ;;  %v13170_v50 = vld [vmem:[#allocation17 + $0x280] sm:$0xf]  ;;  %v13555_v29 = vor.u32 %v15211_v9, %v13554_v23 }
 0x446   :  { %8356 = vmatpush.bf16.msra.mxu3 %v12995_v13  ;;  %v12844_v31 = vld [vmem:[#allocation14 + $0xff8] sm:$0xf0]  ;;  %v13106_v15 = vld [vmem:[#allocation17 + $0x200] sm:$0xf] }
 0x447   :  { %6716 = vmatpush.bf16.msrb.mxu1 %v11631_v53  ;;  %v12847_v27 = vor.u32 %v15028_v4, %v12844_v31  ;;  %v15020_v54 = vld [vmem:[#allocation14 + $0xf9c] sm:$0xf]  ;;  %v15171_v53 = vld [vmem:[#allocation17 + $0x44c] sm:$0xf0]  ;;  %v13490_v30 = vld [vmem:[#allocation17 + $0x500] sm:$0xf] }
 0x448   :  { %v12812_v1 = vld [vmem:[#allocation14 + $0xfb8] sm:$0xf0]  ;;  %6756 = vmatpush.bf16.msra.mxu0 %v12367_v5  ;;  %v13395_v4 = vor.u32 %v15171_v53, %v13394_v42  ;;  %v15167_v5 = vld [vmem:[#allocation17 + $0x42c] sm:$0xf0] }
 0x449   :  { %8343 = vmatpush.bf16.msra.mxu2 %v12867_v37  ;;  %v13219_v37 = vor.u32 %v15127_v40, %v13218_v3  ;;  %v12815_v48 = vor.u32 %v15020_v54, %v12812_v1  ;;  %v15012_v7 = vld [vmem:[#allocation14 + $0xf5c] sm:$0xf]  ;;  %v13154_v40 = vld [vmem:[#allocation17 + $0x260] sm:$0xf]  ;;  %v13379_v11 = vor.u32 %v15167_v5, %v13378_v39 }
 0x44a   :  { %8357 = vmatpush.bf16.msra.mxu3 %v12979_v34  ;;  %v12780_v20 = vld [vmem:[#allocation14 + $0xf78] sm:$0xf0]  ;;  %v15111_v34 = vld [vmem:[#allocation17 + $0x26c] sm:$0xf0]  ;;  %v13138_v1 = vld [vmem:[#allocation17 + $0x240] sm:$0xf] }
 0x44b   :  { %6717 = vmatpush.bf16.msrb.mxu1 %v11599_v47  ;;  %6757 = vmatmul.bf16.vlgmr.msra.gmra.mxu0 %v16093_v38  ;;  %v12783_v8 = vor.u32 %v15012_v7, %v12780_v20  ;;  %v15004_v26 = vld [vmem:[#allocation14 + $0xf1c] sm:$0xf]  ;;  %v15115_v38 = vld [vmem:[#allocation17 + $0x28c] sm:$0xf0]  ;;  %v16270_v47 = vld [vmem:[#allocation16] sm:$0xff]  ;;  %v13155_v52 = vor.u32 %v15111_v34, %v13154_v40 }
 0x44c   :  { %8363 = vmatpush.bf16.msrb.mxu0 %v13219_v37  ;;  %v12748_v2 = vld [vmem:[#allocation14 + $0xf38] sm:$0xf0]  ;;  %v3373_v37 = vperm.slane %v16270_v47, 6  ;;  %v16273_v51 = vpop.f32.mrf.mxu1  ;;  %v13506_v7 = vld [vmem:[#allocation17 + $0x520] sm:$0xf] }
 0x44d   :  { %8344 = vmatpush.bf16.msra.mxu2 %v12851_v49  ;;  %v15215_v49 = vld [vmem:[#allocation17 + $0x5ac] sm:$0xf0]  ;;  %8358 = vmatmul.bf16.vlgmr.msra.gmra.mxu3 %v16261_v18  ;;  %v14996_v3 = vld [vmem:[#allocation14 + $0xedc] sm:$0xf]  ;;  %v15093_v40 = vld [vmem:[#allocation17 + $0x1e4] sm:$0xf] }
 0x44e   :  { %8402 = vmatpush.bf16.msrb.mxu3 %v13603_v24  ;;  %6718 = vmatmul.bf16.vlgmr.msrb.gmra.mxu1 %v16069_v46  ;;  %v13571_v13 = vor.u32 %v15215_v49, %v13570_v56  ;;  %v13171_v46 = vor.u32 %v15115_v38, %v13170_v50  ;;  %v12716_v36 = vld [vmem:[#allocation14 + $0xef8] sm:$0xf0]  ;;  %v16266_v24 = vpop.f32.mrf.mxu0  ;;  %v15061_v56 = vld [vmem:[#allocation17 + $0xe4] sm:$0xf]  ;;  %v13346_v39 = vld [vmem:[#allocation17 + $0x3e0] sm:$0xf] }
 0x44f   :  { %6762 = vmatpush.bf16.msra.mxu1 %v12847_v27  ;;  %v13522_v27 = vld [vmem:[#allocation17 + $0x540] sm:$0xf]  ;;  %v12719_v54 = vor.u32 %v14996_v3, %v12716_v36  ;;  %v14988_v28 = vld [vmem:[#allocation14 + $0xe9c] sm:$0xf]  ;;  %v15057_v38 = vld [vmem:[#allocation17 + $0xc4] sm:$0xf] }
 0x450   :  { %8345 = vmatmul.bf16.vlgmr.msra.gmra.mxu2 %v16257_v58  ;;  %8364 = vmatpush.bf16.msrb.mxu0 %v13203_v59  ;;  %v12684_v60 = vld [vmem:[#allocation14 + $0xeb8] sm:$0xf0]  ;;  %v15099_v3 = vld [vmem:[#allocation17 + $0x20c] sm:$0xf0]  ;;  %v13730_v5 = vld [vmem:[#allocation17 + $0x6e0] sm:$0xf] }
 0x451   :  { %8389 = vmatpush.bf16.msrb.mxu2 %v13475_v21  ;;  %v15119_v21 = vld [vmem:[#allocation17 + $0x2ac] sm:$0xf0]  ;;  %v12964_v49 = vld [vmem:[#allocation17 + $0xf0] sm:$0xf0]  ;;  %v12687_v20 = vor.u32 %v14988_v28, %v12684_v60 }
 0x452   :  { %8403 = vmatpush.bf16.msrb.mxu3 %v13587_v57  ;;  %v13187_v22 = vor.u32 %v15119_v21, %v13186_v62  ;;  %v15163_v57 = vld [vmem:[#allocation17 + $0x40c] sm:$0xf0]  ;;  %v6589_v21 = vpop.f32.mrf.mxu3  ;;  %v12967_v9 = vor.u32 %v15061_v56, %v12964_v49  ;;  %v13092_v34 = vld [vmem:[#allocation17 + $0x1f0] sm:$0xf0]  ;;  %v13330_v56 = vld [vmem:[#allocation17 + $0x3c0] sm:$0xf] }
 0x453   :  { %6763 = vmatpush.bf16.msra.mxu1 %v12815_v48  ;;  %v6576_v31 = vpop.f32.mrf.mxu2  ;;  %v15199_v62 = vld [vmem:[#allocation17 + $0x52c] sm:$0xf0]  ;;  %v13363_v14 = vor.u32 %v15163_v57, %v13362_v43  ;;  %v13076_v17 = vld [vmem:[#allocation17 + $0x1d0] sm:$0xf0]  ;;  %v6499_v43 = vadd.f32 %v16250_v16, %v16242_v32  ;;  %v13714_v49 = vld [vmem:[#allocation17 + $0x6c0] sm:$0xf] }
 0x454   :  { %8365 = vmatpush.bf16.msrb.mxu0 %v13187_v22  ;;  %v6577_v48 = vadd.f32 %v6576_v31, %v3373_v37  ;;  %v13507_v50 = vor.u32 %v15199_v62, %v13506_v7  ;;  %v6513_v42 = vpop.f32.mrf.mxu1  ;;  %v16278_v31 = vpack.c.bf16 %v6779_v41, %v6779_v41  ;;  %v15159_v37 = vld [vmem:[#allocation17 + $0x3ec] sm:$0xf0]  ;;  %v15049_v7 = vld [vmem:[#allocation17 + $0x84] sm:$0xf]  ;;  %v12916_v62 = vld [vmem:[#allocation17 + $0x90] sm:$0xf0] }
 0x455   :  { %8390 = vmatpush.bf16.msrb.mxu2 %v13459_v33  ;;  %v12751_v33 = vor.u32 %v15004_v26, %v12748_v2  ;;  %v12948_v2 = vld [vmem:[#allocation17 + $0xd0] sm:$0xf0]  ;;  %v13347_v57 = vor.u32 %v15159_v37, %v13346_v39  ;;  %v13314_v41 = vld [vmem:[#allocation17 + $0x3a0] sm:$0xf]  ;;  %v15239_v37 = vld [vmem:[#allocation17 + $0x66c] sm:$0xf0] }
 0x456   :  { %8404 = vmatpush.bf16.msrb.mxu3 %v13571_v13  ;;  %v15103_v13 = vld [vmem:[#allocation17 + $0x22c] sm:$0xf0]  ;;  %v16276_v22 = vadd.f32 %v6589_v21, %v6577_v48  ;;  %v6552_v26 = vpop.f32.mrf.mxu0  ;;  %v12951_v36 = vor.u32 %v15057_v38, %v12948_v2  ;;  %v13060_v32 = vld [vmem:[#allocation17 + $0x1b0] sm:$0xf0]  ;;  %v15081_v38 = vld [vmem:[#allocation17 + $0x184] sm:$0xf] }
 0x457   :  { %6764 = vmatpush.bf16.msra.mxu1 %v12783_v8  ;;  %v14980_v8 = vld [vmem:[#allocation14 + $0xe5c] sm:$0xf]  ;;  %v13123_v53 = vor.u32 %v15103_v13, %v13122_v19  ;;  %v15251_v48 = vld [vmem:[#allocation17 + $0x6cc] sm:$0xf0]  ;;  %v12919_v13 = vor.u32 %v15049_v7, %v12916_v62  ;;  %v15033_v7 = vld [vmem:[#allocation17 + $0x4] sm:$0xf] }
 0x458   :  { %8366 = vmatpush.bf16.msrb.mxu0 %v13171_v46  ;;  %v12620_v46 = vld [vmem:[#allocation14 + $0xe38] sm:$0xf0]  ;;  %v13715_v16 = vor.u32 %v15251_v48, %v13714_v49  ;;  %v13650_v49 = vld [vmem:[#allocation17 + $0x640] sm:$0xf]  ;;  %v15235_v48 = vld [vmem:[#allocation17 + $0x64c] sm:$0xf0] }
 0x459   :  { %8391 = vmatpush.bf16.msrb.mxu2 %v13443_v10  ;;  %v15203_v10 = vld [vmem:[#allocation17 + $0x54c] sm:$0xf0]  ;;  %v13044_v2 = vld [vmem:[#allocation17 + $0x190] sm:$0xf0] }
 0x45a   :  { %8405 = vmatpush.bf16.msrb.mxu3 %v13555_v29  ;;  %v13523_v59 = vor.u32 %v15203_v10, %v13522_v27  ;;  %v14972_v29 = vld [vmem:[#allocation14 + $0xe1c] sm:$0xf]  ;;  %v13107_v10 = vor.u32 %v15099_v3, %v13106_v15  ;;  %v6591_v28 = vpop.f32.mrf.mxu3  ;;  %v13682_v15 = vld [vmem:[#allocation17 + $0x680] sm:$0xf] }
 0x45b   :  { %6765 = vmatpush.bf16.msra.mxu1 %v12751_v33  ;;  %v6578_v23 = vpop.f32.mrf.mxu2  ;;  %v15195_v33 = vld [vmem:[#allocation17 + $0x50c] sm:$0xf0]  ;;  %v12932_v27 = vld [vmem:[#allocation17 + $0xb0] sm:$0xf0] }
 0x45c   :  { %8367 = vmatpush.bf16.msrb.mxu0 %v13155_v52  ;;  %v13491_v45 = vor.u32 %v15195_v33, %v13490_v30  ;;  %v15053_v52 = vld [vmem:[#allocation17 + $0xa4] sm:$0xf]  ;;  %v13698_v23 = vld [vmem:[#allocation17 + $0x6a0] sm:$0xf]  ;;  %v15243_v30 = vld [vmem:[#allocation17 + $0x68c] sm:$0xf0] }
 0x45d   :  { %8392 = vmatpush.bf16.msrb.mxu2 %v13427_v6  ;;  %v13139_v6 = vor.u32 %v15107_v55, %v13138_v1  ;;  %v12623_v1 = vor.u32 %v14972_v29, %v12620_v46  ;;  %v15089_v55 = vld [vmem:[#allocation17 + $0x1c4] sm:$0xf]  ;;  %v13298_v46 = vld [vmem:[#allocation17 + $0x380] sm:$0xf]  ;;  %v15147_v33 = vld [vmem:[#allocation17 + $0x38c] sm:$0xf0] }
 0x45e   :  { %8406 = vmatpush.bf16.msrb.mxu3 %v13539_v44  ;;  %v15255_v44 = vld [vmem:[#allocation17 + $0x6ec] sm:$0xf0]  ;;  %v13079_v21 = vor.u32 %v15089_v55, %v13076_v17  ;;  %v12884_v3 = vld [vmem:[#allocation17 + $0x50] sm:$0xf0]  ;;  %v13299_v39 = vor.u32 %v15147_v33, %v13298_v46  ;;  %v13266_v55 = vld [vmem:[#allocation17 + $0x340] sm:$0xf] }
 0x45f   :  { %6766 = vmatpush.bf16.msra.mxu1 %v12719_v54  ;;  %v13095_v54 = vor.u32 %v15093_v40, %v13092_v34  ;;  %v13731_v60 = vor.u32 %v15255_v44, %v13730_v5  ;;  %v15077_v40 = vld [vmem:[#allocation17 + $0x164] sm:$0xf]  ;;  %v13028_v34 = vld [vmem:[#allocation17 + $0x170] sm:$0xf0]  ;;  %v13282_v44 = vld [vmem:[#allocation17 + $0x360] sm:$0xf] }
 0x460   :  { %8368 = vmatpush.bf16.msrb.mxu0 %v13139_v6  ;;  %v15155_v6 = vld [vmem:[#allocation17 + $0x3cc] sm:$0xf0]  ;;  %v13031_v28 = vor.u32 %v15077_v40, %v13028_v34  ;;  %v15073_v17 = vld [vmem:[#allocation17 + $0x144] sm:$0xf]  ;;  %v13604_v34 = vld [vmem:[#allocation17 + $0x5f0] sm:$0xf0] }
 0x461   :  { %8393 = vmatpush.bf16.msrb.mxu2 %v13411_v63  ;;  %v12652_v63 = vld [vmem:[#allocation14 + $0xe78] sm:$0xf0]  ;;  %v13331_v19 = vor.u32 %v15155_v6, %v13330_v56  ;;  %v15139_v6 = vld [vmem:[#allocation17 + $0x34c] sm:$0xf0]  ;;  %v15221_v40 = vld [vmem:[#allocation17 + $0x5e4] sm:$0xf] }
 0x462   :  { %8407 = vmatpush.bf16.msrb.mxu3 %v13523_v59  ;;  %v12935_v59 = vor.u32 %v15053_v52, %v12932_v27  ;;  %v15143_v27 = vld [vmem:[#allocation17 + $0x36c] sm:$0xf0]  ;;  %v13012_v56 = vld [vmem:[#allocation17 + $0x150] sm:$0xf0] }
 0x463   :  { %6767 = vmatpush.bf16.msra.mxu1 %v12687_v20  ;;  %v15131_v33 = vld [vmem:[#allocation17 + $0x30c] sm:$0xf0] }
 0x464   :  { %8369 = vmatpush.bf16.msrb.mxu0 %v13123_v53 }
 0x465   :  { %8394 = vmatpush.bf16.msrb.mxu2 %v13395_v4  ;;  %v12655_v4 = vor.u32 %v14980_v8, %v12652_v63  ;;  %v15045_v8 = vld [vmem:[#allocation17 + $0x64] sm:$0xf]  ;;  %v12900_v63 = vld [vmem:[#allocation17 + $0x70] sm:$0xf0] }
 0x466   :  { %8408 = vmatpush.bf16.msrb.mxu3 %v13507_v50  ;;  %v12903_v29 = vor.u32 %v15045_v8, %v12900_v63 }
 0x467   :  { %6768 = vmatpush.bf16.msra.mxu1 %v12655_v4  ;;  %v15041_v4 = vld [vmem:[#allocation17 + $0x44] sm:$0xf] }
 0x468   :  { %8370 = vmatpush.bf16.msrb.mxu0 %v13107_v10  ;;  %v12887_v5 = vor.u32 %v15041_v4, %v12884_v3  ;;  %v15037_v10 = vld [vmem:[#allocation17 + $0x24] sm:$0xf]  ;;  %v12980_v3 = vld [vmem:[#allocation17 + $0x110] sm:$0xf0] }
 0x469   :  { %8395 = vmatpush.bf16.msrb.mxu2 %v13379_v11  ;;  %v6777_v11 = vmax.f32 %v16198_v12, 0.0  ;;  %v6512_v12 = vadd.f32 %v16273_v51, %v6499_v43  ;;  %v15151_v51 = vld [vmem:[#allocation17 + $0x3ac] sm:$0xf0]  ;;  %v15065_v4 = vld [vmem:[#allocation17 + $0x104] sm:$0xf] }
 0x46a   :  { %8409 = vmatpush.bf16.msrb.mxu3 %v13491_v45  ;;  %v13315_v53 = vor.u32 %v15151_v51, %v13314_v41  ;;  %v13666_v45 = vld [vmem:[#allocation17 + $0x660] sm:$0xf]  ;;  %v12996_v51 = vld [vmem:[#allocation17 + $0x130] sm:$0xf0] }
 0x46b   :  { %v16285_v20 = vpack.c.bf16 %v6777_v11, %v6777_v11  ;;  %6769 = vmatpush.bf16.msra.mxu1 %v12623_v1  ;;  %v6525_v26 = vadd.f32 %v16248_v35, %v6512_v12  ;;  %v16294_v11 = vpop.f32.mrf.mxu0  ;;  %v15189_v12 = vld [vmem:[#allocation17 + $0x4e4] sm:$0xf] }
 0x46c   :  { %8415 = vmatpush.bf16.msra.mxu0 %v13731_v60  ;;  %v6563_v1 = vpop.f32.mrf.mxu1  ;;  %v13667_v60 = vor.u32 %v15239_v37, %v13666_v45  ;;  %v12983_v45 = vor.u32 %v15065_v4, %v12980_v3  ;;  %v15125_v37 = vld [vmem:[#allocation17 + $0x2e4] sm:$0xf]  ;;  %v13156_v3 = vld [vmem:[#allocation17 + $0x270] sm:$0xf0] }
 0x46d   :  { %8396 = vmatpush.bf16.msrb.mxu2 %v13363_v14  ;;  %v15085_v14 = vld [vmem:[#allocation17 + $0x1a4] sm:$0xf]  ;;  %8371 = vmatmul.bf16.vlgmr.msrb.gmra.mxu0 %v16285_v20  ;;  %v6538_v35 = vadd.f32 %v16254_v61, %v6525_v26  ;;  %v15135_v26 = vld [vmem:[#allocation17 + $0x32c] sm:$0xf0] }
 0x46e   :  { %8454 = vmatpush.bf16.msra.mxu3 %v13095_v54  ;;  %6770 = vmatmul.bf16.vlgmr.msra.gmra.mxu1 %v16100_v25  ;;  %v13063_v50 = vor.u32 %v15085_v14, %v13060_v32  ;;  %v13047_v25 = vor.u32 %v15081_v38, %v13044_v2  ;;  %v12868_v54 = vld [vmem:[#allocation17 + $0x30] sm:$0xf0]  ;;  %v13015_v14 = vor.u32 %v15073_v17, %v13012_v56  ;;  %v15231_v38 = vld [vmem:[#allocation17 + $0x62c] sm:$0xf0]  ;;  %v15121_v56 = vld [vmem:[#allocation17 + $0x2c4] sm:$0xf] }
 0x46f   :  { %8376 = vmatpush.bf16.msrb.mxu1 %v13347_v57  ;;  %v6551_v61 = vadd.f32 %v16266_v24, %v6538_v35  ;;  %v13283_v57 = vor.u32 %v15143_v27, %v13282_v44  ;;  %v12852_v24 = vld [vmem:[#allocation17 + $0x10] sm:$0xf0]  ;;  %v13651_v32 = vor.u32 %v15235_v48, %v13650_v49  ;;  %v15227_v44 = vld [vmem:[#allocation17 + $0x60c] sm:$0xf0]  ;;  %v15109_v4 = vld [vmem:[#allocation17 + $0x264] sm:$0xf] }
 0x470   :  { %8397 = vmatmul.bf16.vlgmr.msrb.gmra.mxu2 %v16278_v31  ;;  %8416 = vmatpush.bf16.msra.mxu0 %v13715_v16  ;;  %v12855_v41 = vor.u32 %v15033_v7, %v12852_v24  ;;  %v13220_v27 = vld [vmem:[#allocation17 + $0x2f0] sm:$0xf0]  ;;  %v15213_v24 = vld [vmem:[#allocation17 + $0x5a4] sm:$0xf] }
 0x471   :  { %8441 = vmatpush.bf16.msra.mxu2 %v12967_v9  ;;  %v15247_v9 = vld [vmem:[#allocation17 + $0x6ac] sm:$0xf0]  ;;  %v6564_v43 = vadd.f32 %v6563_v1, %v6551_v61  ;;  %v13607_v61 = vor.u32 %v15221_v40, %v13604_v34  ;;  %v13588_v17 = vld [vmem:[#allocation17 + $0x5d0] sm:$0xf0]  ;;  %v15201_v34 = vld [vmem:[#allocation17 + $0x544] sm:$0xf] }
 0x472   :  { %8455 = vmatpush.bf16.msra.mxu3 %v13079_v21  ;;  %v13699_v42 = vor.u32 %v15247_v9, %v13698_v23  ;;  %v13476_v21 = vld [vmem:[#allocation17 + $0x4f0] sm:$0xf0]  ;;  %v13250_v23 = vld [vmem:[#allocation17 + $0x320] sm:$0xf]  ;;  %v15069_v9 = vld [vmem:[#allocation17 + $0x124] sm:$0xf] }
 0x473   :  { %8377 = vmatpush.bf16.msrb.mxu1 %v13331_v19  ;;  %v16291_v52 = vpop.f32.mrf.mxu2  ;;  %v6780_v62 = vmax.f32 %v6564_v43, 0.0  ;;  %v16298_v19 = vpop.f32.mrf.mxu3  ;;  %v13479_v63 = vor.u32 %v15189_v12, %v13476_v21  ;;  %v12999_v46 = vor.u32 %v15069_v9, %v12996_v51  ;;  %v15177_v43 = vld [vmem:[#allocation17 + $0x484] sm:$0xf]  ;;  %v13204_v49 = vld [vmem:[#allocation17 + $0x2d0] sm:$0xf0] }
 0x474   :  { %8417 = vmatpush.bf16.msra.mxu0 %v13699_v42  ;;  %v6604_v2 = vpop.f32.mrf.mxu0  ;;  %v15185_v42 = vld [vmem:[#allocation17 + $0x4c4] sm:$0xf]  ;;  %v13412_v12 = vld [vmem:[#allocation17 + $0x470] sm:$0xf0]  ;;  %v13207_v21 = vor.u32 %v15121_v56, %v13204_v49 }
 0x475   :  { %8442 = vmatpush.bf16.msra.mxu2 %v12951_v36  ;;  %v13683_v36 = vor.u32 %v15243_v30, %v13682_v15  ;;  %v16296_v16 = vpack.c.bf16 %v6780_v62, %v6780_v62  ;;  %v13234_v15 = vld [vmem:[#allocation17 + $0x300] sm:$0xf]  ;;  %v13251_v30 = vor.u32 %v15135_v26, %v13250_v23  ;;  %v15173_v62 = vld [vmem:[#allocation17 + $0x464] sm:$0xf]  ;;  %v13556_v9 = vld [vmem:[#allocation17 + $0x590] sm:$0xf0] }
 0x476   :  { %8456 = vmatpush.bf16.msra.mxu3 %v13063_v50  ;;  %v13634_v50 = vld [vmem:[#allocation17 + $0x620] sm:$0xf]  ;;  %v15209_v23 = vld [vmem:[#allocation17 + $0x584] sm:$0xf] }
 0x477   :  { %8378 = vmatpush.bf16.msrb.mxu1 %v13315_v53  ;;  %8410 = vmatmul.bf16.vlgmr.msrb.gmra.mxu3 %v16296_v16  ;;  %v13460_v53 = vld [vmem:[#allocation17 + $0x4d0] sm:$0xf0]  ;;  %v13635_v35 = vor.u32 %v15231_v38, %v13634_v50  ;;  %v15169_v51 = vld [vmem:[#allocation17 + $0x444] sm:$0xf]  ;;  %v13559_v38 = vor.u32 %v15209_v23, %v13556_v9 }
 0x478   :  { %8418 = vmatpush.bf16.msra.mxu0 %v13683_v36  ;;  %v15181_v36 = vld [vmem:[#allocation17 + $0x4a4] sm:$0xf]  ;;  %v13172_v50 = vld [vmem:[#allocation17 + $0x290] sm:$0xf0] }
 0x479   :  { %8443 = vmatpush.bf16.msra.mxu2 %v12935_v59  ;;  %v12871_v59 = vor.u32 %v15037_v10, %v12868_v54  ;;  %v13235_v54 = vor.u32 %v15131_v33, %v13234_v15  ;;  %v15113_v26 = vld [vmem:[#allocation17 + $0x284] sm:$0xf]  ;;  %v13380_v15 = vld [vmem:[#allocation17 + $0x430] sm:$0xf0] }
 0x47a   :  { %8457 = vmatpush.bf16.msra.mxu3 %v13047_v25  ;;  %v13463_v25 = vor.u32 %v15185_v42, %v13460_v53  ;;  %v15205_v42 = vld [vmem:[#allocation17 + $0x564] sm:$0xf]  ;;  %v13540_v53 = vld [vmem:[#allocation17 + $0x570] sm:$0xf0] }
 0x47b   :  { %8379 = vmatpush.bf16.msrb.mxu1 %v13299_v39  ;;  %v6630_v8 = vpop.f32.mrf.mxu2  ;;  %v13444_v39 = vld [vmem:[#allocation17 + $0x4b0] sm:$0xf0]  ;;  %v6643_v10 = vpop.f32.mrf.mxu3  ;;  %v13543_v40 = vor.u32 %v15205_v42, %v13540_v53  ;;  %v15193_v23 = vld [vmem:[#allocation17 + $0x504] sm:$0xf]  ;;  %v15056_v42 = vld [vmem:[#allocation17 + $0xb4] sm:$0xf0] }
 0x47c   :  { %8419 = vmatpush.bf16.msra.mxu0 %v13667_v60  ;;  %v13447_v1 = vor.u32 %v15181_v36, %v13444_v39  ;;  %v13396_v8 = vld [vmem:[#allocation17 + $0x450] sm:$0xf0]  ;;  %v13159_v10 = vor.u32 %v15109_v4, %v13156_v3  ;;  %v15097_v53 = vld [vmem:[#allocation17 + $0x204] sm:$0xf]  ;;  %v13082_v3 = vld [vmem:[#allocation17 + $0x1c8] sm:$0xf] }
 0x47d   :  { %8444 = vmatpush.bf16.msra.mxu2 %v12919_v13  ;;  %v13267_v13 = vor.u32 %v15139_v6, %v13266_v55  ;;  %v15217_v55 = vld [vmem:[#allocation17 + $0x5c4] sm:$0xf]  ;;  %v13399_v2 = vor.u32 %v15169_v51, %v13396_v8  ;;  %v13524_v39 = vld [vmem:[#allocation17 + $0x550] sm:$0xf0]  ;;  %v13098_v51 = vld [vmem:[#allocation17 + $0x1e8] sm:$0xf] }
 0x47e   :  { %8458 = vmatpush.bf16.msra.mxu3 %v13031_v28  ;;  %v6778_v28 = vmax.f32 %v16226_v0, 0.0  ;;  %v13591_v48 = vor.u32 %v15217_v55, %v13588_v17  ;;  %v13572_v0 = vld [vmem:[#allocation17 + $0x5b0] sm:$0xf0]  ;;  %v13527_v55 = vor.u32 %v15201_v34, %v13524_v39  ;;  %v15096_v8 = vld [vmem:[#allocation17 + $0x1f4] sm:$0xf0] }
 0x47f   :  { %8380 = vmatpush.bf16.msrb.mxu1 %v13283_v57  ;;  %v13428_v57 = vld [vmem:[#allocation17 + $0x490] sm:$0xf0]  ;;  %v13099_v4 = vor.u32 %v15096_v8, %v13098_v51  ;;  %v15092_v34 = vld [vmem:[#allocation17 + $0x1d4] sm:$0xf0]  ;;  %v13810_v39 = vld [vmem:[#allocation17 + $0x780] sm:$0xf] }
 0x480   :  { %8420 = vmatpush.bf16.msra.mxu0 %v13651_v32  ;;  %v16303_v6 = vpack.c.bf16 %v6778_v28, %v6778_v28  ;;  %v13431_v7 = vor.u32 %v15177_v43, %v13428_v57  ;;  %v13188_v32 = vld [vmem:[#allocation17 + $0x2b0] sm:$0xf0]  ;;  %v15105_v28 = vld [vmem:[#allocation17 + $0x244] sm:$0xf] }
 0x481   :  { %8445 = vmatpush.bf16.msra.mxu2 %v12903_v29  ;;  %v6565_v29 = vpop.f32.mrf.mxu1  ;;  %v15197_v43 = vld [vmem:[#allocation17 + $0x524] sm:$0xf]  ;;  %v13508_v57 = vld [vmem:[#allocation17 + $0x530] sm:$0xf0] }
 0x482   :  { %8459 = vmatpush.bf16.msra.mxu3 %v13015_v14  ;;  %v15117_v14 = vld [vmem:[#allocation17 + $0x2a4] sm:$0xf]  ;;  %v13492_v9 = vld [vmem:[#allocation17 + $0x510] sm:$0xf0] }
 0x483   :  { %8381 = vmatpush.bf16.msrb.mxu1 %v13267_v13  ;;  %v13575_v13 = vor.u32 %v15213_v24, %v13572_v0  ;;  %v13842_v24 = vld [vmem:[#allocation17 + $0x7c0] sm:$0xf]  ;;  %v15283_v0 = vld [vmem:[#allocation17 + $0x7cc] sm:$0xf0] }
 0x484   :  { %8421 = vmatpush.bf16.msra.mxu0 %v13635_v35  ;;  %v3374_v35 = vperm.slane %v16270_v47, 7 }
 0x485   :  { %8446 = vmatpush.bf16.msra.mxu2 %v12887_v5  ;;  %v13618_v5 = vld [vmem:[#allocation17 + $0x600] sm:$0xf] }
 0x486   :  { %8460 = vmatpush.bf16.msra.mxu3 %v12999_v46  ;;  %v13619_v60 = vor.u32 %v15227_v44, %v13618_v5  ;;  %v15165_v46 = vld [vmem:[#allocation17 + $0x424] sm:$0xf]  ;;  %v13858_v5 = vld [vmem:[#allocation17 + $0x7e0] sm:$0xf]  ;;  %v15287_v44 = vld [vmem:[#allocation17 + $0x7ec] sm:$0xf0] }
 0x487   :  { %8382 = vmatpush.bf16.msrb.mxu1 %v13251_v30  ;;  %v13175_v30 = vor.u32 %v15113_v26, %v13172_v50  ;;  %v13383_v36 = vor.u32 %v15165_v46, %v13380_v15  ;;  %v12938_v26 = vld [vmem:[#allocation17 + $0xa8] sm:$0xf]  ;;  %v13495_v15 = vor.u32 %v15193_v23, %v13492_v9  ;;  %v15040_v23 = vld [vmem:[#allocation17 + $0x34] sm:$0xf0] }
 0x488   :  { %8422 = vmatpush.bf16.msra.mxu0 %v13619_v60  ;;  %v16307_v33 = vpop.f32.mrf.mxu0 }
 0x489   :  { %8447 = vmatpush.bf16.msra.mxu2 %v12871_v59  ;;  %v13223_v59 = vor.u32 %v15125_v37, %v13220_v27  ;;  %v13364_v37 = vld [vmem:[#allocation17 + $0x410] sm:$0xf0]  ;;  %v12970_v27 = vld [vmem:[#allocation17 + $0xe8] sm:$0xf] }
 0x48a   :  { %8461 = vmatpush.bf16.msra.mxu3 %v12983_v45  ;;  %v15161_v45 = vld [vmem:[#allocation17 + $0x404] sm:$0xf] }
 0x48b   :  { %8383 = vmatpush.bf16.msrb.mxu1 %v13235_v54  ;;  %v13859_v54 = vor.u32 %v15287_v44, %v13858_v5  ;;  %v13367_v60 = vor.u32 %v15161_v45, %v13364_v37  ;;  %v15275_v5 = vld [vmem:[#allocation17 + $0x78c] sm:$0xf0]  ;;  %v12922_v44 = vld [vmem:[#allocation17 + $0x88] sm:$0xf]  ;;  %v15052_v45 = vld [vmem:[#allocation17 + $0x94] sm:$0xf0] }
 0x48c   :  { %8467 = vmatpush.bf16.msrb.mxu0 %v13223_v59  ;;  %v13811_v37 = vor.u32 %v15275_v5, %v13810_v39 }
 0x48d   :  { %8448 = vmatpush.bf16.msra.mxu2 %v12855_v41  ;;  %v13415_v41 = vor.u32 %v15173_v62, %v13412_v12  ;;  %8462 = vmatmul.bf16.vlgmr.msra.gmra.mxu3 %v16261_v18  ;;  %v15060_v12 = vld [vmem:[#allocation17 + $0xd4] sm:$0xf0] }
 0x48e   :  { %8506 = vmatpush.bf16.msrb.mxu3 %v13607_v61  ;;  %8384 = vmatmul.bf16.vlgmr.msrb.gmra.mxu1 %v16303_v6  ;;  %v15064_v61 = vld [vmem:[#allocation17 + $0xf4] sm:$0xf0] }
 0x48f   :  { %8428 = vmatpush.bf16.msra.mxu1 %v13859_v54  ;;  %v6693_v17 = vpop.f32.mrf.mxu3  ;;  %v12971_v49 = vor.u32 %v15064_v61, %v12970_v27  ;;  %v13066_v54 = vld [vmem:[#allocation17 + $0x1a8] sm:$0xf]  ;;  %v12923_v61 = vor.u32 %v15052_v45, %v12922_v44 }
 0x490   :  { %8449 = vmatmul.bf16.vlgmr.msra.gmra.mxu2 %v16257_v58  ;;  %8468 = vmatpush.bf16.msrb.mxu0 %v13207_v21  ;;  %v6656_v62 = vpop.f32.mrf.mxu0  ;;  %v15101_v21 = vld [vmem:[#allocation17 + $0x224] sm:$0xf] }
 0x491   :  { %8493 = vmatpush.bf16.msrb.mxu2 %v13479_v63  ;;  %v13191_v63 = vor.u32 %v15117_v14, %v13188_v32  ;;  %v13124_v14 = vld [vmem:[#allocation17 + $0x230] sm:$0xf0]  ;;  %v13843_v32 = vor.u32 %v15283_v0, %v13842_v24 }
 0x492   :  { %8507 = vmatpush.bf16.msrb.mxu3 %v13591_v48  ;;  %v12954_v48 = vld [vmem:[#allocation17 + $0xc8] sm:$0xf]  ;;  %v13127_v50 = vor.u32 %v15101_v21, %v13124_v14  ;;  %v15080_v21 = vld [vmem:[#allocation17 + $0x174] sm:$0xf0]  ;;  %v13762_v14 = vld [vmem:[#allocation17 + $0x720] sm:$0xf] }
 0x493   :  { %v6680_v29 = vpop.f32.mrf.mxu2  ;;  %8429 = vmatpush.bf16.msra.mxu1 %v13843_v32  ;;  %v15263_v32 = vld [vmem:[#allocation17 + $0x72c] sm:$0xf0] }
 0x494   :  { %8469 = vmatpush.bf16.msrb.mxu0 %v13191_v63  ;;  %v6681_v47 = vadd.f32 %v6680_v29, %v3374_v35  ;;  %v12955_v63 = vor.u32 %v15060_v12, %v12954_v48  ;;  %v13108_v29 = vld [vmem:[#allocation17 + $0x210] sm:$0xf0]  ;;  %v6603_v35 = vadd.f32 %v16294_v11, %v16276_v22  ;;  %v15088_v22 = vld [vmem:[#allocation17 + $0x1b4] sm:$0xf0]  ;;  %v13794_v11 = vld [vmem:[#allocation17 + $0x760] sm:$0xf]  ;;  %v13763_v9 = vor.u32 %v15263_v32, %v13762_v14 }
 0x495   :  { %8494 = vmatpush.bf16.msrb.mxu2 %v13463_v25  ;;  %v16310_v25 = vpop.f32.mrf.mxu1  ;;  %v12890_v48 = vld [vmem:[#allocation17 + $0x48] sm:$0xf]  ;;  %v15184_v14 = vld [vmem:[#allocation17 + $0x4b4] sm:$0xf0] }
 0x496   :  { %8508 = vmatpush.bf16.msrb.mxu3 %v13575_v13  ;;  %v16312_v59 = vadd.f32 %v6693_v17, %v6681_v47  ;;  %v6616_v27 = vadd.f32 %v16310_v25, %v6603_v35  ;;  %v15048_v47 = vld [vmem:[#allocation17 + $0x74] sm:$0xf0]  ;;  %v13067_v25 = vor.u32 %v15088_v22, %v13066_v54  ;;  %v13034_v12 = vld [vmem:[#allocation17 + $0x168] sm:$0xf] }
 0x497   :  { %v13002_v54 = vld [vmem:[#allocation17 + $0x128] sm:$0xf] }
 0x498   :  { %8470 = vmatpush.bf16.msrb.mxu0 %v13175_v30  ;;  %v6695_v30 = vpop.f32.mrf.mxu3  ;;  %v6629_v17 = vadd.f32 %v16291_v52, %v6616_v27  ;;  %v15249_v27 = vld [vmem:[#allocation17 + $0x6c4] sm:$0xf] }
 0x499   :  { %8495 = vmatpush.bf16.msrb.mxu2 %v13447_v1  ;;  %v13140_v1 = vld [vmem:[#allocation17 + $0x250] sm:$0xf0]  ;;  %v15036_v30 = vld [vmem:[#allocation17 + $0x14] sm:$0xf0] }
 0x49a   :  { %8509 = vmatpush.bf16.msrb.mxu3 %v13559_v38  ;;  %v13826_v38 = vld [vmem:[#allocation17 + $0x7a0] sm:$0xf]  ;;  %v6642_v0 = vadd.f32 %v16298_v19, %v6629_v17  ;;  %v15188_v17 = vld [vmem:[#allocation17 + $0x4d4] sm:$0xf0] }
 0x49b   :  { %v6682_v56 = vpop.f32.mrf.mxu2 }
 0x49c   :  { %8471 = vmatpush.bf16.msrb.mxu0 %v13159_v10  ;;  %v13083_v10 = vor.u32 %v15092_v34, %v13082_v3  ;;  %v13778_v56 = vld [vmem:[#allocation17 + $0x740] sm:$0xf]  ;;  %v6655_v51 = vadd.f32 %v16307_v33, %v6642_v0  ;;  %v15192_v3 = vld [vmem:[#allocation17 + $0x4f4] sm:$0xf0]  ;;  %v13348_v34 = vld [vmem:[#allocation17 + $0x3f0] sm:$0xf0] }
 0x49d   :  { %8496 = vmatpush.bf16.msrb.mxu2 %v13431_v7  ;;  %v13143_v7 = vor.u32 %v15105_v28, %v13140_v1  ;;  %v6617_v13 = vpop.f32.mrf.mxu1  ;;  %v15271_v28 = vld [vmem:[#allocation17 + $0x76c] sm:$0xf0]  ;;  %v12906_v1 = vld [vmem:[#allocation17 + $0x68] sm:$0xf] }
 0x49e   :  { %8510 = vmatpush.bf16.msrb.mxu3 %v13543_v40  ;;  %v12939_v40 = vor.u32 %v15056_v42, %v12938_v26  ;;  %v13035_v26 = vor.u32 %v15080_v21, %v13034_v12  ;;  %v13610_v0 = vld [vmem:[#allocation17 + $0x5e8] sm:$0xf]  ;;  %v13316_v12 = vld [vmem:[#allocation17 + $0x3b0] sm:$0xf0] }
 0x49f   :  { %v13450_v21 = vld [vmem:[#allocation17 + $0x4a8] sm:$0xf] }
 0x4a0   :  { %8472 = vmatpush.bf16.msrb.mxu0 %v13143_v7  ;;  %v15044_v7 = vld [vmem:[#allocation17 + $0x54] sm:$0xf0] }
 0x4a1   :  { %8497 = vmatpush.bf16.msrb.mxu2 %v13415_v41  ;;  %v13511_v41 = vor.u32 %v15197_v43, %v13508_v57  ;;  %v12907_v43 = vor.u32 %v15048_v47, %v12906_v1  ;;  %v15084_v57 = vld [vmem:[#allocation17 + $0x194] sm:$0xf0]  ;;  %v12891_v52 = vor.u32 %v15044_v7, %v12890_v48  ;;  %v13332_v1 = vld [vmem:[#allocation17 + $0x3d0] sm:$0xf0]  ;;  %v12986_v48 = vld [vmem:[#allocation17 + $0x108] sm:$0xf] }
 0x4a2   :  { %8511 = vmatpush.bf16.msrb.mxu3 %v13527_v55  ;;  %v13795_v55 = vor.u32 %v15271_v28, %v13794_v11  ;;  %v15072_v11 = vld [vmem:[#allocation17 + $0x134] sm:$0xf0]  ;;  %v15153_v28 = vld [vmem:[#allocation17 + $0x3c4] sm:$0xf] }
 0x4a3   :  { %v15068_v7 = vld [vmem:[#allocation17 + $0x114] sm:$0xf0] }
 0x4a4   :  { %8473 = vmatpush.bf16.msrb.mxu0 %v13127_v50  ;;  %v13732_v50 = vld [vmem:[#allocation17 + $0x6f0] sm:$0xf0] }
 0x4a5   :  { %8498 = vmatpush.bf16.msrb.mxu2 %v13399_v2  ;;  %v15279_v2 = vld [vmem:[#allocation17 + $0x7ac] sm:$0xf0] }
 0x4a6   :  { %v13827_v46 = vor.u32 %v15279_v2, %v13826_v38  ;;  %8512 = vmatpush.bf16.msrb.mxu3 %v13511_v41  ;;  %v12874_v41 = vld [vmem:[#allocation17 + $0x28] sm:$0xf]  ;;  %v15076_v2 = vld [vmem:[#allocation17 + $0x154] sm:$0xf0] }
 0x4a7   :  { %v13018_v38 = vld [vmem:[#allocation17 + $0x148] sm:$0xf] }
 0x4a8   :  { %8430 = vmatpush.bf16.msra.mxu1 %v13827_v46  ;;  %v16324_v8 = vpop.f32.mrf.mxu0  ;;  %v13746_v46 = vld [vmem:[#allocation17 + $0x700] sm:$0xf]  ;;  %v13019_v39 = vor.u32 %v15076_v2, %v13018_v38  ;;  %v15145_v38 = vld [vmem:[#allocation17 + $0x384] sm:$0xf]  ;;  %v13300_v2 = vld [vmem:[#allocation17 + $0x390] sm:$0xf0] }
 0x4a9   :  { %8499 = vmatpush.bf16.msrb.mxu2 %v13383_v36  ;;  %v13111_v36 = vor.u32 %v15097_v53, %v13108_v29  ;;  %v12875_v53 = vor.u32 %v15040_v23, %v12874_v41  ;;  %v12858_v29 = vld [vmem:[#allocation17 + $0x8] sm:$0xf] }
 0x4aa   :  { %8513 = vmatpush.bf16.msrb.mxu3 %v13495_v15  ;;  %v15259_v15 = vld [vmem:[#allocation17 + $0x70c] sm:$0xf0] }
 0x4ab   :  { %8474 = vmatpush.bf16.msrb.mxu0 %v13111_v36  ;;  %v6667_v19 = vpop.f32.mrf.mxu1  ;;  %v13747_v33 = vor.u32 %v15259_v15, %v13746_v46  ;;  %v13303_v46 = vor.u32 %v15145_v38, %v13300_v2  ;;  %v13530_v2 = vld [vmem:[#allocation17 + $0x548] sm:$0xf] }
 0x4ac   :  { %8431 = vmatpush.bf16.msra.mxu1 %v13811_v37  ;;  %v6668_v42 = vadd.f32 %v6667_v19, %v6655_v51  ;;  %v12859_v37 = vor.u32 %v15036_v30, %v12858_v29  ;;  %v15241_v51 = vld [vmem:[#allocation17 + $0x684] sm:$0xf]  ;;  %v15180_v29 = vld [vmem:[#allocation17 + $0x494] sm:$0xf0] }
 0x4ad   :  { %8500 = vmatpush.bf16.msrb.mxu2 %v13367_v60  ;;  %8514 = vmatmul.bf16.vlgmr.msrb.gmra.mxu3 %v16296_v16  ;;  %v13050_v60 = vld [vmem:[#allocation17 + $0x188] sm:$0xf]  ;;  %v15237_v30 = vld [vmem:[#allocation17 + $0x664] sm:$0xf] }
 0x4ae   :  { %8558 = vmatpush.bf16.msra.mxu3 %v13099_v4  ;;  %v13051_v62 = vor.u32 %v15084_v57, %v13050_v60  ;;  %v13482_v4 = vld [vmem:[#allocation17 + $0x4e8] sm:$0xf]  ;;  %v6781_v35 = vmax.f32 %v6668_v42, 0.0  ;;  %v15245_v57 = vld [vmem:[#allocation17 + $0x6a4] sm:$0xf] }
 0x4af   :  { %v13483_v22 = vor.u32 %v15192_v3, %v13482_v4  ;;  %v15220_v42 = vld [vmem:[#allocation17 + $0x5d4] sm:$0xf0]  ;;  %v13668_v4 = vld [vmem:[#allocation17 + $0x670] sm:$0xf0] }
 0x4b0   :  { %8501 = vmatmul.bf16.vlgmr.msrb.gmra.mxu2 %v16278_v31  ;;  %8432 = vmatpush.bf16.msra.mxu1 %v13795_v55  ;;  %v16326_v44 = vpack.c.bf16 %v6781_v35, %v6781_v35  ;;  %v16328_v45 = vpop.f32.mrf.mxu3  ;;  %v6708_v47 = vpop.f32.mrf.mxu0  ;;  %v13466_v55 = vld [vmem:[#allocation17 + $0x4c8] sm:$0xf] }
 0x4b1   :  { %8545 = vmatpush.bf16.msra.mxu2 %v12971_v49  ;;  %v15267_v49 = vld [vmem:[#allocation17 + $0x74c] sm:$0xf0]  ;;  %v13578_v35 = vld [vmem:[#allocation17 + $0x5a8] sm:$0xf]  ;;  %v15212_v47 = vld [vmem:[#allocation17 + $0x594] sm:$0xf0] }
 0x4b2   :  { %8559 = vmatpush.bf16.msra.mxu3 %v13083_v10  ;;  %v13779_v24 = vor.u32 %v15267_v49, %v13778_v56  ;;  %v13716_v10 = vld [vmem:[#allocation17 + $0x6d0] sm:$0xf0]  ;;  %8423 = vmatmul.bf16.vlgmr.msra.gmra.mxu0 %v16326_v44  ;;  %v13003_v56 = vor.u32 %v15072_v11, %v13002_v54  ;;  %v13562_v11 = vld [vmem:[#allocation17 + $0x588] sm:$0xf] }
 0x4b3   :  { %v16321_v13 = vpop.f32.mrf.mxu2  ;;  %v6669_v60 = vpop.f32.mrf.mxu1  ;;  %v13700_v49 = vld [vmem:[#allocation17 + $0x6b0] sm:$0xf0] }
 0x4b4   :  { %8433 = vmatpush.bf16.msra.mxu1 %v13779_v24  ;;  %v13467_v24 = vor.u32 %v15188_v17, %v13466_v55  ;;  %v13703_v41 = vor.u32 %v15245_v57, %v13700_v49  ;;  %v13652_v54 = vld [vmem:[#allocation17 + $0x650] sm:$0xf0]  ;;  %v13402_v55 = vld [vmem:[#allocation17 + $0x448] sm:$0xf]  ;;  %v15172_v17 = vld [vmem:[#allocation17 + $0x454] sm:$0xf0]  ;;  %v13563_v49 = vor.u32 %v15212_v47, %v13562_v11 }
 0x4b5   :  { %8546 = vmatpush.bf16.msra.mxu2 %v12955_v63  ;;  %v15253_v63 = vld [vmem:[#allocation17 + $0x6e4] sm:$0xf] }
 0x4b6   :  { %8560 = vmatpush.bf16.msra.mxu3 %v13067_v25  ;;  %v13735_v36 = vor.u32 %v15253_v63, %v13732_v50  ;;  %v13335_v25 = vor.u32 %v15153_v28, %v13332_v1  ;;  %v13684_v63 = vld [vmem:[#allocation17 + $0x690] sm:$0xf0]  ;;  %v13594_v50 = vld [vmem:[#allocation17 + $0x5c8] sm:$0xf]  ;;  %v15137_v28 = vld [vmem:[#allocation17 + $0x344] sm:$0xf] }
 0x4b7   :  { %v13687_v15 = vor.u32 %v15241_v51, %v13684_v63  ;;  %v13595_v3 = vor.u32 %v15220_v42, %v13594_v50  ;;  %v13268_v1 = vld [vmem:[#allocation17 + $0x350] sm:$0xf0]  ;;  %v15229_v57 = vld [vmem:[#allocation17 + $0x624] sm:$0xf] }
 0x4b8   :  { %8434 = vmatpush.bf16.msra.mxu1 %v13763_v9  ;;  %8519 = vmatpush.bf16.msra.mxu0 %v13735_v36  ;;  %v6747_v23 = vpop.f32.mrf.mxu3  ;;  %v12987_v9 = vor.u32 %v15068_v7, %v12986_v48  ;;  %v15216_v36 = vld [vmem:[#allocation17 + $0x5b4] sm:$0xf0]  ;;  %v13403_v48 = vor.u32 %v15172_v17, %v13402_v55  ;;  %v13546_v7 = vld [vmem:[#allocation17 + $0x568] sm:$0xf]  ;;  %v13620_v63 = vld [vmem:[#allocation17 + $0x610] sm:$0xf0] }
 0x4b9   :  { %8547 = vmatpush.bf16.msra.mxu2 %v12939_v40  ;;  %v15157_v40 = vld [vmem:[#allocation17 + $0x3e4] sm:$0xf] }
 0x4ba   :  { %8561 = vmatpush.bf16.msra.mxu3 %v13051_v62  ;;  %v13351_v5 = vor.u32 %v15157_v40, %v13348_v34  ;;  %v15149_v62 = vld [vmem:[#allocation17 + $0x3a4] sm:$0xf]  ;;  %v13284_v34 = vld [vmem:[#allocation17 + $0x370] sm:$0xf0] }
 0x4bb   :  { %v13319_v32 = vor.u32 %v15149_v62, %v13316_v12  ;;  %v15141_v40 = vld [vmem:[#allocation17 + $0x364] sm:$0xf]  ;;  %v15208_v12 = vld [vmem:[#allocation17 + $0x574] sm:$0xf0] }
 0x4bc   :  { %8435 = vmatpush.bf16.msra.mxu1 %v13747_v33  ;;  %v13547_v50 = vor.u32 %v15208_v12, %v13546_v7  ;;  %v15129_v42 = vld [vmem:[#allocation17 + $0x304] sm:$0xf]  ;;  %v13100_v7 = vld [vmem:[#allocation17 + $0x1f8] sm:$0xf0] }
 0x4bd   :  { %8548 = vmatpush.bf16.msra.mxu2 %v12923_v61  ;;  %v6734_v61 = vpop.f32.mrf.mxu2 }
 0x4be   :  { %8562 = vmatpush.bf16.msra.mxu3 %v13035_v26  ;;  %v13451_v26 = vor.u32 %v15184_v14, %v13450_v21  ;;  %v13579_v61 = vor.u32 %v15216_v36, %v13578_v35  ;;  %v15168_v21 = vld [vmem:[#allocation17 + $0x434] sm:$0xf0] }
 0x4c0   :  { %8480 = vmatpush.bf16.msrb.mxu1 %v13351_v5  ;;  %v15176_v5 = vld [vmem:[#allocation17 + $0x474] sm:$0xf0] }
 0x4c1   :  { %8549 = vmatpush.bf16.msra.mxu2 %v12907_v43  ;;  %v13719_v43 = vor.u32 %v15249_v27, %v13716_v10  ;;  %v13671_v27 = vor.u32 %v15237_v30, %v13668_v4  ;;  %v15233_v10 = vld [vmem:[#allocation17 + $0x644] sm:$0xf] }
 0x4c2   :  { %8563 = vmatpush.bf16.msra.mxu3 %v13019_v39  ;;  %v13418_v39 = vld [vmem:[#allocation17 + $0x468] sm:$0xf]  ;;  %8475 = vmatmul.bf16.vlgmr.msrb.gmra.mxu0 %v16285_v20  ;;  %v13655_v60 = vor.u32 %v15233_v10, %v13652_v54 }
 0x4c3   :  { %8520 = vmatpush.bf16.msra.mxu0 %v13719_v43  ;;  %v16334_v43 = vld [vmem:[#allocation19] sm:$0xf] }
 0x4c4   :  { %8481 = vmatpush.bf16.msrb.mxu1 %v13335_v25  ;;  %v13271_v25 = vor.u32 %v15137_v28, %v13268_v1  ;;  %v15058_v28 = vld [vmem:[#allocation17 + $0xcc] sm:$0xf]  ;;  %v12956_v1 = vld [vmem:[#allocation17 + $0xd8] sm:$0xf0] }
 0x4c5   :  { %8550 = vmatpush.bf16.msra.mxu2 %v12891_v52  ;;  %v15224_v52 = vld [vmem:[#allocation17 + $0x5f4] sm:$0xf0] }
 0x4c6   :  { %8564 = vmatpush.bf16.msra.mxu3 %v13003_v56  ;;  %v13611_v19 = vor.u32 %v15224_v52, %v13610_v0  ;;  %v13636_v56 = vld [vmem:[#allocation17 + $0x630] sm:$0xf0]  ;;  %v13386_v52 = vld [vmem:[#allocation17 + $0x428] sm:$0xf] }
 0x4c7   :  { %8521 = vmatpush.bf16.msra.mxu0 %v13703_v41  ;;  %v13252_v0 = vld [vmem:[#allocation17 + $0x330] sm:$0xf0]  ;;  %v13639_v23 = vor.u32 %v15229_v57, %v13636_v56  ;;  %v13387_v38 = vor.u32 %v15168_v21, %v13386_v52  ;;  %v12959_v57 = vor.u32 %v15058_v28, %v12956_v1  ;;  %v13498_v56 = vld [vmem:[#allocation17 + $0x508] sm:$0xf]  ;;  %v13036_v1 = vld [vmem:[#allocation17 + $0x178] sm:$0xf0] }
 0x4c8   :  { %8482 = vmatpush.bf16.msrb.mxu1 %v13319_v32  ;;  %v7049_v32 = vperm.slane %v16334_v43, 0  ;;  %v16337_v41 = vpop.f32.mrf.mxu0  ;;  %v13178_v21 = vld [vmem:[#allocation17 + $0x288] sm:$0xf] }
 0x4c9   :  { %8551 = vmatpush.bf16.msra.mxu2 %v12875_v53  ;;  %v13434_v53 = vld [vmem:[#allocation17 + $0x488] sm:$0xf] }
 0x4ca   :  { %8565 = vmatpush.bf16.msra.mxu3 %v12987_v9  ;;  %v13435_v33 = vor.u32 %v15180_v29, %v13434_v53  ;;  %v15225_v9 = vld [vmem:[#allocation17 + $0x604] sm:$0xf]  ;;  %v13236_v53 = vld [vmem:[#allocation17 + $0x310] sm:$0xf0]  ;;  %v15204_v29 = vld [vmem:[#allocation17 + $0x554] sm:$0xf0] }
 0x4cb   :  { %8522 = vmatpush.bf16.msra.mxu0 %v13687_v15  ;;  %v16339_v51 = vpop.f32.mrf.mxu1  ;;  %v15164_v15 = vld [vmem:[#allocation17 + $0x414] sm:$0xf0]  ;;  %v13239_v30 = vor.u32 %v15129_v42, %v13236_v53  ;;  %v13623_v4 = vor.u32 %v15225_v9, %v13620_v63  ;;  %v13531_v36 = vor.u32 %v15204_v29, %v13530_v2  ;;  %v15090_v63 = vld [vmem:[#allocation17 + $0x1cc] sm:$0xf]  ;;  %v13162_v42 = vld [vmem:[#allocation17 + $0x268] sm:$0xf] }
 0x4cc   :  { %8483 = vmatpush.bf16.msrb.mxu1 %v13303_v46  ;;  %v13370_v46 = vld [vmem:[#allocation17 + $0x408] sm:$0xf]  ;;  %v15112_v53 = vld [vmem:[#allocation17 + $0x274] sm:$0xf0] }
 0x4cd   :  { %8552 = vmatpush.bf16.msra.mxu2 %v12859_v37  ;;  %v13287_v37 = vor.u32 %v15141_v40, %v13284_v34  ;;  %8566 = vmatmul.bf16.vlgmr.msra.gmra.mxu3 %v16261_v18 }
 0x4ce   :  { %8610 = vmatpush.bf16.msrb.mxu3 %v13611_v19  ;;  %v13226_v19 = vld [vmem:[#allocation17 + $0x2e8] sm:$0xf] }
 0x4cf   :  { %8523 = vmatpush.bf16.msra.mxu0 %v13671_v27 }
 0x4d0   :  { %8553 = vmatmul.bf16.vlgmr.msra.gmra.mxu2 %v16257_v58  ;;  %8484 = vmatpush.bf16.msrb.mxu1 %v13287_v37  ;;  %v8359_v34 = vpop.f32.mrf.mxu3  ;;  %v15124_v37 = vld [vmem:[#allocation17 + $0x2d4] sm:$0xf0]  ;;  %v6760_v11 = vpop.f32.mrf.mxu0 }
 0x4d1   :  { %8597 = vmatpush.bf16.msrb.mxu2 %v13483_v22  ;;  %v13419_v22 = vor.u32 %v15176_v5, %v13418_v39  ;;  %v13371_v39 = vor.u32 %v15164_v15, %v13370_v46  ;;  %v13210_v5 = vld [vmem:[#allocation17 + $0x2c8] sm:$0xf]  ;;  %v15086_v15 = vld [vmem:[#allocation17 + $0x1ac] sm:$0xf] }
 0x4d2   :  { %8611 = vmatpush.bf16.msrb.mxu3 %v13595_v3  ;;  %v15062_v3 = vld [vmem:[#allocation17 + $0xec] sm:$0xf]  ;;  %v13211_v55 = vor.u32 %v15124_v37, %v13210_v5  ;;  %v12892_v5 = vld [vmem:[#allocation17 + $0x58] sm:$0xf0] }
 0x4d3   :  { %v8346_v62 = vpop.f32.mrf.mxu2  ;;  %8524 = vmatpush.bf16.msra.mxu0 %v13655_v60  ;;  %v6721_v47 = vpop.f32.mrf.mxu1  ;;  %v15120_v60 = vld [vmem:[#allocation17 + $0x2b4] sm:$0xf0]  ;;  %v15078_v11 = vld [vmem:[#allocation17 + $0x16c] sm:$0xf] }
 0x4d4   :  { %8485 = vmatpush.bf16.msrb.mxu1 %v13271_v25  ;;  %v8347_v35 = vadd.f32 %v8346_v62, %v7049_v32  ;;  %v13194_v25 = vld [vmem:[#allocation17 + $0x2a8] sm:$0xf]  ;;  %v6707_v32 = vadd.f32 %v16324_v8, %v16312_v59  ;;  %v13068_v59 = vld [vmem:[#allocation17 + $0x1b8] sm:$0xf0]  ;;  %v15046_v8 = vld [vmem:[#allocation17 + $0x6c] sm:$0xf] }
 0x4d5   :  { %8598 = vmatpush.bf16.msrb.mxu2 %v13467_v24  ;;  %v15133_v24 = vld [vmem:[#allocation17 + $0x324] sm:$0xf]  ;;  %v13195_v62 = vor.u32 %v15120_v60, %v13194_v25  ;;  %v15038_v47 = vld [vmem:[#allocation17 + $0x2c] sm:$0xf] }
 0x4d6   :  { %8612 = vmatpush.bf16.msrb.mxu3 %v13579_v61  ;;  %v13255_v14 = vor.u32 %v15133_v24, %v13252_v0  ;;  %v16341_v27 = vadd.f32 %v8359_v34, %v8347_v35  ;;  %v13514_v61 = vld [vmem:[#allocation17 + $0x528] sm:$0xf]  ;;  %v15054_v24 = vld [vmem:[#allocation17 + $0xac] sm:$0xf]  ;;  %v12940_v0 = vld [vmem:[#allocation17 + $0xb8] sm:$0xf0]  ;;  %v13071_v35 = vor.u32 %v15086_v15, %v13068_v59 }
 0x4d7   :  { %8525 = vmatpush.bf16.msra.mxu0 %v13639_v23  ;;  %v12943_v9 = vor.u32 %v15054_v24, %v12940_v0  ;;  %v15082_v34 = vld [vmem:[#allocation17 + $0x18c] sm:$0xf]  ;;  %v13039_v0 = vor.u32 %v15078_v11, %v13036_v1  ;;  %v13452_v1 = vld [vmem:[#allocation17 + $0x4b8] sm:$0xf0] }
 0x4d8   :  { %8486 = vmatpush.bf16.msrb.mxu1 %v13255_v14  ;;  %v8361_v12 = vpop.f32.mrf.mxu3  ;;  %v15116_v14 = vld [vmem:[#allocation17 + $0x294] sm:$0xf0]  ;;  %v15182_v11 = vld [vmem:[#allocation17 + $0x4ac] sm:$0xf] }
 0x4d9   :  { %8599 = vmatpush.bf16.msrb.mxu2 %v13451_v26  ;;  %v15128_v26 = vld [vmem:[#allocation17 + $0x2f4] sm:$0xf0]  ;;  %v13179_v2 = vor.u32 %v15116_v14, %v13178_v21  ;;  %v13738_v12 = vld [vmem:[#allocation17 + $0x6e8] sm:$0xf]  ;;  %v15074_v21 = vld [vmem:[#allocation17 + $0x14c] sm:$0xf] }
 0x4da   :  { %8613 = vmatpush.bf16.msrb.mxu3 %v13563_v49  ;;  %v13227_v40 = vor.u32 %v15128_v26, %v13226_v19  ;;  %v15196_v49 = vld [vmem:[#allocation17 + $0x514] sm:$0xf0]  ;;  %v13084_v19 = vld [vmem:[#allocation17 + $0x1d8] sm:$0xf0]  ;;  %v15050_v26 = vld [vmem:[#allocation17 + $0x8c] sm:$0xf] }
 0x4db   :  { %v8348_v10 = vpop.f32.mrf.mxu2  ;;  %8526 = vmatpush.bf16.msra.mxu0 %v13623_v4  ;;  %v13499_v52 = vor.u32 %v15196_v49, %v13498_v56  ;;  %v13087_v29 = vor.u32 %v15090_v63, %v13084_v19  ;;  %v15100_v49 = vld [vmem:[#allocation17 + $0x214] sm:$0xf0]  ;;  %v15034_v14 = vld [vmem:[#allocation17 + $0xc] sm:$0xf] }
 0x4dc   :  { %8487 = vmatpush.bf16.msrb.mxu1 %v13239_v30  ;;  %v12908_v30 = vld [vmem:[#allocation17 + $0x78] sm:$0xf0]  ;;  %v15190_v63 = vld [vmem:[#allocation17 + $0x4ec] sm:$0xf] }
 0x4dd   :  { %8600 = vmatpush.bf16.msrb.mxu2 %v13435_v33  ;;  %v12972_v33 = vld [vmem:[#allocation17 + $0xf8] sm:$0xf0] }
 0x4de   :  { %8614 = vmatpush.bf16.msrb.mxu3 %v13547_v50  ;;  %v12975_v54 = vor.u32 %v15062_v3, %v12972_v33  ;;  %8527 = vmatmul.bf16.vlgmr.msra.gmra.mxu0 %v16326_v44  ;;  %v12924_v50 = vld [vmem:[#allocation17 + $0x98] sm:$0xf0]  ;;  %v13163_v3 = vor.u32 %v15112_v53, %v13162_v42  ;;  %v15108_v33 = vld [vmem:[#allocation17 + $0x254] sm:$0xf0]  ;;  %v13844_v53 = vld [vmem:[#allocation17 + $0x7d0] sm:$0xf0] }
 0x4df   :  { %8571 = vmatpush.bf16.msrb.mxu0 %v13227_v40  ;;  %v12927_v46 = vor.u32 %v15050_v26, %v12924_v50  ;;  %v12911_v40 = vor.u32 %v15046_v8, %v12908_v30  ;;  %v15281_v50 = vld [vmem:[#allocation17 + $0x7c4] sm:$0xf]  ;;  %v15070_v8 = vld [vmem:[#allocation17 + $0x12c] sm:$0xf]  ;;  %v13004_v30 = vld [vmem:[#allocation17 + $0x138] sm:$0xf0] }
 0x4e1   :  { %8601 = vmatpush.bf16.msrb.mxu2 %v13419_v22  ;;  %v15200_v22 = vld [vmem:[#allocation17 + $0x534] sm:$0xf0] }
 0x4e2   :  { %8615 = vmatpush.bf16.msrb.mxu3 %v13531_v36  ;;  %v13515_v17 = vor.u32 %v15200_v22, %v13514_v61  ;;  %v13052_v36 = vld [vmem:[#allocation17 + $0x198] sm:$0xf0] }
 0x4e3   :  { %8572 = vmatpush.bf16.msrb.mxu0 %v13211_v55  ;;  %v13055_v61 = vor.u32 %v15082_v34, %v13052_v36  ;;  %v12876_v55 = vld [vmem:[#allocation17 + $0x38] sm:$0xf0]  ;;  %v15277_v34 = vld [vmem:[#allocation17 + $0x7a4] sm:$0xf]  ;;  %v13007_v36 = vor.u32 %v15070_v8, %v13004_v30  ;;  %v15210_v8 = vld [vmem:[#allocation17 + $0x58c] sm:$0xf] }
 0x4e4   :  { %v13564_v30 = vld [vmem:[#allocation17 + $0x598] sm:$0xf0] }
 0x4e5   :  { %8602 = vmatpush.bf16.msrb.mxu2 %v13403_v48  ;;  %v15094_v48 = vld [vmem:[#allocation17 + $0x1ec] sm:$0xf] }
 0x4e6   :  { %8616 = vmatpush.bf16.msrb.mxu3 %v13515_v17  ;;  %v13103_v23 = vor.u32 %v15094_v48, %v13100_v7  ;;  %v15285_v48 = vld [vmem:[#allocation17 + $0x7e4] sm:$0xf]  ;;  %v13860_v7 = vld [vmem:[#allocation17 + $0x7f0] sm:$0xf0] }
 0x4e7   :  { %8573 = vmatpush.bf16.msrb.mxu0 %v13195_v62  ;;  %v12879_v62 = vor.u32 %v15038_v47, %v12876_v55  ;;  %v13863_v19 = vor.u32 %v15285_v48, %v13860_v7  ;;  %v13455_v48 = vor.u32 %v15182_v11, %v13452_v1  ;;  %v15218_v7 = vld [vmem:[#allocation17 + $0x5cc] sm:$0xf]  ;;  %v15257_v11 = vld [vmem:[#allocation17 + $0x704] sm:$0xf]  ;;  %v13748_v1 = vld [vmem:[#allocation17 + $0x710] sm:$0xf0] }
 0x4e9   :  { %8603 = vmatpush.bf16.msrb.mxu2 %v13387_v38  ;;  %v6720_v38 = vadd.f32 %v16339_v51, %v6707_v32  ;;  %v13146_v51 = vld [vmem:[#allocation17 + $0x248] sm:$0xf]  ;;  %v12860_v32 = vld [vmem:[#allocation17 + $0x18] sm:$0xf0] }
 0x4ea   :  { %8617 = vmatpush.bf16.msrb.mxu3 %v13499_v52  ;;  %v13147_v10 = vor.u32 %v15108_v33, %v13146_v51  ;;  %v8372_v25 = vpop.f32.mrf.mxu0  ;;  %v15256_v52 = vld [vmem:[#allocation17 + $0x6f4] sm:$0xf0]  ;;  %v12863_v42 = vor.u32 %v15034_v14, %v12860_v32  ;;  %v13468_v51 = vld [vmem:[#allocation17 + $0x4d8] sm:$0xf0] }
 0x4eb   :  { %v6733_v4 = vadd.f32 %v16321_v13, %v6720_v38  ;;  %8574 = vmatpush.bf16.msrb.mxu0 %v13179_v2  ;;  %v15104_v13 = vld [vmem:[#allocation17 + $0x234] sm:$0xf0]  ;;  %v16355_v56 = vadd.f32 %v8372_v25, %v16341_v27  ;;  %v13484_v27 = vld [vmem:[#allocation17 + $0x4f8] sm:$0xf0]  ;;  %v13739_v26 = vor.u32 %v15256_v52, %v13738_v12 }
 0x4ec   :  { %v13487_v59 = vor.u32 %v15190_v63, %v13484_v27  ;;  %v15240_v14 = vld [vmem:[#allocation17 + $0x674] sm:$0xf0]  ;;  %v13580_v63 = vld [vmem:[#allocation17 + $0x5b8] sm:$0xf0]  ;;  %v15174_v27 = vld [vmem:[#allocation17 + $0x46c] sm:$0xf] }
 0x4ed   :  { %8604 = vmatpush.bf16.msrb.mxu2 %v13371_v39  ;;  %8618 = vmatmul.bf16.vlgmr.msrb.gmra.mxu3 %v16296_v16  ;;  %v15042_v39 = vld [vmem:[#allocation17 + $0x4c] sm:$0xf]  ;;  %v6746_v37 = vadd.f32 %v16328_v45, %v6733_v4  ;;  %v13114_v45 = vld [vmem:[#allocation17 + $0x208] sm:$0xf] }
 0x4ee   :  { %8662 = vmatpush.bf16.msra.mxu3 %v13103_v23  ;;  %v12895_v22 = vor.u32 %v15042_v39, %v12892_v5  ;;  %v13828_v39 = vld [vmem:[#allocation17 + $0x7b0] sm:$0xf0]  ;;  %v13706_v5 = vld [vmem:[#allocation17 + $0x6a8] sm:$0xf] }
 0x4ef   :  { %8575 = vmatpush.bf16.msrb.mxu0 %v13163_v3  ;;  %v6759_v17 = vadd.f32 %v16337_v41, %v6746_v37  ;;  %v13020_v41 = vld [vmem:[#allocation17 + $0x158] sm:$0xf0]  ;;  %v15186_v3 = vld [vmem:[#allocation17 + $0x4cc] sm:$0xf]  ;;  %v15248_v37 = vld [vmem:[#allocation17 + $0x6b4] sm:$0xf0]  ;;  %v13831_v47 = vor.u32 %v15277_v34, %v13828_v39 }
 0x4f0   :  { %8605 = vmatmul.bf16.vlgmr.msrb.gmra.mxu2 %v16278_v31  ;;  %v13023_v2 = vor.u32 %v15074_v21, %v13020_v41  ;;  %v13707_v55 = vor.u32 %v15248_v37, %v13706_v5  ;;  %v15269_v21 = vld [vmem:[#allocation17 + $0x764] sm:$0xf]  ;;  %v13796_v41 = vld [vmem:[#allocation17 + $0x770] sm:$0xf0]  ;;  %v15232_v34 = vld [vmem:[#allocation17 + $0x634] sm:$0xf0] }
 0x4f1   :  { %8649 = vmatpush.bf16.msra.mxu2 %v12975_v54  ;;  %v13130_v54 = vld [vmem:[#allocation17 + $0x228] sm:$0xf]  ;;  %v15206_v5 = vld [vmem:[#allocation17 + $0x56c] sm:$0xf] }
 0x4f2   :  { %8663 = vmatpush.bf16.msra.mxu3 %v13087_v29  ;;  %v13131_v60 = vor.u32 %v15104_v13, %v13130_v54  ;;  %v13722_v29 = vld [vmem:[#allocation17 + $0x6c8] sm:$0xf]  ;;  %v8374_v4 = vpop.f32.mrf.mxu0  ;;  %v15066_v54 = vld [vmem:[#allocation17 + $0x10c] sm:$0xf]  ;;  %v12988_v13 = vld [vmem:[#allocation17 + $0x118] sm:$0xf0] }
 0x4f3   :  { %v16351_v28 = vpop.f32.mrf.mxu2  ;;  %8576 = vmatpush.bf16.msrb.mxu0 %v13147_v10  ;;  %v13471_v10 = vor.u32 %v15186_v3, %v13468_v51  ;;  %v12991_v25 = vor.u32 %v15066_v54, %v12988_v13  ;;  %v15170_v4 = vld [vmem:[#allocation17 + $0x44c] sm:$0xf]  ;;  %v13404_v3 = vld [vmem:[#allocation17 + $0x458] sm:$0xf0] }
 0x4f4   :  { %v13407_v39 = vor.u32 %v15170_v4, %v13404_v3  ;;  %v15166_v54 = vld [vmem:[#allocation17 + $0x42c] sm:$0xf]  ;;  %v13388_v13 = vld [vmem:[#allocation17 + $0x438] sm:$0xf0]  ;;  %v15152_v3 = vld [vmem:[#allocation17 + $0x3b4] sm:$0xf0] }
 0x4f5   :  { %8650 = vmatpush.bf16.msra.mxu2 %v12959_v57  ;;  %v6771_v57 = vpop.f32.mrf.mxu1 }
 0x4f6   :  { %8664 = vmatpush.bf16.msra.mxu3 %v13071_v35  ;;  %v6772_v24 = vadd.f32 %v6771_v57, %v6759_v17  ;;  %v13847_v35 = vor.u32 %v15281_v50, %v13844_v53  ;;  %v15273_v17 = vld [vmem:[#allocation17 + $0x784] sm:$0xf]  ;;  %v15244_v57 = vld [vmem:[#allocation17 + $0x694] sm:$0xf0]  ;;  %v13658_v53 = vld [vmem:[#allocation17 + $0x648] sm:$0xf] }
 0x4f7   :  { %8577 = vmatpush.bf16.msrb.mxu0 %v13131_v60  ;;  %v13812_v60 = vld [vmem:[#allocation17 + $0x790] sm:$0xf0] }
 0x4f8   :  { %v6782_v23 = vmax.f32 %v6772_v24, 0.0  ;;  %v13596_v24 = vld [vmem:[#allocation17 + $0x5d8] sm:$0xf0]  ;;  %v13815_v12 = vor.u32 %v15273_v17, %v13812_v60  ;;  %v15228_v17 = vld [vmem:[#allocation17 + $0x614] sm:$0xf0] }
 0x4f9   :  { %8651 = vmatpush.bf16.msra.mxu2 %v12943_v9  ;;  %v13115_v9 = vor.u32 %v15100_v49, %v13114_v45  ;;  %v13690_v45 = vld [vmem:[#allocation17 + $0x688] sm:$0xf]  ;;  %v13599_v32 = vor.u32 %v15218_v7, %v13596_v24  ;;  %v15160_v60 = vld [vmem:[#allocation17 + $0x3f4] sm:$0xf0]  ;;  %v15126_v7 = vld [vmem:[#allocation17 + $0x2ec] sm:$0xf] }
 0x4fa   :  { %8665 = vmatpush.bf16.msra.mxu3 %v13055_v61  ;;  %v16357_v38 = vpack.c.bf16 %v6782_v23, %v6782_v23  ;;  %v15222_v61 = vld [vmem:[#allocation17 + $0x5ec] sm:$0xf]  ;;  %v13691_v52 = vor.u32 %v15244_v57, %v13690_v45  ;;  %v13228_v24 = vld [vmem:[#allocation17 + $0x2f8] sm:$0xf0] }
 0x4fb   :  { %v8400_v15 = vpop.f32.mrf.mxu2  ;;  %8578 = vmatpush.bf16.msrb.mxu0 %v13115_v9  ;;  %v15214_v9 = vld [vmem:[#allocation17 + $0x5ac] sm:$0xf] }
 0x4fc   :  { %8436 = vmatmul.bf16.vlgmr.msra.gmra.mxu1 %v16357_v38  ;;  %v13583_v15 = vor.u32 %v15214_v9, %v13580_v63 }
 0x4fd   :  { %8652 = vmatpush.bf16.msra.mxu2 %v12927_v46  ;;  %v15252_v46 = vld [vmem:[#allocation17 + $0x6d4] sm:$0xf0]  ;;  %8532 = vmatpush.bf16.msra.mxu1 %v13863_v19  ;;  %v6773_v33 = vpop.f32.mrf.mxu1  ;;  %v13420_v19 = vld [vmem:[#allocation17 + $0x478] sm:$0xf0] }
 0x4fe   :  { %8666 = vmatpush.bf16.msra.mxu3 %v13039_v0  ;;  %8579 = vmatmul.bf16.vlgmr.msrb.gmra.mxu0 %v16285_v20  ;;  %v15178_v0 = vld [vmem:[#allocation17 + $0x48c] sm:$0xf] }
 0x4ff   :  { %8623 = vmatpush.bf16.msra.mxu0 %v13739_v26  ;;  %v13799_v26 = vor.u32 %v15269_v21, %v13796_v41  ;;  %v13751_v41 = vor.u32 %v15257_v11, %v13748_v1  ;;  %v15144_v11 = vld [vmem:[#allocation17 + $0x374] sm:$0xf0]  ;;  %v15110_v1 = vld [vmem:[#allocation17 + $0x26c] sm:$0xf] }
 0x501   :  { %8653 = vmatpush.bf16.msra.mxu2 %v12911_v40  ;;  %v13723_v40 = vor.u32 %v15252_v46, %v13722_v29  ;;  %8533 = vmatpush.bf16.msra.mxu1 %v13847_v35  ;;  %v15236_v29 = vld [vmem:[#allocation17 + $0x654] sm:$0xf0]  ;;  %v16363_v46 = vpop.f32.mrf.mxu3  ;;  %v13764_v35 = vld [vmem:[#allocation17 + $0x730] sm:$0xf0] }
 0x502   :  { %8667 = vmatpush.bf16.msra.mxu3 %v13023_v2  ;;  %v15265_v2 = vld [vmem:[#allocation17 + $0x744] sm:$0xf]  ;;  %v13659_v33 = vor.u32 %v15236_v29, %v13658_v53 }
 0x503   :  { %8624 = vmatpush.bf16.msra.mxu0 %v13723_v40  ;;  %v13642_v40 = vld [vmem:[#allocation17 + $0x628] sm:$0xf] }
 0x505   :  { %8654 = vmatpush.bf16.msra.mxu2 %v12895_v22  ;;  %v13612_v22 = vld [vmem:[#allocation17 + $0x5f8] sm:$0xf0]  ;;  %8534 = vmatpush.bf16.msra.mxu1 %v13831_v47  ;;  %v13626_v47 = vld [vmem:[#allocation17 + $0x608] sm:$0xf] }
 0x506   :  { %8668 = vmatpush.bf16.msra.mxu3 %v13007_v36  ;;  %v13615_v49 = vor.u32 %v15222_v61, %v13612_v22  ;;  %v13567_v36 = vor.u32 %v15210_v8, %v13564_v30  ;;  %v13643_v22 = vor.u32 %v15232_v34, %v13642_v40  ;;  %v13322_v8 = vld [vmem:[#allocation17 + $0x3a8] sm:$0xf] }
 0x507   :  { %8625 = vmatpush.bf16.msra.mxu0 %v13707_v55  ;;  %v13323_v40 = vor.u32 %v15152_v3, %v13322_v8 }
 0x509   :  { %8655 = vmatpush.bf16.msra.mxu2 %v12879_v62  ;;  %v13436_v62 = vld [vmem:[#allocation17 + $0x498] sm:$0xf0]  ;;  %8535 = vmatpush.bf16.msra.mxu1 %v13815_v12  ;;  %v8413_v57 = vpop.f32.mrf.mxu3  ;;  %v15162_v12 = vld [vmem:[#allocation17 + $0x40c] sm:$0xf] }
 0x50a   :  { %8669 = vmatpush.bf16.msra.mxu3 %v12991_v25  ;;  %v13439_v23 = vor.u32 %v15178_v0, %v13436_v62  ;;  %v13354_v25 = vld [vmem:[#allocation17 + $0x3e8] sm:$0xf]  ;;  %v15202_v0 = vld [vmem:[#allocation17 + $0x54c] sm:$0xf]  ;;  %v13532_v62 = vld [vmem:[#allocation17 + $0x558] sm:$0xf0] }
 0x50b   :  { %8626 = vmatpush.bf16.msra.mxu0 %v13691_v52  ;;  %v8385_v55 = vpop.f32.mrf.mxu1  ;;  %v13372_v52 = vld [vmem:[#allocation17 + $0x418] sm:$0xf0]  ;;  %v13535_v9 = vor.u32 %v15202_v0, %v13532_v62 }
 0x50c   :  { %8488 = vmatmul.bf16.vlgmr.msrb.gmra.mxu1 %v16303_v6  ;;  %v8386_v45 = vadd.f32 %v8385_v55, %v16355_v56  ;;  %v13355_v56 = vor.u32 %v15160_v60, %v13354_v25  ;;  %v13375_v63 = vor.u32 %v15162_v12, %v13372_v52  ;;  %v15140_v25 = vld [vmem:[#allocation17 + $0x354] sm:$0xf0]  ;;  %v15106_v60 = vld [vmem:[#allocation17 + $0x24c] sm:$0xf]  ;;  %v13132_v0 = vld [vmem:[#allocation17 + $0x238] sm:$0xf0] }
 0x50d   :  { %8656 = vmatpush.bf16.msra.mxu2 %v12863_v42  ;;  %8670 = vmatmul.bf16.vlgmr.msra.gmra.mxu3 %v16261_v18  ;;  %v13780_v42 = vld [vmem:[#allocation17 + $0x750] sm:$0xf0]  ;;  %v15261_v18 = vld [vmem:[#allocation17 + $0x724] sm:$0xf] }
 0x50e   :  { %8714 = vmatpush.bf16.msrb.mxu3 %v13615_v49  ;;  %8536 = vmatpush.bf16.msra.mxu1 %v13799_v26  ;;  %v13783_v51 = vor.u32 %v15265_v2, %v13780_v42  ;;  %v13767_v61 = vor.u32 %v15261_v18, %v13764_v35  ;;  %v8399_v21 = vadd.f32 %v16351_v28, %v8386_v45  ;;  %v13212_v26 = vld [vmem:[#allocation17 + $0x2d8] sm:$0xf0]  ;;  %v15198_v2 = vld [vmem:[#allocation17 + $0x52c] sm:$0xf] }
 0x50f   :  { %v13516_v42 = vld [vmem:[#allocation17 + $0x538] sm:$0xf0]  ;;  %v15194_v18 = vld [vmem:[#allocation17 + $0x50c] sm:$0xf] }
 0x510   :  { %8657 = vmatmul.bf16.vlgmr.msra.gmra.mxu2 %v16257_v58  ;;  %v13674_v58 = vld [vmem:[#allocation17 + $0x668] sm:$0xf]  ;;  %v13519_v4 = vor.u32 %v15198_v2, %v13516_v42  ;;  %v13500_v35 = vld [vmem:[#allocation17 + $0x518] sm:$0xf0] }
 0x511   :  { %8701 = vmatpush.bf16.msrb.mxu2 %v13487_v59  ;;  %v13675_v50 = vor.u32 %v15240_v14, %v13674_v58  ;;  %v13423_v59 = vor.u32 %v15174_v27, %v13420_v19  ;;  %v13627_v58 = vor.u32 %v15228_v17, %v13626_v47  ;;  %v7050_v14 = vperm.slane %v16334_v43, 1  ;;  %v15156_v27 = vld [vmem:[#allocation17 + $0x3d4] sm:$0xf0]  ;;  %v15122_v19 = vld [vmem:[#allocation17 + $0x2cc] sm:$0xf]  ;;  %v8463_v30 = vpop.f32.mrf.mxu3 }
 0x512   :  { %8715 = vmatpush.bf16.msrb.mxu3 %v13599_v32  ;;  %8537 = vmatpush.bf16.msra.mxu1 %v13783_v51  ;;  %v13231_v32 = vor.u32 %v15126_v7, %v13228_v24  ;;  %v15118_v51 = vld [vmem:[#allocation17 + $0x2ac] sm:$0xf]  ;;  %v13164_v47 = vld [vmem:[#allocation17 + $0x278] sm:$0xf0]  ;;  %v15136_v7 = vld [vmem:[#allocation17 + $0x334] sm:$0xf0] }
 0x513   :  { %8627 = vmatpush.bf16.msra.mxu0 %v13675_v50  ;;  %v8450_v37 = vpop.f32.mrf.mxu2  ;;  %v16370_v50 = vadd.f32 %v16363_v46, %v8399_v21  ;;  %v8387_v29 = vpop.f32.mrf.mxu1  ;;  %v13196_v46 = vld [vmem:[#allocation17 + $0x2b8] sm:$0xf0]  ;;  %v13167_v17 = vor.u32 %v15110_v1, %v13164_v47  ;;  %v15102_v24 = vld [vmem:[#allocation17 + $0x22c] sm:$0xf]  ;;  %v13242_v21 = vld [vmem:[#allocation17 + $0x308] sm:$0xf] }
 0x514   :  { %v8451_v53 = vadd.f32 %v8450_v37, %v7050_v14  ;;  %v13199_v34 = vor.u32 %v15118_v51, %v13196_v46  ;;  %v15114_v37 = vld [vmem:[#allocation17 + $0x28c] sm:$0xf]  ;;  %v13148_v45 = vld [vmem:[#allocation17 + $0x258] sm:$0xf0]  ;;  %v13135_v52 = vor.u32 %v15102_v24, %v13132_v0  ;;  %v13866_v14 = vld [vmem:[#allocation17 + $0x7e8] sm:$0xf] }
 0x515   :  { %8702 = vmatpush.bf16.msrb.mxu2 %v13471_v10  ;;  %v13548_v10 = vld [vmem:[#allocation17 + $0x578] sm:$0xf0]  ;;  %v13850_v2 = vld [vmem:[#allocation17 + $0x7c8] sm:$0xf]  ;;  %v15284_v29 = vld [vmem:[#allocation17 + $0x7d4] sm:$0xf0] }
 0x516   :  { %8716 = vmatpush.bf16.msrb.mxu3 %v13583_v15  ;;  %v13551_v49 = vor.u32 %v15206_v5, %v13548_v10  ;;  %8538 = vmatpush.bf16.msra.mxu1 %v13767_v61  ;;  %v15148_v5 = vld [vmem:[#allocation17 + $0x394] sm:$0xf0]  ;;  %v13180_v10 = vld [vmem:[#allocation17 + $0x298] sm:$0xf0]  ;;  %v13290_v61 = vld [vmem:[#allocation17 + $0x368] sm:$0xf]  ;;  %v13851_v3 = vor.u32 %v15284_v29, %v13850_v2 }
 0x517   :  { %8628 = vmatpush.bf16.msra.mxu0 %v13659_v33  ;;  %v16372_v33 = vadd.f32 %v8463_v30, %v8451_v53  ;;  %v13291_v55 = vor.u32 %v15144_v11, %v13290_v61  ;;  %v13922_v30 = vld [vmem:[#allocation20 + $0x60] sm:$0xf]  ;;  %v13834_v46 = vld [vmem:[#allocation17 + $0x7a8] sm:$0xf]  ;;  %v15276_v61 = vld [vmem:[#allocation17 + $0x794] sm:$0xf0] }
 0x518   :  { %v13692_v11 = vld [vmem:[#allocation17 + $0x698] sm:$0xf0]  ;;  %v13906_v1 = vld [vmem:[#allocation20 + $0x40] sm:$0xf]  ;;  %v15298_v47 = vld [vmem:[#allocation20 + $0x44] sm:$0xf0] }
 0x519   :  { %8703 = vmatpush.bf16.msrb.mxu2 %v13455_v48  ;;  %v13391_v48 = vor.u32 %v15166_v54, %v13388_v13  ;;  %v13183_v13 = vor.u32 %v15114_v37, %v13180_v10  ;;  %v13818_v10 = vld [vmem:[#allocation17 + $0x788] sm:$0xf]  ;;  %v15292_v2 = vld [vmem:[#allocation20 + $0x14] sm:$0xf0] }
 0x51a   :  { %8717 = vmatpush.bf16.msrb.mxu3 %v13567_v36  ;;  %8539 = vmatpush.bf16.msra.mxu1 %v13751_v41  ;;  %v13306_v36 = vld [vmem:[#allocation17 + $0x388] sm:$0xf]  ;;  %v15132_v41 = vld [vmem:[#allocation17 + $0x314] sm:$0xf0] }
 0x51b   :  { %8629 = vmatpush.bf16.msra.mxu0 %v13643_v22  ;;  %v8452_v28 = vpop.f32.mrf.mxu2  ;;  %v13307_v54 = vor.u32 %v15148_v5, %v13306_v36  ;;  %v8465_v22 = vpop.f32.mrf.mxu3  ;;  %v13914_v36 = vld [vmem:[#allocation20 + $0x50] sm:$0xf]  ;;  %v13786_v0 = vld [vmem:[#allocation17 + $0x748] sm:$0xf] }
 0x51c   :  { %v15242_v22 = vld [vmem:[#allocation17 + $0x68c] sm:$0xf] }
 0x51d   :  { %8704 = vmatpush.bf16.msrb.mxu2 %v13439_v23  ;;  %v13338_v23 = vld [vmem:[#allocation17 + $0x3c8] sm:$0xf]  ;;  %8540 = vmatmul.bf16.vlgmr.msra.gmra.mxu1 %v16357_v38 }
 0x51e   :  { %8718 = vmatpush.bf16.msrb.mxu3 %v13551_v49  ;;  %8584 = vmatpush.bf16.msrb.mxu1 %v13355_v56  ;;  %v13339_v15 = vor.u32 %v15156_v27, %v13338_v23  ;;  %v13151_v49 = vor.u32 %v15106_v60, %v13148_v45  ;;  %v15288_v56 = vld [vmem:[#allocation17 + $0x7f4] sm:$0xf0]  ;;  %v13740_v23 = vld [vmem:[#allocation17 + $0x6f8] sm:$0xf0]  ;;  %v13930_v27 = vld [vmem:[#allocation20 + $0x70] sm:$0xf] }
 0x51f   :  { %8630 = vmatpush.bf16.msra.mxu0 %v13627_v58  ;;  %v13116_v58 = vld [vmem:[#allocation17 + $0x218] sm:$0xf0]  ;;  %v15272_v60 = vld [vmem:[#allocation17 + $0x774] sm:$0xf0]  ;;  %v15238_v45 = vld [vmem:[#allocation17 + $0x66c] sm:$0xf] }
 0x521   :  { %8705 = vmatpush.bf16.msrb.mxu2 %v13423_v59  ;;  %v13215_v59 = vor.u32 %v15122_v19, %v13212_v26  ;;  %v15304_v19 = vld [vmem:[#allocation20 + $0x74] sm:$0xf0]  ;;  %v13867_v26 = vor.u32 %v15288_v56, %v13866_v14 }
 0x522   :  { %8719 = vmatpush.bf16.msrb.mxu3 %v13535_v9  ;;  %8631 = vmatmul.bf16.vlgmr.msra.gmra.mxu0 %v16326_v44  ;;  %v13243_v9 = vor.u32 %v15132_v41, %v13242_v21  ;;  %v13931_v42 = vor.u32 %v15304_v19, %v13930_v27  ;;  %v15234_v21 = vld [vmem:[#allocation17 + $0x64c] sm:$0xf]  ;;  %v13660_v41 = vld [vmem:[#allocation17 + $0x658] sm:$0xf0] }
 0x523   :  { %8675 = vmatpush.bf16.msrb.mxu0 %v13231_v32  ;;  %8585 = vmatpush.bf16.msrb.mxu1 %v13339_v15  ;;  %v15254_v32 = vld [vmem:[#allocation17 + $0x6ec] sm:$0xf]  ;;  %v13644_v19 = vld [vmem:[#allocation17 + $0x638] sm:$0xf0] }
 0x524   :  { %v13743_v28 = vor.u32 %v15254_v32, %v13740_v23  ;;  %v15250_v15 = vld [vmem:[#allocation17 + $0x6cc] sm:$0xf]  ;;  %v13663_v32 = vor.u32 %v15234_v21, %v13660_v41  ;;  %v13770_v23 = vld [vmem:[#allocation17 + $0x728] sm:$0xf] }
 0x525   :  { %8706 = vmatpush.bf16.msrb.mxu2 %v13407_v39  ;;  %v13503_v39 = vor.u32 %v15194_v18, %v13500_v35  ;;  %v15280_v35 = vld [vmem:[#allocation17 + $0x7b4] sm:$0xf0]  ;;  %v15230_v27 = vld [vmem:[#allocation17 + $0x62c] sm:$0xf] }
 0x526   :  { %8720 = vmatpush.bf16.msrb.mxu3 %v13519_v4  ;;  %v15302_v4 = vld [vmem:[#allocation20 + $0x64] sm:$0xf0]  ;;  %v13835_v5 = vor.u32 %v15280_v35, %v13834_v46  ;;  %v13647_v29 = vor.u32 %v15230_v27, %v13644_v19  ;;  %v13356_v46 = vld [vmem:[#allocation17 + $0x3f8] sm:$0xf0] }
 0x527   :  { %8676 = vmatpush.bf16.msrb.mxu0 %v13215_v59  ;;  %8586 = vmatpush.bf16.msrb.mxu1 %v13323_v40  ;;  %v13724_v59 = vld [vmem:[#allocation17 + $0x6d8] sm:$0xf0]  ;;  %v13923_v18 = vor.u32 %v15302_v4, %v13922_v30  ;;  %v15246_v40 = vld [vmem:[#allocation17 + $0x6ac] sm:$0xf] }
 0x528   :  { %v13727_v51 = vor.u32 %v15250_v15, %v13724_v59  ;;  %v13754_v15 = vld [vmem:[#allocation17 + $0x708] sm:$0xf]  ;;  %v15226_v30 = vld [vmem:[#allocation17 + $0x60c] sm:$0xf]  ;;  %v13628_v4 = vld [vmem:[#allocation17 + $0x618] sm:$0xf0] }
 0x529   :  { %8707 = vmatpush.bf16.msrb.mxu2 %v13391_v48  ;;  %v13258_v48 = vld [vmem:[#allocation17 + $0x328] sm:$0xf]  ;;  %v15142_v19 = vld [vmem:[#allocation17 + $0x36c] sm:$0xf] }
 0x52a   :  { %8721 = vmatpush.bf16.msrb.mxu3 %v13503_v39  ;;  %v13259_v12 = vor.u32 %v15136_v7, %v13258_v48  ;;  %v15300_v39 = vld [vmem:[#allocation20 + $0x54] sm:$0xf0] }
 0x52b   :  { %8677 = vmatpush.bf16.msrb.mxu0 %v13199_v34  ;;  %8587 = vmatpush.bf16.msrb.mxu1 %v13307_v54  ;;  %v13708_v34 = vld [vmem:[#allocation17 + $0x6b8] sm:$0xf0]  ;;  %v13915_v54 = vor.u32 %v15300_v39, %v13914_v36  ;;  %v15290_v36 = vld [vmem:[#allocation20 + $0x4] sm:$0xf0]  ;;  %v15303_v39 = vld [vmem:[#allocation20 + $0x74] sm:$0xf] }
 0x52c   :  { %v13711_v37 = vor.u32 %v15246_v40, %v13708_v34  ;;  %v15296_v48 = vld [vmem:[#allocation20 + $0x34] sm:$0xf0]  ;;  %v13631_v34 = vor.u32 %v15226_v30, %v13628_v4  ;;  %v15138_v4 = vld [vmem:[#allocation17 + $0x34c] sm:$0xf] }
 0x52d   :  { %8708 = vmatpush.bf16.msrb.mxu2 %v13375_v63  ;;  %8722 = vmatmul.bf16.vlgmr.msrb.gmra.mxu3 %v16296_v16  ;;  %v15098_v16 = vld [vmem:[#allocation17 + $0x20c] sm:$0xf] }
 0x52e   :  { %v13119_v63 = vor.u32 %v15098_v16, %v13116_v58  ;;  %v13890_v16 = vld [vmem:[#allocation20 + $0x20] sm:$0xf]  ;;  %v15294_v58 = vld [vmem:[#allocation20 + $0x24] sm:$0xf0] }
 0x52f   :  { %8678 = vmatpush.bf16.msrb.mxu0 %v13183_v13  ;;  %8588 = vmatpush.bf16.msrb.mxu1 %v13291_v55  ;;  %v16384_v55 = vpop.f32.mrf.mxu0 }
 0x530   :  { %8709 = vmatmul.bf16.vlgmr.msrb.gmra.mxu2 %v16278_v31  ;;  %v13274_v31 = vld [vmem:[#allocation17 + $0x348] sm:$0xf]  ;;  %v16380_v53 = vpop.f32.mrf.mxu3 }
 0x531   :  { %v13275_v57 = vor.u32 %v15140_v25, %v13274_v31  ;;  %9151 = vmatpush.bf16.msra.mxu2 %v13931_v42  ;;  %v13802_v31 = vld [vmem:[#allocation17 + $0x768] sm:$0xf]  ;;  %v13907_v25 = vor.u32 %v15298_v47, %v13906_v1  ;;  %v13994_v47 = vld [vmem:[#allocation20 + $0xf0] sm:$0xf] }
 0x532   :  { %v13803_v7 = vor.u32 %v15272_v60, %v13802_v31  ;;  %v15301_v31 = vld [vmem:[#allocation20 + $0x64] sm:$0xf] }
 0x533   :  { %8679 = vmatpush.bf16.msrb.mxu0 %v13167_v17  ;;  %v16378_v62 = vpop.f32.mrf.mxu2  ;;  %8589 = vmatpush.bf16.msrb.mxu1 %v13275_v57  ;;  %v13695_v17 = vor.u32 %v15242_v22, %v13692_v11  ;;  %v13676_v57 = vld [vmem:[#allocation17 + $0x678] sm:$0xf0] }
 0x534   :  { %v13679_v24 = vor.u32 %v15238_v45, %v13676_v57  ;;  %v13340_v22 = vld [vmem:[#allocation17 + $0x3d8] sm:$0xf0]  ;;  %v15150_v57 = vld [vmem:[#allocation17 + $0x3ac] sm:$0xf] }
 0x535   :  { %9152 = vmatpush.bf16.msra.mxu2 %v13923_v18  ;;  %v13874_v18 = vld [vmem:[#allocation20] sm:$0xf] }
 0x537   :  { %8680 = vmatpush.bf16.msrb.mxu0 %v13151_v49  ;;  %8590 = vmatpush.bf16.msrb.mxu1 %v13259_v12  ;;  %v13898_v49 = vld [vmem:[#allocation20 + $0x30] sm:$0xf]  ;;  %v8426_v14 = vpop.f32.mrf.mxu0 }
 0x538   :  { %v8517_v13 = vpop.f32.mrf.mxu3  ;;  %v13899_v12 = vor.u32 %v15296_v48, %v13898_v49  ;;  %v13324_v49 = vld [vmem:[#allocation17 + $0x3b8] sm:$0xf0]  ;;  %v13986_v48 = vld [vmem:[#allocation20 + $0xe0] sm:$0xf] }
 0x539   :  { %9153 = vmatpush.bf16.msra.mxu2 %v13915_v54  ;;  %v13875_v54 = vor.u32 %v15290_v36, %v13874_v18  ;;  %v15293_v18 = vld [vmem:[#allocation20 + $0x24] sm:$0xf] }
 0x53b   :  { %8681 = vmatpush.bf16.msrb.mxu0 %v13135_v52  ;;  %v8504_v8 = vpop.f32.mrf.mxu2  ;;  %8591 = vmatpush.bf16.msrb.mxu1 %v13243_v9  ;;  %v15268_v52 = vld [vmem:[#allocation17 + $0x754] sm:$0xf0]  ;;  %v13891_v9 = vor.u32 %v15294_v58, %v13890_v16  ;;  %v15146_v16 = vld [vmem:[#allocation17 + $0x38c] sm:$0xf]  ;;  %v13308_v58 = vld [vmem:[#allocation17 + $0x398] sm:$0xf0] }
 0x53c   :  { %v13787_v56 = vor.u32 %v15268_v52, %v13786_v0  ;;  %v15260_v8 = vld [vmem:[#allocation17 + $0x714] sm:$0xf0]  ;;  %v13327_v52 = vor.u32 %v15150_v57, %v13324_v49  ;;  %v15289_v57 = vld [vmem:[#allocation20 + $0x4] sm:$0xf]  ;;  %v13876_v49 = vld [vmem:[#allocation20 + $0x8] sm:$0xf0] }
 0x53d   :  { %9154 = vmatpush.bf16.msra.mxu2 %v13907_v25  ;;  %v13755_v40 = vor.u32 %v15260_v8, %v13754_v15  ;;  %v13924_v25 = vld [vmem:[#allocation20 + $0x68] sm:$0xf0]  ;;  %v15299_v0 = vld [vmem:[#allocation20 + $0x54] sm:$0xf]  ;;  %v13900_v15 = vld [vmem:[#allocation20 + $0x38] sm:$0xf0] }
 0x53e   :  { %8592 = vmatmul.bf16.vlgmr.msrb.gmra.mxu1 %v16303_v6  ;;  %v13927_v45 = vor.u32 %v15301_v31, %v13924_v25  ;;  %v13244_v31 = vld [vmem:[#allocation17 + $0x318] sm:$0xf0]  ;;  %v15286_v25 = vld [vmem:[#allocation17 + $0x7ec] sm:$0xf] }
 0x53f   :  { %8682 = vmatpush.bf16.msrb.mxu0 %v13119_v63  ;;  %8636 = vmatpush.bf16.msra.mxu1 %v13867_v26  ;;  %v15264_v63 = vld [vmem:[#allocation17 + $0x734] sm:$0xf0]  ;;  %v8476_v35 = vpop.f32.mrf.mxu0 }
 0x540   :  { %v13771_v42 = vor.u32 %v15264_v63, %v13770_v23  ;;  %v15297_v23 = vld [vmem:[#allocation20 + $0x44] sm:$0xf] }
 0x541   :  { %9155 = vmatpush.bf16.msra.mxu2 %v13899_v12  ;;  %v13916_v12 = vld [vmem:[#allocation20 + $0x58] sm:$0xf0] }
 0x542   :  { %8683 = vmatmul.bf16.vlgmr.msrb.gmra.mxu0 %v16285_v20  ;;  %v13819_v20 = vor.u32 %v15276_v61, %v13818_v10  ;;  %v13919_v41 = vor.u32 %v15299_v0, %v13916_v12  ;;  %v15282_v12 = vld [vmem:[#allocation17 + $0x7cc] sm:$0xf] }
 0x543   :  { %8727 = vmatpush.bf16.msra.mxu0 %v13743_v28  ;;  %8637 = vmatpush.bf16.msra.mxu1 %v13851_v3  ;;  %v13882_v28 = vld [vmem:[#allocation20 + $0x10] sm:$0xf]  ;;  %v7051_v3 = vperm.slane %v16334_v43, 2  ;;  %v15154_v43 = vld [vmem:[#allocation17 + $0x3cc] sm:$0xf] }
 0x544   :  { %v13883_v59 = vor.u32 %v15292_v2, %v13882_v28  ;;  %v13970_v28 = vld [vmem:[#allocation20 + $0xc0] sm:$0xf] }
 0x545   :  { %9156 = vmatpush.bf16.msra.mxu2 %v13891_v9  ;;  %v13908_v9 = vld [vmem:[#allocation20 + $0x48] sm:$0xf0] }
 0x546   :  { %v13911_v27 = vor.u32 %v15297_v23, %v13908_v9 }
 0x547   :  { %8728 = vmatpush.bf16.msra.mxu0 %v13727_v51  ;;  %8638 = vmatpush.bf16.msra.mxu1 %v13835_v5  ;;  %v15158_v51 = vld [vmem:[#allocation17 + $0x3ec] sm:$0xf]  ;;  %v13932_v5 = vld [vmem:[#allocation20 + $0x78] sm:$0xf0] }
 0x548   :  { %v13359_v10 = vor.u32 %v15158_v51, %v13356_v46  ;;  %v13935_v13 = vor.u32 %v15303_v39, %v13932_v5  ;;  %v13962_v51 = vld [vmem:[#allocation20 + $0xb0] sm:$0xf]  ;;  %v15312_v46 = vld [vmem:[#allocation20 + $0xb4] sm:$0xf0]  ;;  %v15134_v39 = vld [vmem:[#allocation17 + $0x32c] sm:$0xf] }
 0x549   :  { %9157 = vmatpush.bf16.msra.mxu2 %v13883_v59  ;;  %v13260_v5 = vld [vmem:[#allocation17 + $0x338] sm:$0xf0] }
 0x54b   :  { %8729 = vmatpush.bf16.msra.mxu0 %v13711_v37  ;;  %8639 = vmatpush.bf16.msra.mxu1 %v13819_v20  ;;  %v16388_v37 = vadd.f32 %v8476_v35, %v16372_v33  ;;  %v13343_v33 = vor.u32 %v15154_v43, %v13340_v22  ;;  %v13892_v35 = vld [vmem:[#allocation20 + $0x28] sm:$0xf0]  ;;  %v15291_v43 = vld [vmem:[#allocation20 + $0x14] sm:$0xf]  ;;  %v13884_v22 = vld [vmem:[#allocation20 + $0x18] sm:$0xf0] }
 0x54c   :  { %v13895_v36 = vor.u32 %v15293_v18, %v13892_v35  ;;  %v13804_v18 = vld [vmem:[#allocation17 + $0x778] sm:$0xf0]  ;;  %v15313_v35 = vld [vmem:[#allocation20 + $0xc4] sm:$0xf] }
 0x54d   :  { %9158 = vmatpush.bf16.msra.mxu2 %v13875_v54 }
 0x54f   :  { %8730 = vmatpush.bf16.msra.mxu0 %v13695_v17  ;;  %8640 = vmatpush.bf16.msra.mxu1 %v13803_v7  ;;  %v15320_v17 = vld [vmem:[#allocation20 + $0xf4] sm:$0xf0]  ;;  %v8478_v7 = vpop.f32.mrf.mxu0 }
 0x550   :  { %v8567_v11 = vpop.f32.mrf.mxu3  ;;  %v13995_v60 = vor.u32 %v15320_v17, %v13994_v47  ;;  %v13887_v47 = vor.u32 %v15291_v43, %v13884_v22  ;;  %v15130_v17 = vld [vmem:[#allocation17 + $0x30c] sm:$0xf]  ;;  %v13964_v43 = vld [vmem:[#allocation20 + $0xb8] sm:$0xf0] }
 0x551   :  { %9203 = vmatpush.bf16.msrb.mxu2 %v13935_v13 }
 0x552   :  { %9164 = vmatpush.bf16.msra.mxu3 %v13995_v60  ;;  %v13946_v60 = vld [vmem:[#allocation20 + $0x90] sm:$0xf] }
 0x553   :  { %8731 = vmatpush.bf16.msra.mxu0 %v13679_v24  ;;  %v8554_v26 = vpop.f32.mrf.mxu2  ;;  %8641 = vmatpush.bf16.msra.mxu1 %v13787_v56  ;;  %v15318_v24 = vld [vmem:[#allocation20 + $0xe4] sm:$0xf0]  ;;  %v13978_v56 = vld [vmem:[#allocation20 + $0xd0] sm:$0xf] }
 0x554   :  { %v8555_v61 = vadd.f32 %v8554_v26, %v7051_v3  ;;  %v13987_v21 = vor.u32 %v15318_v24, %v13986_v48  ;;  %v13292_v26 = vld [vmem:[#allocation17 + $0x378] sm:$0xf0]  ;;  %v13247_v48 = vor.u32 %v15130_v17, %v13244_v31  ;;  %v13879_v24 = vor.u32 %v15289_v57, %v13876_v49  ;;  %v15309_v31 = vld [vmem:[#allocation20 + $0xa4] sm:$0xf]  ;;  %v15258_v57 = vld [vmem:[#allocation17 + $0x70c] sm:$0xf] }
 0x555   :  { %9204 = vmatpush.bf16.msrb.mxu2 %v13927_v45  ;;  %v13295_v59 = vor.u32 %v15142_v19, %v13292_v26  ;;  %v13276_v3 = vld [vmem:[#allocation17 + $0x358] sm:$0xf0]  ;;  %v13988_v19 = vld [vmem:[#allocation20 + $0xe8] sm:$0xf0] }
 0x556   :  { %v16390_v20 = vadd.f32 %v8567_v11, %v8555_v61  ;;  %9165 = vmatpush.bf16.msra.mxu3 %v13987_v21  ;;  %v15310_v61 = vld [vmem:[#allocation20 + $0xa4] sm:$0xf0]  ;;  %v13263_v11 = vor.u32 %v15134_v39, %v13260_v5  ;;  %v15308_v45 = vld [vmem:[#allocation20 + $0x94] sm:$0xf0]  ;;  %v13938_v21 = vld [vmem:[#allocation20 + $0x80] sm:$0xf] }
 0x557   :  { %8732 = vmatpush.bf16.msra.mxu0 %v13663_v32  ;;  %8642 = vmatpush.bf16.msra.mxu1 %v13771_v42  ;;  %v15316_v32 = vld [vmem:[#allocation20 + $0xd4] sm:$0xf0]  ;;  %v15314_v42 = vld [vmem:[#allocation20 + $0xc4] sm:$0xf0]  ;;  %v13947_v7 = vor.u32 %v15308_v45, %v13946_v60 }
 0x558   :  { %v8569_v14 = vpop.f32.mrf.mxu3  ;;  %v13979_v63 = vor.u32 %v15316_v32, %v13978_v56  ;;  %v13971_v8 = vor.u32 %v15314_v42, %v13970_v28  ;;  %v15319_v56 = vld [vmem:[#allocation20 + $0xf4] sm:$0xf]  ;;  %v13996_v32 = vld [vmem:[#allocation20 + $0xf8] sm:$0xf0]  ;;  %v15274_v42 = vld [vmem:[#allocation17 + $0x78c] sm:$0xf] }
 0x559   :  { %9205 = vmatpush.bf16.msrb.mxu2 %v13919_v41  ;;  %v15306_v41 = vld [vmem:[#allocation20 + $0x84] sm:$0xf0]  ;;  %v13999_v23 = vor.u32 %v15319_v56, %v13996_v32  ;;  %v13772_v17 = vld [vmem:[#allocation17 + $0x738] sm:$0xf0]  ;;  %v13940_v32 = vld [vmem:[#allocation20 + $0x88] sm:$0xf0] }
 0x55a   :  { %9166 = vmatpush.bf16.msra.mxu3 %v13979_v63  ;;  %v13939_v14 = vor.u32 %v15306_v41, %v13938_v21  ;;  %v13836_v63 = vld [vmem:[#allocation17 + $0x7b8] sm:$0xf0]  ;;  %v14058_v41 = vld [vmem:[#allocation20 + $0x170] sm:$0xf] }
 0x55b   :  { %8733 = vmatpush.bf16.msra.mxu0 %v13647_v29  ;;  %v8556_v1 = vpop.f32.mrf.mxu2  ;;  %8643 = vmatpush.bf16.msra.mxu1 %v13755_v40  ;;  %v16394_v2 = vpop.f32.mrf.mxu0  ;;  %v15295_v29 = vld [vmem:[#allocation20 + $0x34] sm:$0xf]  ;;  %v13279_v40 = vor.u32 %v15138_v4, %v13276_v3  ;;  %v13756_v49 = vld [vmem:[#allocation17 + $0x718] sm:$0xf0] }
 0x55c   :  { %v13903_v30 = vor.u32 %v15295_v29, %v13900_v15  ;;  %v13820_v29 = vld [vmem:[#allocation17 + $0x798] sm:$0xf0]  ;;  %v13759_v21 = vor.u32 %v15258_v57, %v13756_v49  ;;  %v15331_v49 = vld [vmem:[#allocation20 + $0x154] sm:$0xf] }
 0x55d   :  { %9206 = vmatpush.bf16.msrb.mxu2 %v13911_v27  ;;  %v15317_v27 = vld [vmem:[#allocation20 + $0xe4] sm:$0xf] }
 0x55e   :  { %8644 = vmatmul.bf16.vlgmr.msra.gmra.mxu1 %v16357_v38  ;;  %9167 = vmatpush.bf16.msra.mxu3 %v13971_v8  ;;  %v13991_v26 = vor.u32 %v15317_v27, %v13988_v19  ;;  %v13980_v8 = vld [vmem:[#allocation20 + $0xd8] sm:$0xf0] }
 0x55f   :  { %8734 = vmatpush.bf16.msra.mxu0 %v13631_v34  ;;  %8688 = vmatpush.bf16.msrb.mxu1 %v13359_v10  ;;  %v13963_v34 = vor.u32 %v15312_v46, %v13962_v51  ;;  %v13954_v10 = vld [vmem:[#allocation20 + $0xa0] sm:$0xf]  ;;  %v15270_v46 = vld [vmem:[#allocation17 + $0x76c] sm:$0xf] }
 0x560   :  { %v13955_v1 = vor.u32 %v15310_v61, %v13954_v10  ;;  %v13807_v10 = vor.u32 %v15270_v46, %v13804_v18  ;;  %v15311_v61 = vld [vmem:[#allocation20 + $0xb4] sm:$0xf] }
 0x561   :  { %9207 = vmatpush.bf16.msrb.mxu2 %v13903_v30  ;;  %v8425_v30 = vadd.f32 %v16384_v55, %v16370_v50  ;;  %v15266_v55 = vld [vmem:[#allocation17 + $0x74c] sm:$0xf]  ;;  %v13967_v22 = vor.u32 %v15311_v61, %v13964_v43 }
 0x562   :  { %8735 = vmatmul.bf16.vlgmr.msra.gmra.mxu0 %v16326_v44  ;;  %v13311_v44 = vor.u32 %v15146_v16, %v13308_v58  ;;  %9168 = vmatpush.bf16.msra.mxu3 %v13963_v34 }
 0x563   :  { %8689 = vmatpush.bf16.msrb.mxu1 %v13343_v33  ;;  %v8530_v54 = vpop.f32.mrf.mxu0  ;;  %v13868_v33 = vld [vmem:[#allocation17 + $0x7f8] sm:$0xf0] }
 0x564   :  { %v13871_v0 = vor.u32 %v15286_v25, %v13868_v33  ;;  %v13788_v54 = vld [vmem:[#allocation17 + $0x758] sm:$0xf0]  ;;  %v13956_v25 = vld [vmem:[#allocation20 + $0xa8] sm:$0xf0] }
 0x565   :  { %9208 = vmatpush.bf16.msrb.mxu2 %v13895_v36 }
 0x566   :  { %9169 = vmatpush.bf16.msra.mxu3 %v13955_v1  ;;  %v13791_v1 = vor.u32 %v15266_v55, %v13788_v54  ;;  %v14010_v55 = vld [vmem:[#allocation20 + $0x110] sm:$0xf]  ;;  %v15324_v54 = vld [vmem:[#allocation20 + $0x114] sm:$0xf0] }
 0x567   :  { %8690 = vmatpush.bf16.msrb.mxu1 %v13327_v52  ;;  %v13852_v52 = vld [vmem:[#allocation17 + $0x7d8] sm:$0xf0] }
 0x568   :  { %v13855_v9 = vor.u32 %v15282_v12, %v13852_v52 }
 0x569   :  { %9209 = vmatpush.bf16.msrb.mxu2 %v13887_v47  ;;  %v15262_v47 = vld [vmem:[#allocation17 + $0x72c] sm:$0xf] }
 0x56a   :  { %9170 = vmatpush.bf16.msra.mxu3 %v13947_v7  ;;  %v13775_v45 = vor.u32 %v15262_v47, %v13772_v17  ;;  %v13948_v7 = vld [vmem:[#allocation20 + $0x98] sm:$0xf0]  ;;  %v15335_v47 = vld [vmem:[#allocation20 + $0x174] sm:$0xf] }
 0x56b   :  { %8691 = vmatpush.bf16.msrb.mxu1 %v13311_v44  ;;  %v15278_v44 = vld [vmem:[#allocation17 + $0x7ac] sm:$0xf]  ;;  %v14060_v17 = vld [vmem:[#allocation20 + $0x178] sm:$0xf0] }
 0x56c   :  { %v13839_v28 = vor.u32 %v15278_v44, %v13836_v63 }
 0x56d   :  { %9210 = vmatpush.bf16.msrb.mxu2 %v13879_v24  ;;  %v15398_v24 = vld [vmem:[#allocation19] sm:$0xf] }
 0x56e   :  { %9171 = vmatpush.bf16.msra.mxu3 %v13939_v14  ;;  %v15305_v14 = vld [vmem:[#allocation20 + $0x84] sm:$0xf] }
 0x56f   :  { %8692 = vmatpush.bf16.msrb.mxu1 %v13295_v59  ;;  %v15315_v59 = vld [vmem:[#allocation20 + $0xd4] sm:$0xf]  ;;  %v13943_v27 = vor.u32 %v15305_v14, %v13940_v32 }
 0x570   :  { %v16398_v16 = vpop.f32.mrf.mxu3  ;;  %v13983_v4 = vor.u32 %v15315_v59, %v13980_v8  ;;  %v15332_v59 = vld [vmem:[#allocation20 + $0x154] sm:$0xf0]  ;;  %v15327_v14 = vld [vmem:[#allocation20 + $0x134] sm:$0xf] }
 0x572   :  { %9216 = vmatpush.bf16.msrb.mxu3 %v13999_v23 }
 0x573   :  { %v16396_v13 = vpop.f32.mrf.mxu2  ;;  %8693 = vmatpush.bf16.msrb.mxu1 %v13279_v40  ;;  %v13972_v40 = vld [vmem:[#allocation20 + $0xc8] sm:$0xf0] }
 0x574   :  { %v13975_v39 = vor.u32 %v15313_v35, %v13972_v40  ;;  %v14026_v35 = vld [vmem:[#allocation20 + $0x130] sm:$0xf]  ;;  %v15328_v40 = vld [vmem:[#allocation20 + $0x134] sm:$0xf0] }
 0x576   :  { %9217 = vmatpush.bf16.msrb.mxu3 %v13991_v26  ;;  %v14050_v26 = vld [vmem:[#allocation20 + $0x160] sm:$0xf] }
 0x577   :  { %8694 = vmatpush.bf16.msrb.mxu1 %v13263_v11 }
 0x578   :  { %v8621_v15 = vpop.f32.mrf.mxu3 }
 0x579   :  { %v8437_v3 = vpop.f32.mrf.mxu1 }
 0x57a   :  { %v8438_v51 = vadd.f32 %v8437_v3, %v8425_v30  ;;  %9218 = vmatpush.bf16.msrb.mxu3 %v13983_v4  ;;  %v14034_v3 = vld [vmem:[#allocation20 + $0x140] sm:$0xf] }
 0x57b   :  { %v8608_v58 = vpop.f32.mrf.mxu2  ;;  %8695 = vmatpush.bf16.msrb.mxu1 %v13247_v48  ;;  %v8580_v36 = vpop.f32.mrf.mxu0  ;;  %v15307_v48 = vld [vmem:[#allocation20 + $0x94] sm:$0xf] }
 0x57c   :  { %v8753_v34 = vmax.f32 %v8438_v51, 0.0  ;;  %v16404_v5 = vadd.f32 %v8580_v36, %v16390_v20  ;;  %v13959_v20 = vor.u32 %v15309_v31, %v13956_v25  ;;  %v13951_v12 = vor.u32 %v15307_v48, %v13948_v7  ;;  %v15336_v58 = vld [vmem:[#allocation20 + $0x174] sm:$0xf0]  ;;  %v14044_v48 = vld [vmem:[#allocation20 + $0x158] sm:$0xf0] }
 0x57d   :  { %v14059_v56 = vor.u32 %v15336_v58, %v14058_v41  ;;  %v14027_v36 = vor.u32 %v15328_v40, %v14026_v35  ;;  %v14063_v25 = vor.u32 %v15335_v47, %v14060_v17  ;;  %v14047_v7 = vor.u32 %v15331_v49, %v14044_v48  ;;  %v14098_v40 = vld [vmem:[#allocation20 + $0x1c0] sm:$0xf]  ;;  %v15349_v49 = vld [vmem:[#allocation20 + $0x1e4] sm:$0xf]  ;;  %v14116_v48 = vld [vmem:[#allocation20 + $0x1e8] sm:$0xf0] }
 0x57e   :  { %8696 = vmatmul.bf16.vlgmr.msrb.gmra.mxu1 %v16303_v6  ;;  %v13823_v6 = vor.u32 %v15274_v42, %v13820_v29  ;;  %v8757_v50 = vpack.c.bf16 %v8753_v34, %v8753_v34  ;;  %9219 = vmatpush.bf16.msrb.mxu3 %v13975_v39 }
 0x57f   :  { %8740 = vmatpush.bf16.msra.mxu1 %v13871_v0  ;;  %v7052_v0 = vperm.slane %v15398_v24, 3  ;;  %9177 = vmatpush.bf16.msrb.mxu0 %v14059_v56  ;;  %v14028_v56 = vld [vmem:[#allocation20 + $0x138] sm:$0xf0] }
 0x580   :  { %9159 = vmatmul.bf16.vlgmr.msra.gmra.mxu2 %v8757_v50  ;;  %v14031_v32 = vor.u32 %v15327_v14, %v14028_v56  ;;  %v15343_v56 = vld [vmem:[#allocation20 + $0x1b4] sm:$0xf] }
 0x581   :  { %v8439_v11 = vpop.f32.mrf.mxu1 }
 0x582   :  { %9220 = vmatpush.bf16.msrb.mxu3 %v13967_v22  ;;  %v14011_v22 = vor.u32 %v15324_v54, %v14010_v55  ;;  %v14002_v11 = vld [vmem:[#allocation20 + $0x100] sm:$0xf] }
 0x583   :  { %8741 = vmatpush.bf16.msra.mxu1 %v13855_v9  ;;  %v8582_v33 = vpop.f32.mrf.mxu0 }
 0x584   :  { %v15333_v33 = vld [vmem:[#allocation20 + $0x164] sm:$0xf] }
 0x586   :  { %9221 = vmatpush.bf16.msrb.mxu3 %v13959_v20  ;;  %v14052_v20 = vld [vmem:[#allocation20 + $0x168] sm:$0xf0] }
 0x587   :  { %8742 = vmatpush.bf16.msra.mxu1 %v13839_v28  ;;  %v15334_v28 = vld [vmem:[#allocation20 + $0x164] sm:$0xf0]  ;;  %v14055_v57 = vor.u32 %v15333_v33, %v14052_v20  ;;  %v15351_v20 = vld [vmem:[#allocation20 + $0x1f4] sm:$0xf] }
 0x588   :  { %v14051_v29 = vor.u32 %v15334_v28, %v14050_v26  ;;  %v14122_v26 = vld [vmem:[#allocation20 + $0x1f0] sm:$0xf]  ;;  %v15352_v28 = vld [vmem:[#allocation20 + $0x1f4] sm:$0xf0] }
 0x589   :  { %v8489_v52 = vpop.f32.mrf.mxu1 }
 0x58a   :  { %v8490_v9 = vadd.f32 %v8489_v52, %v16388_v37  ;;  %9222 = vmatpush.bf16.msrb.mxu3 %v13951_v12  ;;  %9178 = vmatpush.bf16.msrb.mxu0 %v14051_v29  ;;  %v14042_v37 = vld [vmem:[#allocation20 + $0x150] sm:$0xf]  ;;  %v14036_v12 = vld [vmem:[#allocation20 + $0x148] sm:$0xf0] }
 0x58b   :  { %8743 = vmatpush.bf16.msra.mxu1 %v13823_v6  ;;  %v14043_v30 = vor.u32 %v15332_v59, %v14042_v37  ;;  %v15330_v6 = vld [vmem:[#allocation20 + $0x144] sm:$0xf0]  ;;  %v15321_v59 = vld [vmem:[#allocation20 + $0x104] sm:$0xf] }
 0x58c   :  { %v8503_v42 = vadd.f32 %v16378_v62, %v8490_v9  ;;  %v14035_v46 = vor.u32 %v15330_v6, %v14034_v3  ;;  %v14020_v9 = vld [vmem:[#allocation20 + $0x128] sm:$0xf0]  ;;  %v15350_v3 = vld [vmem:[#allocation20 + $0x1e4] sm:$0xf0] }
 0x58e   :  { %9223 = vmatpush.bf16.msrb.mxu3 %v13943_v27  ;;  %v8516_v8 = vadd.f32 %v16380_v53, %v8503_v42  ;;  %9179 = vmatpush.bf16.msrb.mxu0 %v14043_v30  ;;  %v14018_v53 = vld [vmem:[#allocation20 + $0x120] sm:$0xf]  ;;  %v14012_v27 = vld [vmem:[#allocation20 + $0x118] sm:$0xf0] }
 0x58f   :  { %8744 = vmatpush.bf16.msra.mxu1 %v13807_v10  ;;  %v15326_v10 = vld [vmem:[#allocation20 + $0x124] sm:$0xf0] }
 0x590   :  { %v8671_v44 = vpop.f32.mrf.mxu3  ;;  %9211 = vmatmul.bf16.vlgmr.msrb.gmra.mxu2 %v8757_v50  ;;  %v8529_v51 = vadd.f32 %v16394_v2, %v8516_v8  ;;  %v14019_v50 = vor.u32 %v15326_v10, %v14018_v53 }
 0x591   :  { %v8491_v15 = vpop.f32.mrf.mxu1 }
 0x592   :  { %9180 = vmatpush.bf16.msrb.mxu0 %v14035_v46  ;;  %v14123_v15 = vor.u32 %v15352_v28, %v14122_v26  ;;  %v14106_v46 = vld [vmem:[#allocation20 + $0x1d0] sm:$0xf]  ;;  %v15339_v26 = vld [vmem:[#allocation20 + $0x194] sm:$0xf]  ;;  %v14076_v28 = vld [vmem:[#allocation20 + $0x198] sm:$0xf0] }
 0x593   :  { %8745 = vmatpush.bf16.msra.mxu1 %v13791_v1  ;;  %v8658_v60 = vpop.f32.mrf.mxu2  ;;  %v15322_v1 = vld [vmem:[#allocation20 + $0x104] sm:$0xf0] }
 0x594   :  { %v8659_v23 = vadd.f32 %v8658_v60, %v7052_v0  ;;  %v14003_v31 = vor.u32 %v15322_v1, %v14002_v11  ;;  %v15329_v0 = vld [vmem:[#allocation20 + $0x144] sm:$0xf]  ;;  %v14074_v11 = vld [vmem:[#allocation20 + $0x190] sm:$0xf]  ;;  %v15340_v1 = vld [vmem:[#allocation20 + $0x194] sm:$0xf0] }
 0x595   :  { %v14039_v52 = vor.u32 %v15329_v0, %v14036_v12  ;;  %v14075_v17 = vor.u32 %v15340_v1, %v14074_v11  ;;  %v14108_v0 = vld [vmem:[#allocation20 + $0x1d8] sm:$0xf0]  ;;  %v15357_v11 = vld [vmem:[%s16498_s13 + $0x20] sm:$0xff] }
 0x596   :  { %v16407_v19 = vadd.f32 %v8671_v44, %v8659_v23  ;;  %9181 = vmatpush.bf16.msrb.mxu0 %v14027_v36  ;;  %v15325_v23 = vld [vmem:[#allocation20 + $0x124] sm:$0xf]  ;;  %v15356_v1 = vld [vmem:[%s16498_s13 + $0x18] sm:$0xff] }
 0x597   :  { %8746 = vmatpush.bf16.msra.mxu1 %v13775_v45  ;;  %v14023_v44 = vor.u32 %v15325_v23, %v14020_v9  ;;  %v15341_v9 = vld [vmem:[#allocation20 + $0x1a4] sm:$0xf] }
 0x598   :  { %v8673_v4 = vpop.f32.mrf.mxu3 }
 0x599   :  { %v14114_v4 = vld [vmem:[#allocation20 + $0x1e0] sm:$0xf] }
 0x59a   :  { %9182 = vmatpush.bf16.msrb.mxu0 %v14019_v50  ;;  %v14090_v50 = vld [vmem:[#allocation20 + $0x1b0] sm:$0xf] }
 0x59b   :  { %8747 = vmatpush.bf16.msra.mxu1 %v13759_v21  ;;  %v8660_v63 = vpop.f32.mrf.mxu2 }
 0x59c   :  { %v15323_v63 = vld [vmem:[#allocation20 + $0x114] sm:$0xf] }
 0x59d   :  { %v14015_v37 = vor.u32 %v15323_v63, %v14012_v27 }
 0x59e   :  { %8748 = vmatmul.bf16.vlgmr.msra.gmra.mxu1 %v16357_v38  ;;  %v8541_v38 = vpop.f32.mrf.mxu1  ;;  %9183 = vmatpush.bf16.msrb.mxu0 %v14011_v22 }
 0x59f   :  { %v16413_v62 = vpop.f32.mrf.mxu0  ;;  %v8542_v18 = vadd.f32 %v8541_v38, %v8529_v51  ;;  %9190 = vmatpush.bf16.msrb.mxu1 %v14123_v15  ;;  %v14115_v51 = vor.u32 %v15350_v3, %v14114_v4  ;;  %v15348_v38 = vld [vmem:[#allocation20 + $0x1d4] sm:$0xf0]  ;;  %v14068_v15 = vld [vmem:[#allocation20 + $0x188] sm:$0xf0] }
 0x5a0   :  { %v14107_v35 = vor.u32 %v15348_v38, %v14106_v46 }
 0x5a1   :  { %v8754_v34 = vmax.f32 %v8542_v18, 0.0 }
 0x5a2   :  { %9184 = vmatpush.bf16.msrb.mxu0 %v14003_v31  ;;  %v14066_v31 = vld [vmem:[#allocation20 + $0x180] sm:$0xf] }
 0x5a3   :  { %v8758_v39 = vpack.c.bf16 %v8754_v34, %v8754_v34  ;;  %9191 = vmatpush.bf16.msrb.mxu1 %v14115_v51  ;;  %v15346_v34 = vld [vmem:[#allocation20 + $0x1c4] sm:$0xf0] }
 0x5a5   :  { %9172 = vmatmul.bf16.vlgmr.msra.gmra.mxu3 %v8758_v39 }
 0x5a6   :  { %v8543_v2 = vpop.f32.mrf.mxu1  ;;  %9229 = vmatpush.bf16.msra.mxu0 %v14063_v25  ;;  %v15338_v25 = vld [vmem:[#allocation20 + $0x184] sm:$0xf0] }
 0x5a7   :  { %v8634_v61 = vpop.f32.mrf.mxu0  ;;  %9192 = vmatpush.bf16.msrb.mxu1 %v14107_v35  ;;  %v14082_v2 = vld [vmem:[#allocation20 + $0x1a0] sm:$0xf]  ;;  %v14067_v33 = vor.u32 %v15338_v25, %v14066_v31  ;;  %v15354_v25 = vld [vmem:[%s16498_s13 + $0x8] sm:$0xff] }
 0x5aa   :  { %9230 = vmatpush.bf16.msra.mxu0 %v14055_v57 }
 0x5ae   :  { %9231 = vmatpush.bf16.msra.mxu0 %v14047_v7  ;;  %v14119_v7 = vor.u32 %v15349_v49, %v14116_v48  ;;  %v15363_v49 = vld [vmem:[%s16498_s13 + $0x50] sm:$0xff]  ;;  %v15362_v48 = vld [vmem:[%s16498_s13 + $0x48] sm:$0xff] }
 0x5b0   :  { %v16417_v60 = vpop.f32.mrf.mxu3 }
 0x5b2   :  { %9232 = vmatpush.bf16.msra.mxu0 %v14039_v52  ;;  %v15345_v52 = vld [vmem:[#allocation20 + $0x1c4] sm:$0xf] }
 0x5b3   :  { %v16415_v43 = vpop.f32.mrf.mxu2 }
 0x5b5   :  { %9224 = vmatmul.bf16.vlgmr.msrb.gmra.mxu3 %v8758_v39  ;;  %v14099_v39 = vor.u32 %v15346_v34, %v14098_v40  ;;  %v8825_v40 = vld [vmem:[#allocation22] sm:$0x3] }
 0x5b6   :  { %9233 = vmatpush.bf16.msra.mxu0 %v14031_v32  ;;  %v14092_v32 = vld [vmem:[#allocation20 + $0x1b8] sm:$0xf0] }
 0x5b7   :  { %9193 = vmatpush.bf16.msrb.mxu1 %v14099_v39  ;;  %v14095_v23 = vor.u32 %v15343_v56, %v14092_v32 }
 0x5b8   :  { %v8725_v24 = vpop.f32.mrf.mxu3 }
 0x5b9   :  { %v15347_v24 = vld [vmem:[#allocation20 + $0x1d4] sm:$0xf] }
 0x5ba   :  { %9234 = vmatpush.bf16.msra.mxu0 %v14023_v44  ;;  %v14111_v12 = vor.u32 %v15347_v24, %v14108_v0  ;;  %v14084_v44 = vld [vmem:[#allocation20 + $0x1a8] sm:$0xf0] }
 0x5bb   :  { %v8712_v45 = vpop.f32.mrf.mxu2  ;;  %v8593_v21 = vpop.f32.mrf.mxu1  ;;  %v14087_v63 = vor.u32 %v15341_v9, %v14084_v44 }
 0x5bc   :  { %v8594_v30 = vadd.f32 %v8593_v21, %v16404_v5  ;;  %v14124_v45 = vld [vmem:[#allocation20 + $0x1f8] sm:$0xf0]  ;;  %v14100_v21 = vld [vmem:[#allocation20 + $0x1c8] sm:$0xf0] }
 0x5bd   :  { %v14127_v57 = vor.u32 %v15351_v20, %v14124_v45  ;;  %v15353_v20 = vld [vmem:[%s16498_s13] sm:$0xff] }
 0x5be   :  { %9235 = vmatpush.bf16.msra.mxu0 %v14015_v37  ;;  %v8607_v6 = vadd.f32 %v16396_v13, %v8594_v30  ;;  %v15344_v13 = vld [vmem:[#allocation20 + $0x1b4] sm:$0xf0]  ;;  %v15365_v45 = vld [vmem:[%s16498_s13 + $0x60] sm:$0xff] }
 0x5bf   :  { %v8684_v41 = vpop.f32.mrf.mxu0  ;;  %v14091_v54 = vor.u32 %v15344_v13, %v14090_v50 }
 0x5c0   :  { %v16420_v58 = vadd.f32 %v8684_v41, %v16407_v19  ;;  %v14004_v19 = vld [vmem:[#allocation20 + $0x108] sm:$0xf0]  ;;  %v8620_v18 = vadd.f32 %v16398_v16, %v8607_v6  ;;  %v15342_v16 = vld [vmem:[#allocation20 + $0x1a4] sm:$0xf0]  ;;  %v14103_v41 = vor.u32 %v15345_v52, %v14100_v21 }
 0x5c1   :  { %v14007_v8 = vor.u32 %v15321_v59, %v14004_v19  ;;  %9194 = vmatpush.bf16.msrb.mxu1 %v14091_v54  ;;  %v14083_v22 = vor.u32 %v15342_v16, %v14082_v2  ;;  %v15368_v54 = vld [vmem:[%s16498_s13 + $0x78] sm:$0xff]  ;;  %v15367_v2 = vld [vmem:[%s16498_s13 + $0x70] sm:$0xff]  ;;  %v15358_v16 = vld [vmem:[%s16498_s13 + $0x28] sm:$0xff] }
 0x5c2   :  { %v8633_v36 = vadd.f32 %v16413_v62, %v8620_v18  ;;  %9404 = vmatpush.bf16.msra.mxu3 %v15368_v54 }
 0x5c3   :  { %v8595_v42 = vpop.f32.mrf.mxu1  ;;  %9236 = vmatpush.bf16.msra.mxu0 %v14007_v8 }
 0x5c4   :  { %v14079_v42 = vor.u32 %v15339_v26, %v14076_v28  ;;  %v9423_v26 = vld [vmem:[#allocation25 + $0x28] sm:$0xff]  ;;  %v9422_v28 = vld [vmem:[#allocation25 + $0x20] sm:$0xff] }
 0x5c5   :  { %9195 = vmatpush.bf16.msrb.mxu1 %v14083_v22 }
 0x5c6   :  { %9405 = vmatpush.bf16.msra.mxu3 %v15367_v2 }
 0x5c7   :  { %v8686_v29 = vpop.f32.mrf.mxu0 }
 0x5c8   :  { %v15337_v29 = vld [vmem:[#allocation20 + $0x184] sm:$0xf] }
 0x5c9   :  { %9196 = vmatpush.bf16.msrb.mxu1 %v14075_v17  ;;  %v14071_v37 = vor.u32 %v15337_v29, %v14068_v15  ;;  %v9420_v29 = vld [vmem:[#allocation25 + $0x10] sm:$0xff]  ;;  %v9419_v15 = vld [vmem:[#allocation25 + $0x8] sm:$0xff] }
 0x5cd   :  { %9197 = vmatpush.bf16.msrb.mxu1 %v14067_v33  ;;  %v15366_v33 = vld [vmem:[%s16498_s13 + $0x68] sm:$0xff] }
 0x5ce   :  { %9406 = vmatpush.bf16.msra.mxu3 %v15366_v33 }
 0x5d1   :  { %9242 = vmatpush.bf16.msra.mxu1 %v14127_v57  ;;  %v15364_v57 = vld [vmem:[%s16498_s13 + $0x58] sm:$0xff] }
 0x5d2   :  { %9407 = vmatpush.bf16.msra.mxu3 %v15365_v45 }
 0x5d5   :  { %9243 = vmatpush.bf16.msra.mxu1 %v14119_v7  ;;  %v15361_v7 = vld [vmem:[%s16498_s13 + $0x40] sm:$0xff] }
 0x5d6   :  { %9408 = vmatpush.bf16.msra.mxu3 %v15364_v57 }
 0x5d9   :  { %9244 = vmatpush.bf16.msra.mxu1 %v14111_v12 }
 0x5da   :  { %9409 = vmatpush.bf16.msra.mxu3 %v15363_v49 }
 0x5db   :  { %v8645_v53 = vpop.f32.mrf.mxu1 }
 0x5dc   :  { %v8646_v10 = vadd.f32 %v8645_v53, %v8633_v36  ;;  %v8827_v36 = vperm.slane %v8825_v40, 0 }
 0x5dd   :  { %9245 = vmatpush.bf16.msra.mxu1 %v14103_v41 }
 0x5de   :  { %v8755_v55 = vmax.f32 %v8646_v10, 0.0  ;;  %v8828_v10 = vperm.slane %v8825_v40, 1  ;;  %9410 = vmatpush.bf16.msra.mxu3 %v15362_v48 }
 0x5df   :  { %v16426_v5 = vpop.f32.mrf.mxu0 }
 0x5e0   :  { %v8759_v61 = vpack.c.bf16 %v8755_v55, %v8755_v55  ;;  %v15360_v55 = vld [vmem:[%s16498_s13 + $0x38] sm:$0xff] }
 0x5e1   :  { %9246 = vmatpush.bf16.msra.mxu1 %v14095_v23  ;;  %9391 = vmatpush.bf16.msra.mxu2 %v15360_v55 }
 0x5e2   :  { %9185 = vmatmul.bf16.vlgmr.msrb.gmra.mxu0 %v8759_v61  ;;  %9411 = vmatpush.bf16.msra.mxu3 %v15361_v7 }
 0x5e3   :  { %v8647_v47 = vpop.f32.mrf.mxu1 }
 0x5e5   :  { %9247 = vmatpush.bf16.msra.mxu1 %v14087_v63  ;;  %v9425_v63 = vld [vmem:[#allocation25 + $0x38] sm:$0xff] }
 0x5e6   :  { %9437 = vmatpush.msrb.mxu0 %v9425_v63 }
 0x5e7   :  { %v8738_v62 = vpop.f32.mrf.mxu0 }
 0x5e8   :  { %v15355_v62 = vld [vmem:[%s16498_s13 + $0x10] sm:$0xff] }
 0x5e9   :  { %9248 = vmatpush.bf16.msra.mxu1 %v14079_v42  ;;  %v9421_v42 = vld [vmem:[#allocation25 + $0x18] sm:$0xff] }
 0x5ed   :  { %9249 = vmatpush.bf16.msra.mxu1 %v14071_v37  ;;  %v9418_v37 = vld [vmem:[#allocation25] sm:$0xff] }
 0x5f2   :  { %9237 = vmatmul.bf16.vlgmr.msra.gmra.mxu0 %v8759_v61  ;;  %v15359_v61 = vld [vmem:[%s16498_s13 + $0x30] sm:$0xff]  ;;  %s15822_s13 = smov [#allocation26]  }
 0x5f3   :  { %9392 = vmatpush.bf16.msra.mxu2 %v15359_v61  ;;  %s9467_s30 = sshll.u32 %s15822_s13, 4  ;;  %s9468_s30 = int_to_ptr.vmem [resolvable:$true] %s9467_s30 }
 0x5f7   :  { %9393 = vmatpush.bf16.msra.mxu2 %v15358_v16 }
 0x5fb   :  { %v8697_v14 = vpop.f32.mrf.mxu1  ;;  %9394 = vmatpush.bf16.msra.mxu2 %v15357_v11 }
 0x5fc   :  { %v8698_v59 = vadd.f32 %v8697_v14, %v16420_v58 }
 0x5fe   :  { %v8711_v8 = vadd.f32 %v16415_v43, %v8698_v59 }
 0x5ff   :  { %9395 = vmatpush.bf16.msra.mxu2 %v15356_v1 }
 0x600   :  { %v8724_v30 = vadd.f32 %v16417_v60, %v8711_v8  ;;  %v15391_v8 = vld [vmem:[#allocation23] ss:$0 sm:$0xff] }
 0x602   :  { %v8737_v3 = vadd.f32 %v16426_v5, %v8724_v30 }
 0x603   :  { %v8699_v27 = vpop.f32.mrf.mxu1  ;;  %v9160_v19 = vpop.f32.mrf.mxu2  ;;  %9396 = vmatpush.bf16.msra.mxu2 %v15355_v62 }
 0x604   :  { %v9161_v58 = vadd.f32 %v9160_v19, %v8827_v36  ;;  %v9424_v27 = vld [vmem:[#allocation25 + $0x30] sm:$0xff] }
 0x605   :  { %9438 = vmatpush.msrb.mxu0 %v9424_v27 }
 0x607   :  { %9397 = vmatpush.bf16.msra.mxu2 %v15354_v25  ;;  %9439 = vmatpush.msrb.mxu0 %v9423_v26 }
 0x609   :  { %9440 = vmatpush.msrb.mxu0 %v9422_v28 }
 0x60b   :  { %v9162_v4 = vpop.f32.mrf.mxu2  ;;  %9398 = vmatpush.bf16.msra.mxu2 %v15353_v20  ;;  %9441 = vmatpush.msrb.mxu0 %v9421_v42 }
 0x60d   :  { %9442 = vmatpush.msrb.mxu0 %v9420_v29 }
 0x60f   :  { %9443 = vmatpush.msrb.mxu0 %v9419_v15 }
 0x611   :  { %9444 = vmatpush.msrb.mxu0 %v9418_v37 }
 0x613   :  { %v9212_v18 = vpop.f32.mrf.mxu2 }
 0x614   :  { %v9213_v60 = vadd.f32 %v9212_v18, %v8828_v10 }
 0x61b   :  { %v8749_v6 = vpop.f32.mrf.mxu1  ;;  %v9214_v34 = vpop.f32.mrf.mxu2 }
 0x61c   :  { %v8750_v51 = vadd.f32 %v8749_v6, %v8737_v3 }
 0x61e   :  { %v8756_v46 = vmax.f32 %v8750_v51, 0.0 }
 0x620   :  { %v8760_v38 = vpack.c.bf16 %v8756_v46, %v8756_v46 }
 0x622   :  { %9198 = vmatmul.bf16.vlgmr.msrb.gmra.mxu1 %v8760_v38 }
 0x623   :  { %v8751_v35 = vpop.f32.mrf.mxu1 }
 0x628   :  { %v9173_v39 = vpop.f32.mrf.mxu3 }
 0x629   :  { %v9174_v53 = vadd.f32 %v9173_v39, %v9161_v58 }
 0x630   :  { %v9175_v43 = vpop.f32.mrf.mxu3 }
 0x632   :  { %9250 = vmatmul.bf16.vlgmr.msra.gmra.mxu1 %v8760_v38 }
 0x638   :  { %v9225_v50 = vpop.f32.mrf.mxu3 }
 0x639   :  { %v9226_v13 = vadd.f32 %v9225_v50, %v9213_v60 }
 0x640   :  { %v9227_v5 = vpop.f32.mrf.mxu3 }
 0x65f   :  { %v9186_v22 = vpop.f32.mrf.mxu0 }
 0x660   :  { %v9187_v24 = vadd.f32 %v9186_v22, %v9174_v53 }
 0x667   :  { %v9188_v47 = vpop.f32.mrf.mxu0 }
 0x66f   :  { %v9238_v17 = vpop.f32.mrf.mxu0 }
 0x670   :  { %v9239_v14 = vadd.f32 %v9238_v17, %v9226_v13 }
 0x677   :  { %v9240_v31 = vpop.f32.mrf.mxu0 }
 0x69f   :  { %v9199_v0 = vpop.f32.mrf.mxu1 }
 0x6a0   :  { %v9200_v12 = vadd.f32 %v9199_v0, %v9187_v24 }
 0x6a2   :  { %v9255_v52 = vmax.f32 %v9200_v12, 0.0 }
 0x6a4   :  { %v9257_v21 = vpack.c.bf16 %v9255_v52, %v9255_v52 }
 0x6a6   :  { %9399 = vmatmul.bf16.vlgmr.msra.gmra.mxu2 %v9257_v21 }
 0x6a7   :  { %v9201_v41 = vpop.f32.mrf.mxu1 }
 0x6af   :  { %v9251_v56 = vpop.f32.mrf.mxu1 }
 0x6b0   :  { %v9252_v32 = vadd.f32 %v9251_v56, %v9239_v14 }
 0x6b2   :  { %v9256_v23 = vmax.f32 %v9252_v32, 0.0 }
 0x6b4   :  { %v9258_v9 = vpack.c.bf16 %v9256_v23, %v9256_v23 }
 0x6b6   :  { %9412 = vmatmul.bf16.vlgmr.msra.gmra.mxu3 %v9258_v9 }
 0x6b7   :  { %v9253_v44 = vpop.f32.mrf.mxu1 }
 0x729   :  { %v9400_v59 = vpop.f32.mrf.mxu2 }
 0x72a   :  { %v9401_v30 = vadd.f32 %v15391_v8, %v9400_v59 }
 0x731   :  { %v9402_v19 = vpop.f32.mrf.mxu2 }
 0x739   :  { %v9413_v4 = vpop.f32.mrf.mxu3 }
 0x73a   :  { %v9414_v3 = vadd.f32 %v9413_v4, %v9401_v30 }
 0x73c   :  { %v9417_v6 = vmul.f32 %v9414_v3, %v9414_v3 }
 0x73e   :  { %14192 = vmatmul.msk.f32.vlgmr.msrb.gmra.mxu0 %vm327_vm0, %v9417_v6 }
 0x741   :  { %v9415_v51 = vpop.f32.mrf.mxu3 }
 0x7bb   :  { %v9446_v46 = vpop.f32.mrf.mxu0 }
 0x7bc   :  { %v9449_v38 = vmax.f32 %v9446_v46, 1e-24 }
 0x7be   :  { %15392 = vrsqrt.f32 %v9449_v38  ;;  %vm9456_vm2 = vweird.f32 %v9449_v38 }
 0x7c4   :  { %v15393_v18 = vpop.eup %15392 }
 0x7c5   :  { %v9451_v35 = vmul.f32 %v15393_v18, %v9449_v38  ;;  %vm9457_vm1 = vweird.f32 %v15393_v18 }
 0x7c6   :  { %vm9458_vm3 = vmor %vm9456_vm2, %vm9457_vm1 }
 0x7c7   :  { %v9452_v40 = vmul.f32 %v15393_v18, %v9451_v35 }
 0x7c9   :  { %v9453_v34 = vmul.f32 0.5, %v9452_v40 }
 0x7cb   :  { %v9454_v36 = vsub.f32 1.5, %v9453_v34 }
 0x7cd   :  { %v9455_v58 = vmul.f32 %v15393_v18, %v9454_v36 }
 0x7cf   :  { %v9459_v39 = vsel %vm9458_vm3, %v15393_v18, %v9455_v58 }
 0x7d0   :  { %v9460_v53 = vmul.f32 %v9459_v39, %v9414_v3 }
 0x7d2   :  { %9461 = vst.msk [vmem:[#allocation26] sm:$0xff] %vm327_vm0, %v9460_v53 }
 0x7d3   :  { %9472 = dma.vmem_to_hbm [thread:$0]  %s9468_s30, 128, %s9470_s29, [#allocation4]  }
 0x7d4   :  { %15799 = dma.done.wait [#allocation4], 128  }
 0x7d5   :  { %15800 = vsyncadd [#allocation4], 4294967168 }
 0x7d6   :  { %9477 = vsyncpa [#allocation3], 1 }
 0x7d7   :  { %9478 = vsyncpa [#allocation6], 1 }
 0x7d8   :  { %9479 = vsyncpa [#allocation9], 1 }
 0x7d9   :  { %9480 = vsyncpa [#allocation12], 1 }
 0x7da   :  { %9481 = vsyncpa [#allocation15], 1 }
 0x7db   :  { %9482 = vsyncpa [#allocation18], 1 }
 0x7dc   :  { %9483 = vsyncpa [#allocation21], 1 }
 0x7dd   :  { %9484 = vsyncpa [#allocation24], 1 }
 0x7de   :  { %9485 = vsyncpa [#allocation4], 1 }

</bundles_post_ra>
